<compile_context>
chip_gen: v7x
topology: tpu7x:2x2x1
jax: 0.10.0
libtpu: 0.0.40
codegen_flags: <defaults>
</compile_context>

<pallas_src>
import jax
import jax.numpy as jnp
from jax.experimental import pallas as pl
from jax.experimental.pallas import tpu as pltpu

# ---- tile constants ---------------------------------------------------------
TM = 512           # node row block (big DMAs; mem-bound kernel)
HPAD = 128         # hidden 64 padded to a full lane width
CPAD = 128         # classes padded to a full lane width (lane-dense output stores)
_NEG = -1e30       # bias fill for padded class lanes -> exp() == 0 in softmax

_VMEM_LIMIT = 32 * 1024 * 1024


def _round_up(x, m):
    return (x + m - 1) // m * m


# ---- kernels (one row block per grid step, full-K matmuls, no reduction axis) ----
def _xw_kernel(x_ref, w1_ref, out_ref):
    """support1 = x @ W1 for one row block (W1 fully VMEM-resident)."""
    out_ref[...] = jnp.dot(
        x_ref[...], w1_ref[...], preferred_element_type=jnp.float32
    ).astype(out_ref.dtype)


def _agg1_kernel(adj_ref, s1_ref, b1_ref, w2_ref, out_ref):
    """s2 = relu(adj @ support1 + b1) @ W2 for one row block (support1/W2 resident)."""
    agg = jnp.dot(adj_ref[...], s1_ref[...], preferred_element_type=jnp.float32)
    h = jnp.maximum(agg + b1_ref[...], 0.0)
    # F.dropout(..., training=False) is the identity at inference time.
    out_ref[...] = jnp.dot(
        h.astype(w2_ref.dtype), w2_ref[...], preferred_element_type=jnp.float32
    ).astype(out_ref.dtype)


def _agg2_softmax_kernel(adj_ref, s2_ref, b2_ref, out_ref):
    """out = softmax(adj @ s2 + b2) over the class axis (padded lanes masked via -1e30 bias)."""
    z = jnp.dot(adj_ref[...], s2_ref[...], preferred_element_type=jnp.float32) + b2_ref[...]
    m = jnp.max(z, axis=1, keepdims=True)
    e = jnp.exp(z - m)
    denom = jnp.sum(e, axis=1, keepdims=True)
    out_ref[...] = e / denom          # exact normalization (negligible epilogue cost)


# ---- wrapper ----------------------------------------------------------------
@jax.jit
def gcn_forward(x, adj, w1, b1, w2, b2):
    n, f = x.shape
    h = w1.shape[1]
    c = w2.shape[1]
    assert h <= HPAD and c <= CPAD

    n_pad = _round_up(max(n, TM), TM)
    f_pad = _round_up(max(f, 128), 128)

    # bf16 operands for the MXU (cast BEFORE padding; jnp.pad only — no f32 temporaries).
    xp = jnp.pad(x.astype(jnp.bfloat16), ((0, n_pad - n), (0, f_pad - f)))
    adjp = jnp.pad(adj.astype(jnp.bfloat16), ((0, n_pad - n), (0, n_pad - n)))
    w1p = jnp.pad(w1.astype(jnp.bfloat16), ((0, f_pad - f), (0, HPAD - h)))
    w2p = jnp.pad(w2.astype(jnp.bfloat16), ((0, HPAD - h), (0, CPAD - c)))
    b1p = jnp.pad(b1.astype(jnp.float32).reshape(1, -1), ((0, 0), (0, HPAD - h)))
    b2p = jnp.pad(b2.astype(jnp.float32).reshape(1, -1), ((0, 0), (0, CPAD - c)),
                  constant_values=_NEG)

    cparams = pltpu.CompilerParams(
        dimension_semantics=("parallel",),
        vmem_limit_bytes=_VMEM_LIMIT,
    )
    nblk = n_pad // TM

    # ---- phase 1: support1 = x @ W1  -> (n_pad, HPAD) bf16 ----
    support1 = pl.pallas_call(
        _xw_kernel,
        out_shape=jax.ShapeDtypeStruct((n_pad, HPAD), jnp.bfloat16),
        grid=(nblk,),
        in_specs=[
            pl.BlockSpec((TM, f_pad), lambda i: (i, 0)),      # x row slab
            pl.BlockSpec((f_pad, HPAD), lambda i: (0, 0)),    # W1 resident
        ],
        out_specs=pl.BlockSpec((TM, HPAD), lambda i: (i, 0)),
        compiler_params=cparams,
    )(xp, w1p)

    # ---- phase 2: s2 = relu(adj @ support1 + b1) @ W2 -> (n_pad, CPAD) bf16 ----
    support2 = pl.pallas_call(
        _agg1_kernel,
        out_shape=jax.ShapeDtypeStruct((n_pad, CPAD), jnp.bfloat16),
        grid=(nblk,),
        in_specs=[
            pl.BlockSpec((TM, n_pad), lambda i: (i, 0)),      # adj row slab
            pl.BlockSpec((n_pad, HPAD), lambda i: (0, 0)),    # support1 resident
            pl.BlockSpec((1, HPAD), lambda i: (0, 0)),        # b1 resident
            pl.BlockSpec((HPAD, CPAD), lambda i: (0, 0)),     # W2 resident
        ],
        out_specs=pl.BlockSpec((TM, CPAD), lambda i: (i, 0)),
        compiler_params=cparams,
    )(adjp, support1, b1p, w2p)

    # ---- phase 3: out = softmax(adj @ s2 + b2) -> (n_pad, CPAD) f32 ----
    probs = pl.pallas_call(
        _agg2_softmax_kernel,
        out_shape=jax.ShapeDtypeStruct((n_pad, CPAD), jnp.float32),
        grid=(nblk,),
        in_specs=[
            pl.BlockSpec((TM, n_pad), lambda i: (i, 0)),      # adj row slab
            pl.BlockSpec((n_pad, CPAD), lambda i: (0, 0)),    # s2 resident
            pl.BlockSpec((1, CPAD), lambda i: (0, 0)),        # b2 resident (padded lanes = -1e30)
        ],
        out_specs=pl.BlockSpec((TM, CPAD), lambda i: (i, 0)),
        compiler_params=cparams,
    )(adjp, support2, b2p)

    return probs[:n, :c]


# ---- parameter / input construction (matches the torch module) --------------
def init_gc_params(key, in_features, out_features):
    """GraphConvolution.reset_parameters: uniform(-stdv, stdv), stdv = 1/sqrt(out_features)."""
    stdv = 1.0 / (out_features ** 0.5)
    kw, kb = jax.random.split(key)
    w = jax.random.uniform(kw, (in_features, out_features), jnp.float32, -stdv, stdv)
    b = jax.random.uniform(kb, (out_features,), jnp.float32, -stdv, stdv)
    return w, b


def make_normalized_adj(key, n_nodes):
    """Dense symmetric row-normalized adjacency with self-loops (deterministic)."""
    a = (jax.random.uniform(key, (n_nodes, n_nodes)) < 0.05).astype(jnp.float32)
    a = jnp.maximum(a, a.T) + jnp.eye(n_nodes, dtype=jnp.float32)
    deg = jnp.sum(a, axis=1, keepdims=True)
    return a / deg


if __name__ == "__main__":
    # Small synthetic shapes consistent with the module: N nodes, features_n inputs,
    # hidden=64 (hard-coded in __init__), class_n output classes.
    # Deliberately non-multiples of the tile sizes (and >TM rows) to exercise padding
    # and the multi-row-block grid path.
    N_NODES = 600
    FEATURES_N = 500
    HIDDEN = 64
    CLASS_N = 6

    key = jax.random.PRNGKey(0)
    k_x, k_adj, k_l1, k_l2 = jax.random.split(key, 4)

    x = jax.random.normal(k_x, (N_NODES, FEATURES_N), jnp.float32)
    adj = make_normalized_adj(k_adj, N_NODES)
    w1, b1 = init_gc_params(k_l1, FEATURES_N, HIDDEN)
    w2, b2 = init_gc_params(k_l2, HIDDEN, CLASS_N)

    out = gcn_forward(x, adj, w1, b1, w2, b2)
    out = jax.block_until_ready(out)
    assert out.shape == (N_NODES, CLASS_N)

    # Reference in plain JAX, mirroring the bf16 operand casts the kernel performs
    # (matmuls accumulate in f32 on the MXU, activations/bias/softmax in f32).
    def _bf(a):
        return a.astype(jnp.bfloat16).astype(jnp.float32)

    xb, ab, w1b, w2b = _bf(x), _bf(adj), _bf(w1), _bf(w2)
    s1_ref = _bf(xb @ w1b)
    h_ref = _bf(jnp.maximum(ab @ s1_ref + b1.reshape(1, -1), 0.0))
    s2_ref = _bf(h_ref @ w2b)
    z_ref = ab @ s2_ref + b2.reshape(1, -1)
    ref = jax.nn.softmax(z_ref, axis=1)

    assert jnp.allclose(out, ref, atol=1e-2, rtol=1e-2), float(jnp.max(jnp.abs(out - ref)))
    # Exact divide in the epilogue -> rows sum to 1 within f32 rounding.
    assert jnp.allclose(jnp.sum(out, axis=1), 1.0, atol=1e-4)

    print("KERNEL_OK")
</pallas_src>

<mosaic_0001>
module attributes {stable_mosaic.version = 11 : i64} {
  func.func @_xw_kernel(%arg0: i32, %arg1: memref<512x512xbf16, #tpu.memory_space<vmem>>, %arg2: memref<512x128xbf16, #tpu.memory_space<vmem>>, %arg3: memref<512x128xbf16, #tpu.memory_space<vmem>>) attributes {dimension_semantics = [#tpu.dimension_semantics<parallel>], iteration_bounds = array<i64: 2>, scalar_prefetch = 0 : i64, scratch_operands = 0 : i64, tpu.core_type = #tpu.core_type<tc>, window_params = [{transform_indices = @transform_0, window_bounds = array<i64: 512, 512>}, {pipeline_mode = #tpu.pipeline_mode<synchronous>, transform_indices = @transform_1, window_bounds = array<i64: 512, 128>}, {transform_indices = @transform_2, window_bounds = array<i64: 512, 128>}]} {
    %c0 = arith.constant 0 : index
    %c0_0 = arith.constant 0 : index
    %0 = vector.load %arg1[%c0, %c0_0] : memref<512x512xbf16, #tpu.memory_space<vmem>>, vector<512x512xbf16>
    %c0_1 = arith.constant 0 : index
    %c0_2 = arith.constant 0 : index
    %1 = vector.load %arg2[%c0_1, %c0_2] : memref<512x128xbf16, #tpu.memory_space<vmem>>, vector<512x128xbf16>
    %cst = arith.constant dense<0.000000e+00> : vector<512x128xf32>
    %2 = tpu.matmul %0, %1, %cst {dimension_numbers = #tpu.dot_dimension_numbers<[1], [0], [0], [1], [0, 0, 1, 1], [], []>} : vector<512x512xbf16>, vector<512x128xbf16>, vector<512x128xf32> -> vector<512x128xf32>
    %3 = arith.truncf %2 : vector<512x128xf32> to vector<512x128xbf16>
    %c0_3 = arith.constant 0 : index
    %c0_4 = arith.constant 0 : index
    %4 = vector.load %arg3[%c0_3, %c0_4] : memref<512x128xbf16, #tpu.memory_space<vmem>>, vector<512x128xbf16>
    tpu.vector_store %arg3[%c0_3, %c0_4], %3 {strides = array<i32>} : memref<512x128xbf16, #tpu.memory_space<vmem>>, vector<512x128xbf16>,
    return
  }
  func.func @transform_0(%arg0: i32) -> (i32, i32) {
    %c0_i32 = arith.constant 0 : i32
    %c0_i32_0 = arith.constant 0 : i32
    return %arg0, %c0_i32 : i32, i32
  }
  func.func @transform_1(%arg0: i32) -> (i32, i32) {
    %c0_i32 = arith.constant 0 : i32
    %c0_i32_0 = arith.constant 0 : i32
    %c0_i32_1 = arith.constant 0 : i32
    return %c0_i32, %c0_i32_0 : i32, i32
  }
  func.func @transform_2(%arg0: i32) -> (i32, i32) {
    %c0_i32 = arith.constant 0 : i32
    %c0_i32_0 = arith.constant 0 : i32
    return %arg0, %c0_i32 : i32, i32
  }
}

module attributes {stable_mosaic.version = 11 : i64} {
  func.func @_agg1_kernel(%arg0: i32, %arg1: memref<512x1024xbf16, #tpu.memory_space<vmem>>, %arg2: memref<1024x128xbf16, #tpu.memory_space<vmem>>, %arg3: memref<1x128xf32, #tpu.memory_space<vmem>>, %arg4: memref<128x128xbf16, #tpu.memory_space<vmem>>, %arg5: memref<512x128xbf16, #tpu.memory_space<vmem>>) attributes {dimension_semantics = [#tpu.dimension_semantics<parallel>], iteration_bounds = array<i64: 2>, scalar_prefetch = 0 : i64, scratch_operands = 0 : i64, tpu.core_type = #tpu.core_type<tc>, window_params = [{transform_indices = @transform_0, window_bounds = array<i64: 512, 1024>}, {pipeline_mode = #tpu.pipeline_mode<synchronous>, transform_indices = @transform_1, window_bounds = array<i64: 1024, 128>}, {pipeline_mode = #tpu.pipeline_mode<synchronous>, transform_indices = @transform_2, window_bounds = array<i64: 1, 128>}, {pipeline_mode = #tpu.pipeline_mode<synchronous>, transform_indices = @transform_3, window_bounds = array<i64: 128, 128>}, {transform_indices = @transform_4, window_bounds = array<i64: 512, 128>}]} {
    %c0 = arith.constant 0 : index
    %c0_0 = arith.constant 0 : index
    %0 = vector.load %arg1[%c0, %c0_0] : memref<512x1024xbf16, #tpu.memory_space<vmem>>, vector<512x1024xbf16>
    %c0_1 = arith.constant 0 : index
    %c0_2 = arith.constant 0 : index
    %1 = vector.load %arg2[%c0_1, %c0_2] : memref<1024x128xbf16, #tpu.memory_space<vmem>>, vector<1024x128xbf16>
    %cst = arith.constant dense<0.000000e+00> : vector<512x128xf32>
    %2 = tpu.matmul %0, %1, %cst {dimension_numbers = #tpu.dot_dimension_numbers<[1], [0], [0], [1], [0, 0, 1, 1], [], []>} : vector<512x1024xbf16>, vector<1024x128xbf16>, vector<512x128xf32> -> vector<512x128xf32>
    %c0_3 = arith.constant 0 : index
    %c0_4 = arith.constant 0 : index
    %3 = vector.load %arg3[%c0_3, %c0_4] : memref<1x128xf32, #tpu.memory_space<vmem>>, vector<1x128xf32>
    %4 = vector.broadcast %3 : vector<1x128xf32> to vector<512x128xf32>
    %5 = arith.addf %2, %4 : vector<512x128xf32>
    %cst_5 = arith.constant 0.000000e+00 : f32
    %6 = vector.broadcast %cst_5 : f32 to vector<512x128xf32>
    %7 = arith.maximumf %5, %6 : vector<512x128xf32>
    %8 = arith.truncf %7 : vector<512x128xf32> to vector<512x128xbf16>
    %c0_6 = arith.constant 0 : index
    %c0_7 = arith.constant 0 : index
    %9 = vector.load %arg4[%c0_6, %c0_7] : memref<128x128xbf16, #tpu.memory_space<vmem>>, vector<128x128xbf16>
    %cst_8 = arith.constant dense<0.000000e+00> : vector<512x128xf32>
    %10 = tpu.matmul %8, %9, %cst_8 {dimension_numbers = #tpu.dot_dimension_numbers<[1], [0], [0], [1], [0, 0, 1, 1], [], []>} : vector<512x128xbf16>, vector<128x128xbf16>, vector<512x128xf32> -> vector<512x128xf32>
    %11 = arith.truncf %10 : vector<512x128xf32> to vector<512x128xbf16>
    %c0_9 = arith.constant 0 : index
    %c0_10 = arith.constant 0 : index
    %12 = vector.load %arg5[%c0_9, %c0_10] : memref<512x128xbf16, #tpu.memory_space<vmem>>, vector<512x128xbf16>
    tpu.vector_store %arg5[%c0_9, %c0_10], %11 {strides = array<i32>} : memref<512x128xbf16, #tpu.memory_space<vmem>>, vector<512x128xbf16>,
    return
  }
  func.func @transform_0(%arg0: i32) -> (i32, i32) {
    %c0_i32 = arith.constant 0 : i32
    %c0_i32_0 = arith.constant 0 : i32
    return %arg0, %c0_i32 : i32, i32
  }
  func.func @transform_1(%arg0: i32) -> (i32, i32) {
    %c0_i32 = arith.constant 0 : i32
    %c0_i32_0 = arith.constant 0 : i32
    %c0_i32_1 = arith.constant 0 : i32
    return %c0_i32, %c0_i32_0 : i32, i32
  }
  func.func @transform_2(%arg0: i32) -> (i32, i32) {
    %c0_i32 = arith.constant 0 : i32
    %c0_i32_0 = arith.constant 0 : i32
    %c0_i32_1 = arith.constant 0 : i32
    return %c0_i32, %c0_i32_0 : i32, i32
  }
  func.func @transform_3(%arg0: i32) -> (i32, i32) {
    %c0_i32 = arith.constant 0 : i32
    %c0_i32_0 = arith.constant 0 : i32
    %c0_i32_1 = arith.constant 0 : i32
    return %c0_i32, %c0_i32_0 : i32, i32
  }
  func.func @transform_4(%arg0: i32) -> (i32, i32) {
    %c0_i32 = arith.constant 0 : i32
    %c0_i32_0 = arith.constant 0 : i32
    return %arg0, %c0_i32 : i32, i32
  }
}

module attributes {stable_mosaic.version = 11 : i64} {
  func.func @_agg2_softmax_kernel(%arg0: i32, %arg1: memref<512x1024xbf16, #tpu.memory_space<vmem>>, %arg2: memref<1024x128xbf16, #tpu.memory_space<vmem>>, %arg3: memref<1x128xf32, #tpu.memory_space<vmem>>, %arg4: memref<512x128xf32, #tpu.memory_space<vmem>>) attributes {dimension_semantics = [#tpu.dimension_semantics<parallel>], iteration_bounds = array<i64: 2>, scalar_prefetch = 0 : i64, scratch_operands = 0 : i64, tpu.core_type = #tpu.core_type<tc>, window_params = [{transform_indices = @transform_0, window_bounds = array<i64: 512, 1024>}, {pipeline_mode = #tpu.pipeline_mode<synchronous>, transform_indices = @transform_1, window_bounds = array<i64: 1024, 128>}, {pipeline_mode = #tpu.pipeline_mode<synchronous>, transform_indices = @transform_2, window_bounds = array<i64: 1, 128>}, {transform_indices = @transform_3, window_bounds = array<i64: 512, 128>}]} {
    %c0 = arith.constant 0 : index
    %c0_0 = arith.constant 0 : index
    %0 = vector.load %arg1[%c0, %c0_0] : memref<512x1024xbf16, #tpu.memory_space<vmem>>, vector<512x1024xbf16>
    %c0_1 = arith.constant 0 : index
    %c0_2 = arith.constant 0 : index
    %1 = vector.load %arg2[%c0_1, %c0_2] : memref<1024x128xbf16, #tpu.memory_space<vmem>>, vector<1024x128xbf16>
    %cst = arith.constant dense<0.000000e+00> : vector<512x128xf32>
    %2 = tpu.matmul %0, %1, %cst {dimension_numbers = #tpu.dot_dimension_numbers<[1], [0], [0], [1], [0, 0, 1, 1], [], []>} : vector<512x1024xbf16>, vector<1024x128xbf16>, vector<512x128xf32> -> vector<512x128xf32>
    %c0_3 = arith.constant 0 : index
    %c0_4 = arith.constant 0 : index
    %3 = vector.load %arg3[%c0_3, %c0_4] : memref<1x128xf32, #tpu.memory_space<vmem>>, vector<1x128xf32>
    %4 = vector.broadcast %3 : vector<1x128xf32> to vector<512x128xf32>
    %5 = arith.addf %2, %4 : vector<512x128xf32>
    %cst_5 = arith.constant dense<0xFF800000> : vector<512xf32>
    %6 = vector.multi_reduction <maximumf>, %5, %cst_5 [1] : vector<512x128xf32> to vector<512xf32>
    %7 = vector.shape_cast %6 : vector<512xf32> to vector<512x1xf32>
    %8 = vector.broadcast %7 : vector<512x1xf32> to vector<512x128xf32>
    %9 = arith.subf %5, %8 : vector<512x128xf32>
    %10 = math.exp %9 : vector<512x128xf32>
    %cst_6 = arith.constant dense<0.000000e+00> : vector<512xf32>
    %11 = vector.multi_reduction <add>, %10, %cst_6 [1] : vector<512x128xf32> to vector<512xf32>
    %12 = vector.shape_cast %11 : vector<512xf32> to vector<512x1xf32>
    %13 = vector.broadcast %12 : vector<512x1xf32> to vector<512x128xf32>
    %14 = arith.divf %10, %13 : vector<512x128xf32>
    %c0_7 = arith.constant 0 : index
    %c0_8 = arith.constant 0 : index
    %15 = vector.load %arg4[%c0_7, %c0_8] : memref<512x128xf32, #tpu.memory_space<vmem>>, vector<512x128xf32>
    tpu.vector_store %arg4[%c0_7, %c0_8], %14 {strides = array<i32>} : memref<512x128xf32, #tpu.memory_space<vmem>>, vector<512x128xf32>,
    return
  }
  func.func @transform_0(%arg0: i32) -> (i32, i32) {
    %c0_i32 = arith.constant 0 : i32
    %c0_i32_0 = arith.constant 0 : i32
    return %arg0, %c0_i32 : i32, i32
  }
  func.func @transform_1(%arg0: i32) -> (i32, i32) {
    %c0_i32 = arith.constant 0 : i32
    %c0_i32_0 = arith.constant 0 : i32
    %c0_i32_1 = arith.constant 0 : i32
    return %c0_i32, %c0_i32_0 : i32, i32
  }
  func.func @transform_2(%arg0: i32) -> (i32, i32) {
    %c0_i32 = arith.constant 0 : i32
    %c0_i32_0 = arith.constant 0 : i32
    %c0_i32_1 = arith.constant 0 : i32
    return %c0_i32, %c0_i32_0 : i32, i32
  }
  func.func @transform_3(%arg0: i32) -> (i32, i32) {
    %c0_i32 = arith.constant 0 : i32
    %c0_i32_0 = arith.constant 0 : i32
    return %arg0, %c0_i32 : i32, i32
  }
}

</mosaic_0001>

<bundles_post_ra>
// kernel: gcn_forward.3
= control target key start
LH: loop header
LB: loop body
LE: loop exit
PB: predicated region body
PF: predicated region fallthrough
CT: control target
= control target key end

     0   :  { %s2942_s9 = smov 0   ;;  %s3257_s0 = inlined_call_operand.vmem [shape: bf16[1024,512], index: 0, kind: input, shape index: {}]   ;;  %s3258_s1 = inlined_call_operand.vmem [shape: bf16[512,128], index: 1, kind: input, shape index: {}]   ;;  %s3259_s2 = inlined_call_operand.vmem [shape: bf16[1024,128], index: 2, kind: output, shape index: {}]  }
   0x1 LB: > { %s2129_s10 = sadd.s32 4294967295, %s2924_s9   ;;  %p2133_p0 = scmp.ge.s32.totalorder %s2924_s9, 1  ;;  %s2924_s9 = sphi %s2942_s9, %s12_s9  }
   0x2   : > { %p114_p1 = scmp.lt.s32.totalorder %s2924_s9, 3 }
   0x4   : > { %p115_p2 = pnand %p2133_p0, %p114_p1 }
   0x5   : > { %v2694_v0 = vld [vmem:[%s3258_s1] sm:$0xff] (!%p115_p2)   ;;  %v2926_v1 = vmov (!%p115_p2), 0   ;;  %v2696_v3 = vld [vmem:[%s3258_s1 + $0x8] sm:$0xff] (!%p115_p2)   ;;  %v2698_v5 = vld [vmem:[%s3258_s1 + $0x10] sm:$0xff] (!%p115_p2)   ;;  %s2134_s3 = sshll.u32 (!%p115_p2), %s2129_s10, 6 }
   0x6   : > { %118 = sbr.rel (%p115_p2) target bundleno = 537 (0x219), region = 28  ;;  %1175 = vmatprep.subr.bf16.mxu1 (!%p115_p2), %v2926_v1  ;;  %1464 = vmatprep.subr.bf16.mxu0 (!%p115_p2), %v2926_v1  ;;  %v2695_v2 = vld [vmem:[%s3258_s1 + $0x80] sm:$0xff] (!%p115_p2)   ;;  %v2697_v4 = vld [vmem:[%s3258_s1 + $0x88] sm:$0xff] (!%p115_p2)   ;;  %v2699_v6 = vld [vmem:[%s3258_s1 + $0x90] sm:$0xff] (!%p115_p2)   ;;  %p138_p3 = scmp.lt.s32.totalorder (!%p115_p2), %s2134_s3, 127 }
   0x7   : > { %1176 = vmatpush1.bf16.msra.mxu1 (!%p115_p2), %v2694_v0  ;;  %1465 = vmatpush1.bf16.msra.mxu0 (!%p115_p2), %v2695_v2  ;;  %v2700_v7 = vld [vmem:[%s3258_s1 + $0x18] sm:$0xff] (!%p115_p2)   ;;  %v2702_v9 = vld [vmem:[%s3258_s1 + $0x20] sm:$0xff] (!%p115_p2)   ;;  %v2704_v11 = vld [vmem:[%s3258_s1 + $0x28] sm:$0xff] (!%p115_p2)  }
   0x8   : > { %1177 = vmatprep.subr.bf16.mxu1 (!%p115_p2), %v2926_v1  ;;  %1466 = vmatprep.subr.bf16.mxu0 (!%p115_p2), %v2926_v1  ;;  %v2701_v8 = vld [vmem:[%s3258_s1 + $0x98] sm:$0xff] (!%p115_p2)   ;;  %v2703_v10 = vld [vmem:[%s3258_s1 + $0xa0] sm:$0xff] (!%p115_p2)   ;;  %v2705_v12 = vld [vmem:[%s3258_s1 + $0xa8] sm:$0xff] (!%p115_p2)  }
   0x9   : > { %v2706_v13 = vld [vmem:[%s3258_s1 + $0x30] sm:$0xff] (!%p115_p2)   ;;  %v2708_v15 = vld [vmem:[%s3258_s1 + $0x38] sm:$0xff] (!%p115_p2)   ;;  %v2710_v17 = vld [vmem:[%s3258_s1 + $0x40] sm:$0xff] (!%p115_p2)  }
   0xa   : > { %v2707_v14 = vld [vmem:[%s3258_s1 + $0xb0] sm:$0xff] (!%p115_p2)   ;;  %v2709_v16 = vld [vmem:[%s3258_s1 + $0xb8] sm:$0xff] (!%p115_p2)   ;;  %v2711_v18 = vld [vmem:[%s3258_s1 + $0xc0] sm:$0xff] (!%p115_p2)  }
   0xb   : > { %1178 = vmatpush1.bf16.msra.mxu1 (!%p115_p2), %v2696_v3  ;;  %1467 = vmatpush1.bf16.msra.mxu0 (!%p115_p2), %v2697_v4  ;;  %v2712_v20 = vld [vmem:[%s3258_s1 + $0x48] sm:$0xff] (!%p115_p2)   ;;  %v2714_v23 = vld [vmem:[%s3258_s1 + $0x50] sm:$0xff] (!%p115_p2)   ;;  %v2716_v25 = vld [vmem:[%s3258_s1 + $0x58] sm:$0xff] (!%p115_p2)  }
   0xc   : > { %1179 = vmatprep.subr.bf16.mxu1 (!%p115_p2), %v2926_v1  ;;  %1468 = vmatprep.subr.bf16.mxu0 (!%p115_p2), %v2926_v1  ;;  %v2713_v22 = vld [vmem:[%s3258_s1 + $0xc8] sm:$0xff] (!%p115_p2)   ;;  %v2715_v24 = vld [vmem:[%s3258_s1 + $0xd0] sm:$0xff] (!%p115_p2)   ;;  %v2717_v26 = vld [vmem:[%s3258_s1 + $0xd8] sm:$0xff] (!%p115_p2)  }
   0xd   : > { %s3261_s3 = smov (!%p138_p3, %s2134_s3), 127  ;;  %v2718_v27 = vld [vmem:[%s3258_s1 + $0x60] sm:$0xff]   ;;  %v2720_v29 = vld [vmem:[%s3258_s1 + $0x68] sm:$0xff]   ;;  %v2722_v31 = vld [vmem:[%s3258_s1 + $0x70] sm:$0xff]  }
   0xe   : > { %s2365_s17 = sshll.u32 %s3261_s3, 4  ;;  %v2719_v28 = vld [vmem:[%s3258_s1 + $0xe0] sm:$0xff]   ;;  %v2721_v30 = vld [vmem:[%s3258_s1 + $0xe8] sm:$0xff]   ;;  %v2723_v32 = vld [vmem:[%s3258_s1 + $0xf0] sm:$0xff]   ;;  %s2138_s28 = sshll.u32 %s3261_s3, 2 }
   0xf   : > { %1180 = vmatpush1.bf16.msra.mxu1 %v2698_v5  ;;  %1469 = vmatpush1.bf16.msra.mxu0 %v2699_v6  ;;  %s3025_s22 = scalar_lea.vmem %s3257_s0, %s2365_s17  ;;  %v2724_v33 = vld [vmem:[%s3258_s1 + $0x78] sm:$0xff]   ;;  %s3206_s4 = scalar_lea.vmem %s3259_s2, %s2138_s28 }
  0x10   : > { %1181 = vmatprep.subr.bf16.mxu1 %v2926_v1  ;;  %1470 = vmatprep.subr.bf16.mxu0 %v2926_v1  ;;  %v2728_v19 = vld [vmem:[%s3025_s22 + $0x4] ss:$16 sps:$4 sm:$0xff]   ;;  %v2731_v21 = vld [vmem:[%s3025_s22 + $0xc] ss:$16 sps:$4 sm:$0xff]   ;;  %v2726_v35 = vld [vmem:[%s3025_s22] ss:$16 sps:$4 sm:$0xff]  }
  0x11   : > { %1207 = vmatprep.mubr.bf16.mxu1 %v2728_v19  ;;  %1496 = vmatprep.mubr.bf16.mxu0 %v2731_v21  ;;  %v2725_v34 = vld [vmem:[%s3258_s1 + $0xf8] sm:$0xff]   ;;  %v2732_v37 = vld [vmem:[%s3025_s22 + $0x24] ss:$16 sps:$4 sm:$0xff]   ;;  %v2736_v39 = vld [vmem:[%s3025_s22 + $0x20] ss:$16 sps:$4 sm:$0xff]  }
  0x12   : > { %v2729_v36 = vld [vmem:[%s3025_s22 + $0x8] ss:$16 sps:$4 sm:$0xff]   ;;  %v2734_v38 = vld [vmem:[%s3025_s22 + $0x2c] ss:$16 sps:$4 sm:$0xff]   ;;  %v2738_v41 = vld [vmem:[%s3025_s22 + $0x44] ss:$16 sps:$4 sm:$0xff]  }
  0x13   : > { %1182 = vmatpush1.bf16.msra.mxu1 %v2700_v7  ;;  %1471 = vmatpush1.bf16.msra.mxu0 %v2701_v8  ;;  %v2737_v40 = vld [vmem:[%s3025_s22 + $0x28] ss:$16 sps:$4 sm:$0xff]   ;;  %v2740_v42 = vld [vmem:[%s3025_s22 + $0x4c] ss:$16 sps:$4 sm:$0xff]   ;;  %v2742_v43 = vld [vmem:[%s3025_s22 + $0x40] ss:$16 sps:$4 sm:$0xff]  }
  0x14   : > { %1183 = vmatprep.subr.bf16.mxu1 %v2926_v1  ;;  %1472 = vmatprep.subr.bf16.mxu0 %v2926_v1  ;;  %v2743_v44 = vld [vmem:[%s3025_s22 + $0x48] ss:$16 sps:$4 sm:$0xff]   ;;  %v2744_v45 = vld [vmem:[%s3025_s22 + $0x64] ss:$16 sps:$4 sm:$0xff]   ;;  %v2746_v46 = vld [vmem:[%s3025_s22 + $0x6c] ss:$16 sps:$4 sm:$0xff]  }
  0x15   : > { %v2748_v47 = vld [vmem:[%s3025_s22 + $0x60] ss:$16 sps:$4 sm:$0xff]   ;;  %v2749_v48 = vld [vmem:[%s3025_s22 + $0x68] ss:$16 sps:$4 sm:$0xff]   ;;  %v2750_v49 = vld [vmem:[%s3025_s22 + $0x84] ss:$16 sps:$4 sm:$0xff]  }
  0x16   : > { %v2752_v50 = vld [vmem:[%s3025_s22 + $0x8c] ss:$16 sps:$4 sm:$0xff]   ;;  %v2754_v51 = vld [vmem:[%s3025_s22 + $0x80] ss:$16 sps:$4 sm:$0xff]   ;;  %v2755_v52 = vld [vmem:[%s3025_s22 + $0x88] ss:$16 sps:$4 sm:$0xff]  }
  0x17   : > { %1184 = vmatpush1.bf16.msra.mxu1 %v2702_v9  ;;  %1473 = vmatpush1.bf16.msra.mxu0 %v2703_v10  ;;  %v2756_v53 = vld [vmem:[%s3025_s22 + $0xa4] ss:$16 sps:$4 sm:$0xff]   ;;  %v2758_v54 = vld [vmem:[%s3025_s22 + $0xac] ss:$16 sps:$4 sm:$0xff]   ;;  %v2760_v55 = vld [vmem:[%s3025_s22 + $0xa0] ss:$16 sps:$4 sm:$0xff]  }
  0x18   : > { %1185 = vmatprep.subr.bf16.mxu1 %v2926_v1  ;;  %1474 = vmatprep.subr.bf16.mxu0 %v2926_v1  ;;  %v2761_v56 = vld [vmem:[%s3025_s22 + $0xa8] ss:$16 sps:$4 sm:$0xff]   ;;  %v2762_v57 = vld [vmem:[%s3025_s22 + $0xc4] ss:$16 sps:$4 sm:$0xff]   ;;  %v2764_v58 = vld [vmem:[%s3025_s22 + $0xcc] ss:$16 sps:$4 sm:$0xff]  }
  0x19   : > { %v2766_v59 = vld [vmem:[%s3025_s22 + $0xc0] ss:$16 sps:$4 sm:$0xff]   ;;  %v2767_v60 = vld [vmem:[%s3025_s22 + $0xc8] ss:$16 sps:$4 sm:$0xff]   ;;  %v2768_v61 = vld [vmem:[%s3025_s22 + $0xe4] ss:$16 sps:$4 sm:$0xff]  }
  0x1a   : > { %v2770_v62 = vld [vmem:[%s3025_s22 + $0xec] ss:$16 sps:$4 sm:$0xff]   ;;  %v2772_v63 = vld [vmem:[%s3025_s22 + $0xe0] ss:$16 sps:$4 sm:$0xff]   ;;  %v2773_v0 = vld [vmem:[%s3025_s22 + $0xe8] ss:$16 sps:$4 sm:$0xff]  }
  0x1b   : > { %1186 = vmatpush1.bf16.msra.mxu1 %v2704_v11  ;;  %1475 = vmatpush1.bf16.msra.mxu0 %v2705_v12  ;;  %v2776_v2 = vld [vmem:[%s3025_s22 + $0x10c] ss:$16 sps:$4 sm:$0xff]   ;;  %v2778_v3 = vld [vmem:[%s3025_s22 + $0x100] ss:$16 sps:$4 sm:$0xff]   ;;  %v2779_v4 = vld [vmem:[%s3025_s22 + $0x108] ss:$16 sps:$4 sm:$0xff]  }
  0x1c   : > { %1187 = vmatprep.subr.bf16.mxu1 %v2926_v1  ;;  %1476 = vmatprep.subr.bf16.mxu0 %v2926_v1  ;;  %v2780_v5 = vld [vmem:[%s3025_s22 + $0x124] ss:$16 sps:$4 sm:$0xff]   ;;  %v2782_v6 = vld [vmem:[%s3025_s22 + $0x12c] ss:$16 sps:$4 sm:$0xff]   ;;  %v2784_v7 = vld [vmem:[%s3025_s22 + $0x120] ss:$16 sps:$4 sm:$0xff]  }
  0x1d   : > { %v2785_v8 = vld [vmem:[%s3025_s22 + $0x128] ss:$16 sps:$4 sm:$0xff]   ;;  %v2786_v9 = vld [vmem:[%s3025_s22 + $0x144] ss:$16 sps:$4 sm:$0xff]   ;;  %v2788_v10 = vld [vmem:[%s3025_s22 + $0x14c] ss:$16 sps:$4 sm:$0xff]  }
  0x1e   : > { %v2790_v11 = vld [vmem:[%s3025_s22 + $0x140] ss:$16 sps:$4 sm:$0xff]   ;;  %v2791_v12 = vld [vmem:[%s3025_s22 + $0x148] ss:$16 sps:$4 sm:$0xff]   ;;  %v2804_v21 = vld [vmem:[%s3025_s22 + $0x1a4] ss:$16 sps:$4 sm:$0xff]  }
  0x1f   : > { %1188 = vmatpush1.bf16.msra.mxu1 %v2706_v13  ;;  %1477 = vmatpush1.bf16.msra.mxu0 %v2707_v14  ;;  %v2792_v13 = vld [vmem:[%s3025_s22 + $0x164] ss:$16 sps:$4 sm:$0xff]   ;;  %v2794_v14 = vld [vmem:[%s3025_s22 + $0x16c] ss:$16 sps:$4 sm:$0xff]   ;;  %v2802_v19 = vld [vmem:[%s3025_s22 + $0x180] ss:$16 sps:$4 sm:$0xff]  }
  0x20   : > { %1189 = vmatprep.subr.bf16.mxu1 %v2926_v1  ;;  %1478 = vmatprep.subr.bf16.mxu0 %v2926_v1 }
  0x23   : > { %1190 = vmatpush1.bf16.msra.mxu1 %v2708_v15  ;;  %1479 = vmatpush1.bf16.msra.mxu0 %v2709_v16  ;;  %v2796_v15 = vld [vmem:[%s3025_s22 + $0x160] ss:$16 sps:$4 sm:$0xff]   ;;  %v2797_v16 = vld [vmem:[%s3025_s22 + $0x168] ss:$16 sps:$4 sm:$0xff]  }
  0x24   : > { %1191 = vmatprep.subr.bf16.mxu1 %v2926_v1  ;;  %1480 = vmatprep.subr.bf16.mxu0 %v2926_v1 }
  0x27   : > { %1192 = vmatpush1.bf16.msra.mxu1 %v2710_v17  ;;  %1481 = vmatpush1.bf16.msra.mxu0 %v2711_v18  ;;  %v2798_v17 = vld [vmem:[%s3025_s22 + $0x184] ss:$16 sps:$4 sm:$0xff]   ;;  %v2800_v18 = vld [vmem:[%s3025_s22 + $0x18c] ss:$16 sps:$4 sm:$0xff]  }
  0x28   : > { %1193 = vmatprep.subr.bf16.mxu1 %v2926_v1  ;;  %1482 = vmatprep.subr.bf16.mxu0 %v2926_v1 }
  0x2b   : > { %1194 = vmatpush1.bf16.msra.mxu1 %v2712_v20  ;;  %1483 = vmatpush1.bf16.msra.mxu0 %v2713_v22  ;;  %v2803_v20 = vld [vmem:[%s3025_s22 + $0x188] ss:$16 sps:$4 sm:$0xff]   ;;  %v2806_v22 = vld [vmem:[%s3025_s22 + $0x1ac] ss:$16 sps:$4 sm:$0xff]  }
  0x2c   : > { %1195 = vmatprep.subr.bf16.mxu1 %v2926_v1  ;;  %1484 = vmatprep.subr.bf16.mxu0 %v2926_v1 }
  0x2f   : > { %1196 = vmatpush1.bf16.msra.mxu1 %v2714_v23  ;;  %1485 = vmatpush1.bf16.msra.mxu0 %v2715_v24  ;;  %v2808_v23 = vld [vmem:[%s3025_s22 + $0x1a0] ss:$16 sps:$4 sm:$0xff]   ;;  %v2809_v24 = vld [vmem:[%s3025_s22 + $0x1a8] ss:$16 sps:$4 sm:$0xff]  }
  0x30   : > { %1197 = vmatprep.subr.bf16.mxu1 %v2926_v1  ;;  %1486 = vmatprep.subr.bf16.mxu0 %v2926_v1 }
  0x33   : > { %1198 = vmatpush1.bf16.msra.mxu1 %v2716_v25  ;;  %1487 = vmatpush1.bf16.msra.mxu0 %v2717_v26  ;;  %v2810_v25 = vld [vmem:[%s3025_s22 + $0x1c4] ss:$16 sps:$4 sm:$0xff]   ;;  %v2812_v26 = vld [vmem:[%s3025_s22 + $0x1cc] ss:$16 sps:$4 sm:$0xff]  }
  0x34   : > { %1199 = vmatprep.subr.bf16.mxu1 %v2926_v1  ;;  %1488 = vmatprep.subr.bf16.mxu0 %v2926_v1 }
  0x37   : > { %1200 = vmatpush1.bf16.msra.mxu1 %v2718_v27  ;;  %1489 = vmatpush1.bf16.msra.mxu0 %v2719_v28  ;;  %v2814_v27 = vld [vmem:[%s3025_s22 + $0x1c0] ss:$16 sps:$4 sm:$0xff]   ;;  %v2815_v28 = vld [vmem:[%s3025_s22 + $0x1c8] ss:$16 sps:$4 sm:$0xff]  }
  0x38   : > { %1201 = vmatprep.subr.bf16.mxu1 %v2926_v1  ;;  %1490 = vmatprep.subr.bf16.mxu0 %v2926_v1 }
  0x3b   : > { %1202 = vmatpush1.bf16.msra.mxu1 %v2720_v29  ;;  %1491 = vmatpush1.bf16.msra.mxu0 %v2721_v30  ;;  %v2816_v29 = vld [vmem:[%s3025_s22 + $0x1e4] ss:$16 sps:$4 sm:$0xff]   ;;  %v2818_v30 = vld [vmem:[%s3025_s22 + $0x1ec] ss:$16 sps:$4 sm:$0xff]  }
  0x3c   : > { %1203 = vmatprep.subr.bf16.mxu1 %v2926_v1  ;;  %1492 = vmatprep.subr.bf16.mxu0 %v2926_v1 }
  0x3f   : > { %1204 = vmatpush1.bf16.msra.mxu1 %v2722_v31  ;;  %1493 = vmatpush1.bf16.msra.mxu0 %v2723_v32  ;;  %v2820_v31 = vld [vmem:[%s3025_s22 + $0x1e0] ss:$16 sps:$4 sm:$0xff]   ;;  %v2821_v32 = vld [vmem:[%s3025_s22 + $0x1e8] ss:$16 sps:$4 sm:$0xff]  }
  0x40   : > { %1205 = vmatprep.subr.bf16.mxu1 %v2926_v1  ;;  %1494 = vmatprep.subr.bf16.mxu0 %v2926_v1  ;;  %v2774_v1 = vld [vmem:[%s3025_s22 + $0x104] ss:$16 sps:$4 sm:$0xff]  }
  0x43   : > { %1206 = vmatpush1.bf16.msra.mxu1 %v2724_v33  ;;  %1495 = vmatpush1.bf16.msra.mxu0 %v2725_v34  ;;  %v2822_v33 = vld [vmem:[%s3025_s22 + $0x204] ss:$16 sps:$4 sm:$0xff]   ;;  %v2824_v34 = vld [vmem:[%s3025_s22 + $0x20c] ss:$16 sps:$4 sm:$0xff]  }
  0x46   : > { %1208 = vmatmul.mubr.bf16.vlgmr.msra.gmra.mrb[0].mxu1 %v2726_v35  ;;  %1497 = vmatmul.mubr.bf16.vlgmr.msra.gmra.mrb[0].mxu0 %v2729_v36  ;;  %v2826_v35 = vld [vmem:[%s3025_s22 + $0x200] ss:$16 sps:$4 sm:$0xff]   ;;  %v2827_v36 = vld [vmem:[%s3025_s22 + $0x208] ss:$16 sps:$4 sm:$0xff]  }
  0x47   : > { %1215 = vmatprep.mubr.bf16.mxu1 %v2732_v37  ;;  %1504 = vmatprep.mubr.bf16.mxu0 %v2734_v38  ;;  %v2828_v37 = vld [vmem:[%s3025_s22 + $0x224] ss:$16 sps:$4 sm:$0xff]   ;;  %v2830_v38 = vld [vmem:[%s3025_s22 + $0x22c] ss:$16 sps:$4 sm:$0xff]  }
  0x4e   : > { %1216 = vmatmul.mubr.bf16.gmra.mrb[4].mxu1 %v2736_v39  ;;  %1505 = vmatmul.mubr.bf16.gmra.mrb[4].mxu0 %v2737_v40  ;;  %v2832_v39 = vld [vmem:[%s3025_s22 + $0x220] ss:$16 sps:$4 sm:$0xff]   ;;  %v2833_v40 = vld [vmem:[%s3025_s22 + $0x228] ss:$16 sps:$4 sm:$0xff]  }
  0x4f   : > { %1223 = vmatprep.mubr.bf16.mxu1 %v2738_v41  ;;  %1512 = vmatprep.mubr.bf16.mxu0 %v2740_v42  ;;  %v2834_v41 = vld [vmem:[%s3025_s22 + $0x244] ss:$16 sps:$4 sm:$0xff]   ;;  %v2836_v42 = vld [vmem:[%s3025_s22 + $0x24c] ss:$16 sps:$4 sm:$0xff]  }
  0x56   : > { %1224 = vmatmul.mubr.bf16.gmra.mrb[8].mxu1 %v2742_v43  ;;  %1513 = vmatmul.mubr.bf16.gmra.mrb[8].mxu0 %v2743_v44  ;;  %v2838_v43 = vld [vmem:[%s3025_s22 + $0x240] ss:$16 sps:$4 sm:$0xff]   ;;  %v2839_v44 = vld [vmem:[%s3025_s22 + $0x248] ss:$16 sps:$4 sm:$0xff]  }
  0x57   : > { %1231 = vmatprep.mubr.bf16.mxu1 %v2744_v45  ;;  %1520 = vmatprep.mubr.bf16.mxu0 %v2746_v46  ;;  %v2840_v45 = vld [vmem:[%s3025_s22 + $0x264] ss:$16 sps:$4 sm:$0xff]   ;;  %v2842_v46 = vld [vmem:[%s3025_s22 + $0x26c] ss:$16 sps:$4 sm:$0xff]  }
  0x5e   : > { %1232 = vmatmul.mubr.bf16.gmra.mrb[12].mxu1 %v2748_v47  ;;  %1521 = vmatmul.mubr.bf16.gmra.mrb[12].mxu0 %v2749_v48  ;;  %v2844_v47 = vld [vmem:[%s3025_s22 + $0x260] ss:$16 sps:$4 sm:$0xff]   ;;  %v2845_v48 = vld [vmem:[%s3025_s22 + $0x268] ss:$16 sps:$4 sm:$0xff]  }
  0x5f   : > { %1239 = vmatprep.mubr.bf16.mxu1 %v2750_v49  ;;  %1528 = vmatprep.mubr.bf16.mxu0 %v2752_v50  ;;  %v2846_v49 = vld [vmem:[%s3025_s22 + $0x284] ss:$16 sps:$4 sm:$0xff]   ;;  %v2848_v50 = vld [vmem:[%s3025_s22 + $0x28c] ss:$16 sps:$4 sm:$0xff]  }
  0x66   : > { %1240 = vmatmul.mubr.bf16.gmra.mrb[16].mxu1 %v2754_v51  ;;  %1529 = vmatmul.mubr.bf16.gmra.mrb[16].mxu0 %v2755_v52  ;;  %v2850_v51 = vld [vmem:[%s3025_s22 + $0x280] ss:$16 sps:$4 sm:$0xff]   ;;  %v2851_v52 = vld [vmem:[%s3025_s22 + $0x288] ss:$16 sps:$4 sm:$0xff]  }
  0x67   : > { %1247 = vmatprep.mubr.bf16.mxu1 %v2756_v53  ;;  %1536 = vmatprep.mubr.bf16.mxu0 %v2758_v54  ;;  %v2852_v53 = vld [vmem:[%s3025_s22 + $0x2a4] ss:$16 sps:$4 sm:$0xff]   ;;  %v2854_v54 = vld [vmem:[%s3025_s22 + $0x2ac] ss:$16 sps:$4 sm:$0xff]  }
  0x6e   : > { %1248 = vmatmul.mubr.bf16.gmra.mrb[20].mxu1 %v2760_v55  ;;  %1537 = vmatmul.mubr.bf16.gmra.mrb[20].mxu0 %v2761_v56  ;;  %v2856_v55 = vld [vmem:[%s3025_s22 + $0x2a0] ss:$16 sps:$4 sm:$0xff]   ;;  %v2857_v56 = vld [vmem:[%s3025_s22 + $0x2a8] ss:$16 sps:$4 sm:$0xff]  }
  0x6f   : > { %1255 = vmatprep.mubr.bf16.mxu1 %v2762_v57  ;;  %1544 = vmatprep.mubr.bf16.mxu0 %v2764_v58  ;;  %v2858_v57 = vld [vmem:[%s3025_s22 + $0x2c4] ss:$16 sps:$4 sm:$0xff]   ;;  %v2860_v58 = vld [vmem:[%s3025_s22 + $0x2cc] ss:$16 sps:$4 sm:$0xff]  }
  0x76   : > { %1256 = vmatmul.mubr.bf16.gmra.mrb[24].mxu1 %v2766_v59  ;;  %1545 = vmatmul.mubr.bf16.gmra.mrb[24].mxu0 %v2767_v60  ;;  %v2862_v59 = vld [vmem:[%s3025_s22 + $0x2c0] ss:$16 sps:$4 sm:$0xff]   ;;  %v2863_v60 = vld [vmem:[%s3025_s22 + $0x2c8] ss:$16 sps:$4 sm:$0xff]  }
  0x77   : > { %1263 = vmatprep.mubr.bf16.mxu1 %v2768_v61  ;;  %1552 = vmatprep.mubr.bf16.mxu0 %v2770_v62  ;;  %v2864_v61 = vld [vmem:[%s3025_s22 + $0x2e4] ss:$16 sps:$4 sm:$0xff]   ;;  %v2866_v62 = vld [vmem:[%s3025_s22 + $0x2ec] ss:$16 sps:$4 sm:$0xff]  }
  0x7e   : > { %1264 = vmatmul.mubr.bf16.gmra.mrb[28].mxu1 %v2772_v63  ;;  %1553 = vmatmul.mubr.bf16.gmra.mrb[28].mxu0 %v2773_v0  ;;  %v2868_v63 = vld [vmem:[%s3025_s22 + $0x2e0] ss:$16 sps:$4 sm:$0xff]   ;;  %v2869_v0 = vld [vmem:[%s3025_s22 + $0x2e8] ss:$16 sps:$4 sm:$0xff]  }
  0x7f   : > { %1271 = vmatprep.mubr.bf16.mxu1 %v2774_v1  ;;  %1560 = vmatprep.mubr.bf16.mxu0 %v2776_v2  ;;  %v2870_v1 = vld [vmem:[%s3025_s22 + $0x304] ss:$16 sps:$4 sm:$0xff]   ;;  %v2872_v2 = vld [vmem:[%s3025_s22 + $0x30c] ss:$16 sps:$4 sm:$0xff]  }
  0x86   : > { %1272 = vmatmul.mubr.bf16.gmra.mrb[32].mxu1 %v2778_v3  ;;  %1561 = vmatmul.mubr.bf16.gmra.mrb[32].mxu0 %v2779_v4  ;;  %v2874_v3 = vld [vmem:[%s3025_s22 + $0x300] ss:$16 sps:$4 sm:$0xff]   ;;  %v2875_v4 = vld [vmem:[%s3025_s22 + $0x308] ss:$16 sps:$4 sm:$0xff]  }
  0x87   : > { %1279 = vmatprep.mubr.bf16.mxu1 %v2780_v5  ;;  %1568 = vmatprep.mubr.bf16.mxu0 %v2782_v6  ;;  %v2876_v5 = vld [vmem:[%s3025_s22 + $0x324] ss:$16 sps:$4 sm:$0xff]   ;;  %v2878_v6 = vld [vmem:[%s3025_s22 + $0x32c] ss:$16 sps:$4 sm:$0xff]  }
  0x8e   : > { %1280 = vmatmul.mubr.bf16.gmra.mrb[36].mxu1 %v2784_v7  ;;  %1569 = vmatmul.mubr.bf16.gmra.mrb[36].mxu0 %v2785_v8  ;;  %v2880_v7 = vld [vmem:[%s3025_s22 + $0x320] ss:$16 sps:$4 sm:$0xff]   ;;  %v2881_v8 = vld [vmem:[%s3025_s22 + $0x328] ss:$16 sps:$4 sm:$0xff]  }
  0x8f   : > { %1287 = vmatprep.mubr.bf16.mxu1 %v2786_v9  ;;  %1576 = vmatprep.mubr.bf16.mxu0 %v2788_v10  ;;  %v2882_v9 = vld [vmem:[%s3025_s22 + $0x344] ss:$16 sps:$4 sm:$0xff]   ;;  %v2884_v10 = vld [vmem:[%s3025_s22 + $0x34c] ss:$16 sps:$4 sm:$0xff]  }
  0x96   : > { %1288 = vmatmul.mubr.bf16.gmra.mrb[40].mxu1 %v2790_v11  ;;  %1577 = vmatmul.mubr.bf16.gmra.mrb[40].mxu0 %v2791_v12  ;;  %v2886_v11 = vld [vmem:[%s3025_s22 + $0x340] ss:$16 sps:$4 sm:$0xff]   ;;  %v2887_v12 = vld [vmem:[%s3025_s22 + $0x348] ss:$16 sps:$4 sm:$0xff]  }
  0x97   : > { %1295 = vmatprep.mubr.bf16.mxu1 %v2792_v13  ;;  %1584 = vmatprep.mubr.bf16.mxu0 %v2794_v14  ;;  %v2888_v13 = vld [vmem:[%s3025_s22 + $0x364] ss:$16 sps:$4 sm:$0xff]   ;;  %v2890_v14 = vld [vmem:[%s3025_s22 + $0x36c] ss:$16 sps:$4 sm:$0xff]  }
  0x9e   : > { %1296 = vmatmul.mubr.bf16.gmra.mrb[44].mxu1 %v2796_v15  ;;  %1585 = vmatmul.mubr.bf16.gmra.mrb[44].mxu0 %v2797_v16 }
  0x9f   : > { %1303 = vmatprep.mubr.bf16.mxu1 %v2798_v17  ;;  %1592 = vmatprep.mubr.bf16.mxu0 %v2800_v18  ;;  %v2892_v18 = vld [vmem:[%s3025_s22 + $0x360] ss:$16 sps:$4 sm:$0xff]  }
  0xa6   : > { %1304 = vmatmul.mubr.bf16.gmra.mrb[48].mxu1 %v2802_v19  ;;  %1593 = vmatmul.mubr.bf16.gmra.mrb[48].mxu0 %v2803_v20 }
  0xa7   : > { %1311 = vmatprep.mubr.bf16.mxu1 %v2804_v21  ;;  %1600 = vmatprep.mubr.bf16.mxu0 %v2806_v22  ;;  %v2893_v22 = vld [vmem:[%s3025_s22 + $0x368] ss:$16 sps:$4 sm:$0xff]  }
  0xae   : > { %1312 = vmatmul.mubr.bf16.gmra.mrb[52].mxu1 %v2808_v23  ;;  %1601 = vmatmul.mubr.bf16.gmra.mrb[52].mxu0 %v2809_v24  ;;  %v2894_v23 = vld [vmem:[%s3025_s22 + $0x384] ss:$16 sps:$4 sm:$0xff]  }
  0xaf   : > { %1319 = vmatprep.mubr.bf16.mxu1 %v2810_v25  ;;  %1608 = vmatprep.mubr.bf16.mxu0 %v2812_v26  ;;  %v2896_v26 = vld [vmem:[%s3025_s22 + $0x38c] ss:$16 sps:$4 sm:$0xff]  }
  0xb6   : > { %1320 = vmatmul.mubr.bf16.gmra.mrb[56].mxu1 %v2814_v27  ;;  %1609 = vmatmul.mubr.bf16.gmra.mrb[56].mxu0 %v2815_v28 }
  0xb7   : > { %1327 = vmatprep.mubr.bf16.mxu1 %v2816_v29  ;;  %1616 = vmatprep.mubr.bf16.mxu0 %v2818_v30 }
  0xbe   : > { %1328 = vmatmul.mubr.bf16.gmra.mrb[60].mxu1 %v2820_v31  ;;  %1617 = vmatmul.mubr.bf16.gmra.mrb[60].mxu0 %v2821_v32 }
  0xbf   : > { %1335 = vmatprep.mubr.bf16.mxu1 %v2822_v33  ;;  %1624 = vmatprep.mubr.bf16.mxu0 %v2824_v34  ;;  %v2898_v33 = vld [vmem:[%s3025_s22 + $0x380] ss:$16 sps:$4 sm:$0xff]  }
  0xc6   : > { %1336 = vmatmul.mubr.bf16.gmra.mrb[64].mxu1 %v2826_v35  ;;  %1625 = vmatmul.mubr.bf16.gmra.mrb[64].mxu0 %v2827_v36 }
  0xc7   : > { %1343 = vmatprep.mubr.bf16.mxu1 %v2828_v37  ;;  %1632 = vmatprep.mubr.bf16.mxu0 %v2830_v38  ;;  %v2899_v37 = vld [vmem:[%s3025_s22 + $0x388] ss:$16 sps:$4 sm:$0xff]   ;;  %v2900_v38 = vld [vmem:[%s3025_s22 + $0x3a4] ss:$16 sps:$4 sm:$0xff]  }
  0xce   : > { %1344 = vmatmul.mubr.bf16.gmra.mrb[68].mxu1 %v2832_v39  ;;  %1633 = vmatmul.mubr.bf16.gmra.mrb[68].mxu0 %v2833_v40 }
  0xcf   : > { %1351 = vmatprep.mubr.bf16.mxu1 %v2834_v41  ;;  %1640 = vmatprep.mubr.bf16.mxu0 %v2836_v42  ;;  %v2902_v41 = vld [vmem:[%s3025_s22 + $0x3ac] ss:$16 sps:$4 sm:$0xff]  }
  0xd6   : > { %1352 = vmatmul.mubr.bf16.gmra.mrb[72].mxu1 %v2838_v43  ;;  %1641 = vmatmul.mubr.bf16.gmra.mrb[72].mxu0 %v2839_v44 }
  0xd7   : > { %1359 = vmatprep.mubr.bf16.mxu1 %v2840_v45  ;;  %1648 = vmatprep.mubr.bf16.mxu0 %v2842_v46 }
  0xde   : > { %1360 = vmatmul.mubr.bf16.gmra.mrb[76].mxu1 %v2844_v47  ;;  %1649 = vmatmul.mubr.bf16.gmra.mrb[76].mxu0 %v2845_v48  ;;  %v2904_v48 = vld [vmem:[%s3025_s22 + $0x3a0] ss:$16 sps:$4 sm:$0xff]  }
  0xdf   : > { %1367 = vmatprep.mubr.bf16.mxu1 %v2846_v49  ;;  %1656 = vmatprep.mubr.bf16.mxu0 %v2848_v50 }
  0xe6   : > { %1368 = vmatmul.mubr.bf16.gmra.mrb[80].mxu1 %v2850_v51  ;;  %1657 = vmatmul.mubr.bf16.gmra.mrb[80].mxu0 %v2851_v52  ;;  %v2905_v52 = vld [vmem:[%s3025_s22 + $0x3a8] ss:$16 sps:$4 sm:$0xff]  }
  0xe7   : > { %1375 = vmatprep.mubr.bf16.mxu1 %v2852_v53  ;;  %1664 = vmatprep.mubr.bf16.mxu0 %v2854_v54  ;;  %v2906_v53 = vld [vmem:[%s3025_s22 + $0x3c4] ss:$16 sps:$4 sm:$0xff]  }
  0xee   : > { %1376 = vmatmul.mubr.bf16.gmra.mrb[84].mxu1 %v2856_v55  ;;  %1665 = vmatmul.mubr.bf16.gmra.mrb[84].mxu0 %v2857_v56  ;;  %v2908_v56 = vld [vmem:[%s3025_s22 + $0x3cc] ss:$16 sps:$4 sm:$0xff]  }
  0xef   : > { %1383 = vmatprep.mubr.bf16.mxu1 %v2858_v57  ;;  %1672 = vmatprep.mubr.bf16.mxu0 %v2860_v58 }
  0xf6   : > { %1384 = vmatmul.mubr.bf16.gmra.mrb[88].mxu1 %v2862_v59  ;;  %1673 = vmatmul.mubr.bf16.gmra.mrb[88].mxu0 %v2863_v60 }
  0xf7   : > { %1391 = vmatprep.mubr.bf16.mxu1 %v2864_v61  ;;  %1680 = vmatprep.mubr.bf16.mxu0 %v2866_v62 }
  0xfe   : > { %1392 = vmatmul.mubr.bf16.gmra.mrb[92].mxu1 %v2868_v63  ;;  %1681 = vmatmul.mubr.bf16.gmra.mrb[92].mxu0 %v2869_v0  ;;  %v2910_v63 = vld [vmem:[%s3025_s22 + $0x3c0] ss:$16 sps:$4 sm:$0xff]  }
  0xff   : > { %1399 = vmatprep.mubr.bf16.mxu1 %v2870_v1  ;;  %1688 = vmatprep.mubr.bf16.mxu0 %v2872_v2 }
 0x106   : > { %1400 = vmatmul.mubr.bf16.gmra.mrb[96].mxu1 %v2874_v3  ;;  %1689 = vmatmul.mubr.bf16.gmra.mrb[96].mxu0 %v2875_v4  ;;  %v2911_v3 = vld [vmem:[%s3025_s22 + $0x3c8] ss:$16 sps:$4 sm:$0xff]   ;;  %v2912_v4 = vld [vmem:[%s3025_s22 + $0x3e4] ss:$16 sps:$4 sm:$0xff]  }
 0x107   : > { %1407 = vmatprep.mubr.bf16.mxu1 %v2876_v5  ;;  %1696 = vmatprep.mubr.bf16.mxu0 %v2878_v6 }
 0x10e   : > { %1408 = vmatmul.mubr.bf16.gmra.mrb[100].mxu1 %v2880_v7  ;;  %1697 = vmatmul.mubr.bf16.gmra.mrb[100].mxu0 %v2881_v8  ;;  %v2914_v7 = vld [vmem:[%s3025_s22 + $0x3ec] ss:$16 sps:$4 sm:$0xff]  }
 0x10f   : > { %1415 = vmatprep.mubr.bf16.mxu1 %v2882_v9  ;;  %1704 = vmatprep.mubr.bf16.mxu0 %v2884_v10 }
 0x116   : > { %1416 = vmatmul.mubr.bf16.gmra.mrb[104].mxu1 %v2886_v11  ;;  %1705 = vmatmul.mubr.bf16.gmra.mrb[104].mxu0 %v2887_v12 }
 0x117   : > { %1423 = vmatprep.mubr.bf16.mxu1 %v2888_v13  ;;  %1712 = vmatprep.mubr.bf16.mxu0 %v2890_v14  ;;  %v2916_v14 = vld [vmem:[%s3025_s22 + $0x3e0] ss:$16 sps:$4 sm:$0xff]  }
 0x119   : > { %v1209_v15 = vpop.f32.mrb[0].mxu1  ;;  %v1498_v16 = vpop.f32.mrb[0].mxu0 }
 0x11a   : > { %v1211_v17 = vpop.f32.mrb[1].mxu1  ;;  %v1499_v19 = vadd.f32 %v1498_v16, %v1209_v15  ;;  %v1500_v20 = vpop.f32.mrb[1].mxu0 }
 0x11b   : > { %v1212_v21 = vpop.f32.mrb[2].mxu1  ;;  %v1501_v24 = vpop.f32.mrb[2].mxu0 }
 0x11c   : > { %v1214_v25 = vpop.f32.mrb[3].mxu1  ;;  %v1502_v27 = vadd.f32 %v1501_v24, %v1212_v21  ;;  %v1503_v28 = vpop.f32.mrb[3].mxu0 }
 0x11e   : > { %1424 = vmatmul.mubr.bf16.gmra.mrb[108].mxu1 %v2892_v18  ;;  %v2433_v29 = vpack.c.bf16 %v1502_v27, %v1499_v19  ;;  %1713 = vmatmul.mubr.bf16.gmra.mrb[108].mxu0 %v2893_v22  ;;  %v2917_v18 = vld [vmem:[%s3025_s22 + $0x3e8] ss:$16 sps:$4 sm:$0xff]  }
 0x11f   : > { %1431 = vmatprep.mubr.bf16.mxu1 %v2894_v23  ;;  %1720 = vmatprep.mubr.bf16.mxu0 %v2896_v26 }
 0x120   : > { %2434 = vst [vmem:[%s3206_s4] sm:$0xff] %v2433_v29  }
 0x121   : > { %v1217_v30 = vpop.f32.mrb[4].mxu1  ;;  %v1506_v31 = vpop.f32.mrb[4].mxu0 }
 0x122   : > { %v1219_v32 = vpop.f32.mrb[5].mxu1  ;;  %v1507_v34 = vadd.f32 %v1506_v31, %v1217_v30  ;;  %v1508_v35 = vpop.f32.mrb[5].mxu0 }
 0x123   : > { %v1220_v36 = vpop.f32.mrb[6].mxu1  ;;  %v1509_v39 = vpop.f32.mrb[6].mxu0 }
 0x124   : > { %v1222_v40 = vpop.f32.mrb[7].mxu1  ;;  %v1510_v42 = vadd.f32 %v1509_v39, %v1220_v36  ;;  %v1511_v43 = vpop.f32.mrb[7].mxu0 }
 0x126   : > { %1432 = vmatmul.mubr.bf16.gmra.mrb[112].mxu1 %v2898_v33  ;;  %v2438_v44 = vpack.c.bf16 %v1510_v42, %v1507_v34  ;;  %1721 = vmatmul.mubr.bf16.gmra.mrb[112].mxu0 %v2899_v37 }
 0x127   : > { %1439 = vmatprep.mubr.bf16.mxu1 %v2900_v38  ;;  %1728 = vmatprep.mubr.bf16.mxu0 %v2902_v41 }
 0x128   : > { %2590 = vst [vmem:[%s3206_s4 + $0x8] sm:$0xff] %v2438_v44  }
 0x129   : > { %v1225_v45 = vpop.f32.mrb[8].mxu1  ;;  %v1514_v46 = vpop.f32.mrb[8].mxu0 }
 0x12a   : > { %v1227_v47 = vpop.f32.mrb[9].mxu1  ;;  %v1515_v49 = vadd.f32 %v1514_v46, %v1225_v45  ;;  %v1516_v50 = vpop.f32.mrb[9].mxu0 }
 0x12b   : > { %v1228_v51 = vpop.f32.mrb[10].mxu1  ;;  %v1517_v54 = vpop.f32.mrb[10].mxu0 }
 0x12c   : > { %v1230_v55 = vpop.f32.mrb[11].mxu1  ;;  %v1518_v57 = vadd.f32 %v1517_v54, %v1228_v51  ;;  %v1519_v58 = vpop.f32.mrb[11].mxu0 }
 0x12e   : > { %1440 = vmatmul.mubr.bf16.gmra.mrb[116].mxu1 %v2904_v48  ;;  %v2443_v59 = vpack.c.bf16 %v1518_v57, %v1515_v49  ;;  %1729 = vmatmul.mubr.bf16.gmra.mrb[116].mxu0 %v2905_v52 }
 0x12f   : > { %1447 = vmatprep.mubr.bf16.mxu1 %v2906_v53  ;;  %1736 = vmatprep.mubr.bf16.mxu0 %v2908_v56 }
 0x130   : > { %2591 = vst [vmem:[%s3206_s4 + $0x10] sm:$0xff] %v2443_v59  }
 0x131   : > { %v1233_v60 = vpop.f32.mrb[12].mxu1  ;;  %v1522_v61 = vpop.f32.mrb[12].mxu0 }
 0x132   : > { %v1235_v62 = vpop.f32.mrb[13].mxu1  ;;  %v1523_v0 = vadd.f32 %v1522_v61, %v1233_v60  ;;  %v1524_v1 = vpop.f32.mrb[13].mxu0 }
 0x133   : > { %v1236_v2 = vpop.f32.mrb[14].mxu1  ;;  %v1525_v5 = vpop.f32.mrb[14].mxu0 }
 0x134   : > { %v1238_v6 = vpop.f32.mrb[15].mxu1  ;;  %v1526_v8 = vadd.f32 %v1525_v5, %v1236_v2  ;;  %v1527_v9 = vpop.f32.mrb[15].mxu0 }
 0x136   : > { %1448 = vmatmul.mubr.bf16.gmra.mrb[120].mxu1 %v2910_v63  ;;  %v2448_v10 = vpack.c.bf16 %v1526_v8, %v1523_v0  ;;  %1737 = vmatmul.mubr.bf16.gmra.mrb[120].mxu0 %v2911_v3 }
 0x137   : > { %1455 = vmatprep.mubr.bf16.mxu1 %v2912_v4  ;;  %1744 = vmatprep.mubr.bf16.mxu0 %v2914_v7 }
 0x138   : > { %2592 = vst [vmem:[%s3206_s4 + $0x18] sm:$0xff] %v2448_v10  }
 0x139   : > { %v1241_v11 = vpop.f32.mrb[16].mxu1  ;;  %v1530_v12 = vpop.f32.mrb[16].mxu0 }
 0x13a   : > { %v1243_v13 = vpop.f32.mrb[17].mxu1  ;;  %v1531_v15 = vadd.f32 %v1530_v12, %v1241_v11  ;;  %v1532_v16 = vpop.f32.mrb[17].mxu0 }
 0x13b   : > { %v1244_v17 = vpop.f32.mrb[18].mxu1  ;;  %v1533_v19 = vpop.f32.mrb[18].mxu0 }
 0x13c   : > { %v1246_v20 = vpop.f32.mrb[19].mxu1  ;;  %v1534_v21 = vadd.f32 %v1533_v19, %v1244_v17  ;;  %v1535_v22 = vpop.f32.mrb[19].mxu0 }
 0x13e   : > { %1456 = vmatmul.mubr.bf16.gmra.mrb[124].mxu1 %v2916_v14  ;;  %v2453_v23 = vpack.c.bf16 %v1534_v21, %v1531_v15  ;;  %1745 = vmatmul.mubr.bf16.gmra.mrb[124].mxu0 %v2917_v18 }
 0x140   : > { %2593 = vst [vmem:[%s3206_s4 + $0x20] sm:$0xff] %v2453_v23  }
 0x141   : > { %v1249_v24 = vpop.f32.mrb[20].mxu1  ;;  %v1538_v25 = vpop.f32.mrb[20].mxu0 }
 0x142   : > { %v1251_v26 = vpop.f32.mrb[21].mxu1  ;;  %v1539_v27 = vadd.f32 %v1538_v25, %v1249_v24  ;;  %v1540_v28 = vpop.f32.mrb[21].mxu0 }
 0x143   : > { %v1252_v29 = vpop.f32.mrb[22].mxu1  ;;  %v1541_v30 = vpop.f32.mrb[22].mxu0 }
 0x144   : > { %v1254_v31 = vpop.f32.mrb[23].mxu1  ;;  %v1542_v32 = vadd.f32 %v1541_v30, %v1252_v29  ;;  %v1543_v33 = vpop.f32.mrb[23].mxu0 }
 0x146   : > { %v2458_v34 = vpack.c.bf16 %v1542_v32, %v1539_v27 }
 0x148   : > { %2594 = vst [vmem:[%s3206_s4 + $0x28] sm:$0xff] %v2458_v34  }
 0x149   : > { %v1257_v35 = vpop.f32.mrb[24].mxu1  ;;  %v1546_v36 = vpop.f32.mrb[24].mxu0 }
 0x14a   : > { %v1259_v37 = vpop.f32.mrb[25].mxu1  ;;  %v1547_v38 = vadd.f32 %v1546_v36, %v1257_v35  ;;  %v1548_v39 = vpop.f32.mrb[25].mxu0 }
 0x14b   : > { %v1260_v40 = vpop.f32.mrb[26].mxu1  ;;  %v1549_v41 = vpop.f32.mrb[26].mxu0 }
 0x14c   : > { %v1262_v42 = vpop.f32.mrb[27].mxu1  ;;  %v1550_v43 = vadd.f32 %v1549_v41, %v1260_v40  ;;  %v1551_v44 = vpop.f32.mrb[27].mxu0 }
 0x14e   : > { %v2463_v45 = vpack.c.bf16 %v1550_v43, %v1547_v38 }
 0x150   : > { %2595 = vst [vmem:[%s3206_s4 + $0x30] sm:$0xff] %v2463_v45  }
 0x151   : > { %v1265_v46 = vpop.f32.mrb[28].mxu1  ;;  %v1554_v47 = vpop.f32.mrb[28].mxu0 }
 0x152   : > { %v1267_v48 = vpop.f32.mrb[29].mxu1  ;;  %v1555_v49 = vadd.f32 %v1554_v47, %v1265_v46  ;;  %v1556_v50 = vpop.f32.mrb[29].mxu0 }
 0x153   : > { %v1268_v51 = vpop.f32.mrb[30].mxu1  ;;  %v1557_v52 = vpop.f32.mrb[30].mxu0 }
 0x154   : > { %v1270_v53 = vpop.f32.mrb[31].mxu1  ;;  %v1558_v54 = vadd.f32 %v1557_v52, %v1268_v51  ;;  %v1559_v55 = vpop.f32.mrb[31].mxu0 }
 0x156   : > { %v2468_v56 = vpack.c.bf16 %v1558_v54, %v1555_v49 }
 0x158   : > { %2596 = vst [vmem:[%s3206_s4 + $0x38] sm:$0xff] %v2468_v56  }
 0x159   : > { %v1273_v57 = vpop.f32.mrb[32].mxu1  ;;  %v1562_v58 = vpop.f32.mrb[32].mxu0 }
 0x15a   : > { %v1275_v59 = vpop.f32.mrb[33].mxu1  ;;  %v1563_v60 = vadd.f32 %v1562_v58, %v1273_v57  ;;  %v1564_v61 = vpop.f32.mrb[33].mxu0 }
 0x15b   : > { %v1276_v62 = vpop.f32.mrb[34].mxu1  ;;  %v1565_v63 = vpop.f32.mrb[34].mxu0 }
 0x15c   : > { %v1278_v0 = vpop.f32.mrb[35].mxu1  ;;  %v1566_v1 = vadd.f32 %v1565_v63, %v1276_v62  ;;  %v1567_v2 = vpop.f32.mrb[35].mxu0 }
 0x15e   : > { %v2473_v3 = vpack.c.bf16 %v1566_v1, %v1563_v60 }
 0x160   : > { %2597 = vst [vmem:[%s3206_s4 + $0x40] sm:$0xff] %v2473_v3  }
 0x161   : > { %v1281_v4 = vpop.f32.mrb[36].mxu1  ;;  %v1570_v5 = vpop.f32.mrb[36].mxu0 }
 0x162   : > { %v1283_v6 = vpop.f32.mrb[37].mxu1  ;;  %v1571_v7 = vadd.f32 %v1570_v5, %v1281_v4  ;;  %v1572_v8 = vpop.f32.mrb[37].mxu0 }
 0x163   : > { %v1284_v9 = vpop.f32.mrb[38].mxu1  ;;  %v1573_v10 = vpop.f32.mrb[38].mxu0 }
 0x164   : > { %v1286_v11 = vpop.f32.mrb[39].mxu1  ;;  %v1574_v12 = vadd.f32 %v1573_v10, %v1284_v9  ;;  %v1575_v13 = vpop.f32.mrb[39].mxu0 }
 0x166   : > { %v2478_v14 = vpack.c.bf16 %v1574_v12, %v1571_v7 }
 0x168   : > { %2598 = vst [vmem:[%s3206_s4 + $0x48] sm:$0xff] %v2478_v14  }
 0x169   : > { %v1289_v15 = vpop.f32.mrb[40].mxu1  ;;  %v1578_v16 = vpop.f32.mrb[40].mxu0 }
 0x16a   : > { %v1291_v17 = vpop.f32.mrb[41].mxu1  ;;  %v1579_v18 = vadd.f32 %v1578_v16, %v1289_v15  ;;  %v1580_v19 = vpop.f32.mrb[41].mxu0 }
 0x16b   : > { %v1292_v20 = vpop.f32.mrb[42].mxu1  ;;  %v1581_v21 = vpop.f32.mrb[42].mxu0 }
 0x16c   : > { %v1294_v22 = vpop.f32.mrb[43].mxu1  ;;  %v1582_v23 = vadd.f32 %v1581_v21, %v1292_v20  ;;  %v1583_v24 = vpop.f32.mrb[43].mxu0 }
 0x16e   : > { %v2483_v25 = vpack.c.bf16 %v1582_v23, %v1579_v18 }
 0x170   : > { %2599 = vst [vmem:[%s3206_s4 + $0x50] sm:$0xff] %v2483_v25  }
 0x171   : > { %v1297_v26 = vpop.f32.mrb[44].mxu1  ;;  %v1586_v27 = vpop.f32.mrb[44].mxu0 }
 0x172   : > { %v1299_v28 = vpop.f32.mrb[45].mxu1  ;;  %v1587_v29 = vadd.f32 %v1586_v27, %v1297_v26  ;;  %v1588_v30 = vpop.f32.mrb[45].mxu0 }
 0x173   : > { %v1300_v31 = vpop.f32.mrb[46].mxu1  ;;  %v1589_v32 = vpop.f32.mrb[46].mxu0 }
 0x174   : > { %v1302_v33 = vpop.f32.mrb[47].mxu1  ;;  %v1590_v34 = vadd.f32 %v1589_v32, %v1300_v31  ;;  %v1591_v35 = vpop.f32.mrb[47].mxu0 }
 0x176   : > { %v2488_v36 = vpack.c.bf16 %v1590_v34, %v1587_v29 }
 0x178   : > { %2600 = vst [vmem:[%s3206_s4 + $0x58] sm:$0xff] %v2488_v36  }
 0x179   : > { %v1305_v37 = vpop.f32.mrb[48].mxu1  ;;  %v1594_v38 = vpop.f32.mrb[48].mxu0 }
 0x17a   : > { %v1307_v39 = vpop.f32.mrb[49].mxu1  ;;  %v1595_v40 = vadd.f32 %v1594_v38, %v1305_v37  ;;  %v1596_v41 = vpop.f32.mrb[49].mxu0 }
 0x17b   : > { %v1308_v42 = vpop.f32.mrb[50].mxu1  ;;  %v1597_v43 = vpop.f32.mrb[50].mxu0 }
 0x17c   : > { %v1310_v44 = vpop.f32.mrb[51].mxu1  ;;  %v1598_v45 = vadd.f32 %v1597_v43, %v1308_v42  ;;  %v1599_v46 = vpop.f32.mrb[51].mxu0 }
 0x17e   : > { %v2493_v47 = vpack.c.bf16 %v1598_v45, %v1595_v40 }
 0x180   : > { %2601 = vst [vmem:[%s3206_s4 + $0x60] sm:$0xff] %v2493_v47  }
 0x181   : > { %v1313_v48 = vpop.f32.mrb[52].mxu1  ;;  %v1602_v49 = vpop.f32.mrb[52].mxu0 }
 0x182   : > { %v1315_v50 = vpop.f32.mrb[53].mxu1  ;;  %v1603_v51 = vadd.f32 %v1602_v49, %v1313_v48  ;;  %v1604_v52 = vpop.f32.mrb[53].mxu0 }
 0x183   : > { %v1316_v53 = vpop.f32.mrb[54].mxu1  ;;  %v1605_v54 = vpop.f32.mrb[54].mxu0 }
 0x184   : > { %v1318_v55 = vpop.f32.mrb[55].mxu1  ;;  %v1606_v56 = vadd.f32 %v1605_v54, %v1316_v53  ;;  %v1607_v57 = vpop.f32.mrb[55].mxu0 }
 0x186   : > { %v2498_v58 = vpack.c.bf16 %v1606_v56, %v1603_v51 }
 0x188   : > { %2602 = vst [vmem:[%s3206_s4 + $0x68] sm:$0xff] %v2498_v58  }
 0x189   : > { %v1321_v59 = vpop.f32.mrb[56].mxu1  ;;  %v1610_v60 = vpop.f32.mrb[56].mxu0 }
 0x18a   : > { %v1323_v61 = vpop.f32.mrb[57].mxu1  ;;  %v1611_v62 = vadd.f32 %v1610_v60, %v1321_v59  ;;  %v1612_v63 = vpop.f32.mrb[57].mxu0 }
 0x18b   : > { %v1324_v0 = vpop.f32.mrb[58].mxu1  ;;  %v1613_v1 = vpop.f32.mrb[58].mxu0 }
 0x18c   : > { %v1326_v2 = vpop.f32.mrb[59].mxu1  ;;  %v1614_v3 = vadd.f32 %v1613_v1, %v1324_v0  ;;  %v1615_v4 = vpop.f32.mrb[59].mxu0 }
 0x18e   : > { %v2503_v5 = vpack.c.bf16 %v1614_v3, %v1611_v62 }
 0x190   : > { %2603 = vst [vmem:[%s3206_s4 + $0x70] sm:$0xff] %v2503_v5  }
 0x191   : > { %v1329_v6 = vpop.f32.mrb[60].mxu1  ;;  %v1618_v7 = vpop.f32.mrb[60].mxu0 }
 0x192   : > { %v1331_v8 = vpop.f32.mrb[61].mxu1  ;;  %v1619_v9 = vadd.f32 %v1618_v7, %v1329_v6  ;;  %v1620_v10 = vpop.f32.mrb[61].mxu0 }
 0x193   : > { %v1332_v11 = vpop.f32.mrb[62].mxu1  ;;  %v1621_v12 = vpop.f32.mrb[62].mxu0 }
 0x194   : > { %v1334_v13 = vpop.f32.mrb[63].mxu1  ;;  %v1622_v14 = vadd.f32 %v1621_v12, %v1332_v11  ;;  %v1623_v15 = vpop.f32.mrb[63].mxu0 }
 0x196   : > { %v2508_v16 = vpack.c.bf16 %v1622_v14, %v1619_v9 }
 0x198   : > { %2604 = vst [vmem:[%s3206_s4 + $0x78] sm:$0xff] %v2508_v16  }
 0x199   : > { %v1337_v17 = vpop.f32.mrb[64].mxu1  ;;  %v1626_v18 = vpop.f32.mrb[64].mxu0 }
 0x19a   : > { %v1339_v19 = vpop.f32.mrb[65].mxu1  ;;  %v1627_v20 = vadd.f32 %v1626_v18, %v1337_v17  ;;  %v1628_v21 = vpop.f32.mrb[65].mxu0 }
 0x19b   : > { %v1340_v22 = vpop.f32.mrb[66].mxu1  ;;  %v1629_v23 = vpop.f32.mrb[66].mxu0 }
 0x19c   : > { %v1342_v24 = vpop.f32.mrb[67].mxu1  ;;  %v1630_v25 = vadd.f32 %v1629_v23, %v1340_v22  ;;  %v1631_v26 = vpop.f32.mrb[67].mxu0 }
 0x19e   : > { %v2513_v27 = vpack.c.bf16 %v1630_v25, %v1627_v20 }
 0x1a0   : > { %2605 = vst [vmem:[%s3206_s4 + $0x80] sm:$0xff] %v2513_v27  }
 0x1a1   : > { %v1345_v28 = vpop.f32.mrb[68].mxu1  ;;  %v1634_v29 = vpop.f32.mrb[68].mxu0 }
 0x1a2   : > { %v1347_v30 = vpop.f32.mrb[69].mxu1  ;;  %v1635_v31 = vadd.f32 %v1634_v29, %v1345_v28  ;;  %v1636_v32 = vpop.f32.mrb[69].mxu0 }
 0x1a3   : > { %v1348_v33 = vpop.f32.mrb[70].mxu1  ;;  %v1637_v34 = vpop.f32.mrb[70].mxu0 }
 0x1a4   : > { %v1350_v35 = vpop.f32.mrb[71].mxu1  ;;  %v1638_v36 = vadd.f32 %v1637_v34, %v1348_v33  ;;  %v1639_v37 = vpop.f32.mrb[71].mxu0 }
 0x1a6   : > { %v2518_v38 = vpack.c.bf16 %v1638_v36, %v1635_v31 }
 0x1a8   : > { %2606 = vst [vmem:[%s3206_s4 + $0x88] sm:$0xff] %v2518_v38  }
 0x1a9   : > { %v1353_v39 = vpop.f32.mrb[72].mxu1  ;;  %v1642_v40 = vpop.f32.mrb[72].mxu0 }
 0x1aa   : > { %v1355_v41 = vpop.f32.mrb[73].mxu1  ;;  %v1643_v42 = vadd.f32 %v1642_v40, %v1353_v39  ;;  %v1644_v43 = vpop.f32.mrb[73].mxu0 }
 0x1ab   : > { %v1356_v44 = vpop.f32.mrb[74].mxu1  ;;  %v1645_v45 = vpop.f32.mrb[74].mxu0 }
 0x1ac   : > { %v1358_v46 = vpop.f32.mrb[75].mxu1  ;;  %v1646_v47 = vadd.f32 %v1645_v45, %v1356_v44  ;;  %v1647_v48 = vpop.f32.mrb[75].mxu0 }
 0x1ae   : > { %v2523_v49 = vpack.c.bf16 %v1646_v47, %v1643_v42 }
 0x1b0   : > { %2607 = vst [vmem:[%s3206_s4 + $0x90] sm:$0xff] %v2523_v49  }
 0x1b1   : > { %v1361_v50 = vpop.f32.mrb[76].mxu1  ;;  %v1650_v51 = vpop.f32.mrb[76].mxu0 }
 0x1b2   : > { %v1363_v52 = vpop.f32.mrb[77].mxu1  ;;  %v1651_v53 = vadd.f32 %v1650_v51, %v1361_v50  ;;  %v1652_v54 = vpop.f32.mrb[77].mxu0 }
 0x1b3   : > { %v1364_v55 = vpop.f32.mrb[78].mxu1  ;;  %v1653_v56 = vpop.f32.mrb[78].mxu0 }
 0x1b4   : > { %v1366_v57 = vpop.f32.mrb[79].mxu1  ;;  %v1654_v58 = vadd.f32 %v1653_v56, %v1364_v55  ;;  %v1655_v59 = vpop.f32.mrb[79].mxu0 }
 0x1b6   : > { %v2528_v60 = vpack.c.bf16 %v1654_v58, %v1651_v53 }
 0x1b8   : > { %2608 = vst [vmem:[%s3206_s4 + $0x98] sm:$0xff] %v2528_v60  }
 0x1b9   : > { %v1369_v61 = vpop.f32.mrb[80].mxu1  ;;  %v1658_v62 = vpop.f32.mrb[80].mxu0 }
 0x1ba   : > { %v1371_v63 = vpop.f32.mrb[81].mxu1  ;;  %v1659_v0 = vadd.f32 %v1658_v62, %v1369_v61  ;;  %v1660_v1 = vpop.f32.mrb[81].mxu0 }
 0x1bb   : > { %v1372_v2 = vpop.f32.mrb[82].mxu1  ;;  %v1661_v3 = vpop.f32.mrb[82].mxu0 }
 0x1bc   : > { %v1374_v4 = vpop.f32.mrb[83].mxu1  ;;  %v1662_v5 = vadd.f32 %v1661_v3, %v1372_v2  ;;  %v1663_v6 = vpop.f32.mrb[83].mxu0 }
 0x1be   : > { %v2533_v7 = vpack.c.bf16 %v1662_v5, %v1659_v0 }
 0x1c0   : > { %2609 = vst [vmem:[%s3206_s4 + $0xa0] sm:$0xff] %v2533_v7  }
 0x1c1   : > { %v1377_v8 = vpop.f32.mrb[84].mxu1  ;;  %v1666_v9 = vpop.f32.mrb[84].mxu0 }
 0x1c2   : > { %v1379_v10 = vpop.f32.mrb[85].mxu1  ;;  %v1667_v11 = vadd.f32 %v1666_v9, %v1377_v8  ;;  %v1668_v12 = vpop.f32.mrb[85].mxu0 }
 0x1c3   : > { %v1380_v13 = vpop.f32.mrb[86].mxu1  ;;  %v1669_v14 = vpop.f32.mrb[86].mxu0 }
 0x1c4   : > { %v1382_v15 = vpop.f32.mrb[87].mxu1  ;;  %v1670_v16 = vadd.f32 %v1669_v14, %v1380_v13  ;;  %v1671_v17 = vpop.f32.mrb[87].mxu0 }
 0x1c6   : > { %v2538_v18 = vpack.c.bf16 %v1670_v16, %v1667_v11 }
 0x1c8   : > { %2610 = vst [vmem:[%s3206_s4 + $0xa8] sm:$0xff] %v2538_v18  }
 0x1c9   : > { %v1385_v19 = vpop.f32.mrb[88].mxu1  ;;  %v1674_v20 = vpop.f32.mrb[88].mxu0 }
 0x1ca   : > { %v1387_v21 = vpop.f32.mrb[89].mxu1  ;;  %v1675_v22 = vadd.f32 %v1674_v20, %v1385_v19  ;;  %v1676_v23 = vpop.f32.mrb[89].mxu0 }
 0x1cb   : > { %v1388_v24 = vpop.f32.mrb[90].mxu1  ;;  %v1677_v25 = vpop.f32.mrb[90].mxu0 }
 0x1cc   : > { %v1390_v26 = vpop.f32.mrb[91].mxu1  ;;  %v1678_v27 = vadd.f32 %v1677_v25, %v1388_v24  ;;  %v1679_v28 = vpop.f32.mrb[91].mxu0 }
 0x1ce   : > { %v2543_v29 = vpack.c.bf16 %v1678_v27, %v1675_v22 }
 0x1d0   : > { %2611 = vst [vmem:[%s3206_s4 + $0xb0] sm:$0xff] %v2543_v29  }
 0x1d1   : > { %v1393_v30 = vpop.f32.mrb[92].mxu1  ;;  %v1682_v31 = vpop.f32.mrb[92].mxu0 }
 0x1d2   : > { %v1395_v32 = vpop.f32.mrb[93].mxu1  ;;  %v1683_v33 = vadd.f32 %v1682_v31, %v1393_v30  ;;  %v1684_v34 = vpop.f32.mrb[93].mxu0 }
 0x1d3   : > { %v1396_v35 = vpop.f32.mrb[94].mxu1  ;;  %v1685_v36 = vpop.f32.mrb[94].mxu0 }
 0x1d4   : > { %v1398_v37 = vpop.f32.mrb[95].mxu1  ;;  %v1686_v38 = vadd.f32 %v1685_v36, %v1396_v35  ;;  %v1687_v39 = vpop.f32.mrb[95].mxu0 }
 0x1d6   : > { %v2548_v40 = vpack.c.bf16 %v1686_v38, %v1683_v33 }
 0x1d8   : > { %2612 = vst [vmem:[%s3206_s4 + $0xb8] sm:$0xff] %v2548_v40  }
 0x1d9   : > { %v1401_v41 = vpop.f32.mrb[96].mxu1  ;;  %v1690_v42 = vpop.f32.mrb[96].mxu0 }
 0x1da   : > { %v1403_v43 = vpop.f32.mrb[97].mxu1  ;;  %v1691_v44 = vadd.f32 %v1690_v42, %v1401_v41  ;;  %v1692_v45 = vpop.f32.mrb[97].mxu0 }
 0x1db   : > { %v1404_v46 = vpop.f32.mrb[98].mxu1  ;;  %v1693_v47 = vpop.f32.mrb[98].mxu0 }
 0x1dc   : > { %v1406_v48 = vpop.f32.mrb[99].mxu1  ;;  %v1694_v49 = vadd.f32 %v1693_v47, %v1404_v46  ;;  %v1695_v50 = vpop.f32.mrb[99].mxu0 }
 0x1de   : > { %v2553_v51 = vpack.c.bf16 %v1694_v49, %v1691_v44 }
 0x1e0   : > { %2613 = vst [vmem:[%s3206_s4 + $0xc0] sm:$0xff] %v2553_v51  }
 0x1e1   : > { %v1409_v52 = vpop.f32.mrb[100].mxu1  ;;  %v1698_v53 = vpop.f32.mrb[100].mxu0 }
 0x1e2   : > { %v1411_v54 = vpop.f32.mrb[101].mxu1  ;;  %v1699_v55 = vadd.f32 %v1698_v53, %v1409_v52  ;;  %v1700_v56 = vpop.f32.mrb[101].mxu0 }
 0x1e3   : > { %v1412_v57 = vpop.f32.mrb[102].mxu1  ;;  %v1701_v58 = vpop.f32.mrb[102].mxu0 }
 0x1e4   : > { %v1414_v59 = vpop.f32.mrb[103].mxu1  ;;  %v1702_v60 = vadd.f32 %v1701_v58, %v1412_v57  ;;  %v1703_v61 = vpop.f32.mrb[103].mxu0 }
 0x1e6   : > { %v2558_v62 = vpack.c.bf16 %v1702_v60, %v1699_v55 }
 0x1e8   : > { %2614 = vst [vmem:[%s3206_s4 + $0xc8] sm:$0xff] %v2558_v62  }
 0x1e9   : > { %v1417_v63 = vpop.f32.mrb[104].mxu1  ;;  %v1706_v0 = vpop.f32.mrb[104].mxu0 }
 0x1ea   : > { %v1419_v1 = vpop.f32.mrb[105].mxu1  ;;  %v1707_v2 = vadd.f32 %v1706_v0, %v1417_v63  ;;  %v1708_v3 = vpop.f32.mrb[105].mxu0 }
 0x1eb   : > { %v1420_v4 = vpop.f32.mrb[106].mxu1  ;;  %v1709_v5 = vpop.f32.mrb[106].mxu0 }
 0x1ec   : > { %v1422_v6 = vpop.f32.mrb[107].mxu1  ;;  %v1710_v7 = vadd.f32 %v1709_v5, %v1420_v4  ;;  %v1711_v8 = vpop.f32.mrb[107].mxu0 }
 0x1ee   : > { %v2563_v9 = vpack.c.bf16 %v1710_v7, %v1707_v2 }
 0x1f0   : > { %2615 = vst [vmem:[%s3206_s4 + $0xd0] sm:$0xff] %v2563_v9  }
 0x1f1   : > { %v1425_v10 = vpop.f32.mrb[108].mxu1  ;;  %v1714_v11 = vpop.f32.mrb[108].mxu0 }
 0x1f2   : > { %v1427_v12 = vpop.f32.mrb[109].mxu1  ;;  %v1715_v13 = vadd.f32 %v1714_v11, %v1425_v10  ;;  %v1716_v14 = vpop.f32.mrb[109].mxu0 }
 0x1f3   : > { %v1428_v15 = vpop.f32.mrb[110].mxu1  ;;  %v1717_v16 = vpop.f32.mrb[110].mxu0 }
 0x1f4   : > { %v1430_v17 = vpop.f32.mrb[111].mxu1  ;;  %v1718_v18 = vadd.f32 %v1717_v16, %v1428_v15  ;;  %v1719_v19 = vpop.f32.mrb[111].mxu0 }
 0x1f6   : > { %v2568_v20 = vpack.c.bf16 %v1718_v18, %v1715_v13 }
 0x1f8   : > { %2616 = vst [vmem:[%s3206_s4 + $0xd8] sm:$0xff] %v2568_v20  }
 0x1f9   : > { %v1433_v21 = vpop.f32.mrb[112].mxu1  ;;  %v1722_v22 = vpop.f32.mrb[112].mxu0 }
 0x1fa   : > { %v1435_v23 = vpop.f32.mrb[113].mxu1  ;;  %v1723_v24 = vadd.f32 %v1722_v22, %v1433_v21  ;;  %v1724_v25 = vpop.f32.mrb[113].mxu0 }
 0x1fb   : > { %v1436_v26 = vpop.f32.mrb[114].mxu1  ;;  %v1725_v27 = vpop.f32.mrb[114].mxu0 }
 0x1fc   : > { %v1438_v28 = vpop.f32.mrb[115].mxu1  ;;  %v1726_v29 = vadd.f32 %v1725_v27, %v1436_v26  ;;  %v1727_v30 = vpop.f32.mrb[115].mxu0 }
 0x1fe   : > { %v2573_v31 = vpack.c.bf16 %v1726_v29, %v1723_v24 }
 0x200   : > { %2617 = vst [vmem:[%s3206_s4 + $0xe0] sm:$0xff] %v2573_v31  }
 0x201   : > { %v1441_v32 = vpop.f32.mrb[116].mxu1  ;;  %v1730_v33 = vpop.f32.mrb[116].mxu0 }
 0x202   : > { %v1443_v34 = vpop.f32.mrb[117].mxu1  ;;  %v1731_v35 = vadd.f32 %v1730_v33, %v1441_v32  ;;  %v1732_v36 = vpop.f32.mrb[117].mxu0 }
 0x203   : > { %v1444_v37 = vpop.f32.mrb[118].mxu1  ;;  %v1733_v38 = vpop.f32.mrb[118].mxu0 }
 0x204   : > { %v1446_v39 = vpop.f32.mrb[119].mxu1  ;;  %v1734_v40 = vadd.f32 %v1733_v38, %v1444_v37  ;;  %v1735_v41 = vpop.f32.mrb[119].mxu0 }
 0x206   : > { %v2578_v42 = vpack.c.bf16 %v1734_v40, %v1731_v35 }
 0x208   : > { %2618 = vst [vmem:[%s3206_s4 + $0xe8] sm:$0xff] %v2578_v42  }
 0x209   : > { %v1449_v43 = vpop.f32.mrb[120].mxu1  ;;  %v1738_v44 = vpop.f32.mrb[120].mxu0 }
 0x20a   : > { %v1451_v45 = vpop.f32.mrb[121].mxu1  ;;  %v1739_v46 = vadd.f32 %v1738_v44, %v1449_v43  ;;  %v1740_v47 = vpop.f32.mrb[121].mxu0 }
 0x20b   : > { %v1452_v48 = vpop.f32.mrb[122].mxu1  ;;  %v1741_v49 = vpop.f32.mrb[122].mxu0 }
 0x20c   : > { %v1454_v50 = vpop.f32.mrb[123].mxu1  ;;  %v1742_v51 = vadd.f32 %v1741_v49, %v1452_v48  ;;  %v1743_v52 = vpop.f32.mrb[123].mxu0 }
 0x20e   : > { %v2583_v53 = vpack.c.bf16 %v1742_v51, %v1739_v46 }
 0x210   : > { %2619 = vst [vmem:[%s3206_s4 + $0xf0] sm:$0xff] %v2583_v53  }
 0x211   : > { %v1457_v54 = vpop.f32.mrb[124].mxu1  ;;  %v1746_v55 = vpop.f32.mrb[124].mxu0 }
 0x212   : > { %v1459_v56 = vpop.f32.mrb[125].mxu1  ;;  %v1747_v57 = vadd.f32 %v1746_v55, %v1457_v54  ;;  %v1748_v58 = vpop.f32.mrb[125].mxu0 }
 0x213   : > { %v1460_v59 = vpop.f32.mrb[126].mxu1  ;;  %v1749_v60 = vpop.f32.mrb[126].mxu0 }
 0x214   : > { %v1462_v61 = vpop.f32.mrb[127].mxu1  ;;  %v1750_v62 = vadd.f32 %v1749_v60, %v1460_v59  ;;  %v1751_v63 = vpop.f32.mrb[127].mxu0 }
 0x216   : > { %v2588_v0 = vpack.c.bf16 %v1750_v62, %v1747_v57 }
 0x218   : > { %2620 = vst [vmem:[%s3206_s4 + $0xf8] sm:$0xff] %v2588_v0  }
 0x219 PF: > { %s12_s9 = sadd.s32 1, %s2924_s9  }
 0x21a   : > { %p9_p4 = scmp.ge.s32.totalorder %s12_s9, 4  }
 0x21c   :  { %11 = sbr.rel (!%p9_p4) target bundleno = 1 (0x1), region = 58 }

// kernel: gcn_forward.5
= control target key start
LH: loop header
LB: loop body
LE: loop exit
PB: predicated region body
PF: predicated region fallthrough
CT: control target
= control target key end

     0   :  { %s5162_s12 = smov 0   ;;  %s6367_s0 = inlined_call_operand.vmem [shape: bf16[1024,1024], index: 0, kind: input, shape index: {}]   ;;  %s6368_s1 = inlined_call_operand.vmem [shape: bf16[1024,128], index: 1, kind: input, shape index: {}]   ;;  %s6369_s2 = inlined_call_operand.vmem [shape: f32[1,128], index: 2, kind: input, shape index: {}]   ;;  %s6370_s3 = inlined_call_operand.vmem [shape: f32[1024,128], index: 3, kind: output, shape index: {}]  }
   0x1 LB: > { %s4085_s13 = sadd.s32 4294967295, %s5139_s12   ;;  %p4089_p0 = scmp.ge.s32.totalorder %s5139_s12, 1  ;;  %s5139_s12 = sphi %s5162_s12, %s13_s12  }
   0x2   : > { %p139_p1 = scmp.lt.s32.totalorder %s5139_s12, 3 }
   0x4   : > { %p140_p2 = pnand %p4089_p0, %p139_p1 }
   0x6   : > { %143 = sbr.rel (%p140_p2) target bundleno = 1114 (0x45a), region = 32 }
   0xd   : > { %v4812_v0 = vld [vmem:[%s6368_s1] sm:$0xff]   ;;  %v5141_v1 = vmov 0   ;;  %v4814_v3 = vld [vmem:[%s6368_s1 + $0x8] sm:$0xff]   ;;  %v4816_v5 = vld [vmem:[%s6368_s1 + $0x10] sm:$0xff]   ;;  %s4090_s7 = sshll.u32 %s4085_s13, 6 }
   0xe   : > { %2233 = vmatprep.subr.bf16.mxu1 %v5141_v1  ;;  %2811 = vmatprep.subr.bf16.mxu0 %v5141_v1  ;;  %v4813_v2 = vld [vmem:[%s6368_s1 + $0x100] sm:$0xff]   ;;  %v4815_v4 = vld [vmem:[%s6368_s1 + $0x108] sm:$0xff]   ;;  %v4817_v6 = vld [vmem:[%s6368_s1 + $0x110] sm:$0xff]   ;;  %p165_p3 = scmp.lt.s32.totalorder %s4090_s7, 127 }
   0xf   : > { %2234 = vmatpush1.bf16.msra.mxu1 %v4812_v0  ;;  %2812 = vmatpush1.bf16.msra.mxu0 %v4813_v2  ;;  %v4818_v7 = vld [vmem:[%s6368_s1 + $0x18] sm:$0xff]   ;;  %v4820_v9 = vld [vmem:[%s6368_s1 + $0x20] sm:$0xff]   ;;  %v4822_v11 = vld [vmem:[%s6368_s1 + $0x28] sm:$0xff]  }
  0x10   : > { %2235 = vmatprep.subr.bf16.mxu1 %v5141_v1  ;;  %2813 = vmatprep.subr.bf16.mxu0 %v5141_v1  ;;  %v4819_v8 = vld [vmem:[%s6368_s1 + $0x118] sm:$0xff]   ;;  %v4821_v10 = vld [vmem:[%s6368_s1 + $0x120] sm:$0xff]   ;;  %v4823_v12 = vld [vmem:[%s6368_s1 + $0x128] sm:$0xff]   ;;  %s6417_s7 = smov (!%p165_p3, %s4090_s7), 127 }
  0x11   : > { %v4824_v13 = vld [vmem:[%s6368_s1 + $0x30] sm:$0xff]   ;;  %v4826_v15 = vld [vmem:[%s6368_s1 + $0x38] sm:$0xff]   ;;  %s4418_s19 = sshll.u32 %s6417_s7, 5  ;;  %v4828_v17 = vld [vmem:[%s6368_s1 + $0x40] sm:$0xff]   ;;  %s4094_s28 = sshll.u32 %s6417_s7, 3 }
  0x12   : > { %v4825_v14 = vld [vmem:[%s6368_s1 + $0x130] sm:$0xff]   ;;  %v4827_v16 = vld [vmem:[%s6368_s1 + $0x138] sm:$0xff]   ;;  %s5242_s24 = scalar_lea.vmem %s6367_s0, %s4418_s19  ;;  %v4829_v18 = vld [vmem:[%s6368_s1 + $0x140] sm:$0xff]   ;;  %s6136_s4 = scalar_lea.vmem %s6370_s3, %s4094_s28 }
  0x13   : > { %2236 = vmatpush1.bf16.msra.mxu1 %v4814_v3  ;;  %2814 = vmatpush1.bf16.msra.mxu0 %v4815_v4  ;;  %v5253_v19 = vld [vmem:[%s5242_s24] sm:$0xff]  ;;  %v5259_v21 = vld [vmem:[%s5242_s24 + $0x10] sm:$0xff]  ;;  %v4830_v24 = vld [vmem:[%s6368_s1 + $0x48] sm:$0xff]  }
  0x14   : > { %2237 = vmatprep.subr.bf16.mxu1 %v5141_v1  ;;  %2815 = vmatprep.subr.bf16.mxu0 %v5141_v1  ;;  %v5256_v20 = vld [vmem:[%s5242_s24 + $0x20] sm:$0xff]  ;;  %v5264_v23 = vld [vmem:[%s5242_s24 + $0x30] sm:$0xff]  ;;  %v4831_v26 = vld [vmem:[%s6368_s1 + $0x148] sm:$0xff]  }
  0x15   : > { %v4097_v22 = vcombine.high %v5253_v19, %v5256_v20  ;;  %v4101_v25 = vcombine.high %v5259_v21, %v5264_v23  ;;  %v4832_v27 = vld [vmem:[%s6368_s1 + $0x50] sm:$0xff]   ;;  %v4834_v29 = vld [vmem:[%s6368_s1 + $0x58] sm:$0xff]   ;;  %v4836_v31 = vld [vmem:[%s6368_s1 + $0x60] sm:$0xff]   ;;  %v4096_v42 = vcombine.low %v5253_v19, %v5256_v20  ;;  %v4100_v44 = vcombine.low %v5259_v21, %v5264_v23 }
  0x16   : > { %v4833_v28 = vld [vmem:[%s6368_s1 + $0x150] sm:$0xff]   ;;  %v4835_v30 = vld [vmem:[%s6368_s1 + $0x158] sm:$0xff]   ;;  %v4837_v32 = vld [vmem:[%s6368_s1 + $0x160] sm:$0xff]  }
  0x17   : > { %2238 = vmatpush1.bf16.msra.mxu1 %v4816_v5  ;;  %2816 = vmatpush1.bf16.msra.mxu0 %v4817_v6  ;;  %v4838_v33 = vld [vmem:[%s6368_s1 + $0x68] sm:$0xff]   ;;  %v4840_v35 = vld [vmem:[%s6368_s1 + $0x70] sm:$0xff]   ;;  %v4842_v37 = vld [vmem:[%s6368_s1 + $0x78] sm:$0xff]  }
  0x18   : > { %2239 = vmatprep.subr.bf16.mxu1 %v5141_v1  ;;  %2817 = vmatprep.subr.bf16.mxu0 %v5141_v1  ;;  %v4839_v34 = vld [vmem:[%s6368_s1 + $0x168] sm:$0xff]   ;;  %v4841_v36 = vld [vmem:[%s6368_s1 + $0x170] sm:$0xff]   ;;  %v4843_v38 = vld [vmem:[%s6368_s1 + $0x178] sm:$0xff]  }
  0x19   : > { %2265 = vmatprep.mubr.bf16.mxu1 %v4097_v22  ;;  %2843 = vmatprep.mubr.bf16.mxu0 %v4101_v25  ;;  %v186_v39 = vld [vmem:[%s5242_s24 + $0x40] sm:$0xff]  ;;  %v188_v41 = vld [vmem:[%s5242_s24 + $0x50] sm:$0xff]  ;;  %v4846_v51 = vld [vmem:[%s6368_s1 + $0x88] sm:$0xff]  }
  0x1a   : > { %v190_v40 = vld [vmem:[%s5242_s24 + $0x60] sm:$0xff]  ;;  %v192_v43 = vld [vmem:[%s5242_s24 + $0x70] sm:$0xff]  ;;  %v4847_v52 = vld [vmem:[%s6368_s1 + $0x188] sm:$0xff]  }
  0x1b   : > { %2240 = vmatpush1.bf16.msra.mxu1 %v4818_v7  ;;  %2818 = vmatpush1.bf16.msra.mxu0 %v4819_v8  ;;  %v4844_v45 = vld [vmem:[%s6368_s1 + $0x80] sm:$0xff]   ;;  %v4105_v47 = vcombine.high %v186_v39, %v190_v40  ;;  %v4109_v48 = vcombine.high %v188_v41, %v192_v43  ;;  %v196_v53 = vld [vmem:[%s5242_s24 + $0x90] sm:$0xff]  ;;  %v4104_v55 = vcombine.low %v186_v39, %v190_v40  ;;  %v4850_v2 = vld [vmem:[%s6368_s1 + $0x98] sm:$0xff]  }
  0x1c   : > { %2241 = vmatprep.subr.bf16.mxu1 %v5141_v1  ;;  %2819 = vmatprep.subr.bf16.mxu0 %v5141_v1  ;;  %v4845_v46 = vld [vmem:[%s6368_s1 + $0x180] sm:$0xff]   ;;  %v200_v54 = vld [vmem:[%s5242_s24 + $0xb0] sm:$0xff]  ;;  %v4108_v56 = vcombine.low %v188_v41, %v192_v43  ;;  %v4851_v3 = vld [vmem:[%s6368_s1 + $0x198] sm:$0xff]  }
  0x1d   : > { %v194_v49 = vld [vmem:[%s5242_s24 + $0x80] sm:$0xff]  ;;  %v4117_v58 = vcombine.high %v196_v53, %v200_v54  ;;  %v4848_v59 = vld [vmem:[%s6368_s1 + $0x90] sm:$0xff]   ;;  %v4116_v6 = vcombine.low %v196_v53, %v200_v54  ;;  %v4863_v39 = vld [vmem:[%s6368_s1 + $0x1c8] sm:$0xff]  }
  0x1e   : > { %v198_v50 = vld [vmem:[%s5242_s24 + $0xa0] sm:$0xff]  ;;  %v4849_v60 = vld [vmem:[%s6368_s1 + $0x190] sm:$0xff]   ;;  %v4866_v54 = vld [vmem:[%s6368_s1 + $0xd8] sm:$0xff]  }
  0x1f   : > { %2242 = vmatpush1.bf16.msra.mxu1 %v4820_v9  ;;  %2820 = vmatpush1.bf16.msra.mxu0 %v4821_v10  ;;  %v4113_v57 = vcombine.high %v194_v49, %v198_v50  ;;  %v202_v61 = vld [vmem:[%s5242_s24 + $0xc0] sm:$0xff]  ;;  %v204_v63 = vld [vmem:[%s5242_s24 + $0xd0] sm:$0xff]  ;;  %v4112_v4 = vcombine.low %v194_v49, %v198_v50 }
  0x20   : > { %2243 = vmatprep.subr.bf16.mxu1 %v5141_v1  ;;  %2821 = vmatprep.subr.bf16.mxu0 %v5141_v1  ;;  %v206_v62 = vld [vmem:[%s5242_s24 + $0xe0] sm:$0xff]  ;;  %v208_v0 = vld [vmem:[%s5242_s24 + $0xf0] sm:$0xff] }
  0x21   : > { %v4852_v5 = vld [vmem:[%s6368_s1 + $0xa0] sm:$0xff]   ;;  %v4121_v7 = vcombine.high %v202_v61, %v206_v62  ;;  %v4125_v9 = vcombine.high %v204_v63, %v208_v0  ;;  %v4856_v20 = vld [vmem:[%s6368_s1 + $0xb0] sm:$0xff]  }
  0x22   : > { %v4853_v8 = vld [vmem:[%s6368_s1 + $0x1a0] sm:$0xff]   ;;  %v4857_v21 = vld [vmem:[%s6368_s1 + $0x1b0] sm:$0xff]  }
  0x23   : > { %2244 = vmatpush1.bf16.msra.mxu1 %v4822_v11  ;;  %2822 = vmatpush1.bf16.msra.mxu0 %v4823_v12  ;;  %v210_v10 = vld [vmem:[%s5242_s24 + $0x100] sm:$0xff]  ;;  %v212_v12 = vld [vmem:[%s5242_s24 + $0x110] sm:$0xff] }
  0x24   : > { %2245 = vmatprep.subr.bf16.mxu1 %v5141_v1  ;;  %2823 = vmatprep.subr.bf16.mxu0 %v5141_v1  ;;  %v214_v11 = vld [vmem:[%s5242_s24 + $0x120] sm:$0xff]  ;;  %v220_v25 = vld [vmem:[%s5242_s24 + $0x150] sm:$0xff] }
  0x25   : > { %v218_v22 = vld [vmem:[%s5242_s24 + $0x140] sm:$0xff]  ;;  %v240_v49 = vld [vmem:[%s5242_s24 + $0x1f0] sm:$0xff] }
  0x26   : > { %v222_v23 = vld [vmem:[%s5242_s24 + $0x160] sm:$0xff] }
  0x27   : > { %2246 = vmatpush1.bf16.msra.mxu1 %v4824_v13  ;;  %2824 = vmatpush1.bf16.msra.mxu0 %v4825_v14  ;;  %v216_v13 = vld [vmem:[%s5242_s24 + $0x130] sm:$0xff]  ;;  %v4854_v14 = vld [vmem:[%s6368_s1 + $0xa8] sm:$0xff]   ;;  %v4136_v40 = vcombine.low %v218_v22, %v222_v23 }
  0x28   : > { %2247 = vmatprep.subr.bf16.mxu1 %v5141_v1  ;;  %2825 = vmatprep.subr.bf16.mxu0 %v5141_v1  ;;  %v4133_v19 = vcombine.high %v212_v12, %v216_v13 }
  0x2b   : > { %2248 = vmatpush1.bf16.msra.mxu1 %v4826_v15  ;;  %2826 = vmatpush1.bf16.msra.mxu0 %v4827_v16  ;;  %v4855_v15 = vld [vmem:[%s6368_s1 + $0x1a8] sm:$0xff]   ;;  %v4120_v16 = vcombine.low %v202_v61, %v206_v62 }
  0x2c   : > { %2249 = vmatprep.subr.bf16.mxu1 %v5141_v1  ;;  %2827 = vmatprep.subr.bf16.mxu0 %v5141_v1 }
  0x2f   : > { %2250 = vmatpush1.bf16.msra.mxu1 %v4828_v17  ;;  %2828 = vmatpush1.bf16.msra.mxu0 %v4829_v18  ;;  %v4124_v17 = vcombine.low %v204_v63, %v208_v0  ;;  %v4129_v18 = vcombine.high %v210_v10, %v214_v11  ;;  %v250_v0 = vld [vmem:[%s5242_s24 + $0x240] sm:$0xff] }
  0x30   : > { %2251 = vmatprep.subr.bf16.mxu1 %v5141_v1  ;;  %2829 = vmatprep.subr.bf16.mxu0 %v5141_v1 }
  0x33   : > { %2252 = vmatpush1.bf16.msra.mxu1 %v4830_v24  ;;  %2830 = vmatpush1.bf16.msra.mxu0 %v4831_v26  ;;  %v4858_v24 = vld [vmem:[%s6368_s1 + $0xb8] sm:$0xff]   ;;  %v224_v26 = vld [vmem:[%s5242_s24 + $0x170] sm:$0xff] }
  0x34   : > { %2253 = vmatprep.subr.bf16.mxu1 %v5141_v1  ;;  %2831 = vmatprep.subr.bf16.mxu0 %v5141_v1  ;;  %v4140_v41 = vcombine.low %v220_v25, %v224_v26 }
  0x37   : > { %2254 = vmatpush1.bf16.msra.mxu1 %v4832_v27  ;;  %2832 = vmatpush1.bf16.msra.mxu0 %v4833_v28  ;;  %v4859_v27 = vld [vmem:[%s6368_s1 + $0x1b8] sm:$0xff]   ;;  %v4128_v28 = vcombine.low %v210_v10, %v214_v11  ;;  %v4869_v10 = vld [vmem:[%s6368_s1 + $0x1e0] sm:$0xff]  }
  0x38   : > { %2255 = vmatprep.subr.bf16.mxu1 %v5141_v1  ;;  %2833 = vmatprep.subr.bf16.mxu0 %v5141_v1  ;;  %v258_v11 = vld [vmem:[%s5242_s24 + $0x280] sm:$0xff] }
  0x3b   : > { %2256 = vmatpush1.bf16.msra.mxu1 %v4834_v29  ;;  %2834 = vmatpush1.bf16.msra.mxu0 %v4835_v30  ;;  %v4132_v29 = vcombine.low %v212_v12, %v216_v13  ;;  %v4137_v30 = vcombine.high %v218_v22, %v222_v23  ;;  %v262_v12 = vld [vmem:[%s5242_s24 + $0x2a0] sm:$0xff]  ;;  %v260_v13 = vld [vmem:[%s5242_s24 + $0x290] sm:$0xff] }
  0x3c   : > { %2257 = vmatprep.subr.bf16.mxu1 %v5141_v1  ;;  %2835 = vmatprep.subr.bf16.mxu0 %v5141_v1  ;;  %v272_v22 = vld [vmem:[%s5242_s24 + $0x2f0] sm:$0xff]  ;;  %v4176_v23 = vcombine.low %v258_v11, %v262_v12 }
  0x3f   : > { %2258 = vmatpush1.bf16.msra.mxu1 %v4836_v31  ;;  %2836 = vmatpush1.bf16.msra.mxu0 %v4837_v32  ;;  %v4141_v31 = vcombine.high %v220_v25, %v224_v26  ;;  %v4860_v32 = vld [vmem:[%s6368_s1 + $0xc0] sm:$0xff]  }
  0x40   : > { %2259 = vmatprep.subr.bf16.mxu1 %v5141_v1  ;;  %2837 = vmatprep.subr.bf16.mxu0 %v5141_v1 }
  0x43   : > { %2260 = vmatpush1.bf16.msra.mxu1 %v4838_v33  ;;  %2838 = vmatpush1.bf16.msra.mxu0 %v4839_v34  ;;  %v4861_v33 = vld [vmem:[%s6368_s1 + $0x1c0] sm:$0xff]  }
  0x44   : > { %2261 = vmatprep.subr.bf16.mxu1 %v5141_v1  ;;  %2839 = vmatprep.subr.bf16.mxu0 %v5141_v1  ;;  %v226_v34 = vld [vmem:[%s5242_s24 + $0x180] sm:$0xff] }
  0x47   : > { %2262 = vmatpush1.bf16.msra.mxu1 %v4840_v35  ;;  %2840 = vmatpush1.bf16.msra.mxu0 %v4841_v36  ;;  %v230_v35 = vld [vmem:[%s5242_s24 + $0x1a0] sm:$0xff]  ;;  %v4862_v36 = vld [vmem:[%s6368_s1 + $0xc8] sm:$0xff]  }
  0x48   : > { %2263 = vmatprep.subr.bf16.mxu1 %v5141_v1  ;;  %2841 = vmatprep.subr.bf16.mxu0 %v5141_v1  ;;  %v4144_v50 = vcombine.low %v226_v34, %v230_v35 }
  0x4b   : > { %2264 = vmatpush1.bf16.msra.mxu1 %v4842_v37  ;;  %2842 = vmatpush1.bf16.msra.mxu0 %v4843_v38  ;;  %v228_v37 = vld [vmem:[%s5242_s24 + $0x190] sm:$0xff] }
  0x4c   : > { %2522 = vmatprep.subr.bf16.mxu1 %v5141_v1  ;;  %3100 = vmatprep.subr.bf16.mxu0 %v5141_v1  ;;  %v232_v38 = vld [vmem:[%s5242_s24 + $0x1b0] sm:$0xff] }
  0x4d   : > { %v4149_v43 = vcombine.high %v228_v37, %v232_v38 }
  0x4e   : > { %2266 = vmatmul.mubr.bf16.vlgmr.msra.gmra.mrb[0].mxu1 %v4096_v42  ;;  %2844 = vmatmul.mubr.bf16.vlgmr.msra.gmra.mrb[0].mxu0 %v4100_v44  ;;  %v4145_v42 = vcombine.high %v226_v34, %v230_v35  ;;  %v4864_v44 = vld [vmem:[%s6368_s1 + $0xd0] sm:$0xff]  }
  0x4f   : > { %2523 = vmatpush1.bf16.msra.mxu1 %v4844_v45  ;;  %3101 = vmatpush1.bf16.msra.mxu0 %v4845_v46  ;;  %v4865_v45 = vld [vmem:[%s6368_s1 + $0x1d0] sm:$0xff]   ;;  %v234_v46 = vld [vmem:[%s5242_s24 + $0x1c0] sm:$0xff] }
  0x50   : > { %2273 = vmatprep.mubr.bf16.mxu1 %v4105_v47  ;;  %2851 = vmatprep.mubr.bf16.mxu0 %v4109_v48  ;;  %v238_v47 = vld [vmem:[%s5242_s24 + $0x1e0] sm:$0xff]  ;;  %v236_v48 = vld [vmem:[%s5242_s24 + $0x1d0] sm:$0xff] }
  0x51   : > { %2524 = vmatprep.subr.bf16.mxu1 %v5141_v1  ;;  %3102 = vmatprep.subr.bf16.mxu0 %v5141_v1  ;;  %v4157_v53 = vcombine.high %v236_v48, %v240_v49  ;;  %v4156_v61 = vcombine.low %v236_v48, %v240_v49  ;;  %v294_v48 = vld [vmem:[%s5242_s24 + $0x3a0] sm:$0xff]  ;;  %v292_v49 = vld [vmem:[%s5242_s24 + $0x390] sm:$0xff] }
  0x53   : > { %2525 = vmatpush1.bf16.msra.mxu1 %v4846_v51  ;;  %3103 = vmatpush1.bf16.msra.mxu0 %v4847_v52  ;;  %v4148_v51 = vcombine.low %v228_v37, %v232_v38  ;;  %v4153_v52 = vcombine.high %v234_v46, %v238_v47  ;;  %v282_v37 = vld [vmem:[%s5242_s24 + $0x340] sm:$0xff] }
  0x54   : > { %2526 = vmatprep.subr.bf16.mxu1 %v5141_v1  ;;  %3104 = vmatprep.subr.bf16.mxu0 %v5141_v1  ;;  %v286_v38 = vld [vmem:[%s5242_s24 + $0x360] sm:$0xff] }
  0x56   : > { %2274 = vmatmul.mubr.bf16.gmra.mrb[4].mxu1 %v4104_v55  ;;  %2852 = vmatmul.mubr.bf16.gmra.mrb[4].mxu0 %v4108_v56  ;;  %v4867_v55 = vld [vmem:[%s6368_s1 + $0x1d8] sm:$0xff]   ;;  %v242_v56 = vld [vmem:[%s5242_s24 + $0x200] sm:$0xff] }
  0x57   : > { %2281 = vmatprep.mubr.bf16.mxu1 %v4113_v57  ;;  %2859 = vmatprep.mubr.bf16.mxu0 %v4117_v58  ;;  %v246_v57 = vld [vmem:[%s5242_s24 + $0x220] sm:$0xff]  ;;  %v244_v58 = vld [vmem:[%s5242_s24 + $0x210] sm:$0xff] }
  0x58   : > { %2527 = vmatpush1.bf16.msra.mxu1 %v4848_v59  ;;  %3105 = vmatpush1.bf16.msra.mxu0 %v4849_v60  ;;  %v248_v59 = vld [vmem:[%s5242_s24 + $0x230] sm:$0xff]  ;;  %v4152_v60 = vcombine.low %v234_v46, %v238_v47  ;;  %v4161_v62 = vcombine.high %v242_v56, %v246_v57  ;;  %v290_v47 = vld [vmem:[%s5242_s24 + $0x380] sm:$0xff] }
  0x59   : > { %2528 = vmatprep.subr.bf16.mxu1 %v5141_v1  ;;  %3106 = vmatprep.subr.bf16.mxu0 %v5141_v1  ;;  %v4165_v63 = vcombine.high %v244_v58, %v248_v59  ;;  %v4873_v46 = vld [vmem:[%s6368_s1 + $0x1f0] sm:$0xff]  }
  0x5c   : > { %2529 = vmatpush1.bf16.msra.mxu1 %v4850_v2  ;;  %3107 = vmatpush1.bf16.msra.mxu0 %v4851_v3  ;;  %v254_v2 = vld [vmem:[%s5242_s24 + $0x260] sm:$0xff]  ;;  %v252_v3 = vld [vmem:[%s5242_s24 + $0x250] sm:$0xff] }
  0x5d   : > { %2530 = vmatprep.subr.bf16.mxu1 %v5141_v1  ;;  %3108 = vmatprep.subr.bf16.mxu0 %v5141_v1 }
  0x5e   : > { %2282 = vmatmul.mubr.bf16.gmra.mrb[8].mxu1 %v4112_v4  ;;  %2860 = vmatmul.mubr.bf16.gmra.mrb[8].mxu0 %v4116_v6  ;;  %v256_v4 = vld [vmem:[%s5242_s24 + $0x270] sm:$0xff]  ;;  %v4164_v6 = vcombine.low %v244_v58, %v248_v59  ;;  %v4208_v59 = vcombine.low %v290_v47, %v294_v48 }
  0x5f   : > { %2289 = vmatprep.mubr.bf16.mxu1 %v4121_v7  ;;  %2867 = vmatprep.mubr.bf16.mxu0 %v4125_v9  ;;  %v4169_v7 = vcombine.high %v250_v0, %v254_v2  ;;  %v4868_v9 = vld [vmem:[%s6368_s1 + $0xe0] sm:$0xff]   ;;  %v304_v58 = vld [vmem:[%s5242_s24 + $0x3f0] sm:$0xff] }
  0x60   : > { %2531 = vmatpush1.bf16.msra.mxu1 %v4852_v5  ;;  %3109 = vmatpush1.bf16.msra.mxu0 %v4853_v8  ;;  %v4160_v5 = vcombine.low %v242_v56, %v246_v57  ;;  %v4173_v8 = vcombine.high %v252_v3, %v256_v4  ;;  %v302_v56 = vld [vmem:[%s5242_s24 + $0x3e0] sm:$0xff]  ;;  %v300_v57 = vld [vmem:[%s5242_s24 + $0x3d0] sm:$0xff] }
  0x61   : > { %2532 = vmatprep.subr.bf16.mxu1 %v5141_v1  ;;  %3110 = vmatprep.subr.bf16.mxu0 %v5141_v1 }
  0x64   : > { %2533 = vmatpush1.bf16.msra.mxu1 %v4854_v14  ;;  %3111 = vmatpush1.bf16.msra.mxu0 %v4855_v15  ;;  %v264_v14 = vld [vmem:[%s5242_s24 + $0x2b0] sm:$0xff]  ;;  %v4168_v15 = vcombine.low %v250_v0, %v254_v2  ;;  %v306_v0 = vld [vmem:[%s5242_s24 + $0x400] sm:$0xff] }
  0x65   : > { %2534 = vmatprep.subr.bf16.mxu1 %v5141_v1  ;;  %3112 = vmatprep.subr.bf16.mxu0 %v5141_v1  ;;  %v310_v2 = vld [vmem:[%s5242_s24 + $0x420] sm:$0xff] }
  0x66   : > { %2290 = vmatmul.mubr.bf16.gmra.mrb[12].mxu1 %v4120_v16  ;;  %2868 = vmatmul.mubr.bf16.gmra.mrb[12].mxu0 %v4124_v17  ;;  %v4172_v16 = vcombine.low %v252_v3, %v256_v4  ;;  %v4177_v17 = vcombine.high %v258_v11, %v262_v12  ;;  %v308_v3 = vld [vmem:[%s5242_s24 + $0x410] sm:$0xff] }
  0x67   : > { %2297 = vmatprep.mubr.bf16.mxu1 %v4129_v18  ;;  %2875 = vmatprep.mubr.bf16.mxu0 %v4133_v19  ;;  %v4181_v18 = vcombine.high %v260_v13, %v264_v14  ;;  %v266_v19 = vld [vmem:[%s5242_s24 + $0x2c0] sm:$0xff]  ;;  %v312_v4 = vld [vmem:[%s5242_s24 + $0x430] sm:$0xff] }
  0x68   : > { %2535 = vmatpush1.bf16.msra.mxu1 %v4856_v20  ;;  %3113 = vmatpush1.bf16.msra.mxu0 %v4857_v21  ;;  %v270_v20 = vld [vmem:[%s5242_s24 + $0x2e0] sm:$0xff]  ;;  %v268_v21 = vld [vmem:[%s5242_s24 + $0x2d0] sm:$0xff] }
  0x69   : > { %2536 = vmatprep.subr.bf16.mxu1 %v5141_v1  ;;  %3114 = vmatprep.subr.bf16.mxu0 %v5141_v1  ;;  %v4185_v25 = vcombine.high %v266_v19, %v270_v20  ;;  %v4189_v26 = vcombine.high %v268_v21, %v272_v22  ;;  %v4188_v34 = vcombine.low %v268_v21, %v272_v22  ;;  %v316_v11 = vld [vmem:[%s5242_s24 + $0x450] sm:$0xff] }
  0x6a   : > { %v320_v12 = vld [vmem:[%s5242_s24 + $0x470] sm:$0xff] }
  0x6b   : > { %v4236_v22 = vcombine.low %v316_v11, %v320_v12 }
  0x6c   : > { %2537 = vmatpush1.bf16.msra.mxu1 %v4858_v24  ;;  %3115 = vmatpush1.bf16.msra.mxu0 %v4859_v27  ;;  %v4180_v24 = vcombine.low %v260_v13, %v264_v14  ;;  %v4870_v27 = vld [vmem:[%s6368_s1 + $0xe8] sm:$0xff]   ;;  %v4224_v13 = vcombine.low %v306_v0, %v310_v2  ;;  %v4228_v14 = vcombine.low %v308_v3, %v312_v4 }
  0x6d   : > { %2538 = vmatprep.subr.bf16.mxu1 %v5141_v1  ;;  %3116 = vmatprep.subr.bf16.mxu0 %v5141_v1 }
  0x6e   : > { %2298 = vmatmul.mubr.bf16.gmra.mrb[16].mxu1 %v4128_v28  ;;  %2876 = vmatmul.mubr.bf16.gmra.mrb[16].mxu0 %v4132_v29  ;;  %v4871_v28 = vld [vmem:[%s6368_s1 + $0x1e8] sm:$0xff]   ;;  %v274_v29 = vld [vmem:[%s5242_s24 + $0x300] sm:$0xff] }
  0x6f   : > { %2305 = vmatprep.mubr.bf16.mxu1 %v4137_v30  ;;  %2883 = vmatprep.mubr.bf16.mxu0 %v4141_v31  ;;  %v278_v30 = vld [vmem:[%s5242_s24 + $0x320] sm:$0xff]  ;;  %v276_v31 = vld [vmem:[%s5242_s24 + $0x310] sm:$0xff] }
  0x70   : > { %2539 = vmatpush1.bf16.msra.mxu1 %v4860_v32  ;;  %3117 = vmatpush1.bf16.msra.mxu0 %v4861_v33  ;;  %v280_v32 = vld [vmem:[%s5242_s24 + $0x330] sm:$0xff]  ;;  %v4184_v33 = vcombine.low %v266_v19, %v270_v20  ;;  %v4193_v35 = vcombine.high %v274_v29, %v278_v30 }
  0x71   : > { %2540 = vmatprep.subr.bf16.mxu1 %v5141_v1  ;;  %3118 = vmatprep.subr.bf16.mxu0 %v5141_v1  ;;  %v324_v19 = vld [vmem:[%s5242_s24 + $0x490] sm:$0xff] }
  0x72   : > { %v328_v20 = vld [vmem:[%s5242_s24 + $0x4b0] sm:$0xff] }
  0x74   : > { %2541 = vmatpush1.bf16.msra.mxu1 %v4862_v36  ;;  %3119 = vmatpush1.bf16.msra.mxu0 %v4863_v39  ;;  %v4197_v36 = vcombine.high %v276_v31, %v280_v32  ;;  %v284_v39 = vld [vmem:[%s5242_s24 + $0x350] sm:$0xff] }
  0x75   : > { %2542 = vmatprep.subr.bf16.mxu1 %v5141_v1  ;;  %3120 = vmatprep.subr.bf16.mxu0 %v5141_v1 }
  0x76   : > { %2306 = vmatmul.mubr.bf16.gmra.mrb[20].mxu1 %v4136_v40  ;;  %2884 = vmatmul.mubr.bf16.gmra.mrb[20].mxu0 %v4140_v41  ;;  %v288_v40 = vld [vmem:[%s5242_s24 + $0x370] sm:$0xff]  ;;  %v4192_v41 = vcombine.low %v274_v29, %v278_v30  ;;  %v4244_v30 = vcombine.low %v324_v19, %v328_v20 }
  0x77   : > { %2313 = vmatprep.mubr.bf16.mxu1 %v4145_v42  ;;  %2891 = vmatprep.mubr.bf16.mxu0 %v4149_v43  ;;  %v4196_v42 = vcombine.low %v276_v31, %v280_v32  ;;  %v4201_v43 = vcombine.high %v282_v37, %v286_v38 }
  0x78   : > { %2543 = vmatpush1.bf16.msra.mxu1 %v4864_v44  ;;  %3121 = vmatpush1.bf16.msra.mxu0 %v4865_v45  ;;  %v4205_v44 = vcombine.high %v284_v39, %v288_v40  ;;  %v4872_v45 = vld [vmem:[%s6368_s1 + $0xf0] sm:$0xff]  }
  0x79   : > { %2544 = vmatprep.subr.bf16.mxu1 %v5141_v1  ;;  %3122 = vmatprep.subr.bf16.mxu0 %v5141_v1 }
  0x7c   : > { %2545 = vmatpush1.bf16.msra.mxu1 %v4866_v54  ;;  %3123 = vmatpush1.bf16.msra.mxu0 %v4867_v55  ;;  %v298_v55 = vld [vmem:[%s5242_s24 + $0x3c0] sm:$0xff] }
  0x7d   : > { %2546 = vmatprep.subr.bf16.mxu1 %v5141_v1  ;;  %3124 = vmatprep.subr.bf16.mxu0 %v5141_v1 }
  0x7e   : > { %2314 = vmatmul.mubr.bf16.gmra.mrb[24].mxu1 %v4144_v50  ;;  %2892 = vmatmul.mubr.bf16.gmra.mrb[24].mxu0 %v4148_v51  ;;  %v296_v50 = vld [vmem:[%s5242_s24 + $0x3b0] sm:$0xff]  ;;  %v4200_v51 = vcombine.low %v282_v37, %v286_v38 }
  0x7f   : > { %2321 = vmatprep.mubr.bf16.mxu1 %v4153_v52  ;;  %2899 = vmatprep.mubr.bf16.mxu0 %v4157_v53  ;;  %v4204_v52 = vcombine.low %v284_v39, %v288_v40  ;;  %v4209_v53 = vcombine.high %v290_v47, %v294_v48  ;;  %v4213_v54 = vcombine.high %v292_v49, %v296_v50 }
  0x80   : > { %2547 = vmatpush1.bf16.msra.mxu1 %v4868_v9  ;;  %3125 = vmatpush1.bf16.msra.mxu0 %v4869_v10  ;;  %v314_v9 = vld [vmem:[%s5242_s24 + $0x440] sm:$0xff] }
  0x81   : > { %2548 = vmatprep.subr.bf16.mxu1 %v5141_v1  ;;  %3126 = vmatprep.subr.bf16.mxu0 %v5141_v1  ;;  %v318_v10 = vld [vmem:[%s5242_s24 + $0x460] sm:$0xff] }
  0x82   : > { %v4232_v21 = vcombine.low %v314_v9, %v318_v10 }
  0x84   : > { %2549 = vmatpush1.bf16.msra.mxu1 %v4870_v27  ;;  %3127 = vmatpush1.bf16.msra.mxu0 %v4871_v28  ;;  %v332_v27 = vld [vmem:[%s5242_s24 + $0x4d0] sm:$0xff] }
  0x85   : > { %2550 = vmatprep.subr.bf16.mxu1 %v5141_v1  ;;  %3128 = vmatprep.subr.bf16.mxu0 %v5141_v1  ;;  %v336_v28 = vld [vmem:[%s5242_s24 + $0x4f0] sm:$0xff] }
  0x86   : > { %2322 = vmatmul.mubr.bf16.gmra.mrb[28].mxu1 %v4152_v60  ;;  %2900 = vmatmul.mubr.bf16.gmra.mrb[28].mxu0 %v4156_v61  ;;  %v4212_v60 = vcombine.low %v292_v49, %v296_v50  ;;  %v4217_v61 = vcombine.high %v298_v55, %v302_v56  ;;  %v4253_v32 = vcombine.high %v332_v27, %v336_v28  ;;  %v354_v49 = vld [vmem:[%s5242_s24 + $0x580] sm:$0xff] }
  0x87   : > { %2329 = vmatprep.mubr.bf16.mxu1 %v4161_v62  ;;  %2907 = vmatprep.mubr.bf16.mxu0 %v4165_v63  ;;  %v4221_v62 = vcombine.high %v300_v57, %v304_v58  ;;  %v4875_v63 = vld [vmem:[%s6368_s1 + $0x1f8] sm:$0xff]   ;;  %v4252_v38 = vcombine.low %v332_v27, %v336_v28  ;;  %v358_v50 = vld [vmem:[%s5242_s24 + $0x5a0] sm:$0xff]  ;;  %v396_v27 = vld [vmem:[%s5242_s24 + $0x6d0] sm:$0xff] }
  0x88   : > { %2551 = vmatpush1.bf16.msra.mxu1 %v4872_v45  ;;  %3129 = vmatpush1.bf16.msra.mxu0 %v4873_v46  ;;  %v400_v28 = vld [vmem:[%s5242_s24 + $0x6f0] sm:$0xff] }
  0x89   : > { %2552 = vmatprep.subr.bf16.mxu1 %v5141_v1  ;;  %3130 = vmatprep.subr.bf16.mxu0 %v5141_v1  ;;  %v4874_v1 = vld [vmem:[%s6368_s1 + $0xf8] sm:$0xff]  }
  0x8c   : > { %2553 = vmatpush1.bf16.msra.mxu1 %v4874_v1  ;;  %3131 = vmatpush1.bf16.msra.mxu0 %v4875_v63 }
  0x8e   : > { %2330 = vmatmul.mubr.bf16.gmra.mrb[32].mxu1 %v4160_v5  ;;  %2908 = vmatmul.mubr.bf16.gmra.mrb[32].mxu0 %v4164_v6  ;;  %v4216_v5 = vcombine.low %v298_v55, %v302_v56  ;;  %v4220_v6 = vcombine.low %v300_v57, %v304_v58  ;;  %v4273_v55 = vcombine.high %v354_v49, %v358_v50  ;;  %v362_v57 = vld [vmem:[%s5242_s24 + $0x5c0] sm:$0xff] }
  0x8f   : > { %2337 = vmatprep.mubr.bf16.mxu1 %v4169_v7  ;;  %2915 = vmatprep.mubr.bf16.mxu0 %v4173_v8  ;;  %v4225_v7 = vcombine.high %v306_v0, %v310_v2  ;;  %v4229_v8 = vcombine.high %v308_v3, %v312_v4  ;;  %v366_v58 = vld [vmem:[%s5242_s24 + $0x5e0] sm:$0xff]  ;;  %v372_v3 = vld [vmem:[%s5242_s24 + $0x610] sm:$0xff] }
  0x90   : > { %v4281_v1 = vcombine.high %v362_v57, %v366_v58  ;;  %v370_v0 = vld [vmem:[%s5242_s24 + $0x600] sm:$0xff]  ;;  %v376_v4 = vld [vmem:[%s5242_s24 + $0x630] sm:$0xff] }
  0x91   : > { %v374_v2 = vld [vmem:[%s5242_s24 + $0x620] sm:$0xff] }
  0x96   : > { %2338 = vmatmul.mubr.bf16.gmra.mrb[36].mxu1 %v4168_v15  ;;  %2916 = vmatmul.mubr.bf16.gmra.mrb[36].mxu0 %v4172_v16  ;;  %v4233_v15 = vcombine.high %v314_v9, %v318_v10  ;;  %v4237_v16 = vcombine.high %v316_v11, %v320_v12  ;;  %v378_v9 = vld [vmem:[%s5242_s24 + $0x640] sm:$0xff]  ;;  %v380_v11 = vld [vmem:[%s5242_s24 + $0x650] sm:$0xff] }
  0x97   : > { %2345 = vmatprep.mubr.bf16.mxu1 %v4177_v17  ;;  %2923 = vmatprep.mubr.bf16.mxu0 %v4181_v18  ;;  %v322_v17 = vld [vmem:[%s5242_s24 + $0x480] sm:$0xff]  ;;  %v384_v12 = vld [vmem:[%s5242_s24 + $0x670] sm:$0xff] }
  0x98   : > { %v326_v18 = vld [vmem:[%s5242_s24 + $0x4a0] sm:$0xff] }
  0x99   : > { %v4240_v29 = vcombine.low %v322_v17, %v326_v18  ;;  %v382_v10 = vld [vmem:[%s5242_s24 + $0x660] sm:$0xff] }
  0x9e   : > { %2346 = vmatmul.mubr.bf16.gmra.mrb[40].mxu1 %v4176_v23  ;;  %2924 = vmatmul.mubr.bf16.gmra.mrb[40].mxu0 %v4180_v24  ;;  %v4241_v23 = vcombine.high %v322_v17, %v326_v18  ;;  %v4245_v24 = vcombine.high %v324_v19, %v328_v20  ;;  %v386_v17 = vld [vmem:[%s5242_s24 + $0x680] sm:$0xff]  ;;  %v388_v19 = vld [vmem:[%s5242_s24 + $0x690] sm:$0xff] }
  0x9f   : > { %2353 = vmatprep.mubr.bf16.mxu1 %v4185_v25  ;;  %2931 = vmatprep.mubr.bf16.mxu0 %v4189_v26  ;;  %v330_v25 = vld [vmem:[%s5242_s24 + $0x4c0] sm:$0xff]  ;;  %v392_v20 = vld [vmem:[%s5242_s24 + $0x6b0] sm:$0xff] }
  0xa0   : > { %v334_v26 = vld [vmem:[%s5242_s24 + $0x4e0] sm:$0xff] }
  0xa1   : > { %v4249_v31 = vcombine.high %v330_v25, %v334_v26  ;;  %v4248_v37 = vcombine.low %v330_v25, %v334_v26  ;;  %v390_v18 = vld [vmem:[%s5242_s24 + $0x6a0] sm:$0xff] }
  0xa2   : > { %v394_v25 = vld [vmem:[%s5242_s24 + $0x6c0] sm:$0xff] }
  0xa3   : > { %v398_v26 = vld [vmem:[%s5242_s24 + $0x6e0] sm:$0xff] }
  0xa6   : > { %2354 = vmatmul.mubr.bf16.gmra.mrb[44].mxu1 %v4184_v33  ;;  %2932 = vmatmul.mubr.bf16.gmra.mrb[44].mxu0 %v4188_v34  ;;  %v338_v33 = vld [vmem:[%s5242_s24 + $0x500] sm:$0xff] }
  0xa7   : > { %2361 = vmatprep.mubr.bf16.mxu1 %v4193_v35  ;;  %2939 = vmatprep.mubr.bf16.mxu0 %v4197_v36  ;;  %v342_v34 = vld [vmem:[%s5242_s24 + $0x520] sm:$0xff]  ;;  %v340_v35 = vld [vmem:[%s5242_s24 + $0x510] sm:$0xff] }
  0xa8   : > { %v344_v36 = vld [vmem:[%s5242_s24 + $0x530] sm:$0xff]  ;;  %v4257_v39 = vcombine.high %v338_v33, %v342_v34  ;;  %v4256_v45 = vcombine.low %v338_v33, %v342_v34  ;;  %v402_v33 = vld [vmem:[%s5242_s24 + $0x700] sm:$0xff] }
  0xa9   : > { %v4261_v40 = vcombine.high %v340_v35, %v344_v36  ;;  %v4260_v46 = vcombine.low %v340_v35, %v344_v36  ;;  %v406_v34 = vld [vmem:[%s5242_s24 + $0x720] sm:$0xff]  ;;  %v404_v35 = vld [vmem:[%s5242_s24 + $0x710] sm:$0xff] }
  0xaa   : > { %v408_v36 = vld [vmem:[%s5242_s24 + $0x730] sm:$0xff] }
  0xae   : > { %2362 = vmatmul.mubr.bf16.gmra.mrb[48].mxu1 %v4192_v41  ;;  %2940 = vmatmul.mubr.bf16.gmra.mrb[48].mxu0 %v4196_v42  ;;  %v346_v41 = vld [vmem:[%s5242_s24 + $0x540] sm:$0xff] }
  0xaf   : > { %2369 = vmatprep.mubr.bf16.mxu1 %v4201_v43  ;;  %2947 = vmatprep.mubr.bf16.mxu0 %v4205_v44  ;;  %v350_v42 = vld [vmem:[%s5242_s24 + $0x560] sm:$0xff]  ;;  %v348_v43 = vld [vmem:[%s5242_s24 + $0x550] sm:$0xff] }
  0xb0   : > { %v352_v44 = vld [vmem:[%s5242_s24 + $0x570] sm:$0xff]  ;;  %v4265_v47 = vcombine.high %v346_v41, %v350_v42 }
  0xb1   : > { %v4269_v48 = vcombine.high %v348_v43, %v352_v44 }
  0xb6   : > { %2370 = vmatmul.mubr.bf16.gmra.mrb[52].mxu1 %v4200_v51  ;;  %2948 = vmatmul.mubr.bf16.gmra.mrb[52].mxu0 %v4204_v52  ;;  %v356_v51 = vld [vmem:[%s5242_s24 + $0x590] sm:$0xff] }
  0xb7   : > { %2377 = vmatprep.mubr.bf16.mxu1 %v4209_v53  ;;  %2955 = vmatprep.mubr.bf16.mxu0 %v4213_v54  ;;  %v360_v52 = vld [vmem:[%s5242_s24 + $0x5b0] sm:$0xff]  ;;  %v4264_v53 = vcombine.low %v346_v41, %v350_v42  ;;  %v4268_v54 = vcombine.low %v348_v43, %v352_v44  ;;  %v410_v41 = vld [vmem:[%s5242_s24 + $0x740] sm:$0xff] }
  0xb8   : > { %v4277_v56 = vcombine.high %v356_v51, %v360_v52  ;;  %v414_v42 = vld [vmem:[%s5242_s24 + $0x760] sm:$0xff]  ;;  %v412_v43 = vld [vmem:[%s5242_s24 + $0x750] sm:$0xff] }
  0xb9   : > { %v416_v44 = vld [vmem:[%s5242_s24 + $0x770] sm:$0xff] }
  0xbe   : > { %2378 = vmatmul.mubr.bf16.gmra.mrb[56].mxu1 %v4208_v59  ;;  %2956 = vmatmul.mubr.bf16.gmra.mrb[56].mxu0 %v4212_v60  ;;  %v364_v59 = vld [vmem:[%s5242_s24 + $0x5d0] sm:$0xff] }
  0xbf   : > { %2385 = vmatprep.mubr.bf16.mxu1 %v4217_v61  ;;  %2963 = vmatprep.mubr.bf16.mxu0 %v4221_v62  ;;  %v368_v60 = vld [vmem:[%s5242_s24 + $0x5f0] sm:$0xff]  ;;  %v4272_v61 = vcombine.low %v354_v49, %v358_v50  ;;  %v4276_v62 = vcombine.low %v356_v51, %v360_v52  ;;  %v418_v49 = vld [vmem:[%s5242_s24 + $0x780] sm:$0xff] }
  0xc0   : > { %v4285_v63 = vcombine.high %v364_v59, %v368_v60  ;;  %v422_v50 = vld [vmem:[%s5242_s24 + $0x7a0] sm:$0xff]  ;;  %v420_v51 = vld [vmem:[%s5242_s24 + $0x790] sm:$0xff] }
  0xc1   : > { %v424_v52 = vld [vmem:[%s5242_s24 + $0x7b0] sm:$0xff] }
  0xc6   : > { %2386 = vmatmul.mubr.bf16.gmra.mrb[60].mxu1 %v4216_v5  ;;  %2964 = vmatmul.mubr.bf16.gmra.mrb[60].mxu0 %v4220_v6  ;;  %v4280_v5 = vcombine.low %v362_v57, %v366_v58  ;;  %v4284_v6 = vcombine.low %v364_v59, %v368_v60  ;;  %v426_v57 = vld [vmem:[%s5242_s24 + $0x7c0] sm:$0xff]  ;;  %v428_v59 = vld [vmem:[%s5242_s24 + $0x7d0] sm:$0xff] }
  0xc7   : > { %2393 = vmatprep.mubr.bf16.mxu1 %v4225_v7  ;;  %2971 = vmatprep.mubr.bf16.mxu0 %v4229_v8  ;;  %v4289_v7 = vcombine.high %v370_v0, %v374_v2  ;;  %v4293_v8 = vcombine.high %v372_v3, %v376_v4  ;;  %v430_v58 = vld [vmem:[%s5242_s24 + $0x7e0] sm:$0xff]  ;;  %v432_v60 = vld [vmem:[%s5242_s24 + $0x7f0] sm:$0xff] }
  0xce   : > { %2394 = vmatmul.mubr.bf16.gmra.mrb[64].mxu1 %v4224_v13  ;;  %2972 = vmatmul.mubr.bf16.gmra.mrb[64].mxu0 %v4228_v14  ;;  %v4288_v13 = vcombine.low %v370_v0, %v374_v2  ;;  %v4292_v14 = vcombine.low %v372_v3, %v376_v4  ;;  %v179_v0 = vld [vmem:[%s5242_s24 + $0x8] sm:$0xff]  ;;  %v181_v3 = vld [vmem:[%s5242_s24 + $0x18] sm:$0xff] }
  0xcf   : > { %2401 = vmatprep.mubr.bf16.mxu1 %v4233_v15  ;;  %2979 = vmatprep.mubr.bf16.mxu0 %v4237_v16  ;;  %v4297_v15 = vcombine.high %v378_v9, %v382_v10  ;;  %v4301_v16 = vcombine.high %v380_v11, %v384_v12  ;;  %v183_v2 = vld [vmem:[%s5242_s24 + $0x28] sm:$0xff]  ;;  %v185_v4 = vld [vmem:[%s5242_s24 + $0x38] sm:$0xff] }
  0xd6   : > { %2402 = vmatmul.mubr.bf16.gmra.mrb[68].mxu1 %v4232_v21  ;;  %2980 = vmatmul.mubr.bf16.gmra.mrb[68].mxu0 %v4236_v22  ;;  %v4296_v21 = vcombine.low %v378_v9, %v382_v10  ;;  %v4300_v22 = vcombine.low %v380_v11, %v384_v12  ;;  %v187_v9 = vld [vmem:[%s5242_s24 + $0x48] sm:$0xff]  ;;  %v189_v11 = vld [vmem:[%s5242_s24 + $0x58] sm:$0xff] }
  0xd7   : > { %2409 = vmatprep.mubr.bf16.mxu1 %v4241_v23  ;;  %2987 = vmatprep.mubr.bf16.mxu0 %v4245_v24  ;;  %v4305_v23 = vcombine.high %v386_v17, %v390_v18  ;;  %v4309_v24 = vcombine.high %v388_v19, %v392_v20  ;;  %v191_v10 = vld [vmem:[%s5242_s24 + $0x68] sm:$0xff]  ;;  %v193_v12 = vld [vmem:[%s5242_s24 + $0x78] sm:$0xff] }
  0xde   : > { %2410 = vmatmul.mubr.bf16.gmra.mrb[72].mxu1 %v4240_v29  ;;  %2988 = vmatmul.mubr.bf16.gmra.mrb[72].mxu0 %v4244_v30  ;;  %v4304_v29 = vcombine.low %v386_v17, %v390_v18  ;;  %v4308_v30 = vcombine.low %v388_v19, %v392_v20  ;;  %v195_v17 = vld [vmem:[%s5242_s24 + $0x88] sm:$0xff]  ;;  %v197_v19 = vld [vmem:[%s5242_s24 + $0x98] sm:$0xff] }
  0xdf   : > { %2417 = vmatprep.mubr.bf16.mxu1 %v4249_v31  ;;  %2995 = vmatprep.mubr.bf16.mxu0 %v4253_v32  ;;  %v4313_v31 = vcombine.high %v394_v25, %v398_v26  ;;  %v4317_v32 = vcombine.high %v396_v27, %v400_v28  ;;  %v199_v18 = vld [vmem:[%s5242_s24 + $0xa8] sm:$0xff]  ;;  %v201_v20 = vld [vmem:[%s5242_s24 + $0xb8] sm:$0xff] }
  0xe6   : > { %2418 = vmatmul.mubr.bf16.gmra.mrb[76].mxu1 %v4248_v37  ;;  %2996 = vmatmul.mubr.bf16.gmra.mrb[76].mxu0 %v4252_v38  ;;  %v4312_v37 = vcombine.low %v394_v25, %v398_v26  ;;  %v4316_v38 = vcombine.low %v396_v27, %v400_v28  ;;  %v203_v25 = vld [vmem:[%s5242_s24 + $0xc8] sm:$0xff]  ;;  %v205_v27 = vld [vmem:[%s5242_s24 + $0xd8] sm:$0xff] }
  0xe7   : > { %2425 = vmatprep.mubr.bf16.mxu1 %v4257_v39  ;;  %3003 = vmatprep.mubr.bf16.mxu0 %v4261_v40  ;;  %v4321_v39 = vcombine.high %v402_v33, %v406_v34  ;;  %v4325_v40 = vcombine.high %v404_v35, %v408_v36  ;;  %v207_v26 = vld [vmem:[%s5242_s24 + $0xe8] sm:$0xff]  ;;  %v209_v28 = vld [vmem:[%s5242_s24 + $0xf8] sm:$0xff] }
  0xee   : > { %2426 = vmatmul.mubr.bf16.gmra.mrb[80].mxu1 %v4256_v45  ;;  %3004 = vmatmul.mubr.bf16.gmra.mrb[80].mxu0 %v4260_v46  ;;  %v4320_v45 = vcombine.low %v402_v33, %v406_v34  ;;  %v4324_v46 = vcombine.low %v404_v35, %v408_v36  ;;  %v211_v33 = vld [vmem:[%s5242_s24 + $0x108] sm:$0xff]  ;;  %v213_v35 = vld [vmem:[%s5242_s24 + $0x118] sm:$0xff] }
  0xef   : > { %2433 = vmatprep.mubr.bf16.mxu1 %v4265_v47  ;;  %3011 = vmatprep.mubr.bf16.mxu0 %v4269_v48  ;;  %v4329_v47 = vcombine.high %v410_v41, %v414_v42  ;;  %v4333_v48 = vcombine.high %v412_v43, %v416_v44  ;;  %v215_v34 = vld [vmem:[%s5242_s24 + $0x128] sm:$0xff]  ;;  %v217_v36 = vld [vmem:[%s5242_s24 + $0x138] sm:$0xff] }
  0xf6   : > { %2434 = vmatmul.mubr.bf16.gmra.mrb[84].mxu1 %v4264_v53  ;;  %3012 = vmatmul.mubr.bf16.gmra.mrb[84].mxu0 %v4268_v54  ;;  %v4328_v53 = vcombine.low %v410_v41, %v414_v42  ;;  %v4332_v54 = vcombine.low %v412_v43, %v416_v44  ;;  %v219_v41 = vld [vmem:[%s5242_s24 + $0x148] sm:$0xff]  ;;  %v221_v43 = vld [vmem:[%s5242_s24 + $0x158] sm:$0xff] }
  0xf7   : > { %2441 = vmatprep.mubr.bf16.mxu1 %v4273_v55  ;;  %3019 = vmatprep.mubr.bf16.mxu0 %v4277_v56  ;;  %v4337_v55 = vcombine.high %v418_v49, %v422_v50  ;;  %v4341_v56 = vcombine.high %v420_v51, %v424_v52  ;;  %v223_v42 = vld [vmem:[%s5242_s24 + $0x168] sm:$0xff]  ;;  %v225_v44 = vld [vmem:[%s5242_s24 + $0x178] sm:$0xff] }
  0xfe   : > { %2442 = vmatmul.mubr.bf16.gmra.mrb[88].mxu1 %v4272_v61  ;;  %3020 = vmatmul.mubr.bf16.gmra.mrb[88].mxu0 %v4276_v62  ;;  %v4336_v61 = vcombine.low %v418_v49, %v422_v50  ;;  %v4340_v62 = vcombine.low %v420_v51, %v424_v52  ;;  %v227_v49 = vld [vmem:[%s5242_s24 + $0x188] sm:$0xff]  ;;  %v229_v51 = vld [vmem:[%s5242_s24 + $0x198] sm:$0xff] }
  0xff   : > { %2449 = vmatprep.mubr.bf16.mxu1 %v4281_v1  ;;  %3027 = vmatprep.mubr.bf16.mxu0 %v4285_v63  ;;  %v4345_v1 = vcombine.high %v426_v57, %v430_v58  ;;  %v4349_v63 = vcombine.high %v428_v59, %v432_v60  ;;  %v231_v50 = vld [vmem:[%s5242_s24 + $0x1a8] sm:$0xff]  ;;  %v233_v52 = vld [vmem:[%s5242_s24 + $0x1b8] sm:$0xff] }
 0x106   : > { %2450 = vmatmul.mubr.bf16.gmra.mrb[92].mxu1 %v4280_v5  ;;  %3028 = vmatmul.mubr.bf16.gmra.mrb[92].mxu0 %v4284_v6  ;;  %v4344_v5 = vcombine.low %v426_v57, %v430_v58  ;;  %v4348_v6 = vcombine.low %v428_v59, %v432_v60  ;;  %v235_v57 = vld [vmem:[%s5242_s24 + $0x1c8] sm:$0xff]  ;;  %v237_v59 = vld [vmem:[%s5242_s24 + $0x1d8] sm:$0xff] }
 0x107   : > { %2457 = vmatprep.mubr.bf16.mxu1 %v4289_v7  ;;  %3035 = vmatprep.mubr.bf16.mxu0 %v4293_v8  ;;  %v4099_v7 = vcombine.high %v179_v0, %v183_v2  ;;  %v4103_v8 = vcombine.high %v181_v3, %v185_v4  ;;  %v239_v58 = vld [vmem:[%s5242_s24 + $0x1e8] sm:$0xff]  ;;  %v241_v60 = vld [vmem:[%s5242_s24 + $0x1f8] sm:$0xff] }
 0x10e   : > { %2458 = vmatmul.mubr.bf16.gmra.mrb[96].mxu1 %v4288_v13  ;;  %3036 = vmatmul.mubr.bf16.gmra.mrb[96].mxu0 %v4292_v14  ;;  %v4098_v13 = vcombine.low %v179_v0, %v183_v2  ;;  %v4102_v14 = vcombine.low %v181_v3, %v185_v4  ;;  %v243_v0 = vld [vmem:[%s5242_s24 + $0x208] sm:$0xff]  ;;  %v245_v3 = vld [vmem:[%s5242_s24 + $0x218] sm:$0xff] }
 0x10f   : > { %2465 = vmatprep.mubr.bf16.mxu1 %v4297_v15  ;;  %3043 = vmatprep.mubr.bf16.mxu0 %v4301_v16  ;;  %v4107_v15 = vcombine.high %v187_v9, %v191_v10  ;;  %v4111_v16 = vcombine.high %v189_v11, %v193_v12  ;;  %v247_v2 = vld [vmem:[%s5242_s24 + $0x228] sm:$0xff]  ;;  %v249_v4 = vld [vmem:[%s5242_s24 + $0x238] sm:$0xff] }
 0x116   : > { %2466 = vmatmul.mubr.bf16.gmra.mrb[100].mxu1 %v4296_v21  ;;  %3044 = vmatmul.mubr.bf16.gmra.mrb[100].mxu0 %v4300_v22  ;;  %v4106_v21 = vcombine.low %v187_v9, %v191_v10  ;;  %v4110_v22 = vcombine.low %v189_v11, %v193_v12  ;;  %v251_v9 = vld [vmem:[%s5242_s24 + $0x248] sm:$0xff]  ;;  %v253_v11 = vld [vmem:[%s5242_s24 + $0x258] sm:$0xff] }
 0x117   : > { %2473 = vmatprep.mubr.bf16.mxu1 %v4305_v23  ;;  %3051 = vmatprep.mubr.bf16.mxu0 %v4309_v24  ;;  %v4115_v23 = vcombine.high %v195_v17, %v199_v18  ;;  %v4119_v24 = vcombine.high %v197_v19, %v201_v20  ;;  %v255_v10 = vld [vmem:[%s5242_s24 + $0x268] sm:$0xff]  ;;  %v257_v12 = vld [vmem:[%s5242_s24 + $0x278] sm:$0xff] }
 0x11e   : > { %2474 = vmatmul.mubr.bf16.gmra.mrb[104].mxu1 %v4304_v29  ;;  %3052 = vmatmul.mubr.bf16.gmra.mrb[104].mxu0 %v4308_v30  ;;  %v4114_v29 = vcombine.low %v195_v17, %v199_v18  ;;  %v4118_v30 = vcombine.low %v197_v19, %v201_v20  ;;  %v259_v17 = vld [vmem:[%s5242_s24 + $0x288] sm:$0xff]  ;;  %v261_v19 = vld [vmem:[%s5242_s24 + $0x298] sm:$0xff] }
 0x11f   : > { %2481 = vmatprep.mubr.bf16.mxu1 %v4313_v31  ;;  %3059 = vmatprep.mubr.bf16.mxu0 %v4317_v32  ;;  %v4123_v31 = vcombine.high %v203_v25, %v207_v26  ;;  %v4127_v32 = vcombine.high %v205_v27, %v209_v28  ;;  %v263_v18 = vld [vmem:[%s5242_s24 + $0x2a8] sm:$0xff]  ;;  %v265_v20 = vld [vmem:[%s5242_s24 + $0x2b8] sm:$0xff] }
 0x126   : > { %2482 = vmatmul.mubr.bf16.gmra.mrb[108].mxu1 %v4312_v37  ;;  %3060 = vmatmul.mubr.bf16.gmra.mrb[108].mxu0 %v4316_v38  ;;  %v4122_v37 = vcombine.low %v203_v25, %v207_v26  ;;  %v4126_v38 = vcombine.low %v205_v27, %v209_v28  ;;  %v267_v25 = vld [vmem:[%s5242_s24 + $0x2c8] sm:$0xff]  ;;  %v269_v27 = vld [vmem:[%s5242_s24 + $0x2d8] sm:$0xff] }
 0x127   : > { %2489 = vmatprep.mubr.bf16.mxu1 %v4321_v39  ;;  %3067 = vmatprep.mubr.bf16.mxu0 %v4325_v40  ;;  %v4131_v39 = vcombine.high %v211_v33, %v215_v34  ;;  %v4135_v40 = vcombine.high %v213_v35, %v217_v36  ;;  %v271_v26 = vld [vmem:[%s5242_s24 + $0x2e8] sm:$0xff]  ;;  %v273_v28 = vld [vmem:[%s5242_s24 + $0x2f8] sm:$0xff] }
 0x12e   : > { %2490 = vmatmul.mubr.bf16.gmra.mrb[112].mxu1 %v4320_v45  ;;  %3068 = vmatmul.mubr.bf16.gmra.mrb[112].mxu0 %v4324_v46  ;;  %v4130_v45 = vcombine.low %v211_v33, %v215_v34  ;;  %v4134_v46 = vcombine.low %v213_v35, %v217_v36  ;;  %v275_v33 = vld [vmem:[%s5242_s24 + $0x308] sm:$0xff]  ;;  %v277_v35 = vld [vmem:[%s5242_s24 + $0x318] sm:$0xff] }
 0x12f   : > { %2497 = vmatprep.mubr.bf16.mxu1 %v4329_v47  ;;  %3075 = vmatprep.mubr.bf16.mxu0 %v4333_v48  ;;  %v4139_v47 = vcombine.high %v219_v41, %v223_v42  ;;  %v4143_v48 = vcombine.high %v221_v43, %v225_v44  ;;  %v279_v34 = vld [vmem:[%s5242_s24 + $0x328] sm:$0xff]  ;;  %v281_v36 = vld [vmem:[%s5242_s24 + $0x338] sm:$0xff] }
 0x136   : > { %2498 = vmatmul.mubr.bf16.gmra.mrb[116].mxu1 %v4328_v53  ;;  %3076 = vmatmul.mubr.bf16.gmra.mrb[116].mxu0 %v4332_v54  ;;  %v4138_v53 = vcombine.low %v219_v41, %v223_v42  ;;  %v4142_v54 = vcombine.low %v221_v43, %v225_v44  ;;  %v283_v41 = vld [vmem:[%s5242_s24 + $0x348] sm:$0xff]  ;;  %v285_v43 = vld [vmem:[%s5242_s24 + $0x358] sm:$0xff] }
 0x137   : > { %2505 = vmatprep.mubr.bf16.mxu1 %v4337_v55  ;;  %3083 = vmatprep.mubr.bf16.mxu0 %v4341_v56  ;;  %v4147_v55 = vcombine.high %v227_v49, %v231_v50  ;;  %v4151_v56 = vcombine.high %v229_v51, %v233_v52  ;;  %v287_v42 = vld [vmem:[%s5242_s24 + $0x368] sm:$0xff]  ;;  %v289_v44 = vld [vmem:[%s5242_s24 + $0x378] sm:$0xff] }
 0x13e   : > { %2506 = vmatmul.mubr.bf16.gmra.mrb[120].mxu1 %v4336_v61  ;;  %3084 = vmatmul.mubr.bf16.gmra.mrb[120].mxu0 %v4340_v62  ;;  %v4146_v61 = vcombine.low %v227_v49, %v231_v50  ;;  %v4150_v62 = vcombine.low %v229_v51, %v233_v52  ;;  %v291_v49 = vld [vmem:[%s5242_s24 + $0x388] sm:$0xff]  ;;  %v293_v51 = vld [vmem:[%s5242_s24 + $0x398] sm:$0xff] }
 0x13f   : > { %2513 = vmatprep.mubr.bf16.mxu1 %v4345_v1  ;;  %3091 = vmatprep.mubr.bf16.mxu0 %v4349_v63  ;;  %v4155_v1 = vcombine.high %v235_v57, %v239_v58  ;;  %v4159_v63 = vcombine.high %v237_v59, %v241_v60  ;;  %v295_v50 = vld [vmem:[%s5242_s24 + $0x3a8] sm:$0xff]  ;;  %v297_v52 = vld [vmem:[%s5242_s24 + $0x3b8] sm:$0xff] }
 0x146   : > { %2514 = vmatmul.mubr.bf16.gmra.mrb[124].mxu1 %v4344_v5  ;;  %3092 = vmatmul.mubr.bf16.gmra.mrb[124].mxu0 %v4348_v6  ;;  %v4154_v5 = vcombine.low %v235_v57, %v239_v58  ;;  %v4158_v6 = vcombine.low %v237_v59, %v241_v60  ;;  %v299_v57 = vld [vmem:[%s5242_s24 + $0x3c8] sm:$0xff]  ;;  %v301_v59 = vld [vmem:[%s5242_s24 + $0x3d8] sm:$0xff] }
 0x147   : > { %2554 = vmatprep.mubr.bf16.mxu1 %v4099_v7  ;;  %3132 = vmatprep.mubr.bf16.mxu0 %v4103_v8  ;;  %v4163_v7 = vcombine.high %v243_v0, %v247_v2  ;;  %v4167_v8 = vcombine.high %v245_v3, %v249_v4  ;;  %v303_v58 = vld [vmem:[%s5242_s24 + $0x3e8] sm:$0xff]  ;;  %v305_v60 = vld [vmem:[%s5242_s24 + $0x3f8] sm:$0xff] }
 0x14e   : > { %2555 = vmatmul.mubr.bf16.vlgmr.msra.gmra.mrb[0].mxu1 %v4098_v13  ;;  %3133 = vmatmul.mubr.bf16.vlgmr.msra.gmra.mrb[0].mxu0 %v4102_v14  ;;  %v4162_v13 = vcombine.low %v243_v0, %v247_v2  ;;  %v4166_v14 = vcombine.low %v245_v3, %v249_v4  ;;  %v307_v0 = vld [vmem:[%s5242_s24 + $0x408] sm:$0xff]  ;;  %v309_v3 = vld [vmem:[%s5242_s24 + $0x418] sm:$0xff] }
 0x14f   : > { %2562 = vmatprep.mubr.bf16.mxu1 %v4107_v15  ;;  %3140 = vmatprep.mubr.bf16.mxu0 %v4111_v16  ;;  %v4171_v15 = vcombine.high %v251_v9, %v255_v10  ;;  %v4175_v16 = vcombine.high %v253_v11, %v257_v12  ;;  %v311_v2 = vld [vmem:[%s5242_s24 + $0x428] sm:$0xff]  ;;  %v313_v4 = vld [vmem:[%s5242_s24 + $0x438] sm:$0xff] }
 0x156   : > { %2563 = vmatmul.mubr.bf16.gmra.mrb[4].mxu1 %v4106_v21  ;;  %3141 = vmatmul.mubr.bf16.gmra.mrb[4].mxu0 %v4110_v22  ;;  %v4170_v21 = vcombine.low %v251_v9, %v255_v10  ;;  %v4174_v22 = vcombine.low %v253_v11, %v257_v12  ;;  %v315_v9 = vld [vmem:[%s5242_s24 + $0x448] sm:$0xff]  ;;  %v317_v11 = vld [vmem:[%s5242_s24 + $0x458] sm:$0xff] }
 0x157   : > { %2570 = vmatprep.mubr.bf16.mxu1 %v4115_v23  ;;  %3148 = vmatprep.mubr.bf16.mxu0 %v4119_v24  ;;  %v4179_v23 = vcombine.high %v259_v17, %v263_v18  ;;  %v4183_v24 = vcombine.high %v261_v19, %v265_v20  ;;  %v319_v10 = vld [vmem:[%s5242_s24 + $0x468] sm:$0xff]  ;;  %v321_v12 = vld [vmem:[%s5242_s24 + $0x478] sm:$0xff] }
 0x15e   : > { %2571 = vmatmul.mubr.bf16.gmra.mrb[8].mxu1 %v4114_v29  ;;  %3149 = vmatmul.mubr.bf16.gmra.mrb[8].mxu0 %v4118_v30  ;;  %v4178_v29 = vcombine.low %v259_v17, %v263_v18  ;;  %v4182_v30 = vcombine.low %v261_v19, %v265_v20  ;;  %v323_v17 = vld [vmem:[%s5242_s24 + $0x488] sm:$0xff]  ;;  %v325_v19 = vld [vmem:[%s5242_s24 + $0x498] sm:$0xff] }
 0x15f   : > { %2578 = vmatprep.mubr.bf16.mxu1 %v4123_v31  ;;  %3156 = vmatprep.mubr.bf16.mxu0 %v4127_v32  ;;  %v4187_v31 = vcombine.high %v267_v25, %v271_v26  ;;  %v4191_v32 = vcombine.high %v269_v27, %v273_v28  ;;  %v327_v18 = vld [vmem:[%s5242_s24 + $0x4a8] sm:$0xff]  ;;  %v329_v20 = vld [vmem:[%s5242_s24 + $0x4b8] sm:$0xff] }
 0x166   : > { %2579 = vmatmul.mubr.bf16.gmra.mrb[12].mxu1 %v4122_v37  ;;  %3157 = vmatmul.mubr.bf16.gmra.mrb[12].mxu0 %v4126_v38  ;;  %v4186_v37 = vcombine.low %v267_v25, %v271_v26  ;;  %v4190_v38 = vcombine.low %v269_v27, %v273_v28  ;;  %v331_v25 = vld [vmem:[%s5242_s24 + $0x4c8] sm:$0xff]  ;;  %v333_v27 = vld [vmem:[%s5242_s24 + $0x4d8] sm:$0xff] }
 0x167   : > { %2586 = vmatprep.mubr.bf16.mxu1 %v4131_v39  ;;  %3164 = vmatprep.mubr.bf16.mxu0 %v4135_v40  ;;  %v4195_v39 = vcombine.high %v275_v33, %v279_v34  ;;  %v4199_v40 = vcombine.high %v277_v35, %v281_v36  ;;  %v335_v26 = vld [vmem:[%s5242_s24 + $0x4e8] sm:$0xff]  ;;  %v337_v28 = vld [vmem:[%s5242_s24 + $0x4f8] sm:$0xff] }
 0x16e   : > { %2587 = vmatmul.mubr.bf16.gmra.mrb[16].mxu1 %v4130_v45  ;;  %3165 = vmatmul.mubr.bf16.gmra.mrb[16].mxu0 %v4134_v46  ;;  %v4194_v45 = vcombine.low %v275_v33, %v279_v34  ;;  %v4198_v46 = vcombine.low %v277_v35, %v281_v36  ;;  %v339_v33 = vld [vmem:[%s5242_s24 + $0x508] sm:$0xff]  ;;  %v341_v35 = vld [vmem:[%s5242_s24 + $0x518] sm:$0xff] }
 0x16f   : > { %2594 = vmatprep.mubr.bf16.mxu1 %v4139_v47  ;;  %3172 = vmatprep.mubr.bf16.mxu0 %v4143_v48  ;;  %v4203_v47 = vcombine.high %v283_v41, %v287_v42  ;;  %v4207_v48 = vcombine.high %v285_v43, %v289_v44  ;;  %v343_v34 = vld [vmem:[%s5242_s24 + $0x528] sm:$0xff]  ;;  %v345_v36 = vld [vmem:[%s5242_s24 + $0x538] sm:$0xff] }
 0x176   : > { %2595 = vmatmul.mubr.bf16.gmra.mrb[20].mxu1 %v4138_v53  ;;  %3173 = vmatmul.mubr.bf16.gmra.mrb[20].mxu0 %v4142_v54  ;;  %v4202_v53 = vcombine.low %v283_v41, %v287_v42  ;;  %v4206_v54 = vcombine.low %v285_v43, %v289_v44  ;;  %v347_v41 = vld [vmem:[%s5242_s24 + $0x548] sm:$0xff]  ;;  %v349_v43 = vld [vmem:[%s5242_s24 + $0x558] sm:$0xff] }
 0x177   : > { %2602 = vmatprep.mubr.bf16.mxu1 %v4147_v55  ;;  %3180 = vmatprep.mubr.bf16.mxu0 %v4151_v56  ;;  %v4211_v55 = vcombine.high %v291_v49, %v295_v50  ;;  %v4215_v56 = vcombine.high %v293_v51, %v297_v52  ;;  %v351_v42 = vld [vmem:[%s5242_s24 + $0x568] sm:$0xff]  ;;  %v353_v44 = vld [vmem:[%s5242_s24 + $0x578] sm:$0xff] }
 0x17e   : > { %2603 = vmatmul.mubr.bf16.gmra.mrb[24].mxu1 %v4146_v61  ;;  %3181 = vmatmul.mubr.bf16.gmra.mrb[24].mxu0 %v4150_v62  ;;  %v4210_v61 = vcombine.low %v291_v49, %v295_v50  ;;  %v4214_v62 = vcombine.low %v293_v51, %v297_v52  ;;  %v355_v49 = vld [vmem:[%s5242_s24 + $0x588] sm:$0xff]  ;;  %v357_v51 = vld [vmem:[%s5242_s24 + $0x598] sm:$0xff] }
 0x17f   : > { %2610 = vmatprep.mubr.bf16.mxu1 %v4155_v1  ;;  %3188 = vmatprep.mubr.bf16.mxu0 %v4159_v63  ;;  %v4219_v1 = vcombine.high %v299_v57, %v303_v58  ;;  %v4223_v63 = vcombine.high %v301_v59, %v305_v60  ;;  %v359_v50 = vld [vmem:[%s5242_s24 + $0x5a8] sm:$0xff]  ;;  %v361_v52 = vld [vmem:[%s5242_s24 + $0x5b8] sm:$0xff] }
 0x186   : > { %2611 = vmatmul.mubr.bf16.gmra.mrb[28].mxu1 %v4154_v5  ;;  %3189 = vmatmul.mubr.bf16.gmra.mrb[28].mxu0 %v4158_v6  ;;  %v4218_v5 = vcombine.low %v299_v57, %v303_v58  ;;  %v4222_v6 = vcombine.low %v301_v59, %v305_v60  ;;  %v363_v57 = vld [vmem:[%s5242_s24 + $0x5c8] sm:$0xff]  ;;  %v365_v59 = vld [vmem:[%s5242_s24 + $0x5d8] sm:$0xff] }
 0x187   : > { %2618 = vmatprep.mubr.bf16.mxu1 %v4163_v7  ;;  %3196 = vmatprep.mubr.bf16.mxu0 %v4167_v8  ;;  %v4227_v7 = vcombine.high %v307_v0, %v311_v2  ;;  %v4231_v8 = vcombine.high %v309_v3, %v313_v4  ;;  %v367_v58 = vld [vmem:[%s5242_s24 + $0x5e8] sm:$0xff]  ;;  %v369_v60 = vld [vmem:[%s5242_s24 + $0x5f8] sm:$0xff] }
 0x18e   : > { %2619 = vmatmul.mubr.bf16.gmra.mrb[32].mxu1 %v4162_v13  ;;  %3197 = vmatmul.mubr.bf16.gmra.mrb[32].mxu0 %v4166_v14  ;;  %v4226_v13 = vcombine.low %v307_v0, %v311_v2  ;;  %v4230_v14 = vcombine.low %v309_v3, %v313_v4  ;;  %v371_v0 = vld [vmem:[%s5242_s24 + $0x608] sm:$0xff]  ;;  %v373_v3 = vld [vmem:[%s5242_s24 + $0x618] sm:$0xff] }
 0x18f   : > { %2626 = vmatprep.mubr.bf16.mxu1 %v4171_v15  ;;  %3204 = vmatprep.mubr.bf16.mxu0 %v4175_v16  ;;  %v4235_v15 = vcombine.high %v315_v9, %v319_v10  ;;  %v4239_v16 = vcombine.high %v317_v11, %v321_v12  ;;  %v375_v2 = vld [vmem:[%s5242_s24 + $0x628] sm:$0xff]  ;;  %v377_v4 = vld [vmem:[%s5242_s24 + $0x638] sm:$0xff] }
 0x196   : > { %2627 = vmatmul.mubr.bf16.gmra.mrb[36].mxu1 %v4170_v21  ;;  %3205 = vmatmul.mubr.bf16.gmra.mrb[36].mxu0 %v4174_v22  ;;  %v4234_v21 = vcombine.low %v315_v9, %v319_v10  ;;  %v4238_v22 = vcombine.low %v317_v11, %v321_v12  ;;  %v379_v9 = vld [vmem:[%s5242_s24 + $0x648] sm:$0xff]  ;;  %v381_v11 = vld [vmem:[%s5242_s24 + $0x658] sm:$0xff] }
 0x197   : > { %2634 = vmatprep.mubr.bf16.mxu1 %v4179_v23  ;;  %3212 = vmatprep.mubr.bf16.mxu0 %v4183_v24  ;;  %v4243_v23 = vcombine.high %v323_v17, %v327_v18  ;;  %v4247_v24 = vcombine.high %v325_v19, %v329_v20  ;;  %v383_v10 = vld [vmem:[%s5242_s24 + $0x668] sm:$0xff]  ;;  %v385_v12 = vld [vmem:[%s5242_s24 + $0x678] sm:$0xff] }
 0x19e   : > { %2635 = vmatmul.mubr.bf16.gmra.mrb[40].mxu1 %v4178_v29  ;;  %3213 = vmatmul.mubr.bf16.gmra.mrb[40].mxu0 %v4182_v30  ;;  %v4242_v29 = vcombine.low %v323_v17, %v327_v18  ;;  %v4246_v30 = vcombine.low %v325_v19, %v329_v20  ;;  %v387_v17 = vld [vmem:[%s5242_s24 + $0x688] sm:$0xff]  ;;  %v389_v19 = vld [vmem:[%s5242_s24 + $0x698] sm:$0xff] }
 0x19f   : > { %2642 = vmatprep.mubr.bf16.mxu1 %v4187_v31  ;;  %3220 = vmatprep.mubr.bf16.mxu0 %v4191_v32  ;;  %v4251_v31 = vcombine.high %v331_v25, %v335_v26  ;;  %v4255_v32 = vcombine.high %v333_v27, %v337_v28  ;;  %v391_v18 = vld [vmem:[%s5242_s24 + $0x6a8] sm:$0xff]  ;;  %v393_v20 = vld [vmem:[%s5242_s24 + $0x6b8] sm:$0xff] }
 0x1a6   : > { %2643 = vmatmul.mubr.bf16.gmra.mrb[44].mxu1 %v4186_v37  ;;  %3221 = vmatmul.mubr.bf16.gmra.mrb[44].mxu0 %v4190_v38  ;;  %v4250_v37 = vcombine.low %v331_v25, %v335_v26  ;;  %v4254_v38 = vcombine.low %v333_v27, %v337_v28  ;;  %v395_v25 = vld [vmem:[%s5242_s24 + $0x6c8] sm:$0xff]  ;;  %v397_v27 = vld [vmem:[%s5242_s24 + $0x6d8] sm:$0xff] }
 0x1a7   : > { %2650 = vmatprep.mubr.bf16.mxu1 %v4195_v39  ;;  %3228 = vmatprep.mubr.bf16.mxu0 %v4199_v40  ;;  %v4259_v39 = vcombine.high %v339_v33, %v343_v34  ;;  %v4263_v40 = vcombine.high %v341_v35, %v345_v36  ;;  %v399_v26 = vld [vmem:[%s5242_s24 + $0x6e8] sm:$0xff]  ;;  %v401_v28 = vld [vmem:[%s5242_s24 + $0x6f8] sm:$0xff] }
 0x1ae   : > { %2651 = vmatmul.mubr.bf16.gmra.mrb[48].mxu1 %v4194_v45  ;;  %3229 = vmatmul.mubr.bf16.gmra.mrb[48].mxu0 %v4198_v46  ;;  %v4258_v45 = vcombine.low %v339_v33, %v343_v34  ;;  %v4262_v46 = vcombine.low %v341_v35, %v345_v36  ;;  %v5695_v33 = vld [vmem:[%s6369_s2] ss:$0 sm:$0xff]  ;;  %v403_v34 = vld [vmem:[%s5242_s24 + $0x708] sm:$0xff] }
 0x1af   : > { %2658 = vmatprep.mubr.bf16.mxu1 %v4203_v47  ;;  %3236 = vmatprep.mubr.bf16.mxu0 %v4207_v48  ;;  %v4267_v47 = vcombine.high %v347_v41, %v351_v42  ;;  %v4271_v48 = vcombine.high %v349_v43, %v353_v44  ;;  %v407_v35 = vld [vmem:[%s5242_s24 + $0x728] sm:$0xff] }
 0x1b6   : > { %2659 = vmatmul.mubr.bf16.gmra.mrb[52].mxu1 %v4202_v53  ;;  %3237 = vmatmul.mubr.bf16.gmra.mrb[52].mxu0 %v4206_v54  ;;  %v4266_v53 = vcombine.low %v347_v41, %v351_v42  ;;  %v4270_v54 = vcombine.low %v349_v43, %v353_v44  ;;  %v4314_v42 = vcombine.low %v395_v25, %v399_v26 }
 0x1b7   : > { %2666 = vmatprep.mubr.bf16.mxu1 %v4211_v55  ;;  %3244 = vmatprep.mubr.bf16.mxu0 %v4215_v56  ;;  %v4275_v55 = vcombine.high %v355_v49, %v359_v50  ;;  %v4279_v56 = vcombine.high %v357_v51, %v361_v52 }
 0x1be   : > { %2667 = vmatmul.mubr.bf16.gmra.mrb[56].mxu1 %v4210_v61  ;;  %3245 = vmatmul.mubr.bf16.gmra.mrb[56].mxu0 %v4214_v62  ;;  %v4274_v61 = vcombine.low %v355_v49, %v359_v50  ;;  %v4278_v62 = vcombine.low %v357_v51, %v361_v52 }
 0x1bf   : > { %2674 = vmatprep.mubr.bf16.mxu1 %v4219_v1  ;;  %3252 = vmatprep.mubr.bf16.mxu0 %v4223_v63  ;;  %v4283_v1 = vcombine.high %v363_v57, %v367_v58  ;;  %v4287_v63 = vcombine.high %v365_v59, %v369_v60 }
 0x1c6   : > { %2675 = vmatmul.mubr.bf16.gmra.mrb[60].mxu1 %v4218_v5  ;;  %3253 = vmatmul.mubr.bf16.gmra.mrb[60].mxu0 %v4222_v6  ;;  %v4282_v5 = vcombine.low %v363_v57, %v367_v58  ;;  %v4286_v6 = vcombine.low %v365_v59, %v369_v60  ;;  %v413_v57 = vld [vmem:[%s5242_s24 + $0x758] sm:$0xff] }
 0x1c7   : > { %2682 = vmatprep.mubr.bf16.mxu1 %v4227_v7  ;;  %3260 = vmatprep.mubr.bf16.mxu0 %v4231_v8  ;;  %v4291_v7 = vcombine.high %v371_v0, %v375_v2  ;;  %v4295_v8 = vcombine.high %v373_v3, %v377_v4  ;;  %v417_v58 = vld [vmem:[%s5242_s24 + $0x778] sm:$0xff] }
 0x1ce   : > { %2683 = vmatmul.mubr.bf16.gmra.mrb[64].mxu1 %v4226_v13  ;;  %3261 = vmatmul.mubr.bf16.gmra.mrb[64].mxu0 %v4230_v14  ;;  %v4290_v13 = vcombine.low %v371_v0, %v375_v2  ;;  %v4294_v14 = vcombine.low %v373_v3, %v377_v4 }
 0x1cf   : > { %2690 = vmatprep.mubr.bf16.mxu1 %v4235_v15  ;;  %3268 = vmatprep.mubr.bf16.mxu0 %v4239_v16  ;;  %v4299_v15 = vcombine.high %v379_v9, %v383_v10  ;;  %v4303_v16 = vcombine.high %v381_v11, %v385_v12 }
 0x1d6   : > { %2691 = vmatmul.mubr.bf16.gmra.mrb[68].mxu1 %v4234_v21  ;;  %3269 = vmatmul.mubr.bf16.gmra.mrb[68].mxu0 %v4238_v22  ;;  %v4298_v21 = vcombine.low %v379_v9, %v383_v10  ;;  %v4302_v22 = vcombine.low %v381_v11, %v385_v12  ;;  %v419_v10 = vld [vmem:[%s5242_s24 + $0x788] sm:$0xff] }
 0x1d7   : > { %2698 = vmatprep.mubr.bf16.mxu1 %v4243_v23  ;;  %3276 = vmatprep.mubr.bf16.mxu0 %v4247_v24  ;;  %v4307_v23 = vcombine.high %v387_v17, %v391_v18  ;;  %v4311_v24 = vcombine.high %v389_v19, %v393_v20  ;;  %v423_v11 = vld [vmem:[%s5242_s24 + $0x7a8] sm:$0xff] }
 0x1de   : > { %2699 = vmatmul.mubr.bf16.gmra.mrb[72].mxu1 %v4242_v29  ;;  %3277 = vmatmul.mubr.bf16.gmra.mrb[72].mxu0 %v4246_v30  ;;  %v4306_v29 = vcombine.low %v387_v17, %v391_v18  ;;  %v4310_v30 = vcombine.low %v389_v19, %v393_v20 }
 0x1df   : > { %2706 = vmatprep.mubr.bf16.mxu1 %v4251_v31  ;;  %3284 = vmatprep.mubr.bf16.mxu0 %v4255_v32  ;;  %v4315_v31 = vcombine.high %v395_v25, %v399_v26  ;;  %v4319_v32 = vcombine.high %v397_v27, %v401_v28 }
 0x1e6   : > { %2707 = vmatmul.mubr.bf16.gmra.mrb[76].mxu1 %v4250_v37  ;;  %3285 = vmatmul.mubr.bf16.gmra.mrb[76].mxu0 %v4254_v38  ;;  %v405_v37 = vld [vmem:[%s5242_s24 + $0x718] sm:$0xff] }
 0x1e7   : > { %2714 = vmatprep.mubr.bf16.mxu1 %v4259_v39  ;;  %3292 = vmatprep.mubr.bf16.mxu0 %v4263_v40  ;;  %v409_v38 = vld [vmem:[%s5242_s24 + $0x738] sm:$0xff] }
 0x1e8   : > { %v4327_v51 = vcombine.high %v405_v37, %v409_v38  ;;  %v4326_v0 = vcombine.low %v405_v37, %v409_v38 }
 0x1ee   : > { %2715 = vmatmul.mubr.bf16.gmra.mrb[80].mxu1 %v4258_v45  ;;  %3293 = vmatmul.mubr.bf16.gmra.mrb[80].mxu0 %v4262_v46  ;;  %v4318_v45 = vcombine.low %v397_v27, %v401_v28  ;;  %v4323_v46 = vcombine.high %v403_v34, %v407_v35 }
 0x1ef   : > { %2722 = vmatprep.mubr.bf16.mxu1 %v4267_v47  ;;  %3300 = vmatprep.mubr.bf16.mxu0 %v4271_v48 }
 0x1f6   : > { %2723 = vmatmul.mubr.bf16.gmra.mrb[84].mxu1 %v4266_v53  ;;  %3301 = vmatmul.mubr.bf16.gmra.mrb[84].mxu0 %v4270_v54  ;;  %v411_v54 = vld [vmem:[%s5242_s24 + $0x748] sm:$0xff] }
 0x1f7   : > { %2730 = vmatprep.mubr.bf16.mxu1 %v4275_v55  ;;  %3308 = vmatprep.mubr.bf16.mxu0 %v4279_v56  ;;  %v415_v55 = vld [vmem:[%s5242_s24 + $0x768] sm:$0xff] }
 0x1f8   : > { %v4331_v2 = vcombine.high %v411_v54, %v415_v55  ;;  %v4330_v18 = vcombine.low %v411_v54, %v415_v55 }
 0x1fe   : > { %2731 = vmatmul.mubr.bf16.gmra.mrb[88].mxu1 %v4274_v61  ;;  %3309 = vmatmul.mubr.bf16.gmra.mrb[88].mxu0 %v4278_v62  ;;  %v4322_v62 = vcombine.low %v403_v34, %v407_v35  ;;  %v429_v34 = vld [vmem:[%s5242_s24 + $0x7d8] sm:$0xff] }
 0x1ff   : > { %2738 = vmatprep.mubr.bf16.mxu1 %v4283_v1  ;;  %3316 = vmatprep.mubr.bf16.mxu0 %v4287_v63  ;;  %v433_v35 = vld [vmem:[%s5242_s24 + $0x7f8] sm:$0xff] }
 0x206   : > { %2739 = vmatmul.mubr.bf16.gmra.mrb[92].mxu1 %v4282_v5  ;;  %3317 = vmatmul.mubr.bf16.gmra.mrb[92].mxu0 %v4286_v6 }
 0x207   : > { %2746 = vmatprep.mubr.bf16.mxu1 %v4291_v7  ;;  %3324 = vmatprep.mubr.bf16.mxu0 %v4295_v8  ;;  %v4335_v7 = vcombine.high %v413_v57, %v417_v58 }
 0x20e   : > { %2747 = vmatmul.mubr.bf16.gmra.mrb[96].mxu1 %v4290_v13  ;;  %3325 = vmatmul.mubr.bf16.gmra.mrb[96].mxu0 %v4294_v14  ;;  %v421_v13 = vld [vmem:[%s5242_s24 + $0x798] sm:$0xff] }
 0x20f   : > { %2754 = vmatprep.mubr.bf16.mxu1 %v4299_v15  ;;  %3332 = vmatprep.mubr.bf16.mxu0 %v4303_v16  ;;  %v425_v14 = vld [vmem:[%s5242_s24 + $0x7b8] sm:$0xff] }
 0x210   : > { %v4343_v27 = vcombine.high %v421_v13, %v425_v14 }
 0x216   : > { %2755 = vmatmul.mubr.bf16.gmra.mrb[100].mxu1 %v4298_v21  ;;  %3333 = vmatmul.mubr.bf16.gmra.mrb[100].mxu0 %v4302_v22  ;;  %v4334_v21 = vcombine.low %v413_v57, %v417_v58  ;;  %v4339_v22 = vcombine.high %v419_v10, %v423_v11 }
 0x217   : > { %2762 = vmatprep.mubr.bf16.mxu1 %v4307_v23  ;;  %3340 = vmatprep.mubr.bf16.mxu0 %v4311_v24 }
 0x21e   : > { %2763 = vmatmul.mubr.bf16.gmra.mrb[104].mxu1 %v4306_v29  ;;  %3341 = vmatmul.mubr.bf16.gmra.mrb[104].mxu0 %v4310_v30  ;;  %v427_v30 = vld [vmem:[%s5242_s24 + $0x7c8] sm:$0xff] }
 0x21f   : > { %2770 = vmatprep.mubr.bf16.mxu1 %v4315_v31  ;;  %3348 = vmatprep.mubr.bf16.mxu0 %v4319_v32  ;;  %v431_v31 = vld [vmem:[%s5242_s24 + $0x7e8] sm:$0xff] }
 0x220   : > { %v4346_v57 = vcombine.low %v427_v30, %v431_v31 }
 0x221   : > { %v2556_v36 = vpop.f32.mrb[0].mxu1  ;;  %v3134_v40 = vpop.f32.mrb[0].mxu0 }
 0x222   : > { %v4419_v39 = vadd.f32 %v5695_v33, %v2556_v36  ;;  %v2558_v41 = vpop.f32.mrb[1].mxu1  ;;  %v3136_v43 = vpop.f32.mrb[1].mxu0 }
 0x223   : > { %v2559_v44 = vpop.f32.mrb[2].mxu1  ;;  %v3137_v49 = vpop.f32.mrb[2].mxu0  ;;  %v4347_v43 = vcombine.high %v427_v30, %v431_v31 }
 0x224   : > { %v5702_v47 = vadd.f32 %v4419_v39, %v3134_v40  ;;  %v4421_v48 = vadd.f32 %v5695_v33, %v2559_v44  ;;  %v2561_v50 = vpop.f32.mrb[3].mxu1  ;;  %v3139_v52 = vpop.f32.mrb[3].mxu0  ;;  %v4338_v39 = vcombine.low %v419_v10, %v423_v11 }
 0x226   : > { %v5705_v53 = vadd.f32 %v4421_v48, %v3137_v49  ;;  %2771 = vmatmul.mubr.bf16.gmra.mrb[108].mxu1 %v4314_v42  ;;  %3389 = vmax.xlane.f32.xlu0 %v5702_v47  ;;  %v4342_v42 = vcombine.low %v421_v13, %v425_v14  ;;  %v4351_v49 = vcombine.high %v429_v34, %v433_v35 }
 0x227   : > { %3349 = vmatmul.mubr.bf16.gmra.mrb[108].mxu0 %v4318_v45  ;;  %2778 = vmatprep.mubr.bf16.mxu1 %v4323_v46 }
 0x228   : > { %3356 = vmatprep.mubr.bf16.mxu0 %v4327_v51 }
 0x229   : > { %v2564_v56 = vpop.f32.mrb[4].mxu1  ;;  %v3142_v60 = vpop.f32.mrb[4].mxu0 }
 0x22a   : > { %v4423_v59 = vadd.f32 %v5695_v33, %v2564_v56  ;;  %3391 = vmax.xlane.f32.xlu0 %v5705_v53  ;;  %v2566_v61 = vpop.f32.mrb[5].mxu1  ;;  %v3144_v1 = vpop.f32.mrb[5].mxu0 }
 0x22b   : > { %v2567_v63 = vpop.f32.mrb[6].mxu1  ;;  %v3145_v5 = vpop.f32.mrb[6].mxu0 }
 0x22c   : > { %v5714_v3 = vadd.f32 %v4423_v59, %v3142_v60  ;;  %v4425_v4 = vadd.f32 %v5695_v33, %v2567_v63  ;;  %v2569_v6 = vpop.f32.mrb[7].mxu1  ;;  %v3147_v8 = vpop.f32.mrb[7].mxu0  ;;  %v4350_v60 = vcombine.low %v429_v34, %v433_v35 }
 0x22e   : > { %v5717_v9 = vadd.f32 %v4425_v4, %v3145_v5  ;;  %2779 = vmatmul.mubr.bf16.gmra.mrb[112].mxu1 %v4322_v62  ;;  %3393 = vmax.xlane.f32.xlu1 %v5714_v3 }
 0x22f   : > { %3357 = vmatmul.mubr.bf16.gmra.mrb[112].mxu0 %v4326_v0  ;;  %2786 = vmatprep.mubr.bf16.mxu1 %v4331_v2 }
 0x230   : > { %3364 = vmatprep.mubr.bf16.mxu0 %v4335_v7 }
 0x231   : > { %v2572_v12 = vpop.f32.mrb[8].mxu1  ;;  %v3150_v16 = vpop.f32.mrb[8].mxu0 }
 0x232   : > { %v4427_v15 = vadd.f32 %v5695_v33, %v2572_v12  ;;  %3395 = vmax.xlane.f32.xlu1 %v5717_v9  ;;  %v2574_v17 = vpop.f32.mrb[9].mxu1  ;;  %v3152_v19 = vpop.f32.mrb[9].mxu0 }
 0x233   : > { %v2575_v20 = vpop.f32.mrb[10].mxu1  ;;  %v3153_v25 = vpop.f32.mrb[10].mxu0 }
 0x234   : > { %v5726_v23 = vadd.f32 %v4427_v15, %v3150_v16  ;;  %v4429_v24 = vadd.f32 %v5695_v33, %v2575_v20  ;;  %v2577_v26 = vpop.f32.mrb[11].mxu1  ;;  %v3155_v28 = vpop.f32.mrb[11].mxu0 }
 0x236   : > { %v5729_v29 = vadd.f32 %v4429_v24, %v3153_v25  ;;  %2787 = vmatmul.mubr.bf16.gmra.mrb[116].mxu1 %v4330_v18  ;;  %3397 = vmax.xlane.f32.xlu0 %v5726_v23 }
 0x237   : > { %3365 = vmatmul.mubr.bf16.gmra.mrb[116].mxu0 %v4334_v21  ;;  %2794 = vmatprep.mubr.bf16.mxu1 %v4339_v22 }
 0x238   : > { %3399 = vmax.xlane.f32.xlu1 %v5729_v29  ;;  %3372 = vmatprep.mubr.bf16.mxu0 %v4343_v27 }
 0x239   : > { %v2580_v32 = vpop.f32.mrb[12].mxu1  ;;  %v3158_v37 = vpop.f32.mrb[12].mxu0 }
 0x23a   : > { %v4431_v36 = vadd.f32 %v5695_v33, %v2580_v32  ;;  %v2582_v38 = vpop.f32.mrb[13].mxu1  ;;  %v3160_v40 = vpop.f32.mrb[13].mxu0 }
 0x23b   : > { %v2583_v41 = vpop.f32.mrb[14].mxu1  ;;  %v3161_v46 = vpop.f32.mrb[14].mxu0 }
 0x23c   : > { %v5738_v44 = vadd.f32 %v4431_v36, %v3158_v37  ;;  %v4433_v45 = vadd.f32 %v5695_v33, %v2583_v41  ;;  %v2585_v48 = vpop.f32.mrb[15].mxu1  ;;  %v3163_v50 = vpop.f32.mrb[15].mxu0 }
 0x23e   : > { %v5741_v51 = vadd.f32 %v4433_v45, %v3161_v46  ;;  %2795 = vmatmul.mubr.bf16.gmra.mrb[120].mxu1 %v4338_v39  ;;  %3401 = vmax.xlane.f32.xlu0 %v5738_v44 }
 0x23f   : > { %3373 = vmatmul.mubr.bf16.gmra.mrb[120].mxu0 %v4342_v42  ;;  %2802 = vmatprep.mubr.bf16.mxu1 %v4347_v43 }
 0x240   : > { %3403 = vmax.xlane.f32.xlu1 %v5741_v51  ;;  %3380 = vmatprep.mubr.bf16.mxu0 %v4351_v49 }
 0x241   : > { %v2588_v52 = vpop.f32.mrb[16].mxu1  ;;  %v3166_v55 = vpop.f32.mrb[16].mxu0 }
 0x242   : > { %v4435_v54 = vadd.f32 %v5695_v33, %v2588_v52  ;;  %v2590_v56 = vpop.f32.mrb[17].mxu1  ;;  %v3168_v58 = vpop.f32.mrb[17].mxu0 }
 0x243   : > { %v2591_v59 = vpop.f32.mrb[18].mxu1  ;;  %v3169_v1 = vpop.f32.mrb[18].mxu0 }
 0x244   : > { %v5746_v61 = vadd.f32 %v4435_v54, %v3166_v55  ;;  %v4437_v62 = vadd.f32 %v5695_v33, %v2591_v59  ;;  %v2593_v63 = vpop.f32.mrb[19].mxu1  ;;  %v3171_v0 = vpop.f32.mrb[19].mxu0 }
 0x246   : > { %v5749_v2 = vadd.f32 %v4437_v62, %v3169_v1  ;;  %2803 = vmatmul.mubr.bf16.gmra.mrb[124].mxu1 %v4346_v57  ;;  %3405 = vmax.xlane.f32.xlu0 %v5746_v61 }
 0x247   : > { %3381 = vmatmul.mubr.bf16.gmra.mrb[124].mxu0 %v4350_v60 }
 0x248   : > { %3407 = vmax.xlane.f32.xlu1 %v5749_v2 }
 0x249   : > { %v2596_v4 = vpop.f32.mrb[20].mxu1  ;;  %v3174_v6 = vpop.f32.mrb[20].mxu0 }
 0x24a   : > { %v4439_v5 = vadd.f32 %v5695_v33, %v2596_v4  ;;  %v2598_v7 = vpop.f32.mrb[21].mxu1  ;;  %v3176_v8 = vpop.f32.mrb[21].mxu0 }
 0x24b   : > { %v2599_v10 = vpop.f32.mrb[22].mxu1  ;;  %v3177_v13 = vpop.f32.mrb[22].mxu0 }
 0x24c   : > { %v5754_v11 = vadd.f32 %v4439_v5, %v3174_v6  ;;  %v4441_v12 = vadd.f32 %v5695_v33, %v2599_v10  ;;  %v2601_v14 = vpop.f32.mrb[23].mxu1  ;;  %v3179_v15 = vpop.f32.mrb[23].mxu0 }
 0x24e   : > { %v5757_v16 = vadd.f32 %v4441_v12, %v3177_v13  ;;  %3409 = vmax.xlane.f32.xlu0 %v5754_v11 }
 0x250   : > { %3411 = vmax.xlane.f32.xlu1 %v5757_v16 }
 0x251   : > { %v2604_v17 = vpop.f32.mrb[24].mxu1  ;;  %v3182_v19 = vpop.f32.mrb[24].mxu0 }
 0x252   : > { %v4443_v18 = vadd.f32 %v5695_v33, %v2604_v17  ;;  %v2606_v20 = vpop.f32.mrb[25].mxu1  ;;  %v3184_v21 = vpop.f32.mrb[25].mxu0 }
 0x253   : > { %v2607_v22 = vpop.f32.mrb[26].mxu1  ;;  %v3185_v26 = vpop.f32.mrb[26].mxu0 }
 0x254   : > { %v5762_v24 = vadd.f32 %v4443_v18, %v3182_v19  ;;  %v4445_v25 = vadd.f32 %v5695_v33, %v2607_v22  ;;  %v2609_v27 = vpop.f32.mrb[27].mxu1  ;;  %v3187_v28 = vpop.f32.mrb[27].mxu0 }
 0x256   : > { %v5765_v30 = vadd.f32 %v4445_v25, %v3185_v26  ;;  %3413 = vmax.xlane.f32.xlu0 %v5762_v24 }
 0x258   : > { %3415 = vmax.xlane.f32.xlu1 %v5765_v30 }
 0x259   : > { %v2612_v31 = vpop.f32.mrb[28].mxu1  ;;  %v3190_v34 = vpop.f32.mrb[28].mxu0 }
 0x25a   : > { %v4447_v32 = vadd.f32 %v5695_v33, %v2612_v31  ;;  %v2614_v35 = vpop.f32.mrb[29].mxu1  ;;  %v3192_v36 = vpop.f32.mrb[29].mxu0 }
 0x25b   : > { %v2615_v37 = vpop.f32.mrb[30].mxu1  ;;  %v3193_v40 = vpop.f32.mrb[30].mxu0 }
 0x25c   : > { %v5770_v38 = vadd.f32 %v4447_v32, %v3190_v34  ;;  %v4449_v39 = vadd.f32 %v5695_v33, %v2615_v37  ;;  %v2617_v41 = vpop.f32.mrb[31].mxu1  ;;  %v3195_v42 = vpop.f32.mrb[31].mxu0 }
 0x25e   : > { %v5773_v43 = vadd.f32 %v4449_v39, %v3193_v40  ;;  %3417 = vmax.xlane.f32.xlu0 %v5770_v38 }
 0x260   : > { %3419 = vmax.xlane.f32.xlu1 %v5773_v43 }
 0x261   : > { %v2620_v45 = vpop.f32.mrb[32].mxu1  ;;  %v3198_v48 = vpop.f32.mrb[32].mxu0 }
 0x262   : > { %v4451_v46 = vadd.f32 %v5695_v33, %v2620_v45  ;;  %v2622_v49 = vpop.f32.mrb[33].mxu1  ;;  %v3200_v50 = vpop.f32.mrb[33].mxu0 }
 0x263   : > { %v2623_v52 = vpop.f32.mrb[34].mxu1  ;;  %v3201_v56 = vpop.f32.mrb[34].mxu0 }
 0x264   : > { %v5778_v54 = vadd.f32 %v4451_v46, %v3198_v48  ;;  %v4453_v55 = vadd.f32 %v5695_v33, %v2623_v52  ;;  %v2625_v57 = vpop.f32.mrb[35].mxu1  ;;  %v3203_v58 = vpop.f32.mrb[35].mxu0 }
 0x266   : > { %v5781_v59 = vadd.f32 %v4453_v55, %v3201_v56  ;;  %3421 = vmax.xlane.f32.xlu0 %v5778_v54 }
 0x268   : > { %3423 = vmax.xlane.f32.xlu1 %v5781_v59 }
 0x269   : > { %v2628_v60 = vpop.f32.mrb[36].mxu1  ;;  %v3206_v1 = vpop.f32.mrb[36].mxu0 }
 0x26a   : > { %v4455_v62 = vadd.f32 %v5695_v33, %v2628_v60  ;;  %v2630_v63 = vpop.f32.mrb[37].mxu1  ;;  %v3208_v0 = vpop.f32.mrb[37].mxu0 }
 0x26b   : > { %v2631_v4 = vpop.f32.mrb[38].mxu1  ;;  %v3209_v7 = vpop.f32.mrb[38].mxu0 }
 0x26c   : > { %v5786_v5 = vadd.f32 %v4455_v62, %v3206_v1  ;;  %v4457_v6 = vadd.f32 %v5695_v33, %v2631_v4  ;;  %v2633_v8 = vpop.f32.mrb[39].mxu1  ;;  %v3211_v10 = vpop.f32.mrb[39].mxu0 }
 0x26e   : > { %v5789_v12 = vadd.f32 %v4457_v6, %v3209_v7  ;;  %3425 = vmax.xlane.f32.xlu0 %v5786_v5 }
 0x270   : > { %3427 = vmax.xlane.f32.xlu1 %v5789_v12 }
 0x271   : > { %v2636_v13 = vpop.f32.mrb[40].mxu1  ;;  %v3214_v15 = vpop.f32.mrb[40].mxu0 }
 0x272   : > { %v4459_v14 = vadd.f32 %v5695_v33, %v2636_v13  ;;  %v2638_v17 = vpop.f32.mrb[41].mxu1  ;;  %v3216_v18 = vpop.f32.mrb[41].mxu0 }
 0x273   : > { %v2639_v19 = vpop.f32.mrb[42].mxu1  ;;  %v3217_v22 = vpop.f32.mrb[42].mxu0 }
 0x274   : > { %v5794_v20 = vadd.f32 %v4459_v14, %v3214_v15  ;;  %v4461_v21 = vadd.f32 %v5695_v33, %v2639_v19  ;;  %v2641_v25 = vpop.f32.mrb[43].mxu1  ;;  %v3219_v26 = vpop.f32.mrb[43].mxu0 }
 0x276   : > { %v5797_v27 = vadd.f32 %v4461_v21, %v3217_v22  ;;  %3429 = vmax.xlane.f32.xlu0 %v5794_v20 }
 0x278   : > { %3431 = vmax.xlane.f32.xlu1 %v5797_v27 }
 0x279   : > { %v2644_v28 = vpop.f32.mrb[44].mxu1  ;;  %v3222_v32 = vpop.f32.mrb[44].mxu0 }
 0x27a   : > { %v4463_v31 = vadd.f32 %v5695_v33, %v2644_v28  ;;  %v2646_v34 = vpop.f32.mrb[45].mxu1  ;;  %v3224_v35 = vpop.f32.mrb[45].mxu0 }
 0x27b   : > { %v2647_v36 = vpop.f32.mrb[46].mxu1  ;;  %v3225_v40 = vpop.f32.mrb[46].mxu0 }
 0x27c   : > { %v5802_v37 = vadd.f32 %v4463_v31, %v3222_v32  ;;  %v4465_v39 = vadd.f32 %v5695_v33, %v2647_v36  ;;  %v2649_v41 = vpop.f32.mrb[47].mxu1  ;;  %v3227_v42 = vpop.f32.mrb[47].mxu0 }
 0x27e   : > { %v5805_v45 = vadd.f32 %v4465_v39, %v3225_v40  ;;  %3433 = vmax.xlane.f32.xlu0 %v5802_v37 }
 0x280   : > { %3435 = vmax.xlane.f32.xlu1 %v5805_v45 }
 0x281   : > { %v2652_v46 = vpop.f32.mrb[48].mxu1  ;;  %v3230_v49 = vpop.f32.mrb[48].mxu0 }
 0x282   : > { %v4467_v48 = vadd.f32 %v5695_v33, %v2652_v46  ;;  %v2654_v50 = vpop.f32.mrb[49].mxu1  ;;  %v3232_v52 = vpop.f32.mrb[49].mxu0 }
 0x283   : > { %v2655_v55 = vpop.f32.mrb[50].mxu1  ;;  %v3233_v58 = vpop.f32.mrb[50].mxu0 }
 0x284   : > { %v5810_v56 = vadd.f32 %v4467_v48, %v3230_v49  ;;  %v4469_v57 = vadd.f32 %v5695_v33, %v2655_v55  ;;  %v2657_v60 = vpop.f32.mrb[51].mxu1  ;;  %v3235_v62 = vpop.f32.mrb[51].mxu0 }
 0x286   : > { %v5813_v1 = vadd.f32 %v4469_v57, %v3233_v58  ;;  %3437 = vmax.xlane.f32.xlu0 %v5810_v56 }
 0x288   : > { %3439 = vmax.xlane.f32.xlu1 %v5813_v1 }
 0x289   : > { %v2660_v63 = vpop.f32.mrb[52].mxu1  ;;  %v3238_v4 = vpop.f32.mrb[52].mxu0 }
 0x28a   : > { %v4471_v0 = vadd.f32 %v5695_v33, %v2660_v63  ;;  %v2662_v6 = vpop.f32.mrb[53].mxu1  ;;  %v3240_v7 = vpop.f32.mrb[53].mxu0 }
 0x28b   : > { %v2663_v8 = vpop.f32.mrb[54].mxu1  ;;  %v3241_v14 = vpop.f32.mrb[54].mxu0 }
 0x28c   : > { %v5818_v10 = vadd.f32 %v4471_v0, %v3238_v4  ;;  %v4473_v13 = vadd.f32 %v5695_v33, %v2663_v8  ;;  %v2665_v15 = vpop.f32.mrb[55].mxu1  ;;  %v3243_v17 = vpop.f32.mrb[55].mxu0 }
 0x28e   : > { %v5821_v18 = vadd.f32 %v4473_v13, %v3241_v14  ;;  %3441 = vmax.xlane.f32.xlu0 %v5818_v10 }
 0x290   : > { %3443 = vmax.xlane.f32.xlu1 %v5821_v18 }
 0x291   : > { %v2668_v19 = vpop.f32.mrb[56].mxu1  ;;  %v3246_v22 = vpop.f32.mrb[56].mxu0 }
 0x292   : > { %v4475_v21 = vadd.f32 %v5695_v33, %v2668_v19  ;;  %v2670_v25 = vpop.f32.mrb[57].mxu1  ;;  %v3248_v26 = vpop.f32.mrb[57].mxu0 }
 0x293   : > { %v2671_v28 = vpop.f32.mrb[58].mxu1  ;;  %v3249_v34 = vpop.f32.mrb[58].mxu0 }
 0x294   : > { %v5826_v31 = vadd.f32 %v4475_v21, %v3246_v22  ;;  %v4477_v32 = vadd.f32 %v5695_v33, %v2671_v28  ;;  %v2673_v35 = vpop.f32.mrb[59].mxu1  ;;  %v3251_v36 = vpop.f32.mrb[59].mxu0 }
 0x296   : > { %v5829_v39 = vadd.f32 %v4477_v32, %v3249_v34  ;;  %3445 = vmax.xlane.f32.xlu0 %v5826_v31 }
 0x298   : > { %3447 = vmax.xlane.f32.xlu1 %v5829_v39 }
 0x299   : > { %v2676_v40 = vpop.f32.mrb[60].mxu1  ;;  %v3254_v42 = vpop.f32.mrb[60].mxu0 }
 0x29a   : > { %v4479_v41 = vadd.f32 %v5695_v33, %v2676_v40  ;;  %v2678_v46 = vpop.f32.mrb[61].mxu1  ;;  %v3256_v48 = vpop.f32.mrb[61].mxu0 }
 0x29b   : > { %v2679_v49 = vpop.f32.mrb[62].mxu1  ;;  %v3257_v55 = vpop.f32.mrb[62].mxu0 }
 0x29c   : > { %v5834_v50 = vadd.f32 %v4479_v41, %v3254_v42  ;;  %v4481_v52 = vadd.f32 %v5695_v33, %v2679_v49  ;;  %v2681_v57 = vpop.f32.mrb[63].mxu1  ;;  %v3259_v58 = vpop.f32.mrb[63].mxu0 }
 0x29e   : > { %v5837_v60 = vadd.f32 %v4481_v52, %v3257_v55  ;;  %3449 = vmax.xlane.f32.xlu0 %v5834_v50 }
 0x2a0   : > { %3451 = vmax.xlane.f32.xlu1 %v5837_v60 }
 0x2a1   : > { %v2684_v62 = vpop.f32.mrb[64].mxu1  ;;  %v3262_v0 = vpop.f32.mrb[64].mxu0 }
 0x2a2   : > { %v4483_v63 = vadd.f32 %v5695_v33, %v2684_v62  ;;  %v2686_v4 = vpop.f32.mrb[65].mxu1  ;;  %v3264_v6 = vpop.f32.mrb[65].mxu0 }
 0x2a3   : > { %v2687_v7 = vpop.f32.mrb[66].mxu1  ;;  %v3265_v14 = vpop.f32.mrb[66].mxu0 }
 0x2a4   : > { %v5842_v8 = vadd.f32 %v4483_v63, %v3262_v0  ;;  %v4485_v13 = vadd.f32 %v5695_v33, %v2687_v7  ;;  %v2689_v15 = vpop.f32.mrb[67].mxu1  ;;  %v3267_v17 = vpop.f32.mrb[67].mxu0 }
 0x2a6   : > { %v5845_v19 = vadd.f32 %v4485_v13, %v3265_v14  ;;  %3453 = vmax.xlane.f32.xlu0 %v5842_v8 }
 0x2a8   : > { %3455 = vmax.xlane.f32.xlu1 %v5845_v19 }
 0x2a9   : > { %v2692_v21 = vpop.f32.mrb[68].mxu1  ;;  %v3270_v25 = vpop.f32.mrb[68].mxu0 }
 0x2aa   : > { %v4487_v22 = vadd.f32 %v5695_v33, %v2692_v21  ;;  %v2694_v26 = vpop.f32.mrb[69].mxu1  ;;  %v3272_v28 = vpop.f32.mrb[69].mxu0 }
 0x2ab   : > { %v2695_v32 = vpop.f32.mrb[70].mxu1  ;;  %v3273_v36 = vpop.f32.mrb[70].mxu0 }
 0x2ac   : > { %v5850_v34 = vadd.f32 %v4487_v22, %v3270_v25  ;;  %v4489_v35 = vadd.f32 %v5695_v33, %v2695_v32  ;;  %v2697_v40 = vpop.f32.mrb[71].mxu1  ;;  %v3275_v41 = vpop.f32.mrb[71].mxu0 }
 0x2ae   : > { %v5853_v42 = vadd.f32 %v4489_v35, %v3273_v36  ;;  %3457 = vmax.xlane.f32.xlu0 %v5850_v34 }
 0x2b0   : > { %3459 = vmax.xlane.f32.xlu1 %v5853_v42 }
 0x2b1   : > { %v2700_v46 = vpop.f32.mrb[72].mxu1  ;;  %v3278_v49 = vpop.f32.mrb[72].mxu0 }
 0x2b2   : > { %v4491_v48 = vadd.f32 %v5695_v33, %v2700_v46  ;;  %v2702_v52 = vpop.f32.mrb[73].mxu1  ;;  %v3280_v55 = vpop.f32.mrb[73].mxu0 }
 0x2b3   : > { %v3390_v57 = vpop.xlane.xlu0 %3389  ;;  %v3281_v62 = vpop.f32.mrb[74].mxu0 }
 0x2b4   : > { %v5858_v58 = vadd.f32 %v4491_v48, %v3278_v49  ;;  %v3517_v63 = vsub.f32 %v5702_v47, %v3390_v57  ;;  %v2703_v0 = vpop.f32.mrb[74].mxu1  ;;  %v3283_v7 = vpop.f32.mrb[75].mxu0 }
 0x2b5   : > { %v4493_v4 = vadd.f32 %v5695_v33, %v2703_v0  ;;  %v2705_v6 = vpop.f32.mrb[75].mxu1 }
 0x2b6   : > { %v3581_v13 = vmul.f32 1.442695, %v3517_v63  ;;  %3461 = vmax.xlane.f32.xlu0 %v5858_v58 }
 0x2b7   : > { %v3392_v14 = vpop.xlane.xlu0 %3391  ;;  %v5863_v15 = vadd.f32 %v4493_v4, %v3281_v62 }
 0x2b8   : > { %4876 = vpow2.f32 %v3581_v13  ;;  %v3518_v17 = vsub.f32 %v5705_v53, %v3392_v14 }
 0x2b9   : > { %3463 = vmax.xlane.f32.xlu1 %v5863_v15  ;;  %v2708_v21 = vpop.f32.mrb[76].mxu1  ;;  %v3286_v25 = vpop.f32.mrb[76].mxu0 }
 0x2ba   : > { %v3583_v22 = vmul.f32 1.442695, %v3518_v17  ;;  %v4495_v47 = vadd.f32 %v5695_v33, %v2708_v21  ;;  %v2710_v26 = vpop.f32.mrb[77].mxu1  ;;  %v3288_v28 = vpop.f32.mrb[77].mxu0 }
 0x2bb   : > { %v3394_v32 = vpop.xlane.xlu1 %3393  ;;  %v3289_v36 = vpop.f32.mrb[78].mxu0 }
 0x2bc   : > { %4878 = vpow2.f32 %v3583_v22  ;;  %v5868_v35 = vadd.f32 %v4495_v47, %v3286_v25  ;;  %v3519_v40 = vsub.f32 %v5714_v3, %v3394_v32  ;;  %v2711_v41 = vpop.f32.mrb[78].mxu1  ;;  %v3291_v48 = vpop.f32.mrb[79].mxu0 }
 0x2bd   : > { %v4497_v46 = vadd.f32 %v5695_v33, %v2711_v41  ;;  %v2713_v53 = vpop.f32.mrb[79].mxu1 }
 0x2be   : > { %v3585_v49 = vmul.f32 1.442695, %v3519_v40  ;;  %3465 = vmax.xlane.f32.xlu0 %v5868_v35 }
 0x2bf   : > { %v3396_v52 = vpop.xlane.xlu1 %3395  ;;  %v5873_v55 = vadd.f32 %v4497_v46, %v3289_v36 }
 0x2c0   : > { %4880 = vpow2.f32 %v3585_v49  ;;  %v3520_v57 = vsub.f32 %v5717_v9, %v3396_v52 }
 0x2c1   : > { %3467 = vmax.xlane.f32.xlu1 %v5873_v55  ;;  %v2716_v62 = vpop.f32.mrb[80].mxu1  ;;  %v3294_v4 = vpop.f32.mrb[80].mxu0 }
 0x2c2   : > { %v5877_v63 = vpop.eup %4876  ;;  %v3587_v3 = vmul.f32 1.442695, %v3520_v57  ;;  %v4499_v0 = vadd.f32 %v5695_v33, %v2716_v62  ;;  %v2718_v6 = vpop.f32.mrb[81].mxu1 }
 0x2c3   : > { %v3296_v7 = vpop.f32.mrb[81].mxu0  ;;  %v3398_v13 = vpop.xlane.xlu0 %3397  ;;  %3709 = vadd.xlane.f32.xlu0 %v5877_v63 }
 0x2c4   : > { %4882 = vpow2.f32 %v3587_v3  ;;  %v5881_v14 = vadd.f32 %v4499_v0, %v3294_v4  ;;  %v3297_v17 = vpop.f32.mrb[82].mxu0  ;;  %v3521_v9 = vsub.f32 %v5726_v23, %v3398_v13  ;;  %v2719_v21 = vpop.f32.mrb[82].mxu1 }
 0x2c5   : > { %v4501_v22 = vadd.f32 %v5695_v33, %v2719_v21  ;;  %v2721_v47 = vpop.f32.mrb[83].mxu1  ;;  %v3299_v25 = vpop.f32.mrb[83].mxu0 }
 0x2c6   : > { %v5885_v26 = vpop.eup %4878  ;;  %v3589_v28 = vmul.f32 1.442695, %v3521_v9  ;;  %v3400_v32 = vpop.xlane.xlu1 %3399 }
 0x2c7   : > { %v3522_v36 = vsub.f32 %v5729_v29, %v3400_v32  ;;  %3711 = vadd.xlane.f32.xlu1 %v5885_v26  ;;  %3469 = vmax.xlane.f32.xlu0 %v5881_v14  ;;  %v5890_v40 = vadd.f32 %v4501_v22, %v3297_v17 }
 0x2c8   : > { %4884 = vpow2.f32 %v3589_v28 }
 0x2c9   : > { %v3591_v41 = vmul.f32 1.442695, %v3522_v36  ;;  %v2724_v23 = vpop.f32.mrb[84].mxu1  ;;  %v3302_v48 = vpop.f32.mrb[84].mxu0 }
 0x2ca   : > { %v5892_v46 = vpop.eup %4880  ;;  %v4503_v53 = vadd.f32 %v5695_v33, %v2724_v23  ;;  %v2726_v49 = vpop.f32.mrb[85].mxu1 }
 0x2cb   : > { %v3304_v52 = vpop.f32.mrb[85].mxu0  ;;  %v3402_v57 = vpop.xlane.xlu0 %3401  ;;  %3713 = vadd.xlane.f32.xlu0 %v5892_v46  ;;  %3471 = vmax.xlane.f32.xlu1 %v5890_v40  ;;  %4886 = vpow2.f32 %v3591_v41 }
 0x2cc   : > { %v5897_v29 = vadd.f32 %v4503_v53, %v3302_v48  ;;  %v3305_v62 = vpop.f32.mrb[86].mxu0  ;;  %v3523_v3 = vsub.f32 %v5738_v44, %v3402_v57  ;;  %v2727_v0 = vpop.f32.mrb[86].mxu1 }
 0x2cd   : > { %v4505_v4 = vadd.f32 %v5695_v33, %v2727_v0  ;;  %v2729_v6 = vpop.f32.mrb[87].mxu1  ;;  %v3307_v7 = vpop.f32.mrb[87].mxu0 }
 0x2ce   : > { %v5901_v13 = vpop.eup %4882  ;;  %v3593_v17 = vmul.f32 1.442695, %v3523_v3  ;;  %v3404_v9 = vpop.xlane.xlu1 %3403 }
 0x2cf   : > { %v3524_v21 = vsub.f32 %v5741_v51, %v3404_v9  ;;  %3715 = vadd.xlane.f32.xlu1 %v5901_v13  ;;  %3473 = vmax.xlane.f32.xlu0 %v5897_v29  ;;  %v5906_v22 = vadd.f32 %v4505_v4, %v3305_v62 }
 0x2d0   : > { %4888 = vpow2.f32 %v3593_v17 }
 0x2d1   : > { %v3595_v47 = vmul.f32 1.442695, %v3524_v21  ;;  %v2732_v44 = vpop.f32.mrb[88].mxu1  ;;  %v3310_v32 = vpop.f32.mrb[88].mxu0 }
 0x2d2   : > { %v5908_v25 = vpop.eup %4884  ;;  %v4507_v28 = vadd.f32 %v5695_v33, %v2732_v44  ;;  %v2734_v36 = vpop.f32.mrb[89].mxu1 }
 0x2d3   : > { %v3312_v41 = vpop.f32.mrb[89].mxu0  ;;  %v3406_v23 = vpop.xlane.xlu0 %3405  ;;  %3717 = vadd.xlane.f32.xlu0 %v5908_v25  ;;  %3475 = vmax.xlane.f32.xlu1 %v5906_v22  ;;  %4890 = vpow2.f32 %v3595_v47 }
 0x2d4   : > { %v5913_v51 = vadd.f32 %v4507_v28, %v3310_v32  ;;  %v3313_v53 = vpop.f32.mrb[90].mxu0  ;;  %v3525_v48 = vsub.f32 %v5746_v61, %v3406_v23  ;;  %v2735_v49 = vpop.f32.mrb[90].mxu1 }
 0x2d5   : > { %v4509_v52 = vadd.f32 %v5695_v33, %v2735_v49  ;;  %v2737_v57 = vpop.f32.mrb[91].mxu1  ;;  %v3315_v62 = vpop.f32.mrb[91].mxu0 }
 0x2d6   : > { %v5917_v3 = vpop.eup %4886  ;;  %v3597_v0 = vmul.f32 1.442695, %v3525_v48  ;;  %v3408_v4 = vpop.xlane.xlu1 %3407 }
 0x2d7   : > { %v3526_v6 = vsub.f32 %v5749_v2, %v3408_v4  ;;  %3719 = vadd.xlane.f32.xlu1 %v5917_v3  ;;  %3477 = vmax.xlane.f32.xlu0 %v5913_v51  ;;  %v5922_v7 = vadd.f32 %v4509_v52, %v3313_v53 }
 0x2d8   : > { %4892 = vpow2.f32 %v3597_v0 }
 0x2d9   : > { %v3599_v17 = vmul.f32 1.442695, %v3526_v6  ;;  %v2740_v61 = vpop.f32.mrb[92].mxu1  ;;  %v3318_v47 = vpop.f32.mrb[92].mxu0 }
 0x2da   : > { %v5924_v9 = vpop.eup %4888  ;;  %v4511_v21 = vadd.f32 %v5695_v33, %v2740_v61  ;;  %v2742_v44 = vpop.f32.mrb[93].mxu1 }
 0x2db   : > { %v3320_v28 = vpop.f32.mrb[93].mxu0  ;;  %v3410_v32 = vpop.xlane.xlu0 %3409  ;;  %3721 = vadd.xlane.f32.xlu0 %v5924_v9  ;;  %3479 = vmax.xlane.f32.xlu1 %v5922_v7  ;;  %4894 = vpow2.f32 %v3599_v17 }
 0x2dc   : > { %v5929_v2 = vadd.f32 %v4511_v21, %v3318_v47  ;;  %v3321_v36 = vpop.f32.mrb[94].mxu0  ;;  %v3527_v41 = vsub.f32 %v5754_v11, %v3410_v32  ;;  %v2743_v23 = vpop.f32.mrb[94].mxu1 }
 0x2dd   : > { %v4513_v53 = vadd.f32 %v5695_v33, %v2743_v23  ;;  %v2745_v48 = vpop.f32.mrb[95].mxu1  ;;  %v3323_v49 = vpop.f32.mrb[95].mxu0 }
 0x2de   : > { %v5933_v52 = vpop.eup %4890  ;;  %v3601_v57 = vmul.f32 1.442695, %v3527_v41  ;;  %v3412_v62 = vpop.xlane.xlu1 %3411 }
 0x2df   : > { %v3528_v0 = vsub.f32 %v5757_v16, %v3412_v62  ;;  %3723 = vadd.xlane.f32.xlu1 %v5933_v52  ;;  %3481 = vmax.xlane.f32.xlu0 %v5929_v2  ;;  %v5938_v4 = vadd.f32 %v4513_v53, %v3321_v36 }
 0x2e0   : > { %4896 = vpow2.f32 %v3601_v57 }
 0x2e1   : > { %v3603_v6 = vmul.f32 1.442695, %v3528_v0  ;;  %v2748_v11 = vpop.f32.mrb[96].mxu1  ;;  %v3326_v21 = vpop.f32.mrb[96].mxu0 }
 0x2e2   : > { %v5940_v17 = vpop.eup %4892  ;;  %v4515_v61 = vadd.f32 %v5695_v33, %v2748_v11  ;;  %v2750_v47 = vpop.f32.mrb[97].mxu1 }
 0x2e3   : > { %v3328_v44 = vpop.f32.mrb[97].mxu0  ;;  %v3414_v28 = vpop.xlane.xlu0 %3413  ;;  %3725 = vadd.xlane.f32.xlu0 %v5940_v17  ;;  %3483 = vmax.xlane.f32.xlu1 %v5938_v4  ;;  %4898 = vpow2.f32 %v3603_v6 }
 0x2e4   : > { %v5945_v16 = vadd.f32 %v4515_v61, %v3326_v21  ;;  %v3329_v32 = vpop.f32.mrb[98].mxu0  ;;  %v3529_v36 = vsub.f32 %v5762_v24, %v3414_v28  ;;  %v2751_v41 = vpop.f32.mrb[98].mxu1 }
 0x2e5   : > { %v4517_v23 = vadd.f32 %v5695_v33, %v2751_v41  ;;  %v2753_v53 = vpop.f32.mrb[99].mxu1  ;;  %v3331_v48 = vpop.f32.mrb[99].mxu0 }
 0x2e6   : > { %v5949_v49 = vpop.eup %4894  ;;  %v3605_v57 = vmul.f32 1.442695, %v3529_v36  ;;  %v3416_v62 = vpop.xlane.xlu1 %3415 }
 0x2e7   : > { %v3530_v0 = vsub.f32 %v5765_v30, %v3416_v62  ;;  %3727 = vadd.xlane.f32.xlu1 %v5949_v49  ;;  %3485 = vmax.xlane.f32.xlu0 %v5945_v16  ;;  %v5954_v6 = vadd.f32 %v4517_v23, %v3329_v32 }
 0x2e8   : > { %4900 = vpow2.f32 %v3605_v57 }
 0x2e9   : > { %v3607_v11 = vmul.f32 1.442695, %v3530_v0  ;;  %v2756_v24 = vpop.f32.mrb[100].mxu1  ;;  %v3334_v47 = vpop.f32.mrb[100].mxu0 }
 0x2ea   : > { %v5956_v61 = vpop.eup %4896  ;;  %v4519_v21 = vadd.f32 %v5695_v33, %v2756_v24  ;;  %v2758_v44 = vpop.f32.mrb[101].mxu1 }
 0x2eb   : > { %v3336_v28 = vpop.f32.mrb[101].mxu0  ;;  %v3418_v36 = vpop.xlane.xlu0 %3417  ;;  %3729 = vadd.xlane.f32.xlu0 %v5956_v61  ;;  %3487 = vmax.xlane.f32.xlu1 %v5954_v6  ;;  %4902 = vpow2.f32 %v3607_v11 }
 0x2ec   : > { %v5961_v30 = vadd.f32 %v4519_v21, %v3334_v47  ;;  %v3337_v32 = vpop.f32.mrb[102].mxu0  ;;  %v3531_v41 = vsub.f32 %v5770_v38, %v3418_v36  ;;  %v2759_v23 = vpop.f32.mrb[102].mxu1 }
 0x2ed   : > { %v4521_v53 = vadd.f32 %v5695_v33, %v2759_v23  ;;  %v2761_v48 = vpop.f32.mrb[103].mxu1  ;;  %v3339_v57 = vpop.f32.mrb[103].mxu0 }
 0x2ee   : > { %v5965_v62 = vpop.eup %4898  ;;  %v3609_v0 = vmul.f32 1.442695, %v3531_v41  ;;  %v3420_v24 = vpop.xlane.xlu1 %3419 }
 0x2ef   : > { %6386 = vst [vmem:[#allocation2_spill] sm:$0xff] %v5965_v62  ;;  %v3532_v44 = vsub.f32 %v5773_v43, %v3420_v24  ;;  %3731 = vadd.xlane.f32.xlu1 %v5965_v62  ;;  %3489 = vmax.xlane.f32.xlu0 %v5961_v30  ;;  %v5970_v11 = vadd.f32 %v4521_v53, %v3337_v32 }
 0x2f0   : > { %4904 = vpow2.f32 %v3609_v0  ;;  %v5983_v0 = vld [vmem:[%s6369_s2] ss:$0 sm:$0xff] }
 0x2f1   : > { %v3611_v21 = vmul.f32 1.442695, %v3532_v44  ;;  %v2764_v38 = vpop.f32.mrb[104].mxu1  ;;  %v3342_v36 = vpop.f32.mrb[104].mxu0 }
 0x2f2   : > { %v5972_v47 = vpop.eup %4900  ;;  %v4523_v28 = vadd.f32 %v5695_v33, %v2764_v38  ;;  %v2766_v23 = vpop.f32.mrb[105].mxu1 }
 0x2f3   : > { %6387 = vst [vmem:[#allocation3_spill] sm:$0xff] %v5972_v47  ;;  %v3344_v48 = vpop.f32.mrb[105].mxu0  ;;  %v3422_v41 = vpop.xlane.xlu0 %3421  ;;  %3733 = vadd.xlane.f32.xlu0 %v5972_v47  ;;  %3491 = vmax.xlane.f32.xlu1 %v5970_v11  ;;  %4906 = vpow2.f32 %v3611_v21 }
 0x2f4   : > { %v5977_v43 = vadd.f32 %v4523_v28, %v3342_v36  ;;  %v3345_v32 = vpop.f32.mrb[106].mxu0  ;;  %v3533_v53 = vsub.f32 %v5778_v54, %v3422_v41  ;;  %v2767_v57 = vpop.f32.mrb[106].mxu1 }
 0x2f5   : > { %v4525_v33 = vadd.f32 %v5983_v0, %v2767_v57  ;;  %v2769_v24 = vpop.f32.mrb[107].mxu1  ;;  %v3347_v44 = vpop.f32.mrb[107].mxu0 }
 0x2f6   : > { %v5986_v38 = vpop.eup %4902  ;;  %v3613_v23 = vmul.f32 1.442695, %v3533_v53  ;;  %v3424_v48 = vpop.xlane.xlu1 %3423 }
 0x2f7   : > { %6388 = vst [vmem:[#allocation4_spill] sm:$0xff] %v5986_v38  ;;  %v3534_v21 = vsub.f32 %v5781_v59, %v3424_v48  ;;  %3735 = vadd.xlane.f32.xlu1 %v5986_v38  ;;  %3493 = vmax.xlane.f32.xlu0 %v5977_v43  ;;  %v5991_v54 = vadd.f32 %v4525_v33, %v3345_v32 }
 0x2f8   : > { %4908 = vpow2.f32 %v3613_v23 }
 0x2f9   : > { %6389 = vst [vmem:[#allocation5_spill] sm:$0xff] %v5991_v54  ;;  %v3615_v28 = vmul.f32 1.442695, %v3534_v21  ;;  %v2772_v36 = vpop.f32.mrb[108].mxu1 }
 0x2fa   : > { %v5993_v41 = vpop.eup %4904  ;;  %v4527_v57 = vadd.f32 %v5983_v0, %v2772_v36  ;;  %v3350_v24 = vpop.f32.mrb[108].mxu0 }
 0x2fb   : > { %6390 = vst [vmem:[#allocation6_spill] sm:$0xff] %v5993_v41  ;;  %v2774_v44 = vpop.f32.mrb[109].mxu1  ;;  %v3352_v47 = vpop.f32.mrb[109].mxu0  ;;  %3737 = vadd.xlane.f32.xlu0 %v5993_v41  ;;  %3495 = vmax.xlane.f32.xlu1 %v5991_v54  ;;  %4910 = vpow2.f32 %v3615_v28 }
 0x2fc   : > { %v3426_v53 = vpop.xlane.xlu0 %3425  ;;  %v5998_v59 = vadd.f32 %v4527_v57, %v3350_v24  ;;  %v3353_v32 = vpop.f32.mrb[110].mxu0 }
 0x2fd   : > { %v3535_v33 = vsub.f32 %v5786_v5, %v3426_v53  ;;  %v2775_v23 = vpop.f32.mrb[110].mxu1  ;;  %v3355_v38 = vpop.f32.mrb[111].mxu0 }
 0x2fe   : > { %6391 = vst [vmem:[#allocation7_spill] sm:$0xff] %v5998_v59  ;;  %v4529_v48 = vadd.f32 %v5983_v0, %v2775_v23  ;;  %v2777_v21 = vpop.f32.mrb[111].mxu1  ;;  %v6002_v36 = vpop.eup %4906 }
 0x2ff   : > { %6392 = vst [vmem:[#allocation8_spill] sm:$0xff] %v6002_v36  ;;  %v3617_v44 = vmul.f32 1.442695, %v3535_v33  ;;  %v3428_v47 = vpop.xlane.xlu1 %3427  ;;  %3739 = vadd.xlane.f32.xlu1 %v6002_v36  ;;  %3497 = vmax.xlane.f32.xlu0 %v5998_v59 }
 0x300   : > { %v3536_v62 = vsub.f32 %v5789_v12, %v3428_v47  ;;  %v6007_v28 = vadd.f32 %v4529_v48, %v3353_v32 }
 0x301   : > { %4912 = vpow2.f32 %v3617_v44  ;;  %v2780_v5 = vpop.f32.mrb[112].mxu1 }
 0x302   : > { %6393 = vst [vmem:[#allocation9_spill] sm:$0xff] %v6007_v28  ;;  %v3619_v57 = vmul.f32 1.442695, %v3536_v62  ;;  %v6009_v24 = vpop.eup %4908  ;;  %v4531_v53 = vadd.f32 %v5983_v0, %v2780_v5  ;;  %v3358_v38 = vpop.f32.mrb[112].mxu0 }
 0x303   : > { %6394 = vst [vmem:[#allocation10_spill] sm:$0xff] %v6009_v24  ;;  %v2782_v23 = vpop.f32.mrb[113].mxu1  ;;  %v3360_v21 = vpop.f32.mrb[113].mxu0  ;;  %3741 = vadd.xlane.f32.xlu0 %v6009_v24  ;;  %3499 = vmax.xlane.f32.xlu1 %v6007_v28 }
 0x304   : > { %4914 = vpow2.f32 %v3619_v57  ;;  %v6014_v12 = vadd.f32 %v4531_v53, %v3358_v38  ;;  %v3361_v33 = vpop.f32.mrb[114].mxu0  ;;  %v2783_v32 = vpop.f32.mrb[114].mxu1 }
 0x305   : > { %v4533_v48 = vadd.f32 %v5983_v0, %v2783_v32  ;;  %v2785_v62 = vpop.f32.mrb[115].mxu1  ;;  %v3363_v44 = vpop.f32.mrb[115].mxu0 }
 0x306   : > { %6395 = vst [vmem:[#allocation11_spill] sm:$0xff] %v6014_v12  ;;  %v6017_v47 = vpop.eup %4910  ;;  %v3430_v23 = vpop.xlane.xlu0 %3429 }
 0x307   : > { %6396 = vst [vmem:[#allocation12_spill] sm:$0xff] %v6017_v47  ;;  %3743 = vadd.xlane.f32.xlu1 %v6017_v47  ;;  %3501 = vmax.xlane.f32.xlu0 %v6014_v12  ;;  %v6021_v5 = vadd.f32 %v4533_v48, %v3361_v33  ;;  %v3432_v36 = vpop.xlane.xlu1 %3431 }
 0x309   : > { %6397 = vst [vmem:[#allocation13_spill] sm:$0xff] %v6021_v5  ;;  %v2788_v21 = vpop.f32.mrb[116].mxu1 }
 0x30a   : > { %v4535_v57 = vadd.f32 %v5983_v0, %v2788_v21  ;;  %v3366_v53 = vpop.f32.mrb[116].mxu0  ;;  %v2790_v38 = vpop.f32.mrb[117].mxu1  ;;  %v3537_v21 = vsub.f32 %v5794_v20, %v3430_v23 }
 0x30b   : > { %v6023_v24 = vpop.eup %4912  ;;  %v3368_v32 = vpop.f32.mrb[117].mxu0  ;;  %3503 = vmax.xlane.f32.xlu1 %v6021_v5 }
 0x30c   : > { %6398 = vst [vmem:[#allocation14_spill] sm:$0xff] %v6023_v24  ;;  %3745 = vadd.xlane.f32.xlu0 %v6023_v24  ;;  %v6028_v62 = vadd.f32 %v4535_v57, %v3366_v53  ;;  %v3369_v44 = vpop.f32.mrb[118].mxu0  ;;  %v2791_v47 = vpop.f32.mrb[118].mxu1  ;;  %v3538_v53 = vsub.f32 %v5797_v27, %v3432_v36 }
 0x30d   : > { %v4537_v33 = vadd.f32 %v5983_v0, %v2791_v47  ;;  %v2793_v48 = vpop.f32.mrb[119].mxu1  ;;  %v3371_v12 = vpop.f32.mrb[119].mxu0 }
 0x30e   : > { %6399 = vst [vmem:[#allocation15_spill] sm:$0xff] %v6028_v62  ;;  %v6031_v41 = vpop.eup %4914  ;;  %v3434_v28 = vpop.xlane.xlu0 %3433  ;;  %v3621_v12 = vmul.f32 1.442695, %v3537_v21  ;;  %v3623_v27 = vmul.f32 1.442695, %v3538_v53 }
 0x30f   : > { %6400 = vst [vmem:[#allocation16_spill] sm:$0xff] %v6031_v41  ;;  %3747 = vadd.xlane.f32.xlu1 %v6031_v41  ;;  %v6036_v38 = vadd.f32 %v4537_v33, %v3369_v44  ;;  %v3436_v32 = vpop.xlane.xlu1 %3435  ;;  %v3539_v5 = vsub.f32 %v5802_v37, %v3434_v28 }
 0x310   : > { %3505 = vmax.xlane.f32.xlu0 %v6028_v62  ;;  %v3540_v36 = vsub.f32 %v5805_v45, %v3436_v32  ;;  %4916 = vpow2.f32 %v3621_v12 }
 0x311   : > { %v2796_v57 = vpop.f32.mrb[120].mxu1  ;;  %v3625_v21 = vmul.f32 1.442695, %v3539_v5  ;;  %4918 = vpow2.f32 %v3623_v27 }
 0x312   : > { %v4539_v24 = vadd.f32 %v5983_v0, %v2796_v57  ;;  %v3374_v47 = vpop.f32.mrb[120].mxu0  ;;  %v2798_v48 = vpop.f32.mrb[121].mxu1  ;;  %v3627_v57 = vmul.f32 1.442695, %v3540_v36 }
 0x313   : > { %v3376_v59 = vpop.f32.mrb[121].mxu0  ;;  %v3438_v20 = vpop.xlane.xlu0 %3437  ;;  %3507 = vmax.xlane.f32.xlu1 %v6036_v38  ;;  %4920 = vpow2.f32 %v3625_v21 }
 0x314   : > { %v6042_v23 = vadd.f32 %v4539_v24, %v3374_v47  ;;  %v3377_v41 = vpop.f32.mrb[122].mxu0  ;;  %v2799_v44 = vpop.f32.mrb[122].mxu1  ;;  %v3541_v37 = vsub.f32 %v5810_v56, %v3438_v20  ;;  %4922 = vpow2.f32 %v3627_v57 }
 0x315   : > { %v4541_v33 = vadd.f32 %v5983_v0, %v2799_v44  ;;  %v2801_v62 = vpop.f32.mrb[123].mxu1  ;;  %v3379_v54 = vpop.f32.mrb[123].mxu0 }
 0x316   : > { %3509 = vmax.xlane.f32.xlu0 %v6042_v23  ;;  %v3440_v59 = vpop.xlane.xlu1 %3439  ;;  %v3629_v32 = vmul.f32 1.442695, %v3541_v37 }
 0x317   : > { %v6048_v28 = vadd.f32 %v4541_v33, %v3377_v41  ;;  %v3542_v62 = vsub.f32 %v5813_v1, %v3440_v59 }
 0x318   : > { %4924 = vpow2.f32 %v3629_v32 }
 0x319   : > { %3511 = vmax.xlane.f32.xlu1 %v6048_v28  ;;  %v2804_v24 = vpop.f32.mrb[124].mxu1  ;;  %v3631_v1 = vmul.f32 1.442695, %v3542_v62 }
 0x31a   : > { %v4543_v54 = vadd.f32 %v5983_v0, %v2804_v24  ;;  %v3382_v53 = vpop.f32.mrb[124].mxu0  ;;  %v2806_v45 = vpop.f32.mrb[125].mxu1 }
 0x31b   : > { %v3384_v47 = vpop.f32.mrb[125].mxu0  ;;  %v3442_v5 = vpop.xlane.xlu0 %3441  ;;  %4926 = vpow2.f32 %v3631_v1 }
 0x31c   : > { %v6053_v48 = vadd.f32 %v4543_v54, %v3382_v53  ;;  %v3385_v56 = vpop.f32.mrb[126].mxu0  ;;  %v3543_v41 = vsub.f32 %v5818_v10, %v3442_v5  ;;  %v2807_v12 = vpop.f32.mrb[126].mxu1 }
 0x31d   : > { %v4545_v20 = vadd.f32 %v5983_v0, %v2807_v12  ;;  %v2809_v44 = vpop.f32.mrb[127].mxu1  ;;  %v3387_v33 = vpop.f32.mrb[127].mxu0 }
 0x31e   : > { %v3444_v27 = vpop.xlane.xlu1 %3443  ;;  %3513 = vmax.xlane.f32.xlu0 %v6053_v48  ;;  %v3633_v36 = vmul.f32 1.442695, %v3543_v41  ;;  %v6061_v59 = vpop.eup %4916 }
 0x31f   : > { %v3544_v21 = vsub.f32 %v5821_v18, %v3444_v27  ;;  %v6059_v37 = vadd.f32 %v4545_v20, %v3385_v56  ;;  %v6065_v24 = vpop.eup %4918 }
 0x320   : > { %4928 = vpow2.f32 %v3633_v36  ;;  %v6068_v62 = vpop.eup %4920 }
 0x321   : > { %3515 = vmax.xlane.f32.xlu1 %v6059_v37  ;;  %v3635_v10 = vmul.f32 1.442695, %v3544_v21  ;;  %v6073_v45 = vpop.eup %4922 }
 0x322   : > { %3749 = vadd.xlane.f32.xlu0 %v6061_v59  ;;  %v6075_v47 = vpop.eup %4924 }
 0x323   : > { %v3446_v0 = vpop.xlane.xlu0 %3445  ;;  %4930 = vpow2.f32 %v3635_v10 }
 0x324   : > { %v3545_v57 = vsub.f32 %v5826_v31, %v3446_v0 }
 0x325   : > { %3751 = vadd.xlane.f32.xlu1 %v6065_v24  ;;  %v3448_v18 = vpop.xlane.xlu1 %3447  ;;  %v6079_v5 = vpop.eup %4926 }
 0x326   : > { %v3637_v54 = vmul.f32 1.442695, %v3545_v57  ;;  %v3546_v53 = vsub.f32 %v5829_v39, %v3448_v18  ;;  %3753 = vadd.xlane.f32.xlu0 %v6068_v62 }
 0x328   : > { %4932 = vpow2.f32 %v3637_v54  ;;  %v3639_v32 = vmul.f32 1.442695, %v3546_v53 }
 0x329   : > { %3755 = vadd.xlane.f32.xlu1 %v6073_v45 }
 0x32a   : > { %4934 = vpow2.f32 %v3639_v32  ;;  %3757 = vadd.xlane.f32.xlu0 %v6075_v47  ;;  %v6082_v41 = vpop.eup %4928 }
 0x32b   : > { %v3450_v31 = vpop.xlane.xlu0 %3449 }
 0x32c   : > { %v3547_v56 = vsub.f32 %v5834_v50, %v3450_v31 }
 0x32d   : > { %3759 = vadd.xlane.f32.xlu1 %v6079_v5  ;;  %v3452_v39 = vpop.xlane.xlu1 %3451  ;;  %v6087_v44 = vpop.eup %4930 }
 0x32e   : > { %v3641_v12 = vmul.f32 1.442695, %v3547_v56  ;;  %v3548_v20 = vsub.f32 %v5837_v60, %v3452_v39  ;;  %3761 = vadd.xlane.f32.xlu0 %v6082_v41 }
 0x330   : > { %4936 = vpow2.f32 %v3641_v12  ;;  %v3643_v33 = vmul.f32 1.442695, %v3548_v20 }
 0x331   : > { %3763 = vadd.xlane.f32.xlu1 %v6087_v44 }
 0x332   : > { %v6090_v1 = vpop.eup %4932  ;;  %4938 = vpow2.f32 %v3643_v33 }
 0x333   : > { %v3454_v50 = vpop.xlane.xlu0 %3453  ;;  %3765 = vadd.xlane.f32.xlu0 %v6090_v1 }
 0x334   : > { %v6093_v27 = vpop.eup %4934  ;;  %v3549_v36 = vsub.f32 %v5842_v8, %v3454_v50 }
 0x335   : > { %v3456_v21 = vpop.xlane.xlu1 %3455  ;;  %3767 = vadd.xlane.f32.xlu1 %v6093_v27 }
 0x336   : > { %v3645_v60 = vmul.f32 1.442695, %v3549_v36  ;;  %v3550_v10 = vsub.f32 %v5845_v19, %v3456_v21 }
 0x338   : > { %4940 = vpow2.f32 %v3645_v60  ;;  %v3647_v0 = vmul.f32 1.442695, %v3550_v10 }
 0x33a   : > { %v6098_v57 = vpop.eup %4936  ;;  %4942 = vpow2.f32 %v3647_v0 }
 0x33b   : > { %v3458_v18 = vpop.xlane.xlu0 %3457  ;;  %3769 = vadd.xlane.f32.xlu0 %v6098_v57 }
 0x33c   : > { %v6101_v54 = vpop.eup %4938  ;;  %v3551_v53 = vsub.f32 %v5850_v34, %v3458_v18 }
 0x33d   : > { %v3460_v32 = vpop.xlane.xlu1 %3459  ;;  %3771 = vadd.xlane.f32.xlu1 %v6101_v54 }
 0x33e   : > { %v3649_v8 = vmul.f32 1.442695, %v3551_v53  ;;  %v3552_v31 = vsub.f32 %v5853_v42, %v3460_v32 }
 0x340   : > { %4944 = vpow2.f32 %v3649_v8  ;;  %v3651_v19 = vmul.f32 1.442695, %v3552_v31 }
 0x342   : > { %v6106_v56 = vpop.eup %4940  ;;  %4946 = vpow2.f32 %v3651_v19 }
 0x343   : > { %v3462_v39 = vpop.xlane.xlu0 %3461  ;;  %3773 = vadd.xlane.f32.xlu0 %v6106_v56 }
 0x344   : > { %v6109_v12 = vpop.eup %4942  ;;  %v3553_v20 = vsub.f32 %v5858_v58, %v3462_v39 }
 0x345   : > { %3775 = vadd.xlane.f32.xlu1 %v6109_v12 }
 0x346   : > { %v3653_v34 = vmul.f32 1.442695, %v3553_v20  ;;  %v3464_v33 = vpop.xlane.xlu1 %3463 }
 0x347   : > { %v3554_v50 = vsub.f32 %v5863_v15, %v3464_v33 }
 0x348   : > { %4948 = vpow2.f32 %v3653_v34 }
 0x349   : > { %v3655_v42 = vmul.f32 1.442695, %v3554_v50 }
 0x34a   : > { %v6114_v36 = vpop.eup %4944 }
 0x34b   : > { %4950 = vpow2.f32 %v3655_v42  ;;  %v3466_v21 = vpop.xlane.xlu0 %3465  ;;  %3777 = vadd.xlane.f32.xlu0 %v6114_v36 }
 0x34c   : > { %v6117_v60 = vpop.eup %4946  ;;  %v3555_v10 = vsub.f32 %v5868_v35, %v3466_v21 }
 0x34d   : > { %3779 = vadd.xlane.f32.xlu1 %v6117_v60 }
 0x34e   : > { %v3657_v58 = vmul.f32 1.442695, %v3555_v10  ;;  %v3468_v0 = vpop.xlane.xlu1 %3467 }
 0x34f   : > { %v3556_v18 = vsub.f32 %v5873_v55, %v3468_v0 }
 0x350   : > { %4952 = vpow2.f32 %v3657_v58  ;;  %v3710_v15 = vpop.xlane.xlu0 %3709 }
 0x351   : > { %v3659_v53 = vmul.f32 1.442695, %v3556_v18  ;;  %4954 = vrcp.f32 %v3710_v15 }
 0x352   : > { %v6122_v32 = vpop.eup %4948 }
 0x353   : > { %4956 = vpow2.f32 %v3659_v53  ;;  %3781 = vadd.xlane.f32.xlu0 %v6122_v32 }
 0x354   : > { %v3712_v8 = vpop.xlane.xlu1 %3711  ;;  %v3470_v31 = vpop.xlane.xlu0 %3469 }
 0x355   : > { %v6125_v19 = vpop.eup %4950  ;;  %4958 = vrcp.f32 %v3712_v8  ;;  %v3557_v35 = vsub.f32 %v5881_v14, %v3470_v31 }
 0x356   : > { %3783 = vadd.xlane.f32.xlu1 %v6125_v19 }
 0x357   : > { %v3661_v39 = vmul.f32 1.442695, %v3557_v35 }
 0x358   : > { %v3714_v55 = vpop.xlane.xlu0 %3713  ;;  %v3472_v20 = vpop.xlane.xlu1 %3471 }
 0x359   : > { %4960 = vpow2.f32 %v3661_v39  ;;  %v3558_v34 = vsub.f32 %v5890_v40, %v3472_v20 }
 0x35a   : > { %v6131_v33 = vpop.eup %4952  ;;  %4962 = vrcp.f32 %v3714_v55 }
 0x35b   : > { %v4955_v50 = vpop.eup %4954  ;;  %v3663_v14 = vmul.f32 1.442695, %v3558_v34  ;;  %3785 = vadd.xlane.f32.xlu0 %v6131_v33 }
 0x35c   : > { %v3838_v42 = vmul.f32 %v4955_v50, %v5877_v63  ;;  %v3716_v21 = vpop.xlane.xlu1 %3715  ;;  %v3474_v10 = vpop.xlane.xlu0 %3473 }
 0x35d   : > { %v6140_v58 = vpop.eup %4956  ;;  %4964 = vpow2.f32 %v3663_v14  ;;  %v3559_v40 = vsub.f32 %v5897_v29, %v3474_v10 }
 0x35e   : > { %3965 = vst [vmem:[%s6136_s4] sm:$0xff] %v3838_v42  ;;  %4966 = vrcp.f32 %v3716_v21  ;;  %3787 = vadd.xlane.f32.xlu1 %v6140_v58 }
 0x35f   : > { %v4959_v0 = vpop.eup %4958  ;;  %v3665_v18 = vmul.f32 1.442695, %v3559_v40 }
 0x360   : > { %v3840_v15 = vmul.f32 %v4959_v0, %v5885_v26  ;;  %v3718_v53 = vpop.xlane.xlu0 %3717  ;;  %v3476_v8 = vpop.xlane.xlu1 %3475 }
 0x361   : > { %4968 = vpow2.f32 %v3665_v18  ;;  %v3560_v63 = vsub.f32 %v5906_v22, %v3476_v8 }
 0x362   : > { %3966 = vst [vmem:[%s6136_s4 + $0x8] sm:$0xff] %v3840_v15  ;;  %4970 = vrcp.f32 %v3718_v53 }
 0x363   : > { %v6148_v31 = vpop.eup %4960  ;;  %v3667_v35 = vmul.f32 1.442695, %v3560_v63 }
 0x364   : > { %v4963_v29 = vpop.eup %4962  ;;  %v3720_v39 = vpop.xlane.xlu1 %3719  ;;  %3789 = vadd.xlane.f32.xlu0 %v6148_v31 }
 0x365   : > { %v3478_v55 = vpop.xlane.xlu0 %3477  ;;  %v3842_v20 = vmul.f32 %v4963_v29, %v5892_v46  ;;  %4972 = vpow2.f32 %v3667_v35 }
 0x366   : > { %v3561_v26 = vsub.f32 %v5913_v51, %v3478_v55  ;;  %4974 = vrcp.f32 %v3720_v39 }
 0x367   : > { %v6153_v34 = vpop.eup %4964  ;;  %3967 = vst [vmem:[%s6136_s4 + $0x10] sm:$0xff] %v3842_v20 }
 0x368   : > { %v3669_v22 = vmul.f32 1.442695, %v3561_v26  ;;  %v4967_v50 = vpop.eup %4966  ;;  %v3480_v42 = vpop.xlane.xlu1 %3479  ;;  %3791 = vadd.xlane.f32.xlu1 %v6153_v34 }
 0x369   : > { %v3722_v14 = vpop.xlane.xlu0 %3721  ;;  %v3844_v21 = vmul.f32 %v4967_v50, %v5901_v13  ;;  %v3562_v46 = vsub.f32 %v5922_v7, %v3480_v42 }
 0x36a   : > { %4976 = vpow2.f32 %v3669_v22 }
 0x36b   : > { %4978 = vrcp.f32 %v3722_v14  ;;  %v6159_v10 = vpop.eup %4968  ;;  %3968 = vst [vmem:[%s6136_s4 + $0x18] sm:$0xff] %v3844_v21  ;;  %v3671_v51 = vmul.f32 1.442695, %v3562_v46 }
 0x36c   : > { %v4971_v40 = vpop.eup %4970  ;;  %v3724_v0 = vpop.xlane.xlu1 %3723  ;;  %3793 = vadd.xlane.f32.xlu0 %v6159_v10 }
 0x36d   : > { %v3482_v18 = vpop.xlane.xlu0 %3481  ;;  %v3846_v15 = vmul.f32 %v4971_v40, %v5908_v25  ;;  %4980 = vpow2.f32 %v3671_v51 }
 0x36e   : > { %v3563_v13 = vsub.f32 %v5929_v2, %v3482_v18  ;;  %4982 = vrcp.f32 %v3724_v0 }
 0x36f   : > { %v6165_v53 = vpop.eup %4972  ;;  %3969 = vst [vmem:[%s6136_s4 + $0x20] sm:$0xff] %v3846_v15 }
 0x370   : > { %v3673_v7 = vmul.f32 1.442695, %v3563_v13  ;;  %v4975_v8 = vpop.eup %4974  ;;  %v3484_v35 = vpop.xlane.xlu1 %3483  ;;  %3795 = vadd.xlane.f32.xlu1 %v6165_v53 }
 0x371   : > { %v3726_v63 = vpop.xlane.xlu0 %3725  ;;  %v3848_v29 = vmul.f32 %v4975_v8, %v5917_v3  ;;  %v3564_v25 = vsub.f32 %v5938_v4, %v3484_v35 }
 0x372   : > { %4984 = vpow2.f32 %v3673_v7 }
 0x373   : > { %4986 = vrcp.f32 %v3726_v63  ;;  %3970 = vst [vmem:[%s6136_s4 + $0x28] sm:$0xff] %v3848_v29  ;;  %v3675_v2 = vmul.f32 1.442695, %v3564_v25 }
 0x374   : > { %v6171_v39 = vpop.eup %4976  ;;  %v3728_v20 = vpop.xlane.xlu1 %3727 }
 0x375   : > { %v4979_v55 = vpop.eup %4978  ;;  %v3486_v26 = vpop.xlane.xlu0 %3485  ;;  %3797 = vadd.xlane.f32.xlu0 %v6171_v39  ;;  %4988 = vpow2.f32 %v3675_v2 }
 0x376   : > { %v3850_v22 = vmul.f32 %v4979_v55, %v5924_v9  ;;  %v3565_v3 = vsub.f32 %v5945_v16, %v3486_v26  ;;  %4990 = vrcp.f32 %v3728_v20 }
 0x377   : > { %v6177_v50 = vpop.eup %4980 }
 0x378   : > { %3971 = vst [vmem:[%s6136_s4 + $0x30] sm:$0xff] %v3850_v22  ;;  %v3677_v4 = vmul.f32 1.442695, %v3565_v3  ;;  %v4983_v14 = vpop.eup %4982  ;;  %v3488_v21 = vpop.xlane.xlu1 %3487  ;;  %3799 = vadd.xlane.f32.xlu1 %v6177_v50 }
 0x379   : > { %v3730_v42 = vpop.xlane.xlu0 %3729  ;;  %v3852_v46 = vmul.f32 %v4983_v14, %v5933_v52  ;;  %v3566_v9 = vsub.f32 %v5954_v6, %v3488_v21  ;;  %v6401_v14 = vld [vmem:[#allocation2_spill] sm:$0xff]  ;;  %v6402_v21 = vld [vmem:[#allocation5_spill] sm:$0xff] }
 0x37a   : > { %4992 = vpow2.f32 %v3677_v4 }
 0x37b   : > { %4994 = vrcp.f32 %v3730_v42  ;;  %3972 = vst [vmem:[%s6136_s4 + $0x38] sm:$0xff] %v3852_v46  ;;  %v3679_v16 = vmul.f32 1.442695, %v3566_v9 }
 0x37c   : > { %v6183_v51 = vpop.eup %4984  ;;  %v3732_v0 = vpop.xlane.xlu1 %3731 }
 0x37d   : > { %v4987_v40 = vpop.eup %4986  ;;  %v3490_v18 = vpop.xlane.xlu0 %3489  ;;  %3801 = vadd.xlane.f32.xlu0 %v6183_v51  ;;  %4996 = vpow2.f32 %v3679_v16 }
 0x37e   : > { %v3854_v15 = vmul.f32 %v4987_v40, %v5940_v17  ;;  %v3567_v52 = vsub.f32 %v5961_v30, %v3490_v18  ;;  %4998 = vrcp.f32 %v3732_v0  ;;  %v6403_v0 = vld [vmem:[#allocation3_spill] sm:$0xff] }
 0x37f   : > { %v6189_v13 = vpop.eup %4988 }
 0x380   : > { %3973 = vst [vmem:[%s6136_s4 + $0x40] sm:$0xff] %v3854_v15  ;;  %v3681_v6 = vmul.f32 1.442695, %v3567_v52  ;;  %v4991_v7 = vpop.eup %4990  ;;  %v3492_v63 = vpop.xlane.xlu1 %3491  ;;  %3803 = vadd.xlane.f32.xlu1 %v6189_v13  ;;  %v6404_v15 = vld [vmem:[#allocation7_spill] sm:$0xff] }
 0x381   : > { %v3734_v8 = vpop.xlane.xlu0 %3733  ;;  %v3856_v35 = vmul.f32 %v4991_v7, %v5949_v49  ;;  %v3568_v17 = vsub.f32 %v5970_v11, %v3492_v63 }
 0x382   : > { %5000 = vpow2.f32 %v3681_v6 }
 0x383   : > { %5002 = vrcp.f32 %v3734_v8  ;;  %3974 = vst [vmem:[%s6136_s4 + $0x48] sm:$0xff] %v3856_v35  ;;  %v3683_v30 = vmul.f32 1.442695, %v3568_v17  ;;  %v6405_v17 = vld [vmem:[#allocation4_spill] sm:$0xff] }
 0x384   : > { %v6195_v29 = vpop.eup %4992  ;;  %v3736_v2 = vpop.xlane.xlu1 %3735 }
 0x385   : > { %v4995_v25 = vpop.eup %4994  ;;  %v3494_v55 = vpop.xlane.xlu0 %3493  ;;  %3805 = vadd.xlane.f32.xlu0 %v6195_v29  ;;  %5004 = vpow2.f32 %v3683_v30 }
 0x386   : > { %v3858_v20 = vmul.f32 %v4995_v25, %v5956_v61  ;;  %v3569_v49 = vsub.f32 %v5977_v43, %v3494_v55  ;;  %5006 = vrcp.f32 %v3736_v2  ;;  %v6406_v25 = vld [vmem:[#allocation9_spill] sm:$0xff] }
 0x387   : > { %v6201_v26 = vpop.eup %4996 }
 0x388   : > { %3975 = vst [vmem:[%s6136_s4 + $0x50] sm:$0xff] %v3858_v20  ;;  %v3685_v11 = vmul.f32 1.442695, %v3569_v49  ;;  %v4999_v22 = vpop.eup %4998  ;;  %v3496_v4 = vpop.xlane.xlu1 %3495  ;;  %3807 = vadd.xlane.f32.xlu1 %v6201_v26 }
 0x389   : > { %v3738_v3 = vpop.xlane.xlu0 %3737  ;;  %v3860_v42 = vmul.f32 %v4999_v22, %v6401_v14  ;;  %v3570_v61 = vsub.f32 %v6402_v21, %v3496_v4  ;;  %v6408_v14 = vld [vmem:[#allocation11_spill] sm:$0xff] }
 0x38a   : > { %5008 = vpow2.f32 %v3685_v11 }
 0x38b   : > { %5010 = vrcp.f32 %v3738_v3  ;;  %3976 = vst [vmem:[%s6136_s4 + $0x58] sm:$0xff] %v3860_v42  ;;  %v3687_v43 = vmul.f32 1.442695, %v3570_v61  ;;  %v6407_v3 = vld [vmem:[#allocation6_spill] sm:$0xff] }
 0x38c   : > { %v6207_v46 = vpop.eup %5000  ;;  %v3740_v16 = vpop.xlane.xlu1 %3739 }
 0x38d   : > { %v5003_v9 = vpop.eup %5002  ;;  %v3498_v40 = vpop.xlane.xlu0 %3497  ;;  %3809 = vadd.xlane.f32.xlu0 %v6207_v46  ;;  %5012 = vpow2.f32 %v3687_v43 }
 0x38e   : > { %v3862_v18 = vmul.f32 %v5003_v9, %v6403_v0  ;;  %v3571_v52 = vsub.f32 %v6404_v15, %v3498_v40  ;;  %5014 = vrcp.f32 %v3740_v16  ;;  %v6409_v40 = vld [vmem:[#allocation8_spill] sm:$0xff] }
 0x38f   : > { %v6213_v6 = vpop.eup %5004 }
 0x390   : > { %3977 = vst [vmem:[%s6136_s4 + $0x60] sm:$0xff] %v3862_v18  ;;  %v3689_v7 = vmul.f32 1.442695, %v3571_v52  ;;  %v5007_v8 = vpop.eup %5006  ;;  %v3500_v35 = vpop.xlane.xlu1 %3499  ;;  %3811 = vadd.xlane.f32.xlu1 %v6213_v6  ;;  %v6410_v18 = vld [vmem:[#allocation13_spill] sm:$0xff] }
 0x391   : > { %v3742_v63 = vpop.xlane.xlu0 %3741  ;;  %v3864_v30 = vmul.f32 %v5007_v8, %v6405_v17  ;;  %v3572_v2 = vsub.f32 %v6406_v25, %v3500_v35  ;;  %v6411_v17 = vld [vmem:[#allocation10_spill] sm:$0xff]  ;;  %v6412_v25 = vld [vmem:[#allocation15_spill] sm:$0xff] }
 0x392   : > { %5016 = vpow2.f32 %v3689_v7 }
 0x393   : > { %5018 = vrcp.f32 %v3742_v63  ;;  %3978 = vst [vmem:[%s6136_s4 + $0x68] sm:$0xff] %v3864_v30  ;;  %v3691_v20 = vmul.f32 1.442695, %v3572_v2 }
 0x394   : > { %v6219_v55 = vpop.eup %5008  ;;  %v3744_v11 = vpop.xlane.xlu1 %3743 }
 0x395   : > { %v5011_v49 = vpop.eup %5010  ;;  %v3502_v22 = vpop.xlane.xlu0 %3501  ;;  %3813 = vadd.xlane.f32.xlu0 %v6219_v55  ;;  %5020 = vpow2.f32 %v3691_v20 }
 0x396   : > { %v3866_v4 = vmul.f32 %v5011_v49, %v6407_v3  ;;  %v3573_v42 = vsub.f32 %v6408_v14, %v3502_v22  ;;  %5022 = vrcp.f32 %v3744_v11  ;;  %v6413_v3 = vld [vmem:[#allocation12_spill] sm:$0xff] }
 0x397   : > { %v6225_v21 = vpop.eup %5012 }
 0x398   : > { %3979 = vst [vmem:[%s6136_s4 + $0x70] sm:$0xff] %v3866_v4  ;;  %v3693_v61 = vmul.f32 1.442695, %v3573_v42  ;;  %v5015_v43 = vpop.eup %5014  ;;  %v3504_v16 = vpop.xlane.xlu1 %3503  ;;  %3815 = vadd.xlane.f32.xlu1 %v6225_v21 }
 0x399   : > { %v3746_v9 = vpop.xlane.xlu0 %3745  ;;  %v3868_v0 = vmul.f32 %v5015_v43, %v6409_v40  ;;  %v3574_v15 = vsub.f32 %v6410_v18, %v3504_v16  ;;  %v6414_v40 = vld [vmem:[#allocation14_spill] sm:$0xff] }
 0x39a   : > { %5024 = vpow2.f32 %v3693_v61 }
 0x39b   : > { %5026 = vrcp.f32 %v3746_v9  ;;  %3980 = vst [vmem:[%s6136_s4 + $0x78] sm:$0xff] %v3868_v0  ;;  %v3695_v7 = vmul.f32 1.442695, %v3574_v15 }
 0x39c   : > { %v6231_v52 = vpop.eup %5016  ;;  %v3748_v63 = vpop.xlane.xlu1 %3747 }
 0x39d   : > { %v5019_v8 = vpop.eup %5018  ;;  %v3506_v35 = vpop.xlane.xlu0 %3505  ;;  %3817 = vadd.xlane.f32.xlu0 %v6231_v52  ;;  %5028 = vpow2.f32 %v3695_v7 }
 0x39e   : > { %v3870_v30 = vmul.f32 %v5019_v8, %v6411_v17  ;;  %v3575_v2 = vsub.f32 %v6412_v25, %v3506_v35  ;;  %5030 = vrcp.f32 %v3748_v63  ;;  %v6415_v63 = vld [vmem:[#allocation16_spill] sm:$0xff] }
 0x39f   : > { %v6237_v20 = vpop.eup %5020 }
 0x3a0   : > { %3981 = vst [vmem:[%s6136_s4 + $0x80] sm:$0xff] %v3870_v30  ;;  %v3697_v49 = vmul.f32 1.442695, %v3575_v2  ;;  %v5023_v11 = vpop.eup %5022  ;;  %v3508_v22 = vpop.xlane.xlu1 %3507  ;;  %3819 = vadd.xlane.f32.xlu1 %v6237_v20 }
 0x3a1   : > { %v3872_v4 = vmul.f32 %v5023_v11, %v6413_v3  ;;  %v3576_v14 = vsub.f32 %v6036_v38, %v3508_v22 }
 0x3a2   : > { %5032 = vpow2.f32 %v3697_v49 }
 0x3a3   : > { %3982 = vst [vmem:[%s6136_s4 + $0x88] sm:$0xff] %v3872_v4  ;;  %v3699_v61 = vmul.f32 1.442695, %v3576_v14  ;;  %v3510_v43 = vpop.xlane.xlu0 %3509 }
 0x3a4   : > { %v6243_v42 = vpop.eup %5024  ;;  %v3577_v16 = vsub.f32 %v6042_v23, %v3510_v43 }
 0x3a5   : > { %v5027_v9 = vpop.eup %5026  ;;  %3821 = vadd.xlane.f32.xlu0 %v6243_v42  ;;  %5034 = vpow2.f32 %v3699_v61 }
 0x3a6   : > { %v3874_v0 = vmul.f32 %v5027_v9, %v6414_v40  ;;  %v3701_v18 = vmul.f32 1.442695, %v3577_v16  ;;  %v3512_v15 = vpop.xlane.xlu1 %3511 }
 0x3a7   : > { %v6249_v7 = vpop.eup %5028  ;;  %v3578_v38 = vsub.f32 %v6048_v28, %v3512_v15 }
 0x3a8   : > { %3983 = vst [vmem:[%s6136_s4 + $0x90] sm:$0xff] %v3874_v0  ;;  %v5031_v8 = vpop.eup %5030  ;;  %5036 = vpow2.f32 %v3701_v18  ;;  %3823 = vadd.xlane.f32.xlu1 %v6249_v7 }
 0x3a9   : > { %v3876_v35 = vmul.f32 %v5031_v8, %v6415_v63  ;;  %v3703_v17 = vmul.f32 1.442695, %v3578_v38 }
 0x3ab   : > { %3984 = vst [vmem:[%s6136_s4 + $0x98] sm:$0xff] %v3876_v35  ;;  %5038 = vpow2.f32 %v3703_v17  ;;  %v3514_v30 = vpop.xlane.xlu0 %3513 }
 0x3ac   : > { %v6255_v23 = vpop.eup %5032  ;;  %v3579_v25 = vsub.f32 %v6053_v48, %v3514_v30 }
 0x3ad   : > { %3825 = vadd.xlane.f32.xlu0 %v6255_v23 }
 0x3ae   : > { %v3705_v2 = vmul.f32 1.442695, %v3579_v25  ;;  %v3516_v49 = vpop.xlane.xlu1 %3515 }
 0x3af   : > { %v6260_v11 = vpop.eup %5034  ;;  %v3580_v28 = vsub.f32 %v6059_v37, %v3516_v49  ;;  %v3750_v22 = vpop.xlane.xlu0 %3749 }
 0x3b0   : > { %5040 = vpow2.f32 %v3705_v2  ;;  %3827 = vadd.xlane.f32.xlu1 %v6260_v11 }
 0x3b1   : > { %v3707_v3 = vmul.f32 1.442695, %v3580_v28  ;;  %5042 = vrcp.f32 %v3750_v22 }
 0x3b2   : > { %v6264_v4 = vpop.eup %5036  ;;  %v3752_v14 = vpop.xlane.xlu1 %3751 }
 0x3b3   : > { %5044 = vpow2.f32 %v3707_v3  ;;  %3829 = vadd.xlane.f32.xlu0 %v6264_v4  ;;  %v3754_v48 = vpop.xlane.xlu0 %3753 }
 0x3b4   : > { %5046 = vrcp.f32 %v3752_v14 }
 0x3b5   : > { %v6267_v61 = vpop.eup %5038  ;;  %5048 = vrcp.f32 %v3754_v48 }
 0x3b6   : > { %3831 = vadd.xlane.f32.xlu1 %v6267_v61  ;;  %v3756_v37 = vpop.xlane.xlu1 %3755 }
 0x3b7   : > { %5050 = vrcp.f32 %v3756_v37  ;;  %v3758_v43 = vpop.xlane.xlu0 %3757 }
 0x3b8   : > { %5052 = vrcp.f32 %v3758_v43 }
 0x3ba   : > { %v6270_v9 = vpop.eup %5040  ;;  %v3760_v16 = vpop.xlane.xlu1 %3759 }
 0x3bb   : > { %v5043_v40 = vpop.eup %5042  ;;  %5054 = vrcp.f32 %v3760_v16  ;;  %3833 = vadd.xlane.f32.xlu0 %v6270_v9  ;;  %v3762_v0 = vpop.xlane.xlu0 %3761 }
 0x3bc   : > { %v3878_v18 = vmul.f32 %v5043_v40, %v6061_v59  ;;  %5056 = vrcp.f32 %v3762_v0 }
 0x3bd   : > { %v6274_v15 = vpop.eup %5044 }
 0x3be   : > { %v5047_v38 = vpop.eup %5046  ;;  %3985 = vst [vmem:[%s6136_s4 + $0xa0] sm:$0xff] %v3878_v18  ;;  %3835 = vadd.xlane.f32.xlu1 %v6274_v15  ;;  %v3764_v8 = vpop.xlane.xlu1 %3763 }
 0x3bf   : > { %v5049_v63 = vpop.eup %5048  ;;  %v3880_v35 = vmul.f32 %v5047_v38, %v6065_v24  ;;  %5058 = vrcp.f32 %v3764_v8 }
 0x3c0   : > { %v3882_v17 = vmul.f32 %v5049_v63, %v6068_v62  ;;  %v3766_v30 = vpop.xlane.xlu0 %3765 }
 0x3c1   : > { %v5051_v59 = vpop.eup %5050  ;;  %3986 = vst [vmem:[%s6136_s4 + $0xa8] sm:$0xff] %v3880_v35  ;;  %5060 = vrcp.f32 %v3766_v30 }
 0x3c2   : > { %v5053_v25 = vpop.eup %5052  ;;  %3987 = vst [vmem:[%s6136_s4 + $0xb0] sm:$0xff] %v3882_v17  ;;  %v3884_v2 = vmul.f32 %v5051_v59, %v6073_v45  ;;  %v3768_v49 = vpop.xlane.xlu1 %3767 }
 0x3c3   : > { %v3886_v28 = vmul.f32 %v5053_v25, %v6075_v47  ;;  %5062 = vrcp.f32 %v3768_v49 }
 0x3c4   : > { %3988 = vst [vmem:[%s6136_s4 + $0xb8] sm:$0xff] %v3884_v2 }
 0x3c5   : > { %v5055_v24 = vpop.eup %5054  ;;  %3989 = vst [vmem:[%s6136_s4 + $0xc0] sm:$0xff] %v3886_v28 }
 0x3c6   : > { %v5057_v62 = vpop.eup %5056  ;;  %v3888_v22 = vmul.f32 %v5055_v24, %v6079_v5 }
 0x3c7   : > { %v3890_v3 = vmul.f32 %v5057_v62, %v6082_v41 }
 0x3c8   : > { %3990 = vst [vmem:[%s6136_s4 + $0xc8] sm:$0xff] %v3888_v22  ;;  %v3770_v14 = vpop.xlane.xlu0 %3769 }
 0x3c9   : > { %v5059_v48 = vpop.eup %5058  ;;  %3991 = vst [vmem:[%s6136_s4 + $0xd0] sm:$0xff] %v3890_v3  ;;  %5064 = vrcp.f32 %v3770_v14 }
 0x3ca   : > { %v3892_v45 = vmul.f32 %v5059_v48, %v6087_v44  ;;  %v3772_v47 = vpop.xlane.xlu1 %3771 }
 0x3cb   : > { %v5061_v37 = vpop.eup %5060  ;;  %5066 = vrcp.f32 %v3772_v47 }
 0x3cc   : > { %3992 = vst [vmem:[%s6136_s4 + $0xd8] sm:$0xff] %v3892_v45  ;;  %v3894_v43 = vmul.f32 %v5061_v37, %v6090_v1 }
 0x3cd   : > { %v5063_v16 = vpop.eup %5062 }
 0x3ce   : > { %3993 = vst [vmem:[%s6136_s4 + $0xe0] sm:$0xff] %v3894_v43  ;;  %v3896_v5 = vmul.f32 %v5063_v16, %v6093_v27 }
 0x3d0   : > { %3994 = vst [vmem:[%s6136_s4 + $0xe8] sm:$0xff] %v3896_v5  ;;  %v3774_v41 = vpop.xlane.xlu0 %3773 }
 0x3d1   : > { %5068 = vrcp.f32 %v3774_v41 }
 0x3d2   : > { %v3776_v40 = vpop.xlane.xlu1 %3775 }
 0x3d3   : > { %v5065_v0 = vpop.eup %5064  ;;  %5070 = vrcp.f32 %v3776_v40 }
 0x3d4   : > { %v3898_v44 = vmul.f32 %v5065_v0, %v6098_v57 }
 0x3d5   : > { %v5067_v18 = vpop.eup %5066 }
 0x3d6   : > { %3995 = vst [vmem:[%s6136_s4 + $0xf0] sm:$0xff] %v3898_v44  ;;  %v3900_v38 = vmul.f32 %v5067_v18, %v6101_v54 }
 0x3d8   : > { %3996 = vst [vmem:[%s6136_s4 + $0xf8] sm:$0xff] %v3900_v38  ;;  %v3778_v1 = vpop.xlane.xlu0 %3777 }
 0x3d9   : > { %5072 = vrcp.f32 %v3778_v1 }
 0x3da   : > { %v3780_v8 = vpop.xlane.xlu1 %3779 }
 0x3db   : > { %v5069_v27 = vpop.eup %5068  ;;  %5074 = vrcp.f32 %v3780_v8 }
 0x3dc   : > { %v3902_v63 = vmul.f32 %v5069_v27, %v6106_v56 }
 0x3dd   : > { %v5071_v35 = vpop.eup %5070 }
 0x3de   : > { %3997 = vst [vmem:[%s6136_s4 + $0x100] sm:$0xff] %v3902_v63  ;;  %v3904_v17 = vmul.f32 %v5071_v35, %v6109_v12 }
 0x3e0   : > { %3998 = vst [vmem:[%s6136_s4 + $0x108] sm:$0xff] %v3904_v17  ;;  %v3782_v57 = vpop.xlane.xlu0 %3781 }
 0x3e1   : > { %5076 = vrcp.f32 %v3782_v57 }
 0x3e3   : > { %v5073_v30 = vpop.eup %5072  ;;  %v3784_v54 = vpop.xlane.xlu1 %3783 }
 0x3e4   : > { %v3906_v59 = vmul.f32 %v5073_v30, %v6114_v36  ;;  %5078 = vrcp.f32 %v3784_v54 }
 0x3e5   : > { %v5075_v25 = vpop.eup %5074 }
 0x3e6   : > { %3999 = vst [vmem:[%s6136_s4 + $0x110] sm:$0xff] %v3906_v59  ;;  %v3908_v2 = vmul.f32 %v5075_v25, %v6117_v60 }
 0x3e8   : > { %4000 = vst [vmem:[%s6136_s4 + $0x118] sm:$0xff] %v3908_v2  ;;  %v3786_v56 = vpop.xlane.xlu0 %3785 }
 0x3e9   : > { %5080 = vrcp.f32 %v3786_v56 }
 0x3eb   : > { %v5077_v49 = vpop.eup %5076  ;;  %v3788_v12 = vpop.xlane.xlu1 %3787 }
 0x3ec   : > { %v3910_v28 = vmul.f32 %v5077_v49, %v6122_v32  ;;  %5082 = vrcp.f32 %v3788_v12 }
 0x3ee   : > { %v5079_v24 = vpop.eup %5078  ;;  %4001 = vst [vmem:[%s6136_s4 + $0x120] sm:$0xff] %v3910_v28 }
 0x3ef   : > { %v3912_v62 = vmul.f32 %v5079_v24, %v6125_v19 }
 0x3f1   : > { %4002 = vst [vmem:[%s6136_s4 + $0x128] sm:$0xff] %v3912_v62  ;;  %v3790_v36 = vpop.xlane.xlu0 %3789 }
 0x3f2   : > { %5084 = vrcp.f32 %v3790_v36 }
 0x3f3   : > { %v5081_v22 = vpop.eup %5080 }
 0x3f4   : > { %v3914_v60 = vmul.f32 %v5081_v22, %v6131_v33 }
 0x3f5   : > { %v3792_v3 = vpop.xlane.xlu1 %3791 }
 0x3f6   : > { %v5083_v14 = vpop.eup %5082  ;;  %4003 = vst [vmem:[%s6136_s4 + $0x130] sm:$0xff] %v3914_v60  ;;  %5086 = vrcp.f32 %v3792_v3 }
 0x3f7   : > { %v3916_v48 = vmul.f32 %v5083_v14, %v6140_v58 }
 0x3f9   : > { %4004 = vst [vmem:[%s6136_s4 + $0x138] sm:$0xff] %v3916_v48  ;;  %v3794_v32 = vpop.xlane.xlu0 %3793 }
 0x3fa   : > { %5088 = vrcp.f32 %v3794_v32 }
 0x3fc   : > { %v5085_v45 = vpop.eup %5084 }
 0x3fd   : > { %v3918_v19 = vmul.f32 %v5085_v45, %v6148_v31  ;;  %v3796_v47 = vpop.xlane.xlu1 %3795 }
 0x3fe   : > { %5090 = vrcp.f32 %v3796_v47 }
 0x3ff   : > { %4005 = vst [vmem:[%s6136_s4 + $0x140] sm:$0xff] %v3918_v19 }
 0x400   : > { %v5087_v37 = vpop.eup %5086 }
 0x401   : > { %v3920_v33 = vmul.f32 %v5087_v37, %v6153_v34 }
 0x402   : > { %v3798_v43 = vpop.xlane.xlu0 %3797 }
 0x403   : > { %5092 = vrcp.f32 %v3798_v43  ;;  %4006 = vst [vmem:[%s6136_s4 + $0x148] sm:$0xff] %v3920_v33 }
 0x404   : > { %v5089_v16 = vpop.eup %5088 }
 0x405   : > { %v3922_v58 = vmul.f32 %v5089_v16, %v6159_v10  ;;  %v3800_v5 = vpop.xlane.xlu1 %3799 }
 0x406   : > { %5094 = vrcp.f32 %v3800_v5 }
 0x407   : > { %4007 = vst [vmem:[%s6136_s4 + $0x150] sm:$0xff] %v3922_v58 }
 0x408   : > { %v5091_v41 = vpop.eup %5090 }
 0x409   : > { %v3924_v31 = vmul.f32 %v5091_v41, %v6165_v53 }
 0x40a   : > { %v3802_v40 = vpop.xlane.xlu0 %3801 }
 0x40b   : > { %5096 = vrcp.f32 %v3802_v40  ;;  %4008 = vst [vmem:[%s6136_s4 + $0x158] sm:$0xff] %v3924_v31 }
 0x40d   : > { %v5093_v0 = vpop.eup %5092  ;;  %v3804_v44 = vpop.xlane.xlu1 %3803 }
 0x40e   : > { %v3926_v34 = vmul.f32 %v5093_v0, %v6171_v39  ;;  %5098 = vrcp.f32 %v3804_v44 }
 0x410   : > { %4009 = vst [vmem:[%s6136_s4 + $0x160] sm:$0xff] %v3926_v34  ;;  %v5095_v18 = vpop.eup %5094 }
 0x411   : > { %v3928_v10 = vmul.f32 %v5095_v18, %v6177_v50 }
 0x412   : > { %v3806_v38 = vpop.xlane.xlu0 %3805 }
 0x413   : > { %5100 = vrcp.f32 %v3806_v38  ;;  %4010 = vst [vmem:[%s6136_s4 + $0x168] sm:$0xff] %v3928_v10 }
 0x415   : > { %v5097_v1 = vpop.eup %5096  ;;  %v3808_v8 = vpop.xlane.xlu1 %3807 }
 0x416   : > { %v3930_v53 = vmul.f32 %v5097_v1, %v6183_v51  ;;  %5102 = vrcp.f32 %v3808_v8 }
 0x418   : > { %4011 = vst [vmem:[%s6136_s4 + $0x170] sm:$0xff] %v3930_v53  ;;  %v5099_v27 = vpop.eup %5098 }
 0x419   : > { %v3932_v39 = vmul.f32 %v5099_v27, %v6189_v13 }
 0x41a   : > { %v3810_v63 = vpop.xlane.xlu0 %3809 }
 0x41b   : > { %5104 = vrcp.f32 %v3810_v63  ;;  %4012 = vst [vmem:[%s6136_s4 + $0x178] sm:$0xff] %v3932_v39 }
 0x41d   : > { %v5101_v35 = vpop.eup %5100  ;;  %v3812_v17 = vpop.xlane.xlu1 %3811 }
 0x41e   : > { %v3934_v50 = vmul.f32 %v5101_v35, %v6195_v29  ;;  %5106 = vrcp.f32 %v3812_v17 }
 0x420   : > { %4013 = vst [vmem:[%s6136_s4 + $0x180] sm:$0xff] %v3934_v50  ;;  %v5103_v57 = vpop.eup %5102 }
 0x421   : > { %v3936_v51 = vmul.f32 %v5103_v57, %v6201_v26 }
 0x422   : > { %v3814_v30 = vpop.xlane.xlu0 %3813 }
 0x423   : > { %5108 = vrcp.f32 %v3814_v30  ;;  %4014 = vst [vmem:[%s6136_s4 + $0x188] sm:$0xff] %v3936_v51 }
 0x425   : > { %v5105_v54 = vpop.eup %5104  ;;  %v3816_v59 = vpop.xlane.xlu1 %3815 }
 0x426   : > { %v3938_v13 = vmul.f32 %v5105_v54, %v6207_v46  ;;  %5110 = vrcp.f32 %v3816_v59 }
 0x428   : > { %4015 = vst [vmem:[%s6136_s4 + $0x190] sm:$0xff] %v3938_v13  ;;  %v5107_v25 = vpop.eup %5106 }
 0x429   : > { %v3940_v29 = vmul.f32 %v5107_v25, %v6213_v6 }
 0x42a   : > { %v3818_v2 = vpop.xlane.xlu0 %3817 }
 0x42b   : > { %5112 = vrcp.f32 %v3818_v2  ;;  %4016 = vst [vmem:[%s6136_s4 + $0x198] sm:$0xff] %v3940_v29 }
 0x42d   : > { %v5109_v56 = vpop.eup %5108  ;;  %v3820_v49 = vpop.xlane.xlu1 %3819 }
 0x42e   : > { %v3942_v26 = vmul.f32 %v5109_v56, %v6219_v55  ;;  %5114 = vrcp.f32 %v3820_v49 }
 0x430   : > { %4017 = vst [vmem:[%s6136_s4 + $0x1a0] sm:$0xff] %v3942_v26  ;;  %v5111_v12 = vpop.eup %5110 }
 0x431   : > { %v3944_v46 = vmul.f32 %v5111_v12, %v6225_v21 }
 0x432   : > { %v3822_v28 = vpop.xlane.xlu0 %3821 }
 0x433   : > { %5116 = vrcp.f32 %v3822_v28  ;;  %4018 = vst [vmem:[%s6136_s4 + $0x1a8] sm:$0xff] %v3944_v46 }
 0x435   : > { %v5113_v24 = vpop.eup %5112  ;;  %v3824_v62 = vpop.xlane.xlu1 %3823 }
 0x436   : > { %v3946_v6 = vmul.f32 %v5113_v24, %v6231_v52  ;;  %5118 = vrcp.f32 %v3824_v62 }
 0x438   : > { %4019 = vst [vmem:[%s6136_s4 + $0x1b0] sm:$0xff] %v3946_v6  ;;  %v5115_v36 = vpop.eup %5114 }
 0x439   : > { %v3948_v55 = vmul.f32 %v5115_v36, %v6237_v20 }
 0x43a   : > { %v3826_v22 = vpop.xlane.xlu0 %3825 }
 0x43b   : > { %5120 = vrcp.f32 %v3826_v22  ;;  %4020 = vst [vmem:[%s6136_s4 + $0x1b8] sm:$0xff] %v3948_v55 }
 0x43d   : > { %v5117_v60 = vpop.eup %5116  ;;  %v3828_v3 = vpop.xlane.xlu1 %3827 }
 0x43e   : > { %v3950_v21 = vmul.f32 %v5117_v60, %v6243_v42  ;;  %5122 = vrcp.f32 %v3828_v3 }
 0x440   : > { %4021 = vst [vmem:[%s6136_s4 + $0x1c0] sm:$0xff] %v3950_v21  ;;  %v5119_v14 = vpop.eup %5118  ;;  %v3830_v52 = vpop.xlane.xlu0 %3829 }
 0x441   : > { %v3952_v48 = vmul.f32 %v5119_v14, %v6249_v7  ;;  %5124 = vrcp.f32 %v3830_v52 }
 0x443   : > { %4022 = vst [vmem:[%s6136_s4 + $0x1c8] sm:$0xff] %v3952_v48  ;;  %v3832_v32 = vpop.xlane.xlu1 %3831 }
 0x444   : > { %5126 = vrcp.f32 %v3832_v32 }
 0x445   : > { %v5121_v20 = vpop.eup %5120 }
 0x446   : > { %v3954_v45 = vmul.f32 %v5121_v20, %v6255_v23 }
 0x448   : > { %4023 = vst [vmem:[%s6136_s4 + $0x1d0] sm:$0xff] %v3954_v45  ;;  %v5123_v19 = vpop.eup %5122  ;;  %v3834_v42 = vpop.xlane.xlu0 %3833 }
 0x449   : > { %v3956_v47 = vmul.f32 %v5123_v19, %v6260_v11  ;;  %5128 = vrcp.f32 %v3834_v42 }
 0x44b   : > { %v5125_v37 = vpop.eup %5124  ;;  %4024 = vst [vmem:[%s6136_s4 + $0x1d8] sm:$0xff] %v3956_v47  ;;  %v3836_v7 = vpop.xlane.xlu1 %3835 }
 0x44c   : > { %v3958_v33 = vmul.f32 %v5125_v37, %v6264_v4  ;;  %5130 = vrcp.f32 %v3836_v7 }
 0x44e   : > { %v5127_v43 = vpop.eup %5126  ;;  %4025 = vst [vmem:[%s6136_s4 + $0x1e0] sm:$0xff] %v3958_v33 }
 0x44f   : > { %v3960_v16 = vmul.f32 %v5127_v43, %v6267_v61 }
 0x451   : > { %4026 = vst [vmem:[%s6136_s4 + $0x1e8] sm:$0xff] %v3960_v16 }
 0x453   : > { %v5129_v23 = vpop.eup %5128 }
 0x454   : > { %v3962_v58 = vmul.f32 %v5129_v23, %v6270_v9 }
 0x456   : > { %v5131_v5 = vpop.eup %5130  ;;  %4027 = vst [vmem:[%s6136_s4 + $0x1f0] sm:$0xff] %v3962_v58 }
 0x457   : > { %v3964_v11 = vmul.f32 %v5131_v5, %v6274_v15 }
 0x459   : > { %4028 = vst [vmem:[%s6136_s4 + $0x1f8] sm:$0xff] %v3964_v11 }
 0x45a PF: > { %s13_s12 = sadd.s32 1, %s5139_s12  }
 0x45b   : > { %p10_p4 = scmp.ge.s32.totalorder %s13_s12, 4  }
 0x45d   :  { %12 = sbr.rel (!%p10_p4) target bundleno = 1 (0x1), region = 62 }

// kernel: gcn_forward.4
= control target key start
LH: loop header
LB: loop body
LE: loop exit
PB: predicated region body
PF: predicated region fallthrough
CT: control target
= control target key end

     0   :  { %s5553_s15 = smov 0   ;;  %s6493_s0 = inlined_call_operand.vmem [shape: bf16[1024,1024], index: 0, kind: input, shape index: {}]   ;;  %s6494_s1 = inlined_call_operand.vmem [shape: bf16[1024,128], index: 1, kind: input, shape index: {}]   ;;  %s6495_s2 = inlined_call_operand.vmem [shape: f32[1,128], index: 2, kind: input, shape index: {}]   ;;  %s6496_s3 = inlined_call_operand.vmem [shape: bf16[128,128], index: 3, kind: input, shape index: {}]   ;;  %s6497_s4 = inlined_call_operand.vmem [shape: bf16[1024,128], index: 4, kind: output, shape index: {}]  }
   0x1 LB: > { %s4241_s16 = sadd.s32 4294967295, %s5525_s15   ;;  %p4245_p0 = scmp.ge.s32.totalorder %s5525_s15, 1  ;;  %s5525_s15 = sphi %s5553_s15, %s14_s15  }
   0x2   : > { %p164_p1 = scmp.lt.s32.totalorder %s5525_s15, 3 }
   0x4   : > { %p165_p2 = pnand %p4245_p0, %p164_p1 }
   0x5   : > { %v5447_v0 = vld [vmem:[%s6494_s1] sm:$0xff] (!%p165_p2)   ;;  %v5527_v1 = vmov (!%p165_p2), 0   ;;  %v5449_v3 = vld [vmem:[%s6494_s1 + $0x8] sm:$0xff] (!%p165_p2)   ;;  %v5451_v5 = vld [vmem:[%s6494_s1 + $0x10] sm:$0xff] (!%p165_p2)   ;;  %s4246_s11 = sshll.u32 (!%p165_p2), %s4241_s16, 6 }
   0x6   : > { %168 = sbr.rel (%p165_p2) target bundleno = 1077 (0x435), region = 36  ;;  %2260 = vmatprep.subr.bf16.mxu1 (!%p165_p2), %v5527_v1  ;;  %2549 = vmatprep.subr.bf16.mxu0 (!%p165_p2), %v5527_v1  ;;  %v5569_v2 = vld [vmem:[%s6494_s1 + $0x80] sm:$0xff] (!%p165_p2)   ;;  %v5579_v4 = vld [vmem:[%s6494_s1 + $0x88] sm:$0xff] (!%p165_p2)   ;;  %v5590_v6 = vld [vmem:[%s6494_s1 + $0x90] sm:$0xff] (!%p165_p2)   ;;  %p192_p3 = scmp.lt.s32.totalorder (!%p165_p2), %s4246_s11, 127 }
   0x7   : > { %2261 = vmatpush1.bf16.msra.mxu1 (!%p165_p2), %v5447_v0  ;;  %2550 = vmatpush1.bf16.msra.mxu0 (!%p165_p2), %v5569_v2  ;;  %v5453_v7 = vld [vmem:[%s6494_s1 + $0x18] sm:$0xff] (!%p165_p2)   ;;  %v5455_v9 = vld [vmem:[%s6494_s1 + $0x20] sm:$0xff] (!%p165_p2)   ;;  %v5457_v11 = vld [vmem:[%s6494_s1 + $0x28] sm:$0xff] (!%p165_p2)  }
   0x8   : > { %2262 = vmatprep.subr.bf16.mxu1 (!%p165_p2), %v5527_v1  ;;  %2551 = vmatprep.subr.bf16.mxu0 (!%p165_p2), %v5527_v1  ;;  %v5601_v8 = vld [vmem:[%s6494_s1 + $0x98] sm:$0xff] (!%p165_p2)   ;;  %v5612_v10 = vld [vmem:[%s6494_s1 + $0xa0] sm:$0xff] (!%p165_p2)   ;;  %v5625_v12 = vld [vmem:[%s6494_s1 + $0xa8] sm:$0xff] (!%p165_p2)  }
   0x9   : > { %v5459_v13 = vld [vmem:[%s6494_s1 + $0x30] sm:$0xff] (!%p165_p2)   ;;  %v5461_v15 = vld [vmem:[%s6494_s1 + $0x38] sm:$0xff] (!%p165_p2)   ;;  %v5463_v17 = vld [vmem:[%s6494_s1 + $0x40] sm:$0xff] (!%p165_p2)  }
   0xa   : > { %v5638_v14 = vld [vmem:[%s6494_s1 + $0xb0] sm:$0xff] (!%p165_p2)   ;;  %v5650_v16 = vld [vmem:[%s6494_s1 + $0xb8] sm:$0xff] (!%p165_p2)   ;;  %v5666_v18 = vld [vmem:[%s6494_s1 + $0xc0] sm:$0xff] (!%p165_p2)  }
   0xb   : > { %2263 = vmatpush1.bf16.msra.mxu1 (!%p165_p2), %v5449_v3  ;;  %2552 = vmatpush1.bf16.msra.mxu0 (!%p165_p2), %v5579_v4  ;;  %v5465_v24 = vld [vmem:[%s6494_s1 + $0x48] sm:$0xff] (!%p165_p2)   ;;  %v5467_v27 = vld [vmem:[%s6494_s1 + $0x50] sm:$0xff] (!%p165_p2)   ;;  %v5469_v29 = vld [vmem:[%s6494_s1 + $0x58] sm:$0xff] (!%p165_p2)  }
   0xc   : > { %2264 = vmatprep.subr.bf16.mxu1 (!%p165_p2), %v5527_v1  ;;  %2553 = vmatprep.subr.bf16.mxu0 (!%p165_p2), %v5527_v1  ;;  %v5684_v26 = vld [vmem:[%s6494_s1 + $0xc8] sm:$0xff] (!%p165_p2)   ;;  %v5695_v28 = vld [vmem:[%s6494_s1 + $0xd0] sm:$0xff] (!%p165_p2)   ;;  %v5706_v30 = vld [vmem:[%s6494_s1 + $0xd8] sm:$0xff] (!%p165_p2)  }
   0xd   : > { %s6499_s11 = smov (!%p192_p3, %s4246_s11), 127  ;;  %v5471_v31 = vld [vmem:[%s6494_s1 + $0x60] sm:$0xff]   ;;  %v5473_v33 = vld [vmem:[%s6494_s1 + $0x68] sm:$0xff]   ;;  %v5475_v35 = vld [vmem:[%s6494_s1 + $0x70] sm:$0xff]  }
   0xe   : > { %s4646_s23 = sshll.u32 %s6499_s11, 5  ;;  %v5717_v32 = vld [vmem:[%s6494_s1 + $0xe0] sm:$0xff]   ;;  %v5728_v34 = vld [vmem:[%s6494_s1 + $0xe8] sm:$0xff]   ;;  %v5739_v36 = vld [vmem:[%s6494_s1 + $0xf0] sm:$0xff]  }
   0xf   : > { %2265 = vmatpush1.bf16.msra.mxu1 %v5451_v5  ;;  %2554 = vmatpush1.bf16.msra.mxu0 %v5590_v6  ;;  %s5656_s28 = scalar_lea.vmem %s6493_s0, %s4646_s23  ;;  %v5477_v37 = vld [vmem:[%s6494_s1 + $0x78] sm:$0xff]   ;;  %v5479_v46 = vld [vmem:[%s6494_s1 + $0x100] sm:$0xff]   ;;  %v5480_v48 = vld [vmem:[%s6494_s1 + $0x108] sm:$0xff]  }
  0x10   : > { %2266 = vmatprep.subr.bf16.mxu1 %v5527_v1  ;;  %2555 = vmatprep.subr.bf16.mxu0 %v5527_v1  ;;  %v5670_v19 = vld [vmem:[%s5656_s28] sm:$0xff]  ;;  %v206_v21 = vld [vmem:[%s5656_s28 + $0x8] sm:$0xff]  ;;  %v5748_v38 = vld [vmem:[%s6494_s1 + $0xf8] sm:$0xff]  }
  0x11   : > { %v209_v20 = vld [vmem:[%s5656_s28 + $0x20] sm:$0xff]  ;;  %v210_v23 = vld [vmem:[%s5656_s28 + $0x28] sm:$0xff]  ;;  %v5481_v56 = vld [vmem:[%s6494_s1 + $0x110] sm:$0xff]  }
  0x12   : > { %v4253_v22 = vcombine.high %v5670_v19, %v209_v20  ;;  %v4255_v25 = vcombine.high %v206_v21, %v210_v23  ;;  %v213_v39 = vld [vmem:[%s5656_s28 + $0x40] sm:$0xff]  ;;  %v214_v41 = vld [vmem:[%s5656_s28 + $0x48] sm:$0xff]  ;;  %v4252_v43 = vcombine.low %v5670_v19, %v209_v20  ;;  %v4254_v44 = vcombine.low %v206_v21, %v210_v23  ;;  %v5482_v58 = vld [vmem:[%s6494_s1 + $0x118] sm:$0xff]  }
  0x13   : > { %2267 = vmatpush1.bf16.msra.mxu1 %v5453_v7  ;;  %2556 = vmatpush1.bf16.msra.mxu0 %v5601_v8  ;;  %v217_v40 = vld [vmem:[%s5656_s28 + $0x60] sm:$0xff]  ;;  %v218_v42 = vld [vmem:[%s5656_s28 + $0x68] sm:$0xff] }
  0x14   : > { %2268 = vmatprep.subr.bf16.mxu1 %v5527_v1  ;;  %2557 = vmatprep.subr.bf16.mxu0 %v5527_v1  ;;  %v4261_v45 = vcombine.high %v213_v39, %v217_v40  ;;  %v4263_v47 = vcombine.high %v214_v41, %v218_v42  ;;  %v221_v49 = vld [vmem:[%s5656_s28 + $0x80] sm:$0xff]  ;;  %v222_v51 = vld [vmem:[%s5656_s28 + $0x88] sm:$0xff]  ;;  %v4260_v53 = vcombine.low %v213_v39, %v217_v40 }
  0x15   : > { %2292 = vmatprep.mubr.bf16.mxu1 %v4253_v22  ;;  %2581 = vmatprep.mubr.bf16.mxu0 %v4255_v25  ;;  %v225_v50 = vld [vmem:[%s5656_s28 + $0xa0] sm:$0xff]  ;;  %v226_v52 = vld [vmem:[%s5656_s28 + $0xa8] sm:$0xff]  ;;  %v4262_v54 = vcombine.low %v214_v41, %v218_v42  ;;  %v5489_v41 = vld [vmem:[%s6494_s1 + $0x150] sm:$0xff]  }
  0x16   : > { %v4269_v55 = vcombine.high %v221_v49, %v225_v50  ;;  %v4271_v57 = vcombine.high %v222_v51, %v226_v52  ;;  %v229_v59 = vld [vmem:[%s5656_s28 + $0xc0] sm:$0xff]  ;;  %v230_v61 = vld [vmem:[%s5656_s28 + $0xc8] sm:$0xff]  ;;  %v4268_v63 = vcombine.low %v221_v49, %v225_v50  ;;  %v4270_v0 = vcombine.low %v222_v51, %v226_v52 }
  0x17   : > { %2269 = vmatpush1.bf16.msra.mxu1 %v5455_v9  ;;  %2558 = vmatpush1.bf16.msra.mxu0 %v5612_v10  ;;  %v233_v60 = vld [vmem:[%s5656_s28 + $0xe0] sm:$0xff]  ;;  %v234_v62 = vld [vmem:[%s5656_s28 + $0xe8] sm:$0xff] }
  0x18   : > { %2270 = vmatprep.subr.bf16.mxu1 %v5527_v1  ;;  %2559 = vmatprep.subr.bf16.mxu0 %v5527_v1  ;;  %v4277_v3 = vcombine.high %v229_v59, %v233_v60  ;;  %v5484_v5 = vld [vmem:[%s6494_s1 + $0x128] sm:$0xff]   ;;  %v241_v7 = vld [vmem:[%s5656_s28 + $0x120] sm:$0xff] }
  0x19   : > { %v238_v9 = vld [vmem:[%s5656_s28 + $0x108] sm:$0xff]  ;;  %v245_v20 = vld [vmem:[%s5656_s28 + $0x140] sm:$0xff] }
  0x1a   : > { %v249_v21 = vld [vmem:[%s5656_s28 + $0x160] sm:$0xff]  ;;  %v246_v22 = vld [vmem:[%s5656_s28 + $0x148] sm:$0xff] }
  0x1b   : > { %2271 = vmatpush1.bf16.msra.mxu1 %v5457_v11  ;;  %2560 = vmatpush1.bf16.msra.mxu0 %v5625_v12  ;;  %v242_v11 = vld [vmem:[%s5656_s28 + $0x128] sm:$0xff]  ;;  %v4293_v25 = vcombine.high %v245_v20, %v249_v21  ;;  %v5491_v49 = vld [vmem:[%s6494_s1 + $0x160] sm:$0xff]  }
  0x1c   : > { %2272 = vmatprep.subr.bf16.mxu1 %v5527_v1  ;;  %2561 = vmatprep.subr.bf16.mxu0 %v5527_v1  ;;  %v4287_v19 = vcombine.high %v238_v9, %v242_v11  ;;  %v250_v23 = vld [vmem:[%s5656_s28 + $0x168] sm:$0xff]  ;;  %v269_v51 = vld [vmem:[%s5656_s28 + $0x200] sm:$0xff] }
  0x1d   : > { %v4294_v39 = vcombine.low %v246_v22, %v250_v23  ;;  %v273_v52 = vld [vmem:[%s5656_s28 + $0x220] sm:$0xff] }
  0x1f   : > { %2273 = vmatpush1.bf16.msra.mxu1 %v5459_v13  ;;  %2562 = vmatpush1.bf16.msra.mxu0 %v5638_v14  ;;  %v5485_v13 = vld [vmem:[%s6494_s1 + $0x130] sm:$0xff]  }
  0x20   : > { %2274 = vmatprep.subr.bf16.mxu1 %v5527_v1  ;;  %2563 = vmatprep.subr.bf16.mxu0 %v5527_v1 }
  0x23   : > { %2275 = vmatpush1.bf16.msra.mxu1 %v5461_v15  ;;  %2564 = vmatpush1.bf16.msra.mxu0 %v5650_v16  ;;  %v4278_v15 = vcombine.low %v230_v61, %v234_v62 }
  0x24   : > { %2276 = vmatprep.subr.bf16.mxu1 %v5527_v1  ;;  %2565 = vmatprep.subr.bf16.mxu0 %v5527_v1 }
  0x27   : > { %2277 = vmatpush1.bf16.msra.mxu1 %v5463_v17  ;;  %2566 = vmatpush1.bf16.msra.mxu0 %v5666_v18 }
  0x28   : > { %2278 = vmatprep.subr.bf16.mxu1 %v5527_v1  ;;  %2567 = vmatprep.subr.bf16.mxu0 %v5527_v1 }
  0x2b   : > { %2279 = vmatpush1.bf16.msra.mxu1 %v5465_v24  ;;  %2568 = vmatpush1.bf16.msra.mxu0 %v5684_v26  ;;  %v4286_v24 = vcombine.low %v238_v9, %v242_v11 }
  0x2c   : > { %2280 = vmatprep.subr.bf16.mxu1 %v5527_v1  ;;  %2569 = vmatprep.subr.bf16.mxu0 %v5527_v1 }
  0x2f   : > { %2281 = vmatpush1.bf16.msra.mxu1 %v5467_v27  ;;  %2570 = vmatpush1.bf16.msra.mxu0 %v5695_v28  ;;  %v5487_v27 = vld [vmem:[%s6494_s1 + $0x140] sm:$0xff]  }
  0x30   : > { %2282 = vmatprep.subr.bf16.mxu1 %v5527_v1  ;;  %2571 = vmatprep.subr.bf16.mxu0 %v5527_v1 }
  0x33   : > { %2283 = vmatpush1.bf16.msra.mxu1 %v5469_v29  ;;  %2572 = vmatpush1.bf16.msra.mxu0 %v5706_v30  ;;  %v4295_v29 = vcombine.high %v246_v22, %v250_v23 }
  0x34   : > { %2284 = vmatprep.subr.bf16.mxu1 %v5527_v1  ;;  %2573 = vmatprep.subr.bf16.mxu0 %v5527_v1 }
  0x37   : > { %2285 = vmatpush1.bf16.msra.mxu1 %v5471_v31  ;;  %2574 = vmatpush1.bf16.msra.mxu0 %v5717_v32  ;;  %v253_v31 = vld [vmem:[%s5656_s28 + $0x180] sm:$0xff] }
  0x38   : > { %2286 = vmatprep.subr.bf16.mxu1 %v5527_v1  ;;  %2575 = vmatprep.subr.bf16.mxu0 %v5527_v1 }
  0x3b   : > { %2287 = vmatpush1.bf16.msra.mxu1 %v5473_v33  ;;  %2576 = vmatpush1.bf16.msra.mxu0 %v5728_v34  ;;  %v257_v33 = vld [vmem:[%s5656_s28 + $0x1a0] sm:$0xff] }
  0x3c   : > { %2288 = vmatprep.subr.bf16.mxu1 %v5527_v1  ;;  %2577 = vmatprep.subr.bf16.mxu0 %v5527_v1  ;;  %v4301_v40 = vcombine.high %v253_v31, %v257_v33 }
  0x3f   : > { %2289 = vmatpush1.bf16.msra.mxu1 %v5475_v35  ;;  %2578 = vmatpush1.bf16.msra.mxu0 %v5739_v36  ;;  %v254_v35 = vld [vmem:[%s5656_s28 + $0x188] sm:$0xff] }
  0x40   : > { %2290 = vmatprep.subr.bf16.mxu1 %v5527_v1  ;;  %2579 = vmatprep.subr.bf16.mxu0 %v5527_v1 }
  0x43   : > { %2291 = vmatpush1.bf16.msra.mxu1 %v5477_v37  ;;  %2580 = vmatpush1.bf16.msra.mxu0 %v5748_v38  ;;  %v258_v37 = vld [vmem:[%s5656_s28 + $0x1a8] sm:$0xff] }
  0x44   : > { %2838 = vmatprep.subr.bf16.mxu0 %v5527_v1  ;;  %5022 = vmatprep.subr.bf16.mxu1 %v5527_v1  ;;  %v4303_v42 = vcombine.high %v254_v35, %v258_v37 }
  0x46   : > { %2293 = vmatmul.mubr.bf16.vlgmr.msra.gmra.mrb[0].mxu1 %v4252_v43  ;;  %2582 = vmatmul.mubr.bf16.vlgmr.msra.gmra.mrb[0].mxu0 %v4254_v44  ;;  %v261_v43 = vld [vmem:[%s5656_s28 + $0x1c0] sm:$0xff] }
  0x47   : > { %2300 = vmatprep.mubr.bf16.mxu1 %v4261_v45  ;;  %2839 = vmatpush1.bf16.msra.mxu0 %v5479_v46  ;;  %v265_v44 = vld [vmem:[%s5656_s28 + $0x1e0] sm:$0xff]  ;;  %v262_v45 = vld [vmem:[%s5656_s28 + $0x1c8] sm:$0xff] }
  0x48   : > { %2589 = vmatprep.mubr.bf16.mxu0 %v4263_v47  ;;  %2840 = vmatprep.subr.bf16.mxu0 %v5527_v1  ;;  %v266_v46 = vld [vmem:[%s5656_s28 + $0x1e8] sm:$0xff]  ;;  %v4302_v47 = vcombine.low %v254_v35, %v258_v37 }
  0x49   : > { %5038 = vmatpush1.bf16.msra.mxu1 %v5569_v2  ;;  %v5483_v2 = vld [vmem:[%s6494_s1 + $0x120] sm:$0xff]   ;;  %v4311_v50 = vcombine.high %v262_v45, %v266_v46 }
  0x4a   : > { %5023 = vmatprep.subr.bf16.mxu1 %v5527_v1 }
  0x4b   : > { %2841 = vmatpush1.bf16.msra.mxu0 %v5480_v48  ;;  %v4309_v48 = vcombine.high %v261_v43, %v265_v44 }
  0x4c   : > { %2842 = vmatprep.subr.bf16.mxu0 %v5527_v1 }
  0x4d   : > { %5039 = vmatpush1.bf16.msra.mxu1 %v5579_v4  ;;  %v4279_v4 = vcombine.high %v230_v61, %v234_v62  ;;  %v215_v61 = vld [vmem:[%s5656_s28 + $0x50] sm:$0xff] }
  0x4e   : > { %2301 = vmatmul.mubr.bf16.gmra.mrb[4].mxu1 %v4260_v53  ;;  %5024 = vmatprep.subr.bf16.mxu1 %v5527_v1  ;;  %v207_v53 = vld [vmem:[%s5656_s28 + $0x10] sm:$0xff] }
  0x4f   : > { %2590 = vmatmul.mubr.bf16.gmra.mrb[4].mxu0 %v4262_v54  ;;  %2308 = vmatprep.mubr.bf16.mxu1 %v4269_v55  ;;  %v211_v54 = vld [vmem:[%s5656_s28 + $0x30] sm:$0xff]  ;;  %v4310_v55 = vcombine.low %v262_v45, %v266_v46 }
  0x50   : > { %2843 = vmatpush1.bf16.msra.mxu0 %v5481_v56  ;;  %2597 = vmatprep.mubr.bf16.mxu0 %v4271_v57  ;;  %v4317_v56 = vcombine.high %v269_v51, %v273_v52  ;;  %v5493_v57 = vld [vmem:[%s6494_s1 + $0x170] sm:$0xff]  }
  0x51   : > { %2844 = vmatprep.subr.bf16.mxu0 %v5527_v1  ;;  %5040 = vmatpush1.bf16.msra.mxu1 %v5590_v6  ;;  %v237_v6 = vld [vmem:[%s5656_s28 + $0x100] sm:$0xff]  ;;  %v219_v62 = vld [vmem:[%s5656_s28 + $0x70] sm:$0xff] }
  0x52   : > { %5025 = vmatprep.subr.bf16.mxu1 %v5527_v1  ;;  %v4285_v17 = vcombine.high %v237_v6, %v241_v7 }
  0x54   : > { %2845 = vmatpush1.bf16.msra.mxu0 %v5482_v58  ;;  %v4257_v58 = vcombine.high %v207_v53, %v211_v54 }
  0x55   : > { %2846 = vmatprep.subr.bf16.mxu0 %v5527_v1  ;;  %5041 = vmatpush1.bf16.msra.mxu1 %v5601_v8  ;;  %v4276_v8 = vcombine.low %v229_v59, %v233_v60  ;;  %v277_v59 = vld [vmem:[%s5656_s28 + $0x240] sm:$0xff] }
  0x56   : > { %2309 = vmatmul.mubr.bf16.gmra.mrb[8].mxu1 %v4268_v63  ;;  %5026 = vmatprep.subr.bf16.mxu1 %v5527_v1  ;;  %v281_v60 = vld [vmem:[%s5656_s28 + $0x260] sm:$0xff]  ;;  %v4256_v63 = vcombine.low %v207_v53, %v211_v54 }
  0x57   : > { %2598 = vmatmul.mubr.bf16.gmra.mrb[8].mxu0 %v4270_v0  ;;  %2316 = vmatprep.mubr.bf16.mxu1 %v4277_v3  ;;  %v4325_v0 = vcombine.high %v277_v59, %v281_v60  ;;  %v4265_v3 = vcombine.high %v215_v61, %v219_v62  ;;  %v4324_v9 = vcombine.low %v277_v59, %v281_v60 }
  0x58   : > { %2847 = vmatpush1.bf16.msra.mxu0 %v5483_v2  ;;  %2605 = vmatprep.mubr.bf16.mxu0 %v4279_v4  ;;  %v5495_v2 = vld [vmem:[%s6494_s1 + $0x180] sm:$0xff]  }
  0x59   : > { %2848 = vmatprep.subr.bf16.mxu0 %v5527_v1  ;;  %5042 = vmatpush1.bf16.msra.mxu1 %v5612_v10  ;;  %v5486_v10 = vld [vmem:[%s6494_s1 + $0x138] sm:$0xff]   ;;  %v289_v4 = vld [vmem:[%s5656_s28 + $0x2a0] sm:$0xff] }
  0x5a   : > { %5027 = vmatprep.subr.bf16.mxu1 %v5527_v1 }
  0x5c   : > { %2849 = vmatpush1.bf16.msra.mxu0 %v5484_v5  ;;  %v5496_v5 = vld [vmem:[%s6494_s1 + $0x188] sm:$0xff]  }
  0x5d   : > { %2850 = vmatprep.subr.bf16.mxu0 %v5527_v1  ;;  %5043 = vmatpush1.bf16.msra.mxu1 %v5625_v12  ;;  %v4284_v12 = vcombine.low %v237_v6, %v241_v7  ;;  %v223_v6 = vld [vmem:[%s5656_s28 + $0x90] sm:$0xff] }
  0x5e   : > { %2317 = vmatmul.mubr.bf16.gmra.mrb[12].mxu1 %v4276_v8  ;;  %5028 = vmatprep.subr.bf16.mxu1 %v5527_v1  ;;  %v227_v7 = vld [vmem:[%s5656_s28 + $0xb0] sm:$0xff] }
  0x5f   : > { %2606 = vmatmul.mubr.bf16.gmra.mrb[12].mxu0 %v4278_v15  ;;  %2324 = vmatprep.mubr.bf16.mxu1 %v4285_v17  ;;  %v4273_v8 = vcombine.high %v223_v6, %v227_v7  ;;  %v293_v15 = vld [vmem:[%s5656_s28 + $0x2c0] sm:$0xff]  ;;  %v4272_v22 = vcombine.low %v223_v6, %v227_v7 }
  0x60   : > { %2851 = vmatpush1.bf16.msra.mxu0 %v5485_v13  ;;  %2613 = vmatprep.mubr.bf16.mxu0 %v4287_v19  ;;  %v5497_v13 = vld [vmem:[%s6494_s1 + $0x190] sm:$0xff]   ;;  %v297_v17 = vld [vmem:[%s5656_s28 + $0x2e0] sm:$0xff]  ;;  %v5498_v19 = vld [vmem:[%s6494_s1 + $0x198] sm:$0xff]  }
  0x61   : > { %2852 = vmatprep.subr.bf16.mxu0 %v5527_v1  ;;  %5044 = vmatpush1.bf16.msra.mxu1 %v5638_v14  ;;  %v5488_v14 = vld [vmem:[%s6494_s1 + $0x148] sm:$0xff]   ;;  %v4341_v23 = vcombine.high %v293_v15, %v297_v17  ;;  %v341_v7 = vld [vmem:[%s5656_s28 + $0x440] sm:$0xff] }
  0x62   : > { %5029 = vmatprep.subr.bf16.mxu1 %v5527_v1 }
  0x64   : > { %2853 = vmatpush1.bf16.msra.mxu0 %v5486_v10  ;;  %v231_v10 = vld [vmem:[%s5656_s28 + $0xd0] sm:$0xff] }
  0x65   : > { %2854 = vmatprep.subr.bf16.mxu0 %v5527_v1  ;;  %5045 = vmatpush1.bf16.msra.mxu1 %v5650_v16  ;;  %v4292_v16 = vcombine.low %v245_v20, %v249_v21  ;;  %v235_v20 = vld [vmem:[%s5656_s28 + $0xf0] sm:$0xff] }
  0x66   : > { %2325 = vmatmul.mubr.bf16.gmra.mrb[16].mxu1 %v4284_v12  ;;  %5030 = vmatprep.subr.bf16.mxu1 %v5527_v1  ;;  %v4281_v12 = vcombine.high %v231_v10, %v235_v20  ;;  %v4280_v35 = vcombine.low %v231_v10, %v235_v20  ;;  %v349_v10 = vld [vmem:[%s5656_s28 + $0x480] sm:$0xff] }
  0x67   : > { %2614 = vmatmul.mubr.bf16.gmra.mrb[16].mxu0 %v4286_v24  ;;  %2332 = vmatprep.mubr.bf16.mxu1 %v4293_v25  ;;  %v5499_v24 = vld [vmem:[%s6494_s1 + $0x1a0] sm:$0xff]  }
  0x68   : > { %2855 = vmatpush1.bf16.msra.mxu0 %v5487_v27  ;;  %2621 = vmatprep.mubr.bf16.mxu0 %v4295_v29  ;;  %v301_v25 = vld [vmem:[%s5656_s28 + $0x300] sm:$0xff]  ;;  %v5500_v29 = vld [vmem:[%s6494_s1 + $0x1a8] sm:$0xff]  }
  0x69   : > { %2856 = vmatprep.subr.bf16.mxu0 %v5527_v1  ;;  %5046 = vmatpush1.bf16.msra.mxu1 %v5666_v18  ;;  %v5490_v18 = vld [vmem:[%s6494_s1 + $0x158] sm:$0xff]   ;;  %v305_v27 = vld [vmem:[%s5656_s28 + $0x320] sm:$0xff] }
  0x6a   : > { %5031 = vmatprep.subr.bf16.mxu1 %v5527_v1  ;;  %v4349_v37 = vcombine.high %v301_v25, %v305_v27  ;;  %v353_v20 = vld [vmem:[%s5656_s28 + $0x4a0] sm:$0xff] }
  0x6c   : > { %2857 = vmatpush1.bf16.msra.mxu0 %v5488_v14  ;;  %v239_v14 = vld [vmem:[%s5656_s28 + $0x110] sm:$0xff] }
  0x6d   : > { %2858 = vmatprep.subr.bf16.mxu0 %v5527_v1  ;;  %5047 = vmatpush1.bf16.msra.mxu1 %v5684_v26  ;;  %v4300_v26 = vcombine.low %v253_v31, %v257_v33  ;;  %v243_v31 = vld [vmem:[%s5656_s28 + $0x130] sm:$0xff]  ;;  %v4340_v33 = vcombine.low %v293_v15, %v297_v17 }
  0x6e   : > { %2333 = vmatmul.mubr.bf16.gmra.mrb[20].mxu1 %v4292_v16  ;;  %5032 = vmatprep.subr.bf16.mxu1 %v5527_v1  ;;  %v4289_v16 = vcombine.high %v239_v14, %v243_v31  ;;  %v4288_v45 = vcombine.low %v239_v14, %v243_v31  ;;  %v295_v14 = vld [vmem:[%s5656_s28 + $0x2d0] sm:$0xff] }
  0x6f   : > { %2622 = vmatmul.mubr.bf16.gmra.mrb[20].mxu0 %v4294_v39  ;;  %2340 = vmatprep.mubr.bf16.mxu1 %v4301_v40  ;;  %v5501_v39 = vld [vmem:[%s6494_s1 + $0x1b0] sm:$0xff]   ;;  %v309_v40 = vld [vmem:[%s5656_s28 + $0x340] sm:$0xff] }
  0x70   : > { %2859 = vmatpush1.bf16.msra.mxu0 %v5489_v41  ;;  %2629 = vmatprep.mubr.bf16.mxu0 %v4303_v42  ;;  %v313_v41 = vld [vmem:[%s5656_s28 + $0x360] sm:$0xff]  ;;  %v5502_v42 = vld [vmem:[%s6494_s1 + $0x1b8] sm:$0xff]   ;;  %v299_v31 = vld [vmem:[%s5656_s28 + $0x2f0] sm:$0xff] }
  0x71   : > { %2860 = vmatprep.subr.bf16.mxu0 %v5527_v1  ;;  %5048 = vmatpush1.bf16.msra.mxu1 %v5695_v28  ;;  %v5492_v28 = vld [vmem:[%s6494_s1 + $0x168] sm:$0xff]   ;;  %v4357_v46 = vcombine.high %v309_v40, %v313_v41 }
  0x72   : > { %5033 = vmatprep.subr.bf16.mxu1 %v5527_v1 }
  0x74   : > { %2861 = vmatpush1.bf16.msra.mxu0 %v5490_v18  ;;  %v247_v18 = vld [vmem:[%s5656_s28 + $0x150] sm:$0xff] }
  0x75   : > { %2862 = vmatprep.subr.bf16.mxu0 %v5527_v1  ;;  %5049 = vmatpush1.bf16.msra.mxu1 %v5706_v30  ;;  %v4308_v30 = vcombine.low %v261_v43, %v265_v44  ;;  %v251_v43 = vld [vmem:[%s5656_s28 + $0x170] sm:$0xff]  ;;  %v4348_v44 = vcombine.low %v301_v25, %v305_v27  ;;  %v357_v27 = vld [vmem:[%s5656_s28 + $0x4c0] sm:$0xff] }
  0x76   : > { %2341 = vmatmul.mubr.bf16.gmra.mrb[24].mxu1 %v4300_v26  ;;  %5034 = vmatprep.subr.bf16.mxu1 %v5527_v1  ;;  %v4297_v26 = vcombine.high %v247_v18, %v251_v43  ;;  %v4296_v53 = vcombine.low %v247_v18, %v251_v43  ;;  %v307_v18 = vld [vmem:[%s5656_s28 + $0x330] sm:$0xff] }
  0x77   : > { %2630 = vmatmul.mubr.bf16.gmra.mrb[24].mxu0 %v4302_v47  ;;  %2348 = vmatprep.mubr.bf16.mxu1 %v4309_v48  ;;  %v5503_v47 = vld [vmem:[%s6494_s1 + $0x1c0] sm:$0xff]  }
  0x78   : > { %2863 = vmatpush1.bf16.msra.mxu0 %v5491_v49  ;;  %2637 = vmatprep.mubr.bf16.mxu0 %v4311_v50  ;;  %v317_v48 = vld [vmem:[%s5656_s28 + $0x380] sm:$0xff]  ;;  %v5504_v50 = vld [vmem:[%s6494_s1 + $0x1c8] sm:$0xff]  }
  0x79   : > { %2864 = vmatprep.subr.bf16.mxu0 %v5527_v1  ;;  %5050 = vmatpush1.bf16.msra.mxu1 %v5717_v32  ;;  %v5494_v32 = vld [vmem:[%s6494_s1 + $0x178] sm:$0xff]   ;;  %v321_v49 = vld [vmem:[%s5656_s28 + $0x3a0] sm:$0xff] }
  0x7a   : > { %5035 = vmatprep.subr.bf16.mxu1 %v5527_v1  ;;  %v4365_v54 = vcombine.high %v317_v48, %v321_v49  ;;  %v4364_v59 = vcombine.low %v317_v48, %v321_v49  ;;  %v311_v48 = vld [vmem:[%s5656_s28 + $0x350] sm:$0xff] }
  0x7b   : > { %v315_v49 = vld [vmem:[%s5656_s28 + $0x370] sm:$0xff] }
  0x7c   : > { %2865 = vmatpush1.bf16.msra.mxu0 %v5492_v28  ;;  %v255_v28 = vld [vmem:[%s5656_s28 + $0x190] sm:$0xff] }
  0x7d   : > { %2866 = vmatprep.subr.bf16.mxu0 %v5527_v1  ;;  %5051 = vmatpush1.bf16.msra.mxu1 %v5728_v34  ;;  %v4316_v34 = vcombine.low %v269_v51, %v273_v52  ;;  %v259_v51 = vld [vmem:[%s5656_s28 + $0x1b0] sm:$0xff]  ;;  %v4356_v52 = vcombine.low %v309_v40, %v313_v41  ;;  %v365_v40 = vld [vmem:[%s5656_s28 + $0x500] sm:$0xff] }
  0x7e   : > { %2349 = vmatmul.mubr.bf16.gmra.mrb[28].mxu1 %v4308_v30  ;;  %5036 = vmatprep.subr.bf16.mxu1 %v5527_v1  ;;  %v4305_v30 = vcombine.high %v255_v28, %v259_v51  ;;  %v4304_v60 = vcombine.low %v255_v28, %v259_v51  ;;  %v369_v41 = vld [vmem:[%s5656_s28 + $0x520] sm:$0xff] }
  0x7f   : > { %2638 = vmatmul.mubr.bf16.gmra.mrb[28].mxu0 %v4310_v55  ;;  %2356 = vmatprep.mubr.bf16.mxu1 %v4317_v56  ;;  %v5505_v55 = vld [vmem:[%s6494_s1 + $0x1d0] sm:$0xff]   ;;  %v325_v56 = vld [vmem:[%s5656_s28 + $0x3c0] sm:$0xff] }
  0x80   : > { %2867 = vmatpush1.bf16.msra.mxu0 %v5493_v57  ;;  %2870 = vmatprep.mubr.bf16.mxu0 %v4257_v58  ;;  %v329_v57 = vld [vmem:[%s5656_s28 + $0x3e0] sm:$0xff]  ;;  %v263_v58 = vld [vmem:[%s5656_s28 + $0x1d0] sm:$0xff] }
  0x81   : > { %2868 = vmatprep.subr.bf16.mxu0 %v5527_v1  ;;  %5052 = vmatpush1.bf16.msra.mxu1 %v5739_v36  ;;  %v285_v36 = vld [vmem:[%s5656_s28 + $0x280] sm:$0xff] }
  0x82   : > { %5037 = vmatprep.subr.bf16.mxu1 %v5527_v1  ;;  %v4333_v11 = vcombine.high %v285_v36, %v289_v4  ;;  %v4332_v21 = vcombine.low %v285_v36, %v289_v4  ;;  %v4372_v36 = vcombine.low %v325_v56, %v329_v57 }
  0x84   : > { %2869 = vmatpush1.bf16.msra.mxu0 %v5494_v32  ;;  %v267_v32 = vld [vmem:[%s5656_s28 + $0x1f0] sm:$0xff] }
  0x85   : > { %3127 = vmatprep.subr.bf16.mxu0 %v5527_v1  ;;  %5053 = vmatpush1.bf16.msra.mxu1 %v5748_v38  ;;  %v4264_v38 = vcombine.low %v215_v61, %v219_v62  ;;  %v4373_v61 = vcombine.high %v325_v56, %v329_v57  ;;  %v4313_v62 = vcombine.high %v263_v58, %v267_v32  ;;  %v323_v56 = vld [vmem:[%s5656_s28 + $0x3b0] sm:$0xff] }
  0x86   : > { %2357 = vmatmul.mubr.bf16.gmra.mrb[32].mxu1 %v4316_v34  ;;  %v5506_v34 = vld [vmem:[%s6494_s1 + $0x1d8] sm:$0xff]   ;;  %v4312_v4 = vcombine.low %v263_v58, %v267_v32  ;;  %v4360_v58 = vcombine.low %v311_v48, %v315_v49 }
  0x87   : > { %2871 = vmatmul.mubr.bf16.vlgmr.msra.gmra.mrb[0].mxu0 %v4256_v63  ;;  %2364 = vmatprep.mubr.bf16.mxu1 %v4325_v0  ;;  %v333_v63 = vld [vmem:[%s5656_s28 + $0x400] sm:$0xff] }
  0x88   : > { %3128 = vmatpush1.bf16.msra.mxu0 %v5495_v2  ;;  %2878 = vmatprep.mubr.bf16.mxu0 %v4265_v3  ;;  %v337_v0 = vld [vmem:[%s5656_s28 + $0x420] sm:$0xff]  ;;  %v271_v2 = vld [vmem:[%s5656_s28 + $0x210] sm:$0xff] }
  0x89   : > { %3129 = vmatprep.subr.bf16.mxu0 %v5527_v1  ;;  %v275_v3 = vld [vmem:[%s5656_s28 + $0x230] sm:$0xff] }
  0x8a   : > { %v4321_v6 = vcombine.high %v271_v2, %v275_v3 }
  0x8c   : > { %3130 = vmatpush1.bf16.msra.mxu0 %v5496_v5  ;;  %v4381_v5 = vcombine.high %v333_v63, %v337_v0 }
  0x8d   : > { %3131 = vmatprep.subr.bf16.mxu0 %v5527_v1 }
  0x8e   : > { %2365 = vmatmul.mubr.bf16.gmra.mrb[36].mxu1 %v4324_v9  ;;  %v345_v9 = vld [vmem:[%s5656_s28 + $0x460] sm:$0xff] }
  0x8f   : > { %2879 = vmatmul.mubr.bf16.gmra.mrb[4].mxu0 %v4264_v38  ;;  %2372 = vmatprep.mubr.bf16.mxu1 %v4333_v11  ;;  %v279_v38 = vld [vmem:[%s5656_s28 + $0x250] sm:$0xff]  ;;  %v4389_v15 = vcombine.high %v341_v7, %v345_v9 }
  0x90   : > { %2886 = vmatprep.mubr.bf16.mxu0 %v4273_v8  ;;  %3132 = vmatpush1.bf16.msra.mxu0 %v5497_v13  ;;  %v283_v11 = vld [vmem:[%s5656_s28 + $0x270] sm:$0xff]  ;;  %v4380_v8 = vcombine.low %v333_v63, %v337_v0  ;;  %v4320_v13 = vcombine.low %v271_v2, %v275_v3 }
  0x91   : > { %3133 = vmatprep.subr.bf16.mxu0 %v5527_v1  ;;  %v4329_v17 = vcombine.high %v279_v38, %v283_v11 }
  0x94   : > { %3134 = vmatpush1.bf16.msra.mxu0 %v5498_v19  ;;  %v5507_v19 = vld [vmem:[%s6494_s1 + $0x1e0] sm:$0xff]  }
  0x95   : > { %3135 = vmatprep.subr.bf16.mxu0 %v5527_v1 }
  0x96   : > { %2373 = vmatmul.mubr.bf16.gmra.mrb[40].mxu1 %v4332_v21  ;;  %v287_v21 = vld [vmem:[%s5656_s28 + $0x290] sm:$0xff] }
  0x97   : > { %2887 = vmatmul.mubr.bf16.gmra.mrb[8].mxu0 %v4272_v22  ;;  %2380 = vmatprep.mubr.bf16.mxu1 %v4341_v23  ;;  %v291_v22 = vld [vmem:[%s5656_s28 + $0x2b0] sm:$0xff]  ;;  %v4388_v23 = vcombine.low %v341_v7, %v345_v9 }
  0x98   : > { %2894 = vmatprep.mubr.bf16.mxu0 %v4281_v12  ;;  %3136 = vmatpush1.bf16.msra.mxu0 %v5499_v24  ;;  %v4328_v12 = vcombine.low %v279_v38, %v283_v11  ;;  %v4397_v24 = vcombine.high %v349_v10, %v353_v20  ;;  %v4337_v25 = vcombine.high %v287_v21, %v291_v22 }
  0x99   : > { %3137 = vmatprep.subr.bf16.mxu0 %v5527_v1 }
  0x9c   : > { %3138 = vmatpush1.bf16.msra.mxu0 %v5500_v29  ;;  %v361_v29 = vld [vmem:[%s5656_s28 + $0x4e0] sm:$0xff] }
  0x9d   : > { %3139 = vmatprep.subr.bf16.mxu0 %v5527_v1  ;;  %v4404_v43 = vcombine.low %v357_v27, %v361_v29 }
  0x9e   : > { %2381 = vmatmul.mubr.bf16.gmra.mrb[44].mxu1 %v4340_v33  ;;  %v4396_v33 = vcombine.low %v349_v10, %v353_v20 }
  0x9f   : > { %2895 = vmatmul.mubr.bf16.gmra.mrb[12].mxu0 %v4280_v35  ;;  %2388 = vmatprep.mubr.bf16.mxu1 %v4349_v37  ;;  %v4336_v35 = vcombine.low %v287_v21, %v291_v22  ;;  %v4405_v37 = vcombine.high %v357_v27, %v361_v29  ;;  %v413_v22 = vld [vmem:[%s5656_s28 + $0x680] sm:$0xff] }
  0xa0   : > { %2902 = vmatprep.mubr.bf16.mxu0 %v4289_v16  ;;  %3140 = vmatpush1.bf16.msra.mxu0 %v5501_v39  ;;  %v4345_v16 = vcombine.high %v295_v14, %v299_v31  ;;  %v5508_v39 = vld [vmem:[%s6494_s1 + $0x1e8] sm:$0xff]  }
  0xa1   : > { %3141 = vmatprep.subr.bf16.mxu0 %v5527_v1 }
  0xa4   : > { %3142 = vmatpush1.bf16.msra.mxu0 %v5502_v42  ;;  %v303_v42 = vld [vmem:[%s5656_s28 + $0x310] sm:$0xff] }
  0xa5   : > { %3143 = vmatprep.subr.bf16.mxu0 %v5527_v1  ;;  %v4352_v28 = vcombine.low %v303_v42, %v307_v18 }
  0xa6   : > { %2389 = vmatmul.mubr.bf16.gmra.mrb[48].mxu1 %v4348_v44  ;;  %v4344_v44 = vcombine.low %v295_v14, %v299_v31  ;;  %v421_v31 = vld [vmem:[%s5656_s28 + $0x6c0] sm:$0xff] }
  0xa7   : > { %2903 = vmatmul.mubr.bf16.gmra.mrb[16].mxu0 %v4288_v45  ;;  %2396 = vmatprep.mubr.bf16.mxu1 %v4357_v46  ;;  %v4413_v45 = vcombine.high %v365_v40, %v369_v41  ;;  %v4353_v46 = vcombine.high %v303_v42, %v307_v18  ;;  %v429_v42 = vld [vmem:[%s5656_s28 + $0x700] sm:$0xff] }
  0xa8   : > { %2910 = vmatprep.mubr.bf16.mxu0 %v4297_v26  ;;  %3144 = vmatpush1.bf16.msra.mxu0 %v5503_v47  ;;  %v373_v26 = vld [vmem:[%s5656_s28 + $0x540] sm:$0xff] }
  0xa9   : > { %3145 = vmatprep.subr.bf16.mxu0 %v5527_v1  ;;  %v377_v47 = vld [vmem:[%s5656_s28 + $0x560] sm:$0xff] }
  0xaa   : > { %v4421_v51 = vcombine.high %v373_v26, %v377_v47  ;;  %v4420_v57 = vcombine.low %v373_v26, %v377_v47  ;;  %v433_v18 = vld [vmem:[%s5656_s28 + $0x720] sm:$0xff] }
  0xac   : > { %3146 = vmatpush1.bf16.msra.mxu0 %v5504_v50  ;;  %v4412_v50 = vcombine.low %v365_v40, %v369_v41 }
  0xad   : > { %3147 = vmatprep.subr.bf16.mxu0 %v5527_v1 }
  0xae   : > { %2397 = vmatmul.mubr.bf16.gmra.mrb[52].mxu1 %v4356_v52  ;;  %v4361_v52 = vcombine.high %v311_v48, %v315_v49  ;;  %v4477_v48 = vcombine.high %v429_v42, %v433_v18 }
  0xaf   : > { %2911 = vmatmul.mubr.bf16.gmra.mrb[20].mxu0 %v4296_v53  ;;  %2404 = vmatprep.mubr.bf16.mxu1 %v4365_v54  ;;  %v5509_v53 = vld [vmem:[%s6494_s1 + $0x1f0] sm:$0xff]   ;;  %v381_v54 = vld [vmem:[%s5656_s28 + $0x580] sm:$0xff] }
  0xb0   : > { %2918 = vmatprep.mubr.bf16.mxu0 %v4305_v30  ;;  %3148 = vmatpush1.bf16.msra.mxu0 %v5505_v55  ;;  %v385_v30 = vld [vmem:[%s5656_s28 + $0x5a0] sm:$0xff]  ;;  %v319_v55 = vld [vmem:[%s5656_s28 + $0x390] sm:$0xff] }
  0xb1   : > { %3149 = vmatprep.subr.bf16.mxu0 %v5527_v1  ;;  %v4429_v32 = vcombine.high %v381_v54, %v385_v30  ;;  %v4428_v63 = vcombine.low %v381_v54, %v385_v30  ;;  %v4368_v0 = vcombine.low %v319_v55, %v323_v56  ;;  %v379_v54 = vld [vmem:[%s5656_s28 + $0x570] sm:$0xff] }
  0xb4   : > { %3150 = vmatpush1.bf16.msra.mxu0 %v5506_v34  ;;  %v331_v34 = vld [vmem:[%s5656_s28 + $0x3f0] sm:$0xff] }
  0xb5   : > { %3151 = vmatprep.subr.bf16.mxu0 %v5527_v1 }
  0xb6   : > { %2405 = vmatmul.mubr.bf16.gmra.mrb[56].mxu1 %v4364_v59  ;;  %v4369_v59 = vcombine.high %v319_v55, %v323_v56  ;;  %v4476_v55 = vcombine.low %v429_v42, %v433_v18 }
  0xb7   : > { %2919 = vmatmul.mubr.bf16.gmra.mrb[24].mxu0 %v4304_v60  ;;  %2412 = vmatprep.mubr.bf16.mxu1 %v4373_v61  ;;  %v389_v60 = vld [vmem:[%s5656_s28 + $0x5c0] sm:$0xff] }
  0xb8   : > { %2926 = vmatprep.mubr.bf16.mxu0 %v4313_v62  ;;  %3152 = vmatpush1.bf16.msra.mxu0 %v5507_v19  ;;  %v393_v61 = vld [vmem:[%s5656_s28 + $0x5e0] sm:$0xff]  ;;  %v327_v62 = vld [vmem:[%s5656_s28 + $0x3d0] sm:$0xff] }
  0xb9   : > { %3153 = vmatprep.subr.bf16.mxu0 %v5527_v1  ;;  %v4437_v2 = vcombine.high %v389_v60, %v393_v61  ;;  %v4377_v3 = vcombine.high %v327_v62, %v331_v34  ;;  %v4436_v7 = vcombine.low %v389_v60, %v393_v61  ;;  %v4376_v9 = vcombine.low %v327_v62, %v331_v34  ;;  %v445_v61 = vld [vmem:[%s5656_s28 + $0x780] sm:$0xff]  ;;  %v383_v34 = vld [vmem:[%s5656_s28 + $0x590] sm:$0xff] }
  0xba   : > { %v449_v62 = vld [vmem:[%s5656_s28 + $0x7a0] sm:$0xff] }
  0xbc   : > { %3154 = vmatpush1.bf16.msra.mxu0 %v5508_v39 }
  0xbd   : > { %3155 = vmatprep.subr.bf16.mxu0 %v5527_v1 }
  0xbe   : > { %2413 = vmatmul.mubr.bf16.gmra.mrb[60].mxu1 %v4372_v36  ;;  %v397_v36 = vld [vmem:[%s5656_s28 + $0x600] sm:$0xff] }
  0xbf   : > { %2927 = vmatmul.mubr.bf16.gmra.mrb[28].mxu0 %v4312_v4  ;;  %2420 = vmatprep.mubr.bf16.mxu1 %v4381_v5  ;;  %v401_v4 = vld [vmem:[%s5656_s28 + $0x620] sm:$0xff]  ;;  %v335_v5 = vld [vmem:[%s5656_s28 + $0x410] sm:$0xff] }
  0xc0   : > { %2934 = vmatprep.mubr.bf16.mxu0 %v4321_v6  ;;  %3156 = vmatpush1.bf16.msra.mxu0 %v5509_v53  ;;  %v339_v6 = vld [vmem:[%s5656_s28 + $0x430] sm:$0xff]  ;;  %v4445_v38 = vcombine.high %v397_v36, %v401_v4  ;;  %v4444_v19 = vcombine.low %v397_v36, %v401_v4  ;;  %v4493_v36 = vcombine.high %v445_v61, %v449_v62 }
  0xc1   : > { %3157 = vmatprep.subr.bf16.mxu0 %v5527_v1  ;;  %v5510_v1 = vld [vmem:[%s6494_s1 + $0x1f8] sm:$0xff]   ;;  %v4385_v11 = vcombine.high %v335_v5, %v339_v6  ;;  %v4384_v10 = vcombine.low %v335_v5, %v339_v6  ;;  %v375_v53 = vld [vmem:[%s5656_s28 + $0x550] sm:$0xff] }
  0xc4   : > { %3158 = vmatpush1.bf16.msra.mxu0 %v5510_v1  ;;  %v4424_v1 = vcombine.low %v375_v53, %v379_v54 }
  0xc6   : > { %2421 = vmatmul.mubr.bf16.gmra.mrb[64].mxu1 %v4380_v8  ;;  %v405_v8 = vld [vmem:[%s5656_s28 + $0x640] sm:$0xff] }
  0xc7   : > { %2935 = vmatmul.mubr.bf16.gmra.mrb[32].mxu0 %v4320_v13  ;;  %2428 = vmatprep.mubr.bf16.mxu1 %v4389_v15  ;;  %v409_v13 = vld [vmem:[%s5656_s28 + $0x660] sm:$0xff]  ;;  %v343_v15 = vld [vmem:[%s5656_s28 + $0x450] sm:$0xff] }
  0xc8   : > { %2942 = vmatprep.mubr.bf16.mxu0 %v4329_v17  ;;  %v347_v17 = vld [vmem:[%s5656_s28 + $0x470] sm:$0xff]  ;;  %v4453_v20 = vcombine.high %v405_v8, %v409_v13 }
  0xc9   : > { %v4393_v21 = vcombine.high %v343_v15, %v347_v17  ;;  %v4392_v27 = vcombine.low %v343_v15, %v347_v17 }
  0xce   : > { %2429 = vmatmul.mubr.bf16.gmra.mrb[68].mxu1 %v4388_v23  ;;  %v417_v23 = vld [vmem:[%s5656_s28 + $0x6a0] sm:$0xff] }
  0xcf   : > { %2943 = vmatmul.mubr.bf16.gmra.mrb[36].mxu0 %v4328_v12  ;;  %2436 = vmatprep.mubr.bf16.mxu1 %v4397_v24  ;;  %v351_v12 = vld [vmem:[%s5656_s28 + $0x490] sm:$0xff]  ;;  %v4461_v29 = vcombine.high %v413_v22, %v417_v23 }
  0xd0   : > { %2950 = vmatprep.mubr.bf16.mxu0 %v4337_v25  ;;  %v355_v24 = vld [vmem:[%s5656_s28 + $0x4b0] sm:$0xff]  ;;  %v4452_v25 = vcombine.low %v405_v8, %v409_v13  ;;  %v4492_v13 = vcombine.low %v445_v61, %v449_v62  ;;  %v294_v61 = vld [vmem:[%s5656_s28 + $0x2c8] sm:$0xff] }
  0xd1   : > { %v4401_v14 = vcombine.high %v351_v12, %v355_v24  ;;  %v4400_v39 = vcombine.low %v351_v12, %v355_v24  ;;  %v399_v12 = vld [vmem:[%s5656_s28 + $0x610] sm:$0xff]  ;;  %v298_v62 = vld [vmem:[%s5656_s28 + $0x2e8] sm:$0xff] }
  0xd2   : > { %v403_v24 = vld [vmem:[%s5656_s28 + $0x630] sm:$0xff] }
  0xd6   : > { %2437 = vmatmul.mubr.bf16.gmra.mrb[72].mxu1 %v4396_v33  ;;  %v425_v33 = vld [vmem:[%s5656_s28 + $0x6e0] sm:$0xff] }
  0xd7   : > { %2951 = vmatmul.mubr.bf16.gmra.mrb[40].mxu0 %v4336_v35  ;;  %2444 = vmatprep.mubr.bf16.mxu1 %v4405_v37  ;;  %v359_v35 = vld [vmem:[%s5656_s28 + $0x4d0] sm:$0xff]  ;;  %v4469_v40 = vcombine.high %v421_v31, %v425_v33 }
  0xd8   : > { %2958 = vmatprep.mubr.bf16.mxu0 %v4345_v16  ;;  %v363_v37 = vld [vmem:[%s5656_s28 + $0x4f0] sm:$0xff]  ;;  %v4460_v16 = vcombine.low %v413_v22, %v417_v23  ;;  %v270_v22 = vld [vmem:[%s5656_s28 + $0x208] sm:$0xff] }
  0xd9   : > { %v4409_v41 = vcombine.high %v359_v35, %v363_v37  ;;  %v4408_v47 = vcombine.low %v359_v35, %v363_v37  ;;  %v274_v23 = vld [vmem:[%s5656_s28 + $0x228] sm:$0xff]  ;;  %v4449_v35 = vcombine.high %v399_v12, %v403_v24 }
  0xda   : > { %v4318_v18 = vcombine.low %v270_v22, %v274_v23 }
  0xde   : > { %2445 = vmatmul.mubr.bf16.gmra.mrb[76].mxu1 %v4404_v43  ;;  %v367_v43 = vld [vmem:[%s5656_s28 + $0x510] sm:$0xff] }
  0xdf   : > { %2959 = vmatmul.mubr.bf16.gmra.mrb[44].mxu0 %v4344_v44  ;;  %2452 = vmatprep.mubr.bf16.mxu1 %v4413_v45  ;;  %v371_v44 = vld [vmem:[%s5656_s28 + $0x530] sm:$0xff] }
  0xe0   : > { %2966 = vmatprep.mubr.bf16.mxu0 %v4353_v46  ;;  %v4468_v46 = vcombine.low %v421_v31, %v425_v33  ;;  %v4319_v31 = vcombine.high %v270_v22, %v274_v23  ;;  %v310_v22 = vld [vmem:[%s5656_s28 + $0x348] sm:$0xff] }
  0xe1   : > { %v314_v23 = vld [vmem:[%s5656_s28 + $0x368] sm:$0xff] }
  0xe6   : > { %2453 = vmatmul.mubr.bf16.gmra.mrb[80].mxu1 %v4412_v50  ;;  %v4417_v50 = vcombine.high %v367_v43, %v371_v44 }
  0xe7   : > { %2967 = vmatmul.mubr.bf16.gmra.mrb[48].mxu0 %v4352_v28  ;;  %2460 = vmatprep.mubr.bf16.mxu1 %v4421_v51  ;;  %v437_v51 = vld [vmem:[%s5656_s28 + $0x740] sm:$0xff] }
  0xe8   : > { %2974 = vmatprep.mubr.bf16.mxu0 %v4361_v52  ;;  %v441_v52 = vld [vmem:[%s5656_s28 + $0x760] sm:$0xff] }
  0xee   : > { %2461 = vmatmul.mubr.bf16.gmra.mrb[84].mxu1 %v4420_v57  ;;  %v4416_v57 = vcombine.low %v367_v43, %v371_v44  ;;  %v4448_v44 = vcombine.low %v399_v12, %v403_v24  ;;  %v439_v12 = vld [vmem:[%s5656_s28 + $0x750] sm:$0xff] }
  0xef   : > { %2975 = vmatmul.mubr.bf16.gmra.mrb[52].mxu0 %v4360_v58  ;;  %2468 = vmatprep.mubr.bf16.mxu1 %v4429_v32  ;;  %v4485_v58 = vcombine.high %v437_v51, %v441_v52  ;;  %v443_v24 = vld [vmem:[%s5656_s28 + $0x770] sm:$0xff] }
  0xf0   : > { %2982 = vmatprep.mubr.bf16.mxu0 %v4369_v59  ;;  %v4425_v59 = vcombine.high %v375_v53, %v379_v54 }
  0xf6   : > { %2469 = vmatmul.mubr.bf16.gmra.mrb[88].mxu1 %v4428_v63  ;;  %v387_v63 = vld [vmem:[%s5656_s28 + $0x5b0] sm:$0xff] }
  0xf7   : > { %2983 = vmatmul.mubr.bf16.gmra.mrb[56].mxu0 %v4368_v0  ;;  %2476 = vmatprep.mubr.bf16.mxu1 %v4437_v2  ;;  %v4484_v2 = vcombine.low %v437_v51, %v441_v52  ;;  %v4433_v5 = vcombine.high %v383_v34, %v387_v63  ;;  %v4432_v17 = vcombine.low %v383_v34, %v387_v63  ;;  %v415_v51 = vld [vmem:[%s5656_s28 + $0x690] sm:$0xff] }
  0xf8   : > { %2990 = vmatprep.mubr.bf16.mxu0 %v4377_v3  ;;  %v419_v52 = vld [vmem:[%s5656_s28 + $0x6b0] sm:$0xff] }
  0xf9   : > { %v423_v34 = vld [vmem:[%s5656_s28 + $0x6d0] sm:$0xff] }
  0xfa   : > { %v427_v63 = vld [vmem:[%s5656_s28 + $0x6f0] sm:$0xff] }
  0xfe   : > { %2477 = vmatmul.mubr.bf16.gmra.mrb[92].mxu1 %v4436_v7  ;;  %v453_v7 = vld [vmem:[%s5656_s28 + $0x7c0] sm:$0xff] }
  0xff   : > { %2991 = vmatmul.mubr.bf16.gmra.mrb[60].mxu0 %v4376_v9  ;;  %2484 = vmatprep.mubr.bf16.mxu1 %v4445_v38  ;;  %v457_v9 = vld [vmem:[%s5656_s28 + $0x7e0] sm:$0xff]  ;;  %v391_v38 = vld [vmem:[%s5656_s28 + $0x5d0] sm:$0xff] }
 0x100   : > { %2998 = vmatprep.mubr.bf16.mxu0 %v4385_v11  ;;  %v395_v11 = vld [vmem:[%s5656_s28 + $0x5f0] sm:$0xff] }
 0x106   : > { %2485 = vmatmul.mubr.bf16.gmra.mrb[96].mxu1 %v4444_v19  ;;  %v4501_v19 = vcombine.high %v453_v7, %v457_v9 }
 0x107   : > { %2999 = vmatmul.mubr.bf16.gmra.mrb[64].mxu0 %v4384_v10  ;;  %2492 = vmatprep.mubr.bf16.mxu1 %v4453_v20  ;;  %v4441_v20 = vcombine.high %v391_v38, %v395_v11 }
 0x108   : > { %3006 = vmatprep.mubr.bf16.mxu0 %v4393_v21 }
 0x10e   : > { %2493 = vmatmul.mubr.bf16.gmra.mrb[100].mxu1 %v4452_v25 }
 0x10f   : > { %3007 = vmatmul.mubr.bf16.gmra.mrb[68].mxu0 %v4392_v27  ;;  %2500 = vmatprep.mubr.bf16.mxu1 %v4461_v29  ;;  %v4500_v27 = vcombine.low %v453_v7, %v457_v9  ;;  %v4473_v7 = vcombine.high %v423_v34, %v427_v63 }
 0x110   : > { %3014 = vmatprep.mubr.bf16.mxu0 %v4401_v14  ;;  %v4440_v14 = vcombine.low %v391_v38, %v395_v11  ;;  %v302_v38 = vld [vmem:[%s5656_s28 + $0x308] sm:$0xff] }
 0x111   : > { %v306_v11 = vld [vmem:[%s5656_s28 + $0x328] sm:$0xff] }
 0x116   : > { %2501 = vmatmul.mubr.bf16.gmra.mrb[104].mxu1 %v4460_v16  ;;  %v278_v16 = vld [vmem:[%s5656_s28 + $0x248] sm:$0xff] }
 0x117   : > { %3015 = vmatmul.mubr.bf16.gmra.mrb[72].mxu0 %v4400_v39  ;;  %2508 = vmatprep.mubr.bf16.mxu1 %v4469_v40  ;;  %v282_v39 = vld [vmem:[%s5656_s28 + $0x268] sm:$0xff]  ;;  %v407_v40 = vld [vmem:[%s5656_s28 + $0x650] sm:$0xff] }
 0x118   : > { %3022 = vmatprep.mubr.bf16.mxu0 %v4409_v41  ;;  %v411_v41 = vld [vmem:[%s5656_s28 + $0x670] sm:$0xff]  ;;  %v4326_v54 = vcombine.low %v278_v16, %v282_v39 }
 0x119   : > { %v6027_v45 = vpop.f32.mrb[0].mxu1 }
 0x11a   : > { %v2296_v26 = vpop.f32.mrb[1].mxu1 }
 0x11b   : > { %v6029_v49 = vpop.f32.mrb[2].mxu1 }
 0x11c   : > { %v2299_v28 = vpop.f32.mrb[3].mxu1 }
 0x11d   : > { %v290_v28 = vld [vmem:[%s5656_s28 + $0x2a8] sm:$0xff] }
 0x11e   : > { %2509 = vmatmul.mubr.bf16.gmra.mrb[108].mxu1 %v4468_v46  ;;  %v4327_v46 = vcombine.high %v278_v16, %v282_v39  ;;  %v447_v16 = vld [vmem:[%s5656_s28 + $0x790] sm:$0xff] }
 0x11f   : > { %3023 = vmatmul.mubr.bf16.gmra.mrb[76].mxu0 %v4408_v47  ;;  %2516 = vmatprep.mubr.bf16.mxu1 %v4477_v48  ;;  %v4457_v47 = vcombine.high %v407_v40, %v411_v41  ;;  %v451_v39 = vld [vmem:[%s5656_s28 + $0x7b0] sm:$0xff] }
 0x120   : > { %3030 = vmatprep.mubr.bf16.mxu0 %v4417_v50  ;;  %v286_v50 = vld [vmem:[%s5656_s28 + $0x288] sm:$0xff] }
 0x121   : > { %v6035_v30 = vpop.f32.mrb[4].mxu1 }
 0x122   : > { %v2304_v56 = vpop.f32.mrb[5].mxu1 }
 0x123   : > { %v6037_v32 = vpop.f32.mrb[6].mxu1  ;;  %v4456_v56 = vcombine.low %v407_v40, %v411_v41  ;;  %v4358_v40 = vcombine.low %v310_v22, %v314_v23  ;;  %v4488_v41 = vcombine.low %v439_v12, %v443_v24 }
 0x124   : > { %v2307_v60 = vpop.f32.mrb[7].mxu1 }
 0x126   : > { %2517 = vmatmul.mubr.bf16.gmra.mrb[112].mxu1 %v4476_v55 }
 0x127   : > { %3031 = vmatmul.mubr.bf16.gmra.mrb[80].mxu0 %v4416_v57  ;;  %2524 = vmatprep.mubr.bf16.mxu1 %v4485_v58  ;;  %v4335_v57 = vcombine.high %v286_v50, %v290_v28 }
 0x128   : > { %3038 = vmatprep.mubr.bf16.mxu0 %v4425_v59  ;;  %v4465_v59 = vcombine.high %v415_v51, %v419_v52 }
 0x129   : > { %v6043_v0 = vpop.f32.mrb[8].mxu1 }
 0x12a   : > { %v2312_v3 = vpop.f32.mrb[9].mxu1 }
 0x12b   : > { %v6045_v4 = vpop.f32.mrb[10].mxu1  ;;  %v4334_v3 = vcombine.low %v286_v50, %v290_v28  ;;  %v4496_v28 = vcombine.low %v447_v16, %v451_v39 }
 0x12c   : > { %v2315_v6 = vpop.f32.mrb[11].mxu1 }
 0x12e   : > { %2525 = vmatmul.mubr.bf16.gmra.mrb[116].mxu1 %v4484_v2 }
 0x12f   : > { %3039 = vmatmul.mubr.bf16.gmra.mrb[84].mxu0 %v4424_v1  ;;  %2532 = vmatprep.mubr.bf16.mxu1 %v4493_v36  ;;  %v4464_v36 = vcombine.low %v415_v51, %v419_v52 }
 0x130   : > { %3046 = vmatprep.mubr.bf16.mxu0 %v4433_v5  ;;  %v4343_v5 = vcombine.high %v294_v61, %v298_v62 }
 0x131   : > { %v6051_v8 = vpop.f32.mrb[12].mxu1 }
 0x132   : > { %v2320_v15 = vpop.f32.mrb[13].mxu1 }
 0x133   : > { %v6053_v10 = vpop.f32.mrb[14].mxu1  ;;  %v435_v15 = vld [vmem:[%s5656_s28 + $0x730] sm:$0xff] }
 0x134   : > { %v2323_v21 = vpop.f32.mrb[15].mxu1 }
 0x136   : > { %2533 = vmatmul.mubr.bf16.gmra.mrb[120].mxu1 %v4492_v13  ;;  %v431_v13 = vld [vmem:[%s5656_s28 + $0x710] sm:$0xff] }
 0x137   : > { %3047 = vmatmul.mubr.bf16.gmra.mrb[88].mxu0 %v4432_v17  ;;  %2540 = vmatprep.mubr.bf16.mxu1 %v4501_v19  ;;  %v4342_v17 = vcombine.low %v294_v61, %v298_v62  ;;  %v4472_v19 = vcombine.low %v423_v34, %v427_v63  ;;  %v4481_v21 = vcombine.high %v431_v13, %v435_v15  ;;  %v342_v34 = vld [vmem:[%s5656_s28 + $0x448] sm:$0xff] }
 0x138   : > { %3054 = vmatprep.mubr.bf16.mxu0 %v4441_v20  ;;  %v4351_v20 = vcombine.high %v302_v38, %v306_v11  ;;  %v346_v63 = vld [vmem:[%s5656_s28 + $0x468] sm:$0xff] }
 0x139   : > { %v6059_v25 = vpop.f32.mrb[16].mxu1 }
 0x13a   : > { %v2328_v29 = vpop.f32.mrb[17].mxu1 }
 0x13b   : > { %v6061_v33 = vpop.f32.mrb[18].mxu1  ;;  %v4480_v29 = vcombine.low %v431_v13, %v435_v15  ;;  %v224_v13 = vld [vmem:[%s5656_s28 + $0x98] sm:$0xff] }
 0x13c   : > { %v2331_v37 = vpop.f32.mrb[19].mxu1  ;;  %v228_v15 = vld [vmem:[%s5656_s28 + $0xb8] sm:$0xff] }
 0x13d   : > { %v322_v37 = vld [vmem:[%s5656_s28 + $0x3a8] sm:$0xff] }
 0x13e   : > { %2541 = vmatmul.mubr.bf16.gmra.mrb[124].mxu1 %v4500_v27  ;;  %v4350_v27 = vcombine.low %v302_v38, %v306_v11  ;;  %v350_v38 = vld [vmem:[%s5656_s28 + $0x488] sm:$0xff] }
 0x13f   : > { %3055 = vmatmul.mubr.bf16.gmra.mrb[92].mxu0 %v4440_v14  ;;  %2645 = vmatprep.mubr.bf16.mxu1 %v4319_v31  ;;  %v4359_v14 = vcombine.high %v310_v22, %v314_v23  ;;  %v4489_v31 = vcombine.high %v439_v12, %v443_v24  ;;  %v354_v11 = vld [vmem:[%s5656_s28 + $0x4a8] sm:$0xff]  ;;  %v232_v12 = vld [vmem:[%s5656_s28 + $0xd8] sm:$0xff] }
 0x140   : > { %3062 = vmatprep.mubr.bf16.mxu0 %v4449_v35  ;;  %v318_v35 = vld [vmem:[%s5656_s28 + $0x388] sm:$0xff]  ;;  %v236_v24 = vld [vmem:[%s5656_s28 + $0xf8] sm:$0xff] }
 0x141   : > { %v6067_v42 = vpop.f32.mrb[20].mxu1  ;;  %v4366_v50 = vcombine.low %v318_v35, %v322_v37  ;;  %v358_v22 = vld [vmem:[%s5656_s28 + $0x4c8] sm:$0xff] }
 0x142   : > { %v2336_v43 = vpop.f32.mrb[21].mxu1  ;;  %v362_v23 = vld [vmem:[%s5656_s28 + $0x4e8] sm:$0xff] }
 0x143   : > { %v6069_v26 = vpop.f32.mrb[22].mxu1  ;;  %v4497_v43 = vcombine.high %v447_v16, %v451_v39  ;;  %v240_v16 = vld [vmem:[%s5656_s28 + $0x118] sm:$0xff] }
 0x144   : > { %v2339_v48 = vpop.f32.mrb[23].mxu1  ;;  %v244_v39 = vld [vmem:[%s5656_s28 + $0x138] sm:$0xff] }
 0x145   : > { %v459_v48 = vld [vmem:[%s5656_s28 + $0x7f0] sm:$0xff] }
 0x146   : > { %2646 = vmatmul.mubr.bf16.vlgmr.msra.gmra.mrb[32].mxu1 %v4318_v18  ;;  %v4367_v18 = vcombine.high %v318_v35, %v322_v37  ;;  %v366_v35 = vld [vmem:[%s5656_s28 + $0x508] sm:$0xff] }
 0x147   : > { %3063 = vmatmul.mubr.bf16.gmra.mrb[96].mxu0 %v4448_v44  ;;  %2653 = vmatprep.mubr.bf16.mxu1 %v4327_v46  ;;  %v326_v44 = vld [vmem:[%s5656_s28 + $0x3c8] sm:$0xff] }
 0x148   : > { %3070 = vmatprep.mubr.bf16.mxu0 %v4457_v47  ;;  %v330_v46 = vld [vmem:[%s5656_s28 + $0x3e8] sm:$0xff]  ;;  %v455_v47 = vld [vmem:[%s5656_s28 + $0x7d0] sm:$0xff] }
 0x149   : > { %v6075_v53 = vpop.f32.mrb[24].mxu1  ;;  %v4375_v51 = vcombine.high %v326_v44, %v330_v46  ;;  %v4505_v52 = vcombine.high %v455_v47, %v459_v48  ;;  %v370_v37 = vld [vmem:[%s5656_s28 + $0x528] sm:$0xff] }
 0x14a   : > { %v2344_v55 = vpop.f32.mrb[25].mxu1 }
 0x14b   : > { %v6077_v58 = vpop.f32.mrb[26].mxu1  ;;  %v338_v55 = vld [vmem:[%s5656_s28 + $0x428] sm:$0xff] }
 0x14c   : > { %v2347_v60 = vpop.f32.mrb[27].mxu1 }
 0x14d   : > { %v4504_v60 = vcombine.low %v455_v47, %v459_v48  ;;  %v248_v47 = vld [vmem:[%s5656_s28 + $0x158] sm:$0xff] }
 0x14e   : > { %2654 = vmatmul.mubr.bf16.gmra.mrb[36].mxu1 %v4326_v54  ;;  %v334_v54 = vld [vmem:[%s5656_s28 + $0x408] sm:$0xff]  ;;  %v252_v48 = vld [vmem:[%s5656_s28 + $0x178] sm:$0xff] }
 0x14f   : > { %3071 = vmatmul.mubr.bf16.gmra.mrb[100].mxu0 %v4456_v56  ;;  %2661 = vmatprep.mubr.bf16.mxu1 %v4335_v57  ;;  %v208_v56 = vld [vmem:[%s5656_s28 + $0x18] sm:$0xff]  ;;  %v4383_v61 = vcombine.high %v334_v54, %v338_v55 }
 0x150   : > { %3078 = vmatprep.mubr.bf16.mxu0 %v4465_v59  ;;  %v212_v57 = vld [vmem:[%s5656_s28 + $0x38] sm:$0xff]  ;;  %v4374_v59 = vcombine.low %v326_v44, %v330_v46  ;;  %v374_v44 = vld [vmem:[%s5656_s28 + $0x548] sm:$0xff] }
 0x151   : > { %v6083_v2 = vpop.f32.mrb[28].mxu1  ;;  %v4259_v62 = vcombine.high %v208_v56, %v212_v57  ;;  %v378_v46 = vld [vmem:[%s5656_s28 + $0x568] sm:$0xff] }
 0x152   : > { %v2352_v1 = vpop.f32.mrb[29].mxu1 }
 0x153   : > { %v6085_v6 = vpop.f32.mrb[30].mxu1  ;;  %v220_v1 = vld [vmem:[%s5656_s28 + $0x78] sm:$0xff] }
 0x154   : > { %v2355_v9 = vpop.f32.mrb[31].mxu1 }
 0x156   : > { %2662 = vmatmul.mubr.bf16.gmra.mrb[40].mxu1 %v4334_v3  ;;  %v216_v3 = vld [vmem:[%s5656_s28 + $0x58] sm:$0xff] }
 0x157   : > { %3079 = vmatmul.mubr.bf16.gmra.mrb[104].mxu0 %v4464_v36  ;;  %2669 = vmatprep.mubr.bf16.mxu1 %v4343_v5  ;;  %v4382_v36 = vcombine.low %v334_v54, %v338_v55  ;;  %v4258_v5 = vcombine.low %v208_v56, %v212_v57  ;;  %v4267_v9 = vcombine.high %v216_v3, %v220_v1  ;;  %v382_v55 = vld [vmem:[%s5656_s28 + $0x588] sm:$0xff]  ;;  %v256_v57 = vld [vmem:[%s5656_s28 + $0x198] sm:$0xff] }
 0x158   : > { %3086 = vmatprep.mubr.bf16.mxu0 %v4473_v7  ;;  %v4391_v7 = vcombine.high %v342_v34, %v346_v63  ;;  %v4299_v54 = vcombine.high %v248_v47, %v252_v48  ;;  %v386_v56 = vld [vmem:[%s5656_s28 + $0x5a8] sm:$0xff] }
 0x15e   : > { %2670 = vmatmul.mubr.bf16.gmra.mrb[44].mxu1 %v4342_v17  ;;  %v4390_v17 = vcombine.low %v342_v34, %v346_v63  ;;  %v390_v63 = vld [vmem:[%s5656_s28 + $0x5c8] sm:$0xff] }
 0x15f   : > { %3087 = vmatmul.mubr.bf16.gmra.mrb[108].mxu0 %v4472_v19  ;;  %2677 = vmatprep.mubr.bf16.mxu1 %v4351_v20  ;;  %v4266_v19 = vcombine.low %v216_v3, %v220_v1  ;;  %v4399_v20 = vcombine.high %v350_v38, %v354_v11  ;;  %v394_v3 = vld [vmem:[%s5656_s28 + $0x5e8] sm:$0xff]  ;;  %v264_v1 = vld [vmem:[%s5656_s28 + $0x1d8] sm:$0xff] }
 0x160   : > { %3094 = vmatprep.mubr.bf16.mxu0 %v4481_v21  ;;  %v4275_v21 = vcombine.high %v224_v13, %v228_v15 }
 0x166   : > { %2678 = vmatmul.mubr.bf16.gmra.mrb[48].mxu1 %v4350_v27  ;;  %v4398_v27 = vcombine.low %v350_v38, %v354_v11  ;;  %v398_v11 = vld [vmem:[%s5656_s28 + $0x608] sm:$0xff] }
 0x167   : > { %3095 = vmatmul.mubr.bf16.gmra.mrb[112].mxu0 %v4480_v29  ;;  %2685 = vmatprep.mubr.bf16.mxu1 %v4359_v14  ;;  %v4274_v29 = vcombine.low %v224_v13, %v228_v15  ;;  %v4407_v14 = vcombine.high %v358_v22, %v362_v23  ;;  %v402_v13 = vld [vmem:[%s5656_s28 + $0x628] sm:$0xff]  ;;  %v272_v15 = vld [vmem:[%s5656_s28 + $0x218] sm:$0xff] }
 0x168   : > { %3102 = vmatprep.mubr.bf16.mxu0 %v4489_v31  ;;  %v4283_v31 = vcombine.high %v232_v12, %v236_v24 }
 0x16e   : > { %2686 = vmatmul.mubr.bf16.gmra.mrb[52].mxu1 %v4358_v40  ;;  %v4406_v40 = vcombine.low %v358_v22, %v362_v23  ;;  %v4447_v22 = vcombine.high %v398_v11, %v402_v13 }
 0x16f   : > { %3103 = vmatmul.mubr.bf16.gmra.mrb[116].mxu0 %v4488_v41  ;;  %2693 = vmatprep.mubr.bf16.mxu1 %v4367_v18  ;;  %v4282_v41 = vcombine.low %v232_v12, %v236_v24  ;;  %v4415_v18 = vcombine.high %v366_v35, %v370_v37  ;;  %v406_v12 = vld [vmem:[%s5656_s28 + $0x648] sm:$0xff] }
 0x170   : > { %3110 = vmatprep.mubr.bf16.mxu0 %v4497_v43  ;;  %v4291_v43 = vcombine.high %v240_v16, %v244_v39  ;;  %v410_v24 = vld [vmem:[%s5656_s28 + $0x668] sm:$0xff] }
 0x176   : > { %2694 = vmatmul.mubr.bf16.gmra.mrb[56].mxu1 %v4366_v50  ;;  %v4414_v50 = vcombine.low %v366_v35, %v370_v37  ;;  %v4455_v35 = vcombine.high %v406_v12, %v410_v24 }
 0x177   : > { %3111 = vmatmul.mubr.bf16.gmra.mrb[120].mxu0 %v4496_v28  ;;  %2701 = vmatprep.mubr.bf16.mxu1 %v4375_v51  ;;  %v5511_v28 = vld [vmem:[%s6496_s3] sm:$0xff]   ;;  %v4290_v51 = vcombine.low %v240_v16, %v244_v39  ;;  %v414_v16 = vld [vmem:[%s5656_s28 + $0x688] sm:$0xff] }
 0x178   : > { %3118 = vmatprep.mubr.bf16.mxu0 %v4505_v52  ;;  %v4423_v52 = vcombine.high %v374_v44, %v378_v46  ;;  %4942 = vmatprep.subr.bf16.mxu1 %v5511_v28  ;;  %v418_v39 = vld [vmem:[%s5656_s28 + $0x6a8] sm:$0xff] }
 0x179   : > { %4943 = vmatpush3.bf16.msra.mxu1 %v5511_v28  ;;  %v300_v28 = vld [vmem:[%s5656_s28 + $0x2f8] sm:$0xff] }
 0x17e   : > { %2702 = vmatmul.mubr.bf16.gmra.mrb[60].mxu1 %v4374_v59  ;;  %v260_v59 = vld [vmem:[%s5656_s28 + $0x1b8] sm:$0xff] }
 0x17f   : > { %3119 = vmatmul.mubr.bf16.gmra.mrb[124].mxu0 %v4504_v60  ;;  %2709 = vmatprep.mubr.bf16.mxu1 %v4383_v61  ;;  %v4422_v60 = vcombine.low %v374_v44, %v378_v46  ;;  %v4298_v61 = vcombine.low %v248_v47, %v252_v48  ;;  %v4307_v34 = vcombine.high %v256_v57, %v260_v59  ;;  %v422_v47 = vld [vmem:[%s5656_s28 + $0x6c8] sm:$0xff] }
 0x180   : > { %3159 = vmatprep.mubr.bf16.mxu0 %v4259_v62  ;;  %v4431_v62 = vcombine.high %v382_v55, %v386_v56  ;;  %v4463_v44 = vcombine.high %v414_v16, %v418_v39  ;;  %v426_v48 = vld [vmem:[%s5656_s28 + $0x6e8] sm:$0xff] }
 0x186   : > { %2710 = vmatmul.mubr.bf16.gmra.mrb[64].mxu1 %v4382_v36  ;;  %v268_v36 = vld [vmem:[%s5656_s28 + $0x1f8] sm:$0xff] }
 0x187   : > { %3160 = vmatmul.mubr.bf16.vlgmr.msra.gmra.mrb[0].mxu0 %v4258_v5  ;;  %2717 = vmatprep.mubr.bf16.mxu1 %v4391_v7  ;;  %v4430_v5 = vcombine.low %v382_v55, %v386_v56  ;;  %v4306_v7 = vcombine.low %v256_v57, %v260_v59  ;;  %v4315_v38 = vcombine.high %v264_v1, %v268_v36  ;;  %v5514_v57 = vld [vmem:[%s6496_s3 + $0x18] sm:$0xff]   ;;  %v430_v59 = vld [vmem:[%s5656_s28 + $0x708] sm:$0xff] }
 0x188   : > { %3167 = vmatprep.mubr.bf16.mxu0 %v4267_v9  ;;  %v4439_v9 = vcombine.high %v390_v63, %v394_v3  ;;  %v4471_v55 = vcombine.high %v422_v47, %v426_v48 }
 0x18e   : > { %2718 = vmatmul.mubr.bf16.gmra.mrb[68].mxu1 %v4390_v17  ;;  %v276_v17 = vld [vmem:[%s5656_s28 + $0x238] sm:$0xff] }
 0x18f   : > { %3168 = vmatmul.mubr.bf16.gmra.mrb[4].mxu0 %v4266_v19  ;;  %2725 = vmatprep.mubr.bf16.mxu1 %v4399_v20  ;;  %v4438_v19 = vcombine.low %v390_v63, %v394_v3  ;;  %v5512_v20 = vld [vmem:[%s6496_s3 + $0x8] sm:$0xff]   ;;  %v4323_v23 = vcombine.high %v272_v15, %v276_v17  ;;  %v4470_v63 = vcombine.low %v422_v47, %v426_v48 }
 0x190   : > { %3175 = vmatprep.mubr.bf16.mxu0 %v4275_v21  ;;  %v4314_v21 = vcombine.low %v264_v1, %v268_v36  ;;  %4944 = vmatprep.subr.bf16.mxu1 %v5512_v20 }
 0x191   : > { %4945 = vmatpush3.bf16.msra.mxu1 %v5512_v20 }
 0x196   : > { %2726 = vmatmul.mubr.bf16.gmra.mrb[72].mxu1 %v4398_v27  ;;  %v280_v27 = vld [vmem:[%s5656_s28 + $0x258] sm:$0xff] }
 0x197   : > { %3176 = vmatmul.mubr.bf16.gmra.mrb[8].mxu0 %v4274_v29  ;;  %2733 = vmatprep.mubr.bf16.mxu1 %v4407_v14  ;;  %v284_v29 = vld [vmem:[%s5656_s28 + $0x278] sm:$0xff]  ;;  %v4446_v14 = vcombine.low %v398_v11, %v402_v13  ;;  %v5517_v13 = vld [vmem:[%s6496_s3 + $0x30] sm:$0xff]  }
 0x198   : > { %3183 = vmatprep.mubr.bf16.mxu0 %v4283_v31  ;;  %v4322_v31 = vcombine.low %v272_v15, %v276_v17  ;;  %v4331_v37 = vcombine.high %v280_v27, %v284_v29  ;;  %v316_v11 = vld [vmem:[%s5656_s28 + $0x378] sm:$0xff] }
 0x19e   : > { %2734 = vmatmul.mubr.bf16.gmra.mrb[76].mxu1 %v4406_v40  ;;  %v288_v40 = vld [vmem:[%s5656_s28 + $0x298] sm:$0xff] }
 0x19f   : > { %3184 = vmatmul.mubr.bf16.gmra.mrb[12].mxu0 %v4282_v41  ;;  %2741 = vmatprep.mubr.bf16.mxu1 %v4415_v18  ;;  %v292_v41 = vld [vmem:[%s5656_s28 + $0x2b8] sm:$0xff]  ;;  %v4454_v18 = vcombine.low %v406_v12, %v410_v24 }
 0x1a0   : > { %3191 = vmatprep.mubr.bf16.mxu0 %v4291_v43  ;;  %v4330_v43 = vcombine.low %v280_v27, %v284_v29  ;;  %v4339_v46 = vcombine.high %v288_v40, %v292_v41  ;;  %v320_v12 = vld [vmem:[%s5656_s28 + $0x398] sm:$0xff] }
 0x1a1   : > { %v324_v24 = vld [vmem:[%s5656_s28 + $0x3b8] sm:$0xff] }
 0x1a6   : > { %2742 = vmatmul.mubr.bf16.gmra.mrb[80].mxu1 %v4414_v50  ;;  %v296_v50 = vld [vmem:[%s5656_s28 + $0x2d8] sm:$0xff] }
 0x1a7   : > { %3192 = vmatmul.mubr.bf16.gmra.mrb[16].mxu0 %v4290_v51  ;;  %2749 = vmatprep.mubr.bf16.mxu1 %v4423_v52  ;;  %v5513_v51 = vld [vmem:[%s6496_s3 + $0x10] sm:$0xff]   ;;  %v4462_v52 = vcombine.low %v414_v16, %v418_v39  ;;  %v4347_v56 = vcombine.high %v296_v50, %v300_v28  ;;  %v4346_v3 = vcombine.low %v296_v50, %v300_v28  ;;  %v328_v16 = vld [vmem:[%s5656_s28 + $0x3d8] sm:$0xff] }
 0x1a8   : > { %3199 = vmatprep.mubr.bf16.mxu0 %v4299_v54  ;;  %v4338_v54 = vcombine.low %v288_v40, %v292_v41  ;;  %4946 = vmatprep.subr.bf16.mxu1 %v5513_v51  ;;  %v332_v39 = vld [vmem:[%s5656_s28 + $0x3f8] sm:$0xff]  ;;  %v4370_v41 = vcombine.low %v320_v12, %v324_v24 }
 0x1a9   : > { %4947 = vmatpush3.bf16.msra.mxu1 %v5513_v51  ;;  %v4378_v48 = vcombine.low %v328_v16, %v332_v39  ;;  %v344_v28 = vld [vmem:[%s5656_s28 + $0x458] sm:$0xff] }
 0x1aa   : > { %4948 = vmatprep.subr.bf16.mxu1 %v5514_v57  ;;  %v348_v51 = vld [vmem:[%s5656_s28 + $0x478] sm:$0xff] }
 0x1ad   : > { %4949 = vmatpush3.bf16.msra.mxu1 %v5514_v57  ;;  %v4394_v57 = vcombine.low %v344_v28, %v348_v51 }
 0x1ae   : > { %2750 = vmatmul.mubr.bf16.gmra.mrb[84].mxu1 %v4422_v60  ;;  %v434_v60 = vld [vmem:[%s5656_s28 + $0x728] sm:$0xff] }
 0x1af   : > { %3200 = vmatmul.mubr.bf16.gmra.mrb[20].mxu0 %v4298_v61  ;;  %2757 = vmatprep.mubr.bf16.mxu1 %v4431_v62  ;;  %v304_v61 = vld [vmem:[%s5656_s28 + $0x318] sm:$0xff]  ;;  %v4479_v1 = vcombine.high %v430_v59, %v434_v60  ;;  %v4478_v15 = vcombine.low %v430_v59, %v434_v60 }
 0x1b0   : > { %3207 = vmatprep.mubr.bf16.mxu0 %v4307_v34  ;;  %v308_v62 = vld [vmem:[%s5656_s28 + $0x338] sm:$0xff]  ;;  %v5515_v34 = vld [vmem:[%s6496_s3 + $0x20] sm:$0xff]  }
 0x1b1   : > { %4950 = vmatprep.subr.bf16.mxu1 %v5515_v34  ;;  %v4355_v36 = vcombine.high %v304_v61, %v308_v62  ;;  %v4354_v17 = vcombine.low %v304_v61, %v308_v62  ;;  %v360_v60 = vld [vmem:[%s5656_s28 + $0x4d8] sm:$0xff] }
 0x1b2   : > { %4951 = vmatpush3.bf16.msra.mxu1 %v5515_v34  ;;  %v364_v61 = vld [vmem:[%s5656_s28 + $0x4f8] sm:$0xff] }
 0x1b3   : > { %v4411_v34 = vcombine.high %v360_v60, %v364_v61 }
 0x1b6   : > { %2758 = vmatmul.mubr.bf16.gmra.mrb[88].mxu1 %v4430_v5  ;;  %v5516_v5 = vld [vmem:[%s6496_s3 + $0x28] sm:$0xff]  }
 0x1b7   : > { %3208 = vmatmul.mubr.bf16.gmra.mrb[24].mxu0 %v4306_v7  ;;  %2765 = vmatprep.mubr.bf16.mxu1 %v4439_v9  ;;  %v438_v7 = vld [vmem:[%s5656_s28 + $0x748] sm:$0xff] }
 0x1b8   : > { %3215 = vmatprep.mubr.bf16.mxu0 %v4315_v38  ;;  %v442_v9 = vld [vmem:[%s5656_s28 + $0x768] sm:$0xff]  ;;  %4952 = vmatprep.subr.bf16.mxu1 %v5516_v5  ;;  %v312_v38 = vld [vmem:[%s5656_s28 + $0x358] sm:$0xff] }
 0x1b9   : > { %4953 = vmatpush3.bf16.msra.mxu1 %v5516_v5  ;;  %v4363_v20 = vcombine.high %v312_v38, %v316_v11  ;;  %v4486_v27 = vcombine.low %v438_v7, %v442_v9  ;;  %v4362_v29 = vcombine.low %v312_v38, %v316_v11 }
 0x1ba   : > { %4954 = vmatprep.subr.bf16.mxu1 %v5517_v13 }
 0x1bd   : > { %4955 = vmatpush3.bf16.msra.mxu1 %v5517_v13  ;;  %v376_v13 = vld [vmem:[%s5656_s28 + $0x558] sm:$0xff] }
 0x1be   : > { %2766 = vmatmul.mubr.bf16.gmra.mrb[92].mxu1 %v4438_v19  ;;  %v4487_v19 = vcombine.high %v438_v7, %v442_v9  ;;  %v4410_v7 = vcombine.low %v360_v60, %v364_v61 }
 0x1bf   : > { %3216 = vmatmul.mubr.bf16.gmra.mrb[28].mxu0 %v4314_v21  ;;  %2773 = vmatprep.mubr.bf16.mxu1 %v4447_v22  ;;  %v5518_v21 = vld [vmem:[%s6496_s3 + $0x38] sm:$0xff]   ;;  %v446_v22 = vld [vmem:[%s5656_s28 + $0x788] sm:$0xff] }
 0x1c0   : > { %3223 = vmatprep.mubr.bf16.mxu0 %v4323_v23  ;;  %v450_v23 = vld [vmem:[%s5656_s28 + $0x7a8] sm:$0xff]  ;;  %4956 = vmatprep.subr.bf16.mxu1 %v5518_v21 }
 0x1c1   : > { %4957 = vmatpush3.bf16.msra.mxu1 %v5518_v21  ;;  %v4494_v40 = vcombine.low %v446_v22, %v450_v23 }
 0x1c6   : > { %2774 = vmatmul.mubr.bf16.gmra.mrb[96].mxu1 %v4446_v14  ;;  %v4495_v14 = vcombine.high %v446_v22, %v450_v23 }
 0x1c7   : > { %3224 = vmatmul.mubr.bf16.gmra.mrb[32].mxu0 %v4322_v31  ;;  %2781 = vmatprep.mubr.bf16.mxu1 %v4455_v35  ;;  %v4371_v31 = vcombine.high %v320_v12, %v324_v24  ;;  %v454_v35 = vld [vmem:[%s5656_s28 + $0x7c8] sm:$0xff]  ;;  %v384_v12 = vld [vmem:[%s5656_s28 + $0x598] sm:$0xff] }
 0x1c8   : > { %3231 = vmatprep.mubr.bf16.mxu0 %v4331_v37  ;;  %v458_v37 = vld [vmem:[%s5656_s28 + $0x7e8] sm:$0xff]  ;;  %v388_v24 = vld [vmem:[%s5656_s28 + $0x5b8] sm:$0xff] }
 0x1c9   : > { %v4502_v47 = vcombine.low %v454_v35, %v458_v37 }
 0x1ce   : > { %2782 = vmatmul.mubr.bf16.gmra.mrb[100].mxu1 %v4454_v18  ;;  %v4503_v18 = vcombine.high %v454_v35, %v458_v37  ;;  %v4435_v35 = vcombine.high %v384_v12, %v388_v24 }
 0x1cf   : > { %3232 = vmatmul.mubr.bf16.gmra.mrb[36].mxu0 %v4330_v43  ;;  %2789 = vmatprep.mubr.bf16.mxu1 %v4463_v44  ;;  %v4379_v43 = vcombine.high %v328_v16, %v332_v39  ;;  %v336_v44 = vld [vmem:[%s5656_s28 + $0x418] sm:$0xff] }
 0x1d0   : > { %3239 = vmatprep.mubr.bf16.mxu0 %v4339_v46  ;;  %v340_v46 = vld [vmem:[%s5656_s28 + $0x438] sm:$0xff] }
 0x1d1   : > { %v4387_v50 = vcombine.high %v336_v44, %v340_v46  ;;  %v392_v16 = vld [vmem:[%s5656_s28 + $0x5d8] sm:$0xff] }
 0x1d2   : > { %v396_v39 = vld [vmem:[%s5656_s28 + $0x5f8] sm:$0xff] }
 0x1d6   : > { %2790 = vmatmul.mubr.bf16.gmra.mrb[104].mxu1 %v4462_v52  ;;  %v4386_v52 = vcombine.low %v336_v44, %v340_v46  ;;  %v4443_v44 = vcombine.high %v392_v16, %v396_v39 }
 0x1d7   : > { %3240 = vmatmul.mubr.bf16.gmra.mrb[40].mxu0 %v4338_v54  ;;  %2797 = vmatprep.mubr.bf16.mxu1 %v4471_v55  ;;  %v4395_v54 = vcombine.high %v344_v28, %v348_v51  ;;  %v352_v55 = vld [vmem:[%s5656_s28 + $0x498] sm:$0xff]  ;;  %v4442_v51 = vcombine.low %v392_v16, %v396_v39 }
 0x1d8   : > { %3247 = vmatprep.mubr.bf16.mxu0 %v4347_v56  ;;  %v356_v56 = vld [vmem:[%s5656_s28 + $0x4b8] sm:$0xff] }
 0x1d9   : > { %v4403_v59 = vcombine.high %v352_v55, %v356_v56  ;;  %v4402_v62 = vcombine.low %v352_v55, %v356_v56  ;;  %v408_v56 = vld [vmem:[%s5656_s28 + $0x658] sm:$0xff] }
 0x1da   : > { %v432_v39 = vld [vmem:[%s5656_s28 + $0x718] sm:$0xff] }
 0x1de   : > { %2798 = vmatmul.mubr.bf16.gmra.mrb[108].mxu1 %v4470_v63 }
 0x1df   : > { %3248 = vmatmul.mubr.bf16.gmra.mrb[44].mxu0 %v4346_v3  ;;  %2805 = vmatprep.mubr.bf16.mxu1 %v4479_v1  ;;  %v368_v3 = vld [vmem:[%s5656_s28 + $0x518] sm:$0xff] }
 0x1e0   : > { %3255 = vmatprep.mubr.bf16.mxu0 %v4355_v36  ;;  %v372_v1 = vld [vmem:[%s5656_s28 + $0x538] sm:$0xff] }
 0x1e1   : > { %v4419_v38 = vcombine.high %v368_v3, %v372_v1 }
 0x1e6   : > { %2806 = vmatmul.mubr.bf16.gmra.mrb[112].mxu1 %v4478_v15  ;;  %v380_v15 = vld [vmem:[%s5656_s28 + $0x578] sm:$0xff] }
 0x1e7   : > { %3256 = vmatmul.mubr.bf16.gmra.mrb[48].mxu0 %v4354_v17  ;;  %2813 = vmatprep.mubr.bf16.mxu1 %v4487_v19  ;;  %v4427_v22 = vcombine.high %v376_v13, %v380_v15 }
 0x1e8   : > { %3263 = vmatprep.mubr.bf16.mxu0 %v4363_v20  ;;  %v4418_v20 = vcombine.low %v368_v3, %v372_v1  ;;  %v416_v1 = vld [vmem:[%s5656_s28 + $0x698] sm:$0xff] }
 0x1ee   : > { %2814 = vmatmul.mubr.bf16.gmra.mrb[116].mxu1 %v4486_v27 }
 0x1ef   : > { %3264 = vmatmul.mubr.bf16.gmra.mrb[52].mxu0 %v4362_v29  ;;  %2821 = vmatprep.mubr.bf16.mxu1 %v4495_v14  ;;  %v4426_v14 = vcombine.low %v376_v13, %v380_v15 }
 0x1f0   : > { %3271 = vmatprep.mubr.bf16.mxu0 %v4371_v31 }
 0x1f6   : > { %2822 = vmatmul.mubr.bf16.gmra.mrb[120].mxu1 %v4494_v40 }
 0x1f7   : > { %3272 = vmatmul.mubr.bf16.gmra.mrb[56].mxu0 %v4370_v41  ;;  %2829 = vmatprep.mubr.bf16.mxu1 %v4503_v18  ;;  %v4434_v18 = vcombine.low %v384_v12, %v388_v24 }
 0x1f8   : > { %3279 = vmatprep.mubr.bf16.mxu0 %v4379_v43 }
 0x1fe   : > { %2830 = vmatmul.mubr.bf16.gmra.mrb[124].mxu1 %v4502_v47  ;;  %v400_v47 = vld [vmem:[%s5656_s28 + $0x618] sm:$0xff] }
 0x1ff   : > { %3280 = vmatmul.mubr.bf16.gmra.mrb[60].mxu0 %v4378_v48  ;;  %v404_v48 = vld [vmem:[%s5656_s28 + $0x638] sm:$0xff] }
 0x200   : > { %3287 = vmatprep.mubr.bf16.mxu0 %v4387_v50  ;;  %v4450_v61 = vcombine.low %v400_v47, %v404_v48 }
 0x207   : > { %3288 = vmatmul.mubr.bf16.gmra.mrb[64].mxu0 %v4386_v52 }
 0x208   : > { %3295 = vmatprep.mubr.bf16.mxu0 %v4395_v54  ;;  %v4451_v54 = vcombine.high %v400_v47, %v404_v48 }
 0x20f   : > { %3296 = vmatmul.mubr.bf16.gmra.mrb[68].mxu0 %v4394_v57  ;;  %v412_v57 = vld [vmem:[%s5656_s28 + $0x678] sm:$0xff] }
 0x210   : > { %3303 = vmatprep.mubr.bf16.mxu0 %v4403_v59 }
 0x217   : > { %3304 = vmatmul.mubr.bf16.gmra.mrb[72].mxu0 %v4402_v62 }
 0x218   : > { %3311 = vmatprep.mubr.bf16.mxu0 %v4411_v34  ;;  %v4459_v34 = vcombine.high %v408_v56, %v412_v57 }
 0x219   : > { %v6199_v63 = vpop.f32.mrb[32].mxu1 }
 0x21a   : > { %v2649_v36 = vpop.f32.mrb[33].mxu1 }
 0x21b   : > { %v6203_v5 = vpop.f32.mrb[34].mxu1  ;;  %v420_v36 = vld [vmem:[%s5656_s28 + $0x6b8] sm:$0xff] }
 0x21c   : > { %v2652_v9 = vpop.f32.mrb[35].mxu1  ;;  %v4467_v15 = vcombine.high %v416_v1, %v420_v36  ;;  %v4466_v24 = vcombine.low %v416_v1, %v420_v36  ;;  %v440_v1 = vld [vmem:[%s5656_s28 + $0x758] sm:$0xff] }
 0x21d   : > { %v444_v36 = vld [vmem:[%s5656_s28 + $0x778] sm:$0xff] }
 0x21f   : > { %3312 = vmatmul.mubr.bf16.gmra.mrb[76].mxu0 %v4410_v7 }
 0x220   : > { %3319 = vmatprep.mubr.bf16.mxu0 %v4419_v38  ;;  %v4458_v38 = vcombine.low %v408_v56, %v412_v57 }
 0x221   : > { %v6205_v11 = vpop.f32.mrb[36].mxu1 }
 0x222   : > { %v2657_v17 = vpop.f32.mrb[37].mxu1 }
 0x223   : > { %v6209_v19 = vpop.f32.mrb[38].mxu1 }
 0x224   : > { %v2660_v21 = vpop.f32.mrb[39].mxu1 }
 0x225   : > { %v428_v21 = vld [vmem:[%s5656_s28 + $0x6f8] sm:$0xff] }
 0x227   : > { %3320 = vmatmul.mubr.bf16.gmra.mrb[80].mxu0 %v4418_v20  ;;  %v424_v20 = vld [vmem:[%s5656_s28 + $0x6d8] sm:$0xff] }
 0x228   : > { %3327 = vmatprep.mubr.bf16.mxu0 %v4427_v22 }
 0x229   : > { %v6211_v23 = vpop.f32.mrb[40].mxu1 }
 0x22a   : > { %v2665_v27 = vpop.f32.mrb[41].mxu1 }
 0x22b   : > { %v6215_v29 = vpop.f32.mrb[42].mxu1 }
 0x22c   : > { %v2668_v31 = vpop.f32.mrb[43].mxu1 }
 0x22d   : > { %v6250_v31 = vld [vmem:[%s6495_s2] ss:$0 sm:$0xff] }
 0x22f   : > { %3328 = vmatmul.mubr.bf16.gmra.mrb[84].mxu0 %v4426_v14  ;;  %v4475_v14 = vcombine.high %v424_v20, %v428_v21 }
 0x230   : > { %3335 = vmatprep.mubr.bf16.mxu0 %v4435_v35  ;;  %v2295_v35 = vadd.f32 %v6250_v31, %v6027_v45 }
 0x231   : > { %v6217_v37 = vpop.f32.mrb[44].mxu1 }
 0x232   : > { %v2673_v40 = vpop.f32.mrb[45].mxu1 }
 0x233   : > { %v6221_v41 = vpop.f32.mrb[46].mxu1  ;;  %v436_v40 = vld [vmem:[%s5656_s28 + $0x738] sm:$0xff] }
 0x234   : > { %v2676_v43 = vpop.f32.mrb[47].mxu1  ;;  %v4483_v56 = vcombine.high %v432_v39, %v436_v40 }
 0x237   : > { %3336 = vmatmul.mubr.bf16.gmra.mrb[88].mxu0 %v4434_v18 }
 0x238   : > { %3343 = vmatprep.mubr.bf16.mxu0 %v4443_v44  ;;  %v2298_v44 = vadd.f32 %v6250_v31, %v6029_v49 }
 0x239   : > { %v6223_v46 = vpop.f32.mrb[48].mxu1 }
 0x23a   : > { %v2681_v50 = vpop.f32.mrb[49].mxu1 }
 0x23b   : > { %v6227_v28 = vpop.f32.mrb[50].mxu1 }
 0x23c   : > { %v2684_v52 = vpop.f32.mrb[51].mxu1 }
 0x23f   : > { %3344 = vmatmul.mubr.bf16.gmra.mrb[92].mxu0 %v4442_v51  ;;  %v4474_v51 = vcombine.low %v424_v20, %v428_v21 }
 0x240   : > { %3351 = vmatprep.mubr.bf16.mxu0 %v4451_v54 }
 0x241   : > { %v6229_v55 = vpop.f32.mrb[52].mxu1 }
 0x242   : > { %v2689_v59 = vpop.f32.mrb[53].mxu1 }
 0x243   : > { %v6233_v60 = vpop.f32.mrb[54].mxu1 }
 0x244   : > { %v2692_v62 = vpop.f32.mrb[55].mxu1 }
 0x245   : > { %v2303_v62 = vadd.f32 %v6250_v31, %v6035_v30 }
 0x247   : > { %3352 = vmatmul.mubr.bf16.gmra.mrb[96].mxu0 %v4450_v61 }
 0x248   : > { %3359 = vmatprep.mubr.bf16.mxu0 %v4459_v34 }
 0x249   : > { %v6235_v3 = vpop.f32.mrb[56].mxu1 }
 0x24a   : > { %v2697_v7 = vpop.f32.mrb[57].mxu1 }
 0x24b   : > { %v6239_v9 = vpop.f32.mrb[58].mxu1 }
 0x24c   : > { %v2700_v13 = vpop.f32.mrb[59].mxu1 }
 0x24d   : > { %v2306_v13 = vadd.f32 %v6250_v31, %v6037_v32  ;;  %v2311_v32 = vadd.f32 %v6250_v31, %v6043_v0 }
 0x24f   : > { %3360 = vmatmul.mubr.bf16.gmra.mrb[100].mxu0 %v4458_v38 }
 0x250   : > { %3367 = vmatprep.mubr.bf16.mxu0 %v4467_v15 }
 0x251   : > { %v6241_v17 = vpop.f32.mrb[60].mxu1 }
 0x252   : > { %v2705_v22 = vpop.f32.mrb[61].mxu1 }
 0x253   : > { %v6245_v12 = vpop.f32.mrb[62].mxu1  ;;  %v4482_v22 = vcombine.low %v432_v39, %v436_v40  ;;  %v2314_v39 = vadd.f32 %v6250_v31, %v6045_v4  ;;  %v2319_v4 = vadd.f32 %v6250_v31, %v6051_v8 }
 0x254   : > { %v2708_v27 = vpop.f32.mrb[63].mxu1 }
 0x255   : > { %v4491_v27 = vcombine.high %v440_v1, %v444_v36 }
 0x257   : > { %3368 = vmatmul.mubr.bf16.gmra.mrb[104].mxu0 %v4466_v24 }
 0x258   : > { %3375 = vmatprep.mubr.bf16.mxu0 %v4475_v14 }
 0x259   : > { %v6254_v16 = vpop.f32.mrb[64].mxu1 }
 0x25a   : > { %v3161_v18 = vpop.f32.mrb[0].mxu0  ;;  %v2713_v43 = vpop.f32.mrb[65].mxu1 }
 0x25b   : > { %v5055_v47 = vadd.f32 %v3161_v18, %v2295_v35  ;;  %v3163_v48 = vpop.f32.mrb[1].mxu0  ;;  %v6260_v50 = vpop.f32.mrb[66].mxu1 }
 0x25c   : > { %v3164_v52 = vpop.f32.mrb[2].mxu0  ;;  %v2716_v54 = vpop.f32.mrb[67].mxu1  ;;  %v448_v48 = vld [vmem:[%s5656_s28 + $0x798] sm:$0xff] }
 0x25d   : > { %v5057_v45 = vadd.f32 %v3164_v52, %v2298_v44  ;;  %v3166_v57 = vpop.f32.mrb[3].mxu0  ;;  %v3416_v59 = vmax.f32 %v5055_v47, 0.0 }
 0x25e   : > { %v4490_v57 = vcombine.low %v440_v1, %v444_v36  ;;  %v2322_v1 = vadd.f32 %v6250_v31, %v6053_v10 }
 0x25f   : > { %v3417_v61 = vmax.f32 %v5057_v45, 0.0  ;;  %3376 = vmatmul.mubr.bf16.gmra.mrb[108].mxu0 %v4474_v51  ;;  %v452_v51 = vld [vmem:[%s5656_s28 + $0x7b8] sm:$0xff] }
 0x260   : > { %3383 = vmatprep.mubr.bf16.mxu0 %v4483_v56 }
 0x261   : > { %v3480_v49 = vpack.c.bf16 %v3417_v61, %v3416_v59  ;;  %v6264_v34 = vpop.f32.mrb[68].mxu1  ;;  %v4499_v61 = vcombine.high %v448_v48, %v452_v51 }
 0x262   : > { %v3169_v7 = vpop.f32.mrb[4].mxu0  ;;  %v2721_v38 = vpop.f32.mrb[69].mxu1 }
 0x263   : > { %v5059_v15 = vadd.f32 %v3169_v7, %v2303_v62  ;;  %v3171_v20 = vpop.f32.mrb[5].mxu0  ;;  %4958 = vmatprep.mubr.bf16.mxu1 %v3480_v49  ;;  %v6270_v21 = vpop.f32.mrb[70].mxu1 }
 0x264   : > { %v3172_v24 = vpop.f32.mrb[6].mxu0  ;;  %v2724_v30 = vpop.f32.mrb[71].mxu1  ;;  %v456_v20 = vld [vmem:[%s5656_s28 + $0x7d8] sm:$0xff] }
 0x265   : > { %v5061_v14 = vadd.f32 %v3172_v24, %v2306_v13  ;;  %v3174_v35 = vpop.f32.mrb[7].mxu0  ;;  %v3418_v18 = vmax.f32 %v5059_v15, 0.0 }
 0x266   : > { %v4498_v35 = vcombine.low %v448_v48, %v452_v51  ;;  %v2330_v48 = vadd.f32 %v6250_v31, %v6061_v33 }
 0x267   : > { %v3419_v43 = vmax.f32 %v5061_v14, 0.0  ;;  %3384 = vmatmul.mubr.bf16.gmra.mrb[112].mxu0 %v4482_v22  ;;  %v460_v22 = vld [vmem:[%s5656_s28 + $0x7f8] sm:$0xff]  ;;  %s4250_s28 = sshll.u32 %s6499_s11, 2 }
 0x268   : > { %3391 = vmatprep.mubr.bf16.mxu0 %v4491_v27  ;;  %s6444_s30 = scalar_lea.vmem %s6497_s4, %s4250_s28 }
 0x269   : > { %v3481_v44 = vpack.c.bf16 %v3419_v43, %v3418_v18  ;;  %v6274_v47 = vpop.f32.mrb[72].mxu1 }
 0x26a   : > { %v3177_v52 = vpop.f32.mrb[8].mxu0  ;;  %v2729_v54 = vpop.f32.mrb[73].mxu1 }
 0x26b   : > { %v5063_v40 = vadd.f32 %v3177_v52, %v2311_v32  ;;  %v3179_v56 = vpop.f32.mrb[9].mxu0  ;;  %4959 = vmatmul.mubr.bf16.vlgmr.msra.gmra.mrb[128].mxu1 %v3481_v44  ;;  %v6280_v45 = vpop.f32.mrb[74].mxu1  ;;  %v4507_v32 = vcombine.high %v456_v20, %v460_v22 }
 0x26c   : > { %v3180_v59 = vpop.f32.mrb[10].mxu0  ;;  %v2732_v0 = vpop.f32.mrb[75].mxu1 }
 0x26d   : > { %v5065_v62 = vadd.f32 %v3180_v59, %v2314_v39  ;;  %v3182_v49 = vpop.f32.mrb[11].mxu0  ;;  %v3420_v7 = vmax.f32 %v5063_v40, 0.0  ;;  %v2327_v39 = vadd.f32 %v6250_v31, %v6059_v25 }
 0x26f   : > { %v3421_v38 = vmax.f32 %v5065_v62, 0.0  ;;  %3392 = vmatmul.mubr.bf16.gmra.mrb[116].mxu0 %v4490_v57 }
 0x270   : > { %3399 = vmatprep.mubr.bf16.mxu0 %v4499_v61  ;;  %v4506_v61 = vcombine.low %v456_v20, %v460_v22 }
 0x271   : > { %v3482_v13 = vpack.c.bf16 %v3421_v38, %v3420_v7  ;;  %v6284_v15 = vpop.f32.mrb[76].mxu1 }
 0x272   : > { %v3185_v24 = vpop.f32.mrb[12].mxu0  ;;  %v2737_v30 = vpop.f32.mrb[77].mxu1 }
 0x273   : > { %v5067_v36 = vadd.f32 %v3185_v24, %v2319_v4  ;;  %v3187_v27 = vpop.f32.mrb[13].mxu0  ;;  %4962 = vmatprep.mubr.bf16.mxu1 %v3482_v13  ;;  %v6290_v14 = vpop.f32.mrb[78].mxu1  ;;  %v2335_v13 = vadd.f32 %v6250_v31, %v6067_v42  ;;  %v2343_v42 = vadd.f32 %v6250_v31, %v6075_v53  ;;  %v2351_v53 = vadd.f32 %v6250_v31, %v6083_v2 }
 0x274   : > { %v3188_v18 = vpop.f32.mrb[14].mxu0  ;;  %v2740_v43 = vpop.f32.mrb[79].mxu1  ;;  %v5086_v2 = vadd.f32 %v6250_v31, %v6199_v63  ;;  %v5090_v63 = vadd.f32 %v6250_v31, %v6205_v11  ;;  %v5094_v11 = vadd.f32 %v6250_v31, %v6211_v23  ;;  %v5098_v23 = vadd.f32 %v6250_v31, %v6217_v37 }
 0x275   : > { %v5069_v8 = vadd.f32 %v3188_v18, %v2322_v1  ;;  %v3190_v44 = vpop.f32.mrb[15].mxu0  ;;  %v3422_v52 = vmax.f32 %v5067_v36, 0.0  ;;  %v2338_v36 = vadd.f32 %v6250_v31, %v6069_v26  ;;  %v2346_v26 = vadd.f32 %v6250_v31, %v6077_v58 }
 0x276   : > { %v2354_v58 = vadd.f32 %v6250_v31, %v6085_v6  ;;  %v5088_v6 = vadd.f32 %v6250_v31, %v6203_v5  ;;  %v5092_v5 = vadd.f32 %v6250_v31, %v6209_v19  ;;  %v5096_v19 = vadd.f32 %v6250_v31, %v6215_v29 }
 0x277   : > { %v3423_v54 = vmax.f32 %v5069_v8, 0.0  ;;  %3400 = vmatmul.mubr.bf16.gmra.mrb[120].mxu0 %v4498_v35  ;;  %v5100_v29 = vadd.f32 %v6250_v31, %v6221_v41  ;;  %v5102_v37 = vadd.f32 %v6250_v31, %v6223_v46  ;;  %v5104_v41 = vadd.f32 %v6250_v31, %v6227_v28 }
 0x278   : > { %3407 = vmatprep.mubr.bf16.mxu0 %v4507_v32  ;;  %v5106_v46 = vadd.f32 %v6250_v31, %v6229_v55  ;;  %v5108_v28 = vadd.f32 %v6250_v31, %v6233_v60  ;;  %v5110_v55 = vadd.f32 %v6250_v31, %v6235_v3  ;;  %v5112_v60 = vadd.f32 %v6250_v31, %v6239_v9 }
 0x279   : > { %v3483_v40 = vpack.c.bf16 %v3423_v54, %v3422_v52  ;;  %v6294_v10 = vpop.f32.mrb[80].mxu1  ;;  %v5114_v3 = vadd.f32 %v6250_v31, %v6241_v17  ;;  %v5116_v9 = vadd.f32 %v6250_v31, %v6245_v12  ;;  %v5118_v17 = vadd.f32 %v6250_v31, %v6254_v16 }
 0x27a   : > { %v3193_v56 = vpop.f32.mrb[16].mxu0  ;;  %v2745_v57 = vpop.f32.mrb[81].mxu1  ;;  %v5124_v16 = vadd.f32 %v6250_v31, %v6270_v21 }
 0x27b   : > { %v5071_v51 = vadd.f32 %v3193_v56, %v2327_v39  ;;  %v3195_v59 = vpop.f32.mrb[17].mxu0  ;;  %4963 = vmatmul.mubr.bf16.gmra.mrb[132].mxu1 %v3483_v40  ;;  %v6298_v0 = vpop.f32.mrb[82].mxu1 }
 0x27c   : > { %v3196_v62 = vpop.f32.mrb[18].mxu0  ;;  %v2748_v49 = vpop.f32.mrb[83].mxu1 }
 0x27d   : > { %v5073_v7 = vadd.f32 %v3196_v62, %v2330_v48  ;;  %v3198_v38 = vpop.f32.mrb[19].mxu0  ;;  %v3424_v4 = vmax.f32 %v5071_v51, 0.0 }
 0x27f   : > { %v3425_v25 = vmax.f32 %v5073_v7, 0.0  ;;  %3408 = vmatmul.mubr.bf16.gmra.mrb[124].mxu0 %v4506_v61 }
 0x281   : > { %v3484_v24 = vpack.c.bf16 %v3425_v25, %v3424_v4  ;;  %v6302_v30 = vpop.f32.mrb[84].mxu1 }
 0x282   : > { %v3201_v33 = vpop.f32.mrb[20].mxu0  ;;  %v2753_v1 = vpop.f32.mrb[85].mxu1 }
 0x283   : > { %v5075_v27 = vadd.f32 %v3201_v33, %v2335_v13  ;;  %v3203_v20 = vpop.f32.mrb[21].mxu0  ;;  %4966 = vmatprep.mubr.bf16.mxu1 %v3484_v24  ;;  %v6306_v22 = vpop.f32.mrb[86].mxu1 }
 0x284   : > { %v3204_v35 = vpop.f32.mrb[22].mxu0  ;;  %v2756_v18 = vpop.f32.mrb[87].mxu1 }
 0x285   : > { %v5077_v43 = vadd.f32 %v3204_v35, %v2338_v36  ;;  %v3206_v32 = vpop.f32.mrb[23].mxu0  ;;  %v3426_v8 = vmax.f32 %v5075_v27, 0.0 }
 0x287   : > { %v3427_v44 = vmax.f32 %v5077_v43, 0.0 }
 0x289   : > { %v3485_v52 = vpack.c.bf16 %v3427_v44, %v3426_v8  ;;  %v6310_v54 = vpop.f32.mrb[88].mxu1 }
 0x28a   : > { %v3209_v39 = vpop.f32.mrb[24].mxu0  ;;  %v2761_v40 = vpop.f32.mrb[89].mxu1 }
 0x28b   : > { %v5079_v56 = vadd.f32 %v3209_v39, %v2343_v42  ;;  %v3211_v57 = vpop.f32.mrb[25].mxu0  ;;  %4967 = vmatmul.mubr.bf16.gmra.mrb[136].mxu1 %v3485_v52  ;;  %v6314_v48 = vpop.f32.mrb[90].mxu1 }
 0x28c   : > { %v3212_v51 = vpop.f32.mrb[26].mxu0  ;;  %v2764_v59 = vpop.f32.mrb[91].mxu1 }
 0x28d   : > { %v5081_v61 = vadd.f32 %v3212_v51, %v2346_v26  ;;  %v3214_v62 = vpop.f32.mrb[27].mxu0  ;;  %v3428_v49 = vmax.f32 %v5079_v56, 0.0 }
 0x28f   : > { %v3429_v7 = vmax.f32 %v5081_v61, 0.0 }
 0x291   : > { %v3486_v38 = vpack.c.bf16 %v3429_v7, %v3428_v49  ;;  %v6318_v4 = vpop.f32.mrb[92].mxu1 }
 0x292   : > { %v3217_v25 = vpop.f32.mrb[28].mxu0  ;;  %v2769_v13 = vpop.f32.mrb[93].mxu1 }
 0x293   : > { %v5083_v24 = vadd.f32 %v3217_v25, %v2351_v53  ;;  %v3219_v33 = vpop.f32.mrb[29].mxu0  ;;  %4970 = vmatprep.mubr.bf16.mxu1 %v3486_v38  ;;  %v6322_v1 = vpop.f32.mrb[94].mxu1 }
 0x294   : > { %v3220_v36 = vpop.f32.mrb[30].mxu0  ;;  %v2772_v27 = vpop.f32.mrb[95].mxu1 }
 0x295   : > { %v5085_v20 = vadd.f32 %v3220_v36, %v2354_v58  ;;  %v3222_v35 = vpop.f32.mrb[31].mxu0  ;;  %v3430_v18 = vmax.f32 %v5083_v24, 0.0 }
 0x297   : > { %v3431_v43 = vmax.f32 %v5085_v20, 0.0 }
 0x299   : > { %v3487_v32 = vpack.c.bf16 %v3431_v43, %v3430_v18  ;;  %v6326_v8 = vpop.f32.mrb[96].mxu1 }
 0x29a   : > { %v3225_v44 = vpop.f32.mrb[32].mxu0  ;;  %v2777_v42 = vpop.f32.mrb[97].mxu1 }
 0x29b   : > { %v5087_v52 = vadd.f32 %v5086_v2, %v3225_v44  ;;  %v3227_v39 = vpop.f32.mrb[33].mxu0  ;;  %4971 = vmatmul.mubr.bf16.gmra.mrb[140].mxu1 %v3487_v32  ;;  %v6330_v40 = vpop.f32.mrb[98].mxu1 }
 0x29c   : > { %v3228_v26 = vpop.f32.mrb[34].mxu0  ;;  %v2780_v56 = vpop.f32.mrb[99].mxu1 }
 0x29d   : > { %v5089_v57 = vadd.f32 %v5088_v6, %v3228_v26  ;;  %v3230_v51 = vpop.f32.mrb[35].mxu0  ;;  %v3432_v59 = vmax.f32 %v5087_v52, 0.0 }
 0x29f   : > { %v3433_v61 = vmax.f32 %v5089_v57, 0.0 }
 0x2a1   : > { %v3488_v62 = vpack.c.bf16 %v3433_v61, %v3432_v59  ;;  %v6334_v49 = vpop.f32.mrb[100].mxu1 }
 0x2a2   : > { %v3233_v7 = vpop.f32.mrb[36].mxu0  ;;  %v2785_v53 = vpop.f32.mrb[101].mxu1 }
 0x2a3   : > { %v5091_v38 = vadd.f32 %v5090_v63, %v3233_v7  ;;  %v3235_v25 = vpop.f32.mrb[37].mxu0  ;;  %4974 = vmatprep.mubr.bf16.mxu1 %v3488_v62  ;;  %v6338_v13 = vpop.f32.mrb[102].mxu1 }
 0x2a4   : > { %v3236_v58 = vpop.f32.mrb[38].mxu0  ;;  %v2788_v24 = vpop.f32.mrb[103].mxu1 }
 0x2a5   : > { %v5093_v33 = vadd.f32 %v5092_v5, %v3236_v58  ;;  %v3238_v36 = vpop.f32.mrb[39].mxu0  ;;  %v3434_v27 = vmax.f32 %v5091_v38, 0.0 }
 0x2a7   : > { %v3435_v20 = vmax.f32 %v5093_v33, 0.0 }
 0x2a9   : > { %v3489_v35 = vpack.c.bf16 %v3435_v20, %v3434_v27  ;;  %v6342_v18 = vpop.f32.mrb[104].mxu1 }
 0x2aa   : > { %v3241_v43 = vpop.f32.mrb[40].mxu0  ;;  %v2793_v2 = vpop.f32.mrb[105].mxu1 }
 0x2ab   : > { %v5095_v32 = vadd.f32 %v5094_v11, %v3241_v43  ;;  %v3243_v44 = vpop.f32.mrb[41].mxu0  ;;  %4975 = vmatmul.mubr.bf16.gmra.mrb[144].mxu1 %v3489_v35  ;;  %v6346_v42 = vpop.f32.mrb[106].mxu1 }
 0x2ac   : > { %v3244_v6 = vpop.f32.mrb[42].mxu0  ;;  %v2796_v52 = vpop.f32.mrb[107].mxu1 }
 0x2ad   : > { %v5097_v39 = vadd.f32 %v5096_v19, %v3244_v6  ;;  %v3246_v26 = vpop.f32.mrb[43].mxu0  ;;  %v3436_v56 = vmax.f32 %v5095_v32, 0.0 }
 0x2af   : > { %v3437_v57 = vmax.f32 %v5097_v39, 0.0 }
 0x2b1   : > { %v3490_v51 = vpack.c.bf16 %v3437_v57, %v3436_v56  ;;  %v6350_v59 = vpop.f32.mrb[108].mxu1 }
 0x2b2   : > { %v3249_v61 = vpop.f32.mrb[44].mxu0  ;;  %v2801_v63 = vpop.f32.mrb[109].mxu1 }
 0x2b3   : > { %v5099_v62 = vadd.f32 %v5098_v23, %v3249_v61  ;;  %v3251_v7 = vpop.f32.mrb[45].mxu0  ;;  %4978 = vmatprep.mubr.bf16.mxu1 %v3490_v51  ;;  %v6354_v53 = vpop.f32.mrb[110].mxu1 }
 0x2b4   : > { %v3252_v5 = vpop.f32.mrb[46].mxu0  ;;  %v2804_v38 = vpop.f32.mrb[111].mxu1 }
 0x2b5   : > { %v5101_v25 = vadd.f32 %v5100_v29, %v3252_v5  ;;  %v3254_v58 = vpop.f32.mrb[47].mxu0  ;;  %v3438_v24 = vmax.f32 %v5099_v62, 0.0 }
 0x2b7   : > { %v3439_v33 = vmax.f32 %v5101_v25, 0.0 }
 0x2b9   : > { %v3491_v36 = vpack.c.bf16 %v3439_v33, %v3438_v24  ;;  %v6358_v27 = vpop.f32.mrb[112].mxu1 }
 0x2ba   : > { %v3257_v20 = vpop.f32.mrb[48].mxu0  ;;  %v2809_v11 = vpop.f32.mrb[113].mxu1 }
 0x2bb   : > { %v5103_v35 = vadd.f32 %v5102_v37, %v3257_v20  ;;  %v3259_v43 = vpop.f32.mrb[49].mxu0  ;;  %4979 = vmatmul.mubr.bf16.gmra.mrb[148].mxu1 %v3491_v36  ;;  %v6362_v2 = vpop.f32.mrb[114].mxu1 }
 0x2bc   : > { %v3260_v19 = vpop.f32.mrb[50].mxu0  ;;  %v2812_v32 = vpop.f32.mrb[115].mxu1 }
 0x2bd   : > { %v5105_v44 = vadd.f32 %v5104_v41, %v3260_v19  ;;  %v3262_v6 = vpop.f32.mrb[51].mxu0  ;;  %v3440_v52 = vmax.f32 %v5103_v35, 0.0 }
 0x2bf   : > { %v3441_v39 = vmax.f32 %v5105_v44, 0.0 }
 0x2c1   : > { %v3492_v26 = vpack.c.bf16 %v3441_v39, %v3440_v52  ;;  %v6366_v56 = vpop.f32.mrb[116].mxu1 }
 0x2c2   : > { %v3265_v57 = vpop.f32.mrb[52].mxu0  ;;  %v2817_v23 = vpop.f32.mrb[117].mxu1 }
 0x2c3   : > { %v5107_v51 = vadd.f32 %v5106_v46, %v3265_v57  ;;  %v3267_v61 = vpop.f32.mrb[53].mxu0  ;;  %4982 = vmatprep.mubr.bf16.mxu1 %v3492_v26  ;;  %v6370_v63 = vpop.f32.mrb[118].mxu1 }
 0x2c4   : > { %v3268_v29 = vpop.f32.mrb[54].mxu0  ;;  %v2820_v62 = vpop.f32.mrb[119].mxu1 }
 0x2c5   : > { %v5109_v7 = vadd.f32 %v5108_v28, %v3268_v29  ;;  %v3270_v5 = vpop.f32.mrb[55].mxu0  ;;  %v3442_v38 = vmax.f32 %v5107_v51, 0.0 }
 0x2c7   : > { %v3443_v25 = vmax.f32 %v5109_v7, 0.0 }
 0x2c9   : > { %v3493_v58 = vpack.c.bf16 %v3443_v25, %v3442_v38  ;;  %v6374_v24 = vpop.f32.mrb[120].mxu1  ;;  %v5120_v25 = vadd.f32 %v6250_v31, %v6260_v50 }
 0x2ca   : > { %v3273_v33 = vpop.f32.mrb[56].mxu0  ;;  %v2825_v37 = vpop.f32.mrb[121].mxu1 }
 0x2cb   : > { %v5111_v36 = vadd.f32 %v5110_v55, %v3273_v33  ;;  %v3275_v20 = vpop.f32.mrb[57].mxu0  ;;  %4983 = vmatmul.mubr.bf16.gmra.mrb[152].mxu1 %v3493_v58  ;;  %v6378_v11 = vpop.f32.mrb[122].mxu1 }
 0x2cc   : > { %v3276_v41 = vpop.f32.mrb[58].mxu0  ;;  %v2828_v35 = vpop.f32.mrb[123].mxu1  ;;  %v5122_v20 = vadd.f32 %v6250_v31, %v6264_v34  ;;  %v5128_v34 = vadd.f32 %v6250_v31, %v6280_v45 }
 0x2cd   : > { %v5113_v43 = vadd.f32 %v5112_v60, %v3276_v41  ;;  %v3278_v19 = vpop.f32.mrb[59].mxu0  ;;  %v3444_v32 = vmax.f32 %v5111_v36, 0.0 }
 0x2cf   : > { %v3445_v44 = vmax.f32 %v5113_v43, 0.0 }
 0x2d1   : > { %v3494_v6 = vpack.c.bf16 %v3445_v44, %v3444_v32  ;;  %v6382_v52 = vpop.f32.mrb[124].mxu1 }
 0x2d2   : > { %v3281_v39 = vpop.f32.mrb[60].mxu0  ;;  %v2833_v46 = vpop.f32.mrb[125].mxu1 }
 0x2d3   : > { %v5115_v26 = vadd.f32 %v5114_v3, %v3281_v39  ;;  %v3283_v57 = vpop.f32.mrb[61].mxu0  ;;  %4986 = vmatprep.mubr.bf16.mxu1 %v3494_v6  ;;  %v6386_v23 = vpop.f32.mrb[126].mxu1  ;;  %v5126_v39 = vadd.f32 %v6250_v31, %v6274_v47  ;;  %v5132_v47 = vadd.f32 %v6250_v31, %v6290_v14 }
 0x2d4   : > { %v3284_v28 = vpop.f32.mrb[62].mxu0  ;;  %v2836_v51 = vpop.f32.mrb[127].mxu1 }
 0x2d5   : > { %v5117_v61 = vadd.f32 %v5116_v9, %v3284_v28  ;;  %v3286_v29 = vpop.f32.mrb[63].mxu0  ;;  %v3446_v62 = vmax.f32 %v5115_v26, 0.0 }
 0x2d7   : > { %v3447_v7 = vmax.f32 %v5117_v61, 0.0 }
 0x2d9   : > { %v3495_v5 = vpack.c.bf16 %v3447_v7, %v3446_v62  ;;  %v5130_v62 = vadd.f32 %v6250_v31, %v6284_v15  ;;  %v5136_v15 = vadd.f32 %v6250_v31, %v6298_v0 }
 0x2da   : > { %v3289_v38 = vpop.f32.mrb[64].mxu0 }
 0x2db   : > { %v5119_v12 = vadd.f32 %v5118_v17, %v3289_v38  ;;  %v3291_v55 = vpop.f32.mrb[65].mxu0  ;;  %4987 = vmatmul.mubr.bf16.gmra.mrb[156].mxu1 %v3495_v5 }
 0x2dc   : > { %v3292_v58 = vpop.f32.mrb[66].mxu0 }
 0x2dd   : > { %v5121_v33 = vadd.f32 %v5120_v25, %v3292_v58  ;;  %v3294_v37 = vpop.f32.mrb[67].mxu0  ;;  %v3448_v60 = vmax.f32 %v5119_v12, 0.0 }
 0x2df   : > { %v3449_v36 = vmax.f32 %v5121_v33, 0.0  ;;  %v5134_v33 = vadd.f32 %v6250_v31, %v6294_v10  ;;  %v5140_v10 = vadd.f32 %v6250_v31, %v6306_v22 }
 0x2e1   : > { %v3496_v41 = vpack.c.bf16 %v3449_v36, %v3448_v60 }
 0x2e2   : > { %v3297_v35 = vpop.f32.mrb[68].mxu0 }
 0x2e3   : > { %v5123_v43 = vadd.f32 %v5122_v20, %v3297_v35  ;;  %v3299_v19 = vpop.f32.mrb[69].mxu0  ;;  %4990 = vmatprep.mubr.bf16.mxu1 %v3496_v41 }
 0x2e4   : > { %v3300_v50 = vpop.f32.mrb[70].mxu0  ;;  %v5138_v19 = vadd.f32 %v6250_v31, %v6302_v30  ;;  %v5144_v30 = vadd.f32 %v6250_v31, %v6314_v48 }
 0x2e5   : > { %v5125_v32 = vadd.f32 %v5124_v16, %v3300_v50  ;;  %v3302_v44 = vpop.f32.mrb[71].mxu0  ;;  %v3450_v3 = vmax.f32 %v5123_v43, 0.0 }
 0x2e7   : > { %v3451_v6 = vmax.f32 %v5125_v32, 0.0 }
 0x2e9   : > { %v3497_v46 = vpack.c.bf16 %v3451_v6, %v3450_v3 }
 0x2ea   : > { %v3305_v9 = vpop.f32.mrb[72].mxu0 }
 0x2eb   : > { %v5127_v26 = vadd.f32 %v5126_v39, %v3305_v9  ;;  %v3307_v57 = vpop.f32.mrb[73].mxu0  ;;  %4991 = vmatmul.mubr.bf16.gmra.mrb[160].mxu1 %v3497_v46 }
 0x2ec   : > { %v3308_v21 = vpop.f32.mrb[74].mxu0 }
 0x2ed   : > { %v5129_v28 = vadd.f32 %v5128_v34, %v3308_v21  ;;  %v3310_v51 = vpop.f32.mrb[75].mxu0  ;;  %v3452_v61 = vmax.f32 %v5127_v26, 0.0  ;;  %v5142_v34 = vadd.f32 %v6250_v31, %v6310_v54  ;;  %v5148_v54 = vadd.f32 %v6250_v31, %v6322_v1 }
 0x2ef   : > { %v3453_v29 = vmax.f32 %v5129_v28, 0.0 }
 0x2f1   : > { %v3498_v7 = vpack.c.bf16 %v3453_v29, %v3452_v61 }
 0x2f2   : > { %v3313_v17 = vpop.f32.mrb[76].mxu0 }
 0x2f3   : > { %v5131_v5 = vadd.f32 %v5130_v62, %v3313_v17  ;;  %v3315_v38 = vpop.f32.mrb[77].mxu0  ;;  %4994 = vmatprep.mubr.bf16.mxu1 %v3498_v7  ;;  %v5146_v7 = vadd.f32 %v6250_v31, %v6318_v4  ;;  %v5152_v4 = vadd.f32 %v6250_v31, %v6330_v40 }
 0x2f4   : > { %v3316_v45 = vpop.f32.mrb[78].mxu0 }
 0x2f5   : > { %v5133_v25 = vadd.f32 %v5132_v47, %v3316_v45  ;;  %v3318_v12 = vpop.f32.mrb[79].mxu0  ;;  %v3454_v55 = vmax.f32 %v5131_v5, 0.0 }
 0x2f7   : > { %v3455_v58 = vmax.f32 %v5133_v25, 0.0 }
 0x2f9   : > { %v3499_v37 = vpack.c.bf16 %v3455_v58, %v3454_v55  ;;  %v5150_v58 = vadd.f32 %v6250_v31, %v6326_v8  ;;  %v5156_v8 = vadd.f32 %v6250_v31, %v6338_v13 }
 0x2fa   : > { %v3321_v60 = vpop.f32.mrb[80].mxu0 }
 0x2fb   : > { %v5135_v36 = vadd.f32 %v5134_v33, %v3321_v60  ;;  %v3323_v20 = vpop.f32.mrb[81].mxu0  ;;  %4995 = vmatmul.mubr.bf16.gmra.mrb[164].mxu1 %v3499_v37 }
 0x2fc   : > { %v3324_v14 = vpop.f32.mrb[82].mxu0 }
 0x2fd   : > { %v5137_v41 = vadd.f32 %v5136_v15, %v3324_v14  ;;  %v3326_v35 = vpop.f32.mrb[83].mxu0  ;;  %v3456_v16 = vmax.f32 %v5135_v36, 0.0 }
 0x2fe   : > { %v5154_v35 = vadd.f32 %v6250_v31, %v6334_v49  ;;  %v5160_v49 = vadd.f32 %v6250_v31, %v6346_v42 }
 0x2ff   : > { %v3457_v43 = vmax.f32 %v5137_v41, 0.0 }
 0x301   : > { %v3500_v50 = vpack.c.bf16 %v3457_v43, %v3456_v16 }
 0x302   : > { %v3329_v32 = vpop.f32.mrb[84].mxu0 }
 0x303   : > { %v5139_v44 = vadd.f32 %v5138_v19, %v3329_v32  ;;  %v3331_v3 = vpop.f32.mrb[85].mxu0  ;;  %4998 = vmatprep.mubr.bf16.mxu1 %v3500_v50 }
 0x304   : > { %v3332_v0 = vpop.f32.mrb[86].mxu0 }
 0x305   : > { %v5141_v6 = vadd.f32 %v5140_v10, %v3332_v0  ;;  %v3334_v39 = vpop.f32.mrb[87].mxu0  ;;  %v3458_v46 = vmax.f32 %v5139_v44, 0.0  ;;  %v5158_v0 = vadd.f32 %v6250_v31, %v6342_v18  ;;  %v5164_v18 = vadd.f32 %v6250_v31, %v6354_v53 }
 0x307   : > { %v3459_v9 = vmax.f32 %v5141_v6, 0.0 }
 0x309   : > { %v3501_v26 = vpack.c.bf16 %v3459_v9, %v3458_v46 }
 0x30a   : > { %v3337_v57 = vpop.f32.mrb[88].mxu0 }
 0x30b   : > { %v5143_v21 = vadd.f32 %v5142_v34, %v3337_v57  ;;  %v3339_v28 = vpop.f32.mrb[89].mxu0  ;;  %4999 = vmatmul.mubr.bf16.gmra.mrb[168].mxu1 %v3501_v26 }
 0x30c   : > { %v3340_v22 = vpop.f32.mrb[90].mxu0 }
 0x30d   : > { %v5145_v51 = vadd.f32 %v5144_v30, %v3340_v22  ;;  %v3342_v61 = vpop.f32.mrb[91].mxu0  ;;  %v3460_v29 = vmax.f32 %v5143_v21, 0.0  ;;  %v5162_v21 = vadd.f32 %v6250_v31, %v6350_v59  ;;  %v5168_v59 = vadd.f32 %v6250_v31, %v6362_v2 }
 0x30e   : > { %v5170_v2 = vadd.f32 %v6250_v31, %v6366_v56  ;;  %v5174_v56 = vadd.f32 %v6250_v31, %v6374_v24  ;;  %v5178_v24 = vadd.f32 %v6250_v31, %v6382_v52 }
 0x30f   : > { %v3461_v62 = vmax.f32 %v5145_v51, 0.0 }
 0x311   : > { %v3502_v17 = vpack.c.bf16 %v3461_v62, %v3460_v29 }
 0x312   : > { %v3345_v47 = vpop.f32.mrb[92].mxu0 }
 0x313   : > { %v5147_v5 = vadd.f32 %v5146_v7, %v3345_v47  ;;  %v3347_v38 = vpop.f32.mrb[93].mxu0  ;;  %5002 = vmatprep.mubr.bf16.mxu1 %v3502_v17  ;;  %v5166_v47 = vadd.f32 %v6250_v31, %v6358_v27 }
 0x314   : > { %v3348_v48 = vpop.f32.mrb[94].mxu0 }
 0x315   : > { %v5149_v45 = vadd.f32 %v5148_v54, %v3348_v48  ;;  %v3350_v25 = vpop.f32.mrb[95].mxu0  ;;  %v3462_v12 = vmax.f32 %v5147_v5, 0.0 }
 0x317   : > { %v3463_v55 = vmax.f32 %v5149_v45, 0.0 }
 0x319   : > { %v3503_v33 = vpack.c.bf16 %v3463_v55, %v3462_v12 }
 0x31a   : > { %v3353_v37 = vpop.f32.mrb[96].mxu0 }
 0x31b   : > { %v5151_v60 = vadd.f32 %v5150_v58, %v3353_v37  ;;  %v3355_v15 = vpop.f32.mrb[97].mxu0  ;;  %5003 = vmatmul.mubr.bf16.gmra.mrb[172].mxu1 %v3503_v33 }
 0x31c   : > { %v3356_v1 = vpop.f32.mrb[98].mxu0 }
 0x31d   : > { %v5153_v36 = vadd.f32 %v5152_v4, %v3356_v1  ;;  %v3358_v20 = vpop.f32.mrb[99].mxu0  ;;  %v3464_v14 = vmax.f32 %v5151_v60, 0.0 }
 0x31f   : > { %v3465_v41 = vmax.f32 %v5153_v36, 0.0  ;;  %v5172_v36 = vadd.f32 %v6250_v31, %v6370_v63 }
 0x321   : > { %v3504_v16 = vpack.c.bf16 %v3465_v41, %v3464_v14 }
 0x322   : > { %v3361_v43 = vpop.f32.mrb[100].mxu0 }
 0x323   : > { %v5155_v19 = vadd.f32 %v5154_v35, %v3361_v43  ;;  %v3363_v50 = vpop.f32.mrb[101].mxu0  ;;  %5006 = vmatprep.mubr.bf16.mxu1 %v3504_v16 }
 0x324   : > { %v3364_v40 = vpop.f32.mrb[102].mxu0 }
 0x325   : > { %v5157_v32 = vadd.f32 %v5156_v8, %v3364_v40  ;;  %v3366_v10 = vpop.f32.mrb[103].mxu0  ;;  %v3466_v44 = vmax.f32 %v5155_v19, 0.0  ;;  %v5176_v40 = vadd.f32 %v6250_v31, %v6378_v11 }
 0x327   : > { %v3467_v3 = vmax.f32 %v5157_v32, 0.0 }
 0x329   : > { %v3505_v6 = vpack.c.bf16 %v3467_v3, %v3466_v44 }
 0x32a   : > { %v3369_v39 = vpop.f32.mrb[104].mxu0 }
 0x32b   : > { %v5159_v46 = vadd.f32 %v5158_v0, %v3369_v39  ;;  %v3371_v9 = vpop.f32.mrb[105].mxu0  ;;  %5007 = vmatmul.mubr.bf16.gmra.mrb[176].mxu1 %v3505_v6 }
 0x32c   : > { %v3372_v13 = vpop.f32.mrb[106].mxu0 }
 0x32d   : > { %v5161_v34 = vadd.f32 %v5160_v49, %v3372_v13  ;;  %v3374_v26 = vpop.f32.mrb[107].mxu0  ;;  %v3468_v57 = vmax.f32 %v5159_v46, 0.0 }
 0x32f   : > { %v3469_v30 = vmax.f32 %v5161_v34, 0.0 }
 0x331   : > { %v3506_v28 = vpack.c.bf16 %v3469_v30, %v3468_v57  ;;  %v5180_v57 = vadd.f32 %v6250_v31, %v6386_v23 }
 0x332   : > { %v3377_v22 = vpop.f32.mrb[108].mxu0 }
 0x333   : > { %v5163_v51 = vadd.f32 %v5162_v21, %v3377_v22  ;;  %v3379_v61 = vpop.f32.mrb[109].mxu0  ;;  %5010 = vmatprep.mubr.bf16.mxu1 %v3506_v28 }
 0x334   : > { %v3380_v42 = vpop.f32.mrb[110].mxu0 }
 0x335   : > { %v5165_v29 = vadd.f32 %v5164_v18, %v3380_v42  ;;  %v3382_v62 = vpop.f32.mrb[111].mxu0  ;;  %v3470_v7 = vmax.f32 %v5163_v51, 0.0 }
 0x337   : > { %v3471_v17 = vmax.f32 %v5165_v29, 0.0 }
 0x339   : > { %v3507_v54 = vpack.c.bf16 %v3471_v17, %v3470_v7 }
 0x33a   : > { %v3385_v5 = vpop.f32.mrb[112].mxu0 }
 0x33b   : > { %v5167_v38 = vadd.f32 %v5166_v47, %v3385_v5  ;;  %v3387_v48 = vpop.f32.mrb[113].mxu0  ;;  %5011 = vmatmul.mubr.bf16.gmra.mrb[180].mxu1 %v3507_v54 }
 0x33c   : > { %v3388_v53 = vpop.f32.mrb[114].mxu0 }
 0x33d   : > { %v5169_v45 = vadd.f32 %v5168_v59, %v3388_v53  ;;  %v3390_v25 = vpop.f32.mrb[115].mxu0  ;;  %v3472_v55 = vmax.f32 %v5167_v38, 0.0 }
 0x33e   : > { %v4960_v12 = vpop.f32.mrb[128].mxu1 }
 0x33f   : > { %v3473_v58 = vmax.f32 %v5169_v45, 0.0  ;;  %v3610_v33 = vpop.f32.mrb[129].mxu1 }
 0x340   : > { %v4961_v27 = vpop.f32.mrb[130].mxu1 }
 0x341   : > { %v3508_v37 = vpack.c.bf16 %v3473_v58, %v3472_v55  ;;  %v4719_v4 = vpack.c.bf16 %v4961_v27, %v4960_v12  ;;  %v3613_v60 = vpop.f32.mrb[131].mxu1 }
 0x342   : > { %v4714_v15 = vpack.c.bf16 %v3613_v60, %v3610_v33  ;;  %v3393_v1 = vpop.f32.mrb[116].mxu0 }
 0x343   : > { %4871 = vst [vmem:[%s6444_s30 + $0x8] sm:$0xff] %v4719_v4   ;;  %v5171_v20 = vadd.f32 %v5170_v2, %v3393_v1  ;;  %v3395_v14 = vpop.f32.mrb[117].mxu0  ;;  %5014 = vmatprep.mubr.bf16.mxu1 %v3508_v37 }
 0x344   : > { %4715 = vst [vmem:[%s6444_s30] sm:$0xff] %v4714_v15   ;;  %v3396_v41 = vpop.f32.mrb[118].mxu0 }
 0x345   : > { %v5173_v35 = vadd.f32 %v5172_v36, %v3396_v41  ;;  %v3398_v16 = vpop.f32.mrb[119].mxu0  ;;  %v3474_v43 = vmax.f32 %v5171_v20, 0.0 }
 0x347   : > { %v3475_v8 = vmax.f32 %v5173_v35, 0.0 }
 0x349   : > { %v3509_v19 = vpack.c.bf16 %v3475_v8, %v3474_v43 }
 0x34a   : > { %v3401_v50 = vpop.f32.mrb[120].mxu0 }
 0x34b   : > { %v5175_v32 = vadd.f32 %v5174_v56, %v3401_v50  ;;  %v3403_v63 = vpop.f32.mrb[121].mxu0  ;;  %5015 = vmatmul.mubr.bf16.gmra.mrb[184].mxu1 %v3509_v19 }
 0x34c   : > { %v3404_v10 = vpop.f32.mrb[122].mxu0 }
 0x34d   : > { %v5177_v44 = vadd.f32 %v5176_v40, %v3404_v10  ;;  %v3406_v3 = vpop.f32.mrb[123].mxu0  ;;  %v3476_v6 = vmax.f32 %v5175_v32, 0.0 }
 0x34e   : > { %v4964_v0 = vpop.f32.mrb[132].mxu1 }
 0x34f   : > { %v3477_v39 = vmax.f32 %v5177_v44, 0.0  ;;  %v3626_v49 = vpop.f32.mrb[133].mxu1 }
 0x350   : > { %v4965_v46 = vpop.f32.mrb[134].mxu1 }
 0x351   : > { %v3510_v9 = vpack.c.bf16 %v3477_v39, %v3476_v6  ;;  %v4729_v13 = vpack.c.bf16 %v4965_v46, %v4964_v0  ;;  %v3629_v34 = vpop.f32.mrb[135].mxu1 }
 0x352   : > { %v4724_v11 = vpack.c.bf16 %v3629_v34, %v3626_v49  ;;  %v3409_v26 = vpop.f32.mrb[124].mxu0 }
 0x353   : > { %4873 = vst [vmem:[%s6444_s30 + $0x18] sm:$0xff] %v4729_v13   ;;  %v5179_v30 = vadd.f32 %v5178_v24, %v3409_v26  ;;  %v3411_v21 = vpop.f32.mrb[125].mxu0  ;;  %5018 = vmatprep.mubr.bf16.mxu1 %v3510_v9 }
 0x354   : > { %4872 = vst [vmem:[%s6444_s30 + $0x10] sm:$0xff] %v4724_v11   ;;  %v3412_v28 = vpop.f32.mrb[126].mxu0 }
 0x355   : > { %v5181_v22 = vadd.f32 %v5180_v57, %v3412_v28  ;;  %v3414_v18 = vpop.f32.mrb[127].mxu0  ;;  %v3478_v51 = vmax.f32 %v5179_v30, 0.0 }
 0x357   : > { %v3479_v52 = vmax.f32 %v5181_v22, 0.0 }
 0x359   : > { %v3511_v61 = vpack.c.bf16 %v3479_v52, %v3478_v51 }
 0x35b   : > { %5019 = vmatmul.mubr.bf16.gmra.mrb[188].mxu1 %v3511_v61 }
 0x35e   : > { %v4968_v42 = vpop.f32.mrb[136].mxu1 }
 0x35f   : > { %v3642_v29 = vpop.f32.mrb[137].mxu1 }
 0x360   : > { %v4969_v62 = vpop.f32.mrb[138].mxu1 }
 0x361   : > { %v4739_v31 = vpack.c.bf16 %v4969_v62, %v4968_v42  ;;  %v3645_v23 = vpop.f32.mrb[139].mxu1 }
 0x362   : > { %v4734_v7 = vpack.c.bf16 %v3645_v23, %v3642_v29 }
 0x363   : > { %4875 = vst [vmem:[%s6444_s30 + $0x28] sm:$0xff] %v4739_v31  }
 0x364   : > { %4874 = vst [vmem:[%s6444_s30 + $0x20] sm:$0xff] %v4734_v7  }
 0x36e   : > { %v4972_v17 = vpop.f32.mrb[140].mxu1 }
 0x36f   : > { %v3658_v47 = vpop.f32.mrb[141].mxu1 }
 0x370   : > { %v4973_v54 = vpop.f32.mrb[142].mxu1 }
 0x371   : > { %v4749_v5 = vpack.c.bf16 %v4973_v54, %v4972_v17  ;;  %v3661_v59 = vpop.f32.mrb[143].mxu1 }
 0x372   : > { %v4744_v38 = vpack.c.bf16 %v3661_v59, %v3658_v47 }
 0x373   : > { %4877 = vst [vmem:[%s6444_s30 + $0x38] sm:$0xff] %v4749_v5  }
 0x374   : > { %4876 = vst [vmem:[%s6444_s30 + $0x30] sm:$0xff] %v4744_v38  }
 0x37e   : > { %v4976_v48 = vpop.f32.mrb[144].mxu1 }
 0x37f   : > { %v3674_v53 = vpop.f32.mrb[145].mxu1 }
 0x380   : > { %v4977_v45 = vpop.f32.mrb[146].mxu1 }
 0x381   : > { %v4759_v25 = vpack.c.bf16 %v4977_v45, %v4976_v48  ;;  %v3677_v12 = vpop.f32.mrb[147].mxu1 }
 0x382   : > { %v4754_v55 = vpack.c.bf16 %v3677_v12, %v3674_v53 }
 0x383   : > { %4879 = vst [vmem:[%s6444_s30 + $0x48] sm:$0xff] %v4759_v25  }
 0x384   : > { %4878 = vst [vmem:[%s6444_s30 + $0x40] sm:$0xff] %v4754_v55  }
 0x38e   : > { %v4980_v58 = vpop.f32.mrb[148].mxu1 }
 0x38f   : > { %v3690_v33 = vpop.f32.mrb[149].mxu1 }
 0x390   : > { %v4981_v27 = vpop.f32.mrb[150].mxu1 }
 0x391   : > { %v4769_v2 = vpack.c.bf16 %v4981_v27, %v4980_v58  ;;  %v3693_v37 = vpop.f32.mrb[151].mxu1 }
 0x392   : > { %v4764_v4 = vpack.c.bf16 %v3693_v37, %v3690_v33 }
 0x393   : > { %4881 = vst [vmem:[%s6444_s30 + $0x58] sm:$0xff] %v4769_v2  }
 0x394   : > { %4880 = vst [vmem:[%s6444_s30 + $0x50] sm:$0xff] %v4764_v4  }
 0x39e   : > { %v4984_v60 = vpop.f32.mrb[152].mxu1 }
 0x39f   : > { %v3706_v15 = vpop.f32.mrb[153].mxu1 }
 0x3a0   : > { %v4985_v1 = vpop.f32.mrb[154].mxu1 }
 0x3a1   : > { %v4779_v36 = vpack.c.bf16 %v4985_v1, %v4984_v60  ;;  %v3709_v20 = vpop.f32.mrb[155].mxu1 }
 0x3a2   : > { %v4774_v14 = vpack.c.bf16 %v3709_v20, %v3706_v15 }
 0x3a3   : > { %4883 = vst [vmem:[%s6444_s30 + $0x68] sm:$0xff] %v4779_v36  }
 0x3a4   : > { %4882 = vst [vmem:[%s6444_s30 + $0x60] sm:$0xff] %v4774_v14  }
 0x3ae   : > { %v4988_v41 = vpop.f32.mrb[156].mxu1 }
 0x3af   : > { %v3722_v35 = vpop.f32.mrb[157].mxu1 }
 0x3b0   : > { %v4989_v16 = vpop.f32.mrb[158].mxu1 }
 0x3b1   : > { %v4789_v43 = vpack.c.bf16 %v4989_v16, %v4988_v41  ;;  %v3725_v8 = vpop.f32.mrb[159].mxu1 }
 0x3b2   : > { %v4784_v56 = vpack.c.bf16 %v3725_v8, %v3722_v35 }
 0x3b3   : > { %4885 = vst [vmem:[%s6444_s30 + $0x78] sm:$0xff] %v4789_v43  }
 0x3b4   : > { %4884 = vst [vmem:[%s6444_s30 + $0x70] sm:$0xff] %v4784_v56  }
 0x3be   : > { %v4992_v19 = vpop.f32.mrb[160].mxu1 }
 0x3bf   : > { %v3738_v50 = vpop.f32.mrb[161].mxu1 }
 0x3c0   : > { %v4993_v40 = vpop.f32.mrb[162].mxu1 }
 0x3c1   : > { %v4799_v32 = vpack.c.bf16 %v4993_v40, %v4992_v19  ;;  %v3741_v63 = vpop.f32.mrb[163].mxu1 }
 0x3c2   : > { %v4794_v10 = vpack.c.bf16 %v3741_v63, %v3738_v50 }
 0x3c3   : > { %4887 = vst [vmem:[%s6444_s30 + $0x88] sm:$0xff] %v4799_v32  }
 0x3c4   : > { %4886 = vst [vmem:[%s6444_s30 + $0x80] sm:$0xff] %v4794_v10  }
 0x3ce   : > { %v4996_v44 = vpop.f32.mrb[164].mxu1 }
 0x3cf   : > { %v3754_v3 = vpop.f32.mrb[165].mxu1 }
 0x3d0   : > { %v4997_v0 = vpop.f32.mrb[166].mxu1 }
 0x3d1   : > { %v4809_v6 = vpack.c.bf16 %v4997_v0, %v4996_v44  ;;  %v3757_v39 = vpop.f32.mrb[167].mxu1 }
 0x3d2   : > { %v4804_v49 = vpack.c.bf16 %v3757_v39, %v3754_v3 }
 0x3d3   : > { %4889 = vst [vmem:[%s6444_s30 + $0x98] sm:$0xff] %v4809_v6  }
 0x3d4   : > { %4888 = vst [vmem:[%s6444_s30 + $0x90] sm:$0xff] %v4804_v49  }
 0x3de   : > { %v5000_v46 = vpop.f32.mrb[168].mxu1 }
 0x3df   : > { %v3770_v24 = vpop.f32.mrb[169].mxu1 }
 0x3e0   : > { %v5001_v9 = vpop.f32.mrb[170].mxu1 }
 0x3e1   : > { %v4819_v13 = vpack.c.bf16 %v5001_v9, %v5000_v46  ;;  %v3773_v34 = vpop.f32.mrb[171].mxu1 }
 0x3e2   : > { %v4814_v11 = vpack.c.bf16 %v3773_v34, %v3770_v24 }
 0x3e3   : > { %4891 = vst [vmem:[%s6444_s30 + $0xa8] sm:$0xff] %v4819_v13  }
 0x3e4   : > { %4890 = vst [vmem:[%s6444_s30 + $0xa0] sm:$0xff] %v4814_v11  }
 0x3ee   : > { %v5004_v26 = vpop.f32.mrb[172].mxu1 }
 0x3ef   : > { %v3786_v57 = vpop.f32.mrb[173].mxu1 }
 0x3f0   : > { %v5005_v30 = vpop.f32.mrb[174].mxu1 }
 0x3f1   : > { %v4829_v21 = vpack.c.bf16 %v5005_v30, %v5004_v26  ;;  %v3789_v28 = vpop.f32.mrb[175].mxu1 }
 0x3f2   : > { %v4824_v22 = vpack.c.bf16 %v3789_v28, %v3786_v57 }
 0x3f3   : > { %4893 = vst [vmem:[%s6444_s30 + $0xb8] sm:$0xff] %v4829_v21  }
 0x3f4   : > { %4892 = vst [vmem:[%s6444_s30 + $0xb0] sm:$0xff] %v4824_v22  }
 0x3fe   : > { %v5008_v18 = vpop.f32.mrb[176].mxu1 }
 0x3ff   : > { %v3802_v51 = vpop.f32.mrb[177].mxu1 }
 0x400   : > { %v5009_v52 = vpop.f32.mrb[178].mxu1 }
 0x401   : > { %v4839_v61 = vpack.c.bf16 %v5009_v52, %v5008_v18  ;;  %v3805_v42 = vpop.f32.mrb[179].mxu1 }
 0x402   : > { %v4834_v29 = vpack.c.bf16 %v3805_v42, %v3802_v51 }
 0x403   : > { %4895 = vst [vmem:[%s6444_s30 + $0xc8] sm:$0xff] %v4839_v61  }
 0x404   : > { %4894 = vst [vmem:[%s6444_s30 + $0xc0] sm:$0xff] %v4834_v29  }
 0x40e   : > { %v5012_v62 = vpop.f32.mrb[180].mxu1 }
 0x40f   : > { %v3818_v31 = vpop.f32.mrb[181].mxu1 }
 0x410   : > { %v5013_v23 = vpop.f32.mrb[182].mxu1 }
 0x411   : > { %v4849_v7 = vpack.c.bf16 %v5013_v23, %v5012_v62  ;;  %v3821_v17 = vpop.f32.mrb[183].mxu1 }
 0x412   : > { %v4844_v47 = vpack.c.bf16 %v3821_v17, %v3818_v31 }
 0x413   : > { %4897 = vst [vmem:[%s6444_s30 + $0xd8] sm:$0xff] %v4849_v7  }
 0x414   : > { %4896 = vst [vmem:[%s6444_s30 + $0xd0] sm:$0xff] %v4844_v47  }
 0x41e   : > { %v5016_v54 = vpop.f32.mrb[184].mxu1 }
 0x41f   : > { %v3834_v5 = vpop.f32.mrb[185].mxu1 }
 0x420   : > { %v5017_v59 = vpop.f32.mrb[186].mxu1 }
 0x421   : > { %v4859_v38 = vpack.c.bf16 %v5017_v59, %v5016_v54  ;;  %v3837_v48 = vpop.f32.mrb[187].mxu1 }
 0x422   : > { %v4854_v53 = vpack.c.bf16 %v3837_v48, %v3834_v5 }
 0x423   : > { %4899 = vst [vmem:[%s6444_s30 + $0xe8] sm:$0xff] %v4859_v38  }
 0x424   : > { %4898 = vst [vmem:[%s6444_s30 + $0xe0] sm:$0xff] %v4854_v53  }
 0x42e   : > { %v5020_v45 = vpop.f32.mrb[188].mxu1 }
 0x42f   : > { %v3850_v25 = vpop.f32.mrb[189].mxu1 }
 0x430   : > { %v5021_v12 = vpop.f32.mrb[190].mxu1 }
 0x431   : > { %v4869_v55 = vpack.c.bf16 %v5021_v12, %v5020_v45  ;;  %v3853_v58 = vpop.f32.mrb[191].mxu1 }
 0x432   : > { %v4864_v33 = vpack.c.bf16 %v3853_v58, %v3850_v25 }
 0x433   : > { %4901 = vst [vmem:[%s6444_s30 + $0xf8] sm:$0xff] %v4869_v55  }
 0x434   : > { %4900 = vst [vmem:[%s6444_s30 + $0xf0] sm:$0xff] %v4864_v33  }
 0x435 PF: > { %s14_s15 = sadd.s32 1, %s5525_s15  }
 0x436   : > { %p11_p4 = scmp.ge.s32.totalorder %s14_s15, 4  }
 0x438   :  { %13 = sbr.rel (!%p11_p4) target bundleno = 1 (0x1), region = 66 }

</bundles_post_ra>
